<compile_context>
chip_gen: v6e
topology: v6e:2x2x1
jax: 0.10.0
libtpu: 0.0.40
codegen_flags: <defaults>
</compile_context>

<pallas_src>
from functools import partial

import numpy as np
import jax
import jax.numpy as jnp
from jax.experimental import pallas as pl
from jax.experimental.pallas import tpu as pltpu

K = 5            # conv kernel size (both convs)
SP1 = 256        # conv1/pool1 spatial positions (196 = 14*14) padded to 256 lanes
P1LEN = 6 * 196  # flattened pool1 length per sample (torch (C,H,W) order)


# ----------------------------------------------------------------------------
# XLA glue: pooling-tap-split im2col for conv1 (lane-dense, batch along lanes)
# ----------------------------------------------------------------------------
def _stage1_patches(x):
    """x: (N, 3, 32, 32) -> (4, 75, N*SP1) bf16.

    For pooling tap t=(a,b) in {0,1}^2, lane s*SP1 + (i*14+j) holds the 75-long
    conv1 patch (row order c*25 + dy*5 + dx) feeding conv-output position
    (2*i+a, 2*j+b) of sample s; lanes 196..255 of every sample are zero pad.
    """
    n = x.shape[0]
    x = x.astype(jnp.bfloat16)
    taps = []
    for a in (0, 1):
        for b in (0, 1):
            cols = []
            for dy in range(K):
                for dx in range(K):
                    cols.append(x[:, :, a + dy:a + dy + 27:2,
                                        b + dx:b + dx + 27:2])    # (N, 3, 14, 14)
            taps.append(jnp.stack(cols, axis=2).reshape(n, 3 * K * K, 196))
    q = jnp.stack(taps, axis=0)                                   # (4, N, 75, 196)
    q = jnp.pad(q, ((0, 0), (0, 0), (0, 0), (0, SP1 - 196)))
    return jnp.transpose(q, (0, 2, 1, 3)).reshape(4, 75, n * SP1)


# ----------------------------------------------------------------------------
# Pallas kernels
# ----------------------------------------------------------------------------
def _conv1_pool_kernel(q_ref, w_ref, b_ref, o_ref):
    """conv1 + bias + ReLU + 2x2 maxpool for a block of B samples.

    q_ref: (4, 75, B*SP1) bf16   pooling-tap-split im2col patches
    w_ref: (8, 75) bf16 (Cout=6 zero-padded to 8);  b_ref: (8, 1) f32
    o_ref: (8, B*SP1) bf16       pool1, channel-major, B samples along lanes
    """
    w = w_ref[...]
    acc = jnp.dot(w, q_ref[0], preferred_element_type=jnp.float32)
    for t in range(1, 4):                         # max over pool taps (VPU)
        acc = jnp.maximum(acc, jnp.dot(w, q_ref[t],
                                       preferred_element_type=jnp.float32))
    # max over taps commutes with the shared per-channel bias add and the ReLU
    o_ref[...] = jnp.maximum(acc + b_ref[...], 0.0).astype(o_ref.dtype)


def _conv2_pool_fc_kernel(x_ref, t_ref, b2_ref, wf1_ref, bf1_ref,
                          wf2_ref, bf2_ref, wf3_ref, bf3_ref, o_ref):
    """conv2 + bias + ReLU + maxpool2 + flatten + fc1 + fc2 + fc3 for B samples.

    x_ref:  (B, 1176) bf16   pool1 flattened per sample in (C, H, W) order
    t_ref:  (4, 1176, 400) bf16  Toeplitz-expanded conv2 weights (one per pool
            tap); column order (cout, i, j) == torch flatten order, so the tap
            max of the 4 matmuls IS pool2 flattened and fc1 is a plain matmul.
    b2_ref: (1, 400) f32 (conv2 bias repeated per spatial position)
    wf1/2/3: (400,256)/(256,128)/(128,NCP) bf16;  bf1/2/3: (1, .) f32 biases
    o_ref:  (B, NCP) f32
    """
    x = x_ref[...]
    acc = jnp.dot(x, t_ref[0], preferred_element_type=jnp.float32)
    for t in range(1, 4):
        acc = jnp.maximum(acc, jnp.dot(x, t_ref[t],
                                       preferred_element_type=jnp.float32))
    pooled = jnp.maximum(acc + b2_ref[...], 0.0)              # (B, 400)

    h1 = jnp.dot(pooled.astype(jnp.bfloat16), wf1_ref[...],
                 preferred_element_type=jnp.float32) + bf1_ref[...]
    h1 = jnp.maximum(h1, 0.0)                                 # (B, 256)
    h2 = jnp.dot(h1.astype(jnp.bfloat16), wf2_ref[...],
                 preferred_element_type=jnp.float32) + bf2_ref[...]
    h2 = jnp.maximum(h2, 0.0)                                 # (B, 128)
    o_ref[...] = jnp.dot(h2.astype(jnp.bfloat16), wf3_ref[...],
                         preferred_element_type=jnp.float32) + bf3_ref[...]


# ----------------------------------------------------------------------------
# Parameters (torch layout) + one-time kernel re-layout
# ----------------------------------------------------------------------------
def init_params(key, num_classes=100):
    """Parameters in torch layout: conv (Cout,Cin,kh,kw), linear (out,in)."""
    ks = jax.random.split(key, 10)

    def w(k, shape, fan_in):
        return jax.random.normal(k, shape, jnp.float32) / np.sqrt(fan_in)

    def b(k, n):
        return 0.1 * jax.random.normal(k, (n,), jnp.float32)

    return {
        "w_conv1": w(ks[0], (6, 3, K, K), 3 * K * K),  "b_conv1": b(ks[1], 6),
        "w_conv2": w(ks[2], (16, 6, K, K), 6 * K * K), "b_conv2": b(ks[3], 16),
        "w_fc1": w(ks[4], (256, 400), 400),            "b_fc1": b(ks[5], 256),
        "w_fc2": w(ks[6], (128, 256), 256),            "b_fc2": b(ks[7], 128),
        "w_fc3": w(ks[8], (num_classes, 128), 128),    "b_fc3": b(ks[9], num_classes),
    }


def _toeplitz_conv2_pool(w_conv2):
    """(16,6,5,5) conv2 weight -> (4, 1176, 400) matrices T_t such that
    dot(pool1_flat (B,1176), T_t)[:, cout*25 + i*5 + j] is the conv2 output at
    position (2i+a, 2j+b) for pooling tap t=(a,b).  One-time, host-side."""
    w2 = np.asarray(jax.device_get(w_conv2), np.float32)
    c2, c1, i, j, dy, dx = np.meshgrid(np.arange(16), np.arange(6),
                                       np.arange(5), np.arange(5),
                                       np.arange(5), np.arange(5),
                                       indexing="ij")
    vals = w2[c2, c1, dy, dx].ravel()
    cols = (c2 * 25 + i * 5 + j).ravel()
    out = np.zeros((4, 6 * 196, 16 * 25), np.float32)
    for t, (a, b) in enumerate(((0, 0), (0, 1), (1, 0), (1, 1))):
        rows = (c1 * 196 + (2 * i + a + dy) * 14 + (2 * j + b + dx)).ravel()
        out[t, rows, cols] = vals           # unique (row, col) per assignment
    return out


def prepare_params(p, num_classes=100):
    """One-time re-layout of torch-style params into kernel layouts (no
    per-forward transposes)."""
    ncp = 128 * ((num_classes + 127) // 128)       # pad classes to lane multiple
    bf16 = jnp.bfloat16
    w1 = jnp.pad(p["w_conv1"].reshape(6, 3 * K * K), ((0, 2), (0, 0)))
    wf3 = jnp.pad(jnp.transpose(p["w_fc3"]), ((0, 0), (0, ncp - num_classes)))
    bf3 = jnp.pad(p["b_fc3"], (0, ncp - num_classes))
    return {
        "w1": w1.astype(bf16),                                # (8, 75)
        "b1": jnp.pad(p["b_conv1"], (0, 2)).reshape(8, 1),    # (8, 1) f32
        "tt": jnp.asarray(_toeplitz_conv2_pool(p["w_conv2"]), dtype=bf16),
        "b2": jnp.repeat(p["b_conv2"], 25).reshape(1, 400),   # (1, 400) f32
        "wf1": jnp.transpose(p["w_fc1"]).astype(bf16),        # (400, 256)
        "bf1": p["b_fc1"].reshape(1, 256),
        "wf2": jnp.transpose(p["w_fc2"]).astype(bf16),        # (256, 128)
        "bf2": p["b_fc2"].reshape(1, 128),
        "wf3": wf3.astype(bf16),                              # (128, ncp)
        "bf3": bf3.reshape(1, ncp),
    }


# ----------------------------------------------------------------------------
# Forward pass (2 batch-blocked pallas_calls)
# ----------------------------------------------------------------------------
@partial(jax.jit, static_argnames=("num_classes", "block_batch"))
def _lenet_logits(x, kp, num_classes, block_batch):
    n = x.shape[0]
    if n % block_batch != 0:
        raise ValueError(f"batch {n} must be a multiple of block_batch {block_batch}")
    ncp = kp["wf3"].shape[1]
    bb = block_batch
    grid = (n // bb,)
    # v7x: keep bb <= 32 (64 MiB VMEM) and grid >= 2 (two TensorCores);
    # v5e/v6e (128 MiB VMEM) can raise bb and vmem_limit_bytes further.
    cparams = pltpu.CompilerParams(dimension_semantics=("parallel",),
                                   vmem_limit_bytes=32 * 1024 * 1024)

    # ---- kernel 1: conv1 + bias + ReLU + pool1 (bf16, batch along lanes) ----
    q = _stage1_patches(x)                                     # (4, 75, n*SP1)
    pool1_cm = pl.pallas_call(
        _conv1_pool_kernel,
        out_shape=jax.ShapeDtypeStruct((8, n * SP1), jnp.bfloat16),
        grid=grid,
        in_specs=[
            pl.BlockSpec((4, 75, bb * SP1), lambda i: (0, 0, i)),
            pl.BlockSpec((8, 75), lambda i: (0, 0)),
            pl.BlockSpec((8, 1), lambda i: (0, 0)),
        ],
        out_specs=pl.BlockSpec((8, bb * SP1), lambda i: (0, i)),
        compiler_params=cparams,
    )(q, kp["w1"], kp["b1"])

    # tiny re-layout: pool1 -> per-sample (C,H,W)-flattened rows (N, 1176)
    p1 = pool1_cm.reshape(8, n, SP1)[:6, :, :196]              # (6, N, 196)
    pool1_flat = jnp.transpose(p1, (1, 0, 2)).reshape(n, P1LEN)

    # ---- kernel 2: conv2 + ReLU + pool2 + flatten + fc1 + fc2 + fc3 ----
    logits_padded = pl.pallas_call(
        _conv2_pool_fc_kernel,
        out_shape=jax.ShapeDtypeStruct((n, ncp), jnp.float32),
        grid=grid,
        in_specs=[
            pl.BlockSpec((bb, P1LEN), lambda i: (i, 0)),
            pl.BlockSpec((4, P1LEN, 400), lambda i: (0, 0, 0)),
            pl.BlockSpec((1, 400), lambda i: (0, 0)),
            pl.BlockSpec((400, 256), lambda i: (0, 0)),
            pl.BlockSpec((1, 256), lambda i: (0, 0)),
            pl.BlockSpec((256, 128), lambda i: (0, 0)),
            pl.BlockSpec((1, 128), lambda i: (0, 0)),
            pl.BlockSpec((128, ncp), lambda i: (0, 0)),
            pl.BlockSpec((1, ncp), lambda i: (0, 0)),
        ],
        out_specs=pl.BlockSpec((bb, ncp), lambda i: (i, 0)),
        compiler_params=cparams,
    )(pool1_flat, kp["tt"], kp["b2"], kp["wf1"], kp["bf1"],
      kp["wf2"], kp["bf2"], kp["wf3"], kp["bf3"])

    return logits_padded[:, :num_classes]


def lenet_forward(x, kp, num_classes=100, block_batch=8):
    """Returns (logits (N, num_classes), shape_dict) mirroring the torch module."""
    n = x.shape[0]
    logits = _lenet_logits(x.astype(jnp.float32), kp, num_classes, block_batch)
    shape_dict = {1: (n, 6, 14, 14), 2: (n, 16, 5, 5), 3: (n, 400),
                  4: (n, 256), 5: (n, 128), 6: (n, num_classes)}
    return logits, shape_dict


# ----------------------------------------------------------------------------
# Pure-JAX reference (torch semantics) for verification
# ----------------------------------------------------------------------------
def lenet_reference(x, p, bf16_inputs=False):
    """With bf16_inputs=True, every conv/matmul input is rounded to bf16 first
    (matching the kernels' dtype policy) so the check isolates kernel structure."""
    hi = jax.lax.Precision.HIGHEST
    rnd = ((lambda a: a.astype(jnp.bfloat16).astype(jnp.float32))
           if bf16_inputs else (lambda a: a))

    def conv(y, w, b):
        y = jax.lax.conv_general_dilated(
            rnd(y), rnd(w), window_strides=(1, 1), padding="VALID",
            dimension_numbers=("NCHW", "OIHW", "NCHW"), precision=hi)
        return jnp.maximum(y + b[None, :, None, None], 0.0)

    def pool(y):
        n, c, h, w = y.shape
        return y.reshape(n, c, h // 2, 2, w // 2, 2).max(axis=(3, 5))

    def fc(y, w, b, relu):
        y = jnp.dot(rnd(y), rnd(w).T, precision=hi) + b
        return jnp.maximum(y, 0.0) if relu else y

    y = pool(conv(x, p["w_conv1"], p["b_conv1"]))
    y = pool(conv(y, p["w_conv2"], p["b_conv2"]))
    y = y.reshape(x.shape[0], -1)                    # torch flatten (C, H, W)
    y = fc(y, p["w_fc1"], p["b_fc1"], True)
    y = fc(y, p["w_fc2"], p["b_fc2"], True)
    return fc(y, p["w_fc3"], p["b_fc3"], False)


if __name__ == "__main__":
    key = jax.random.PRNGKey(0)
    k_x, k_p = jax.random.split(key)

    N, NUM_CLASSES = 16, 100                 # 2 batch blocks of 8 samples each
    x = jax.random.normal(k_x, (N, 3, 32, 32), dtype=jnp.float32)
    params = init_params(k_p, num_classes=NUM_CLASSES)
    kparams = prepare_params(params, num_classes=NUM_CLASSES)   # one-time re-layout

    logits, shape_dict = lenet_forward(x, kparams, num_classes=NUM_CLASSES,
                                       block_batch=8)
    jax.block_until_ready(logits)

    assert logits.shape == (N, NUM_CLASSES), logits.shape
    assert shape_dict == {1: (N, 6, 14, 14), 2: (N, 16, 5, 5), 3: (N, 400),
                          4: (N, 256), 5: (N, 128), 6: (N, NUM_CLASSES)}, shape_dict

    # structural check: reference with the same bf16 rounding points as the kernels
    ref_bf16 = lenet_reference(x, params, bf16_inputs=True)
    np.testing.assert_allclose(np.asarray(logits), np.asarray(ref_bf16),
                               rtol=1e-2, atol=1e-2)
    # semantic sanity check vs the full-f32 torch-equivalent forward
    ref_f32 = lenet_reference(x, params, bf16_inputs=False)
    np.testing.assert_allclose(np.asarray(logits), np.asarray(ref_f32),
                               rtol=5e-2, atol=5e-2)
    print("KERNEL_OK")
</pallas_src>

<mosaic_0001>
module attributes {stable_mosaic.version = 11 : i64} {
  func.func @_conv1_pool_kernel(%arg0: i32, %arg1: memref<4x75x2048xbf16, #tpu.memory_space<vmem>>, %arg2: memref<8x75xbf16, #tpu.memory_space<vmem>>, %arg3: memref<8x1xf32, #tpu.memory_space<vmem>>, %arg4: memref<8x2048xbf16, #tpu.memory_space<vmem>>) attributes {dimension_semantics = [#tpu.dimension_semantics<parallel>], iteration_bounds = array<i64: 2>, scalar_prefetch = 0 : i64, scratch_operands = 0 : i64, tpu.core_type = #tpu.core_type<tc>, window_params = [{transform_indices = @transform_0, window_bounds = array<i64: 4, 75, 2048>}, {pipeline_mode = #tpu.pipeline_mode<synchronous>, transform_indices = @transform_1, window_bounds = array<i64: 8, 75>}, {pipeline_mode = #tpu.pipeline_mode<synchronous>, transform_indices = @transform_2, window_bounds = array<i64: 8, 1>}, {transform_indices = @transform_3, window_bounds = array<i64: 8, 2048>}]} {
    %c0 = arith.constant 0 : index
    %c0_0 = arith.constant 0 : index
    %0 = vector.load %arg2[%c0, %c0_0] : memref<8x75xbf16, #tpu.memory_space<vmem>>, vector<8x75xbf16>
    %c0_1 = arith.constant 0 : index
    %c0_2 = arith.constant 0 : index
    %c0_3 = arith.constant 0 : index
    %1 = vector.load %arg1[%c0_1, %c0_2, %c0_3] : memref<4x75x2048xbf16, #tpu.memory_space<vmem>>, vector<1x75x2048xbf16>
    %2 = vector.shape_cast %1 : vector<1x75x2048xbf16> to vector<75x2048xbf16>
    %cst = arith.constant dense<0.000000e+00> : vector<8x2048xf32>
    %3 = tpu.matmul %0, %2, %cst {dimension_numbers = #tpu.dot_dimension_numbers<[1], [0], [0], [1], [0, 0, 1, 1], [], []>} : vector<8x75xbf16>, vector<75x2048xbf16>, vector<8x2048xf32> -> vector<8x2048xf32>
    %c1 = arith.constant 1 : index
    %c0_4 = arith.constant 0 : index
    %c0_5 = arith.constant 0 : index
    %4 = vector.load %arg1[%c1, %c0_4, %c0_5] : memref<4x75x2048xbf16, #tpu.memory_space<vmem>>, vector<1x75x2048xbf16>
    %5 = vector.shape_cast %4 : vector<1x75x2048xbf16> to vector<75x2048xbf16>
    %cst_6 = arith.constant dense<0.000000e+00> : vector<8x2048xf32>
    %6 = tpu.matmul %0, %5, %cst_6 {dimension_numbers = #tpu.dot_dimension_numbers<[1], [0], [0], [1], [0, 0, 1, 1], [], []>} : vector<8x75xbf16>, vector<75x2048xbf16>, vector<8x2048xf32> -> vector<8x2048xf32>
    %7 = arith.maximumf %3, %6 : vector<8x2048xf32>
    %c2 = arith.constant 2 : index
    %c0_7 = arith.constant 0 : index
    %c0_8 = arith.constant 0 : index
    %8 = vector.load %arg1[%c2, %c0_7, %c0_8] : memref<4x75x2048xbf16, #tpu.memory_space<vmem>>, vector<1x75x2048xbf16>
    %9 = vector.shape_cast %8 : vector<1x75x2048xbf16> to vector<75x2048xbf16>
    %cst_9 = arith.constant dense<0.000000e+00> : vector<8x2048xf32>
    %10 = tpu.matmul %0, %9, %cst_9 {dimension_numbers = #tpu.dot_dimension_numbers<[1], [0], [0], [1], [0, 0, 1, 1], [], []>} : vector<8x75xbf16>, vector<75x2048xbf16>, vector<8x2048xf32> -> vector<8x2048xf32>
    %11 = arith.maximumf %7, %10 : vector<8x2048xf32>
    %c3 = arith.constant 3 : index
    %c0_10 = arith.constant 0 : index
    %c0_11 = arith.constant 0 : index
    %12 = vector.load %arg1[%c3, %c0_10, %c0_11] : memref<4x75x2048xbf16, #tpu.memory_space<vmem>>, vector<1x75x2048xbf16>
    %13 = vector.shape_cast %12 : vector<1x75x2048xbf16> to vector<75x2048xbf16>
    %cst_12 = arith.constant dense<0.000000e+00> : vector<8x2048xf32>
    %14 = tpu.matmul %0, %13, %cst_12 {dimension_numbers = #tpu.dot_dimension_numbers<[1], [0], [0], [1], [0, 0, 1, 1], [], []>} : vector<8x75xbf16>, vector<75x2048xbf16>, vector<8x2048xf32> -> vector<8x2048xf32>
    %15 = arith.maximumf %11, %14 : vector<8x2048xf32>
    %c0_13 = arith.constant 0 : index
    %c0_14 = arith.constant 0 : index
    %16 = vector.load %arg3[%c0_13, %c0_14] : memref<8x1xf32, #tpu.memory_space<vmem>>, vector<8x1xf32>
    %17 = vector.broadcast %16 : vector<8x1xf32> to vector<8x2048xf32>
    %18 = arith.addf %15, %17 : vector<8x2048xf32>
    %cst_15 = arith.constant 0.000000e+00 : f32
    %19 = vector.broadcast %cst_15 : f32 to vector<8x2048xf32>
    %20 = arith.maximumf %18, %19 : vector<8x2048xf32>
    %21 = arith.truncf %20 : vector<8x2048xf32> to vector<8x2048xbf16>
    %c0_16 = arith.constant 0 : index
    %c0_17 = arith.constant 0 : index
    %22 = vector.load %arg4[%c0_16, %c0_17] : memref<8x2048xbf16, #tpu.memory_space<vmem>>, vector<8x2048xbf16>
    tpu.vector_store %arg4[%c0_16, %c0_17], %21 {strides = array<i32>} : memref<8x2048xbf16, #tpu.memory_space<vmem>>, vector<8x2048xbf16>,
    return
  }
  func.func @transform_0(%arg0: i32) -> (i32, i32, i32) {
    %c0_i32 = arith.constant 0 : i32
    %c0_i32_0 = arith.constant 0 : i32
    %c0_i32_1 = arith.constant 0 : i32
    return %c0_i32, %c0_i32_0, %arg0 : i32, i32, i32
  }
  func.func @transform_1(%arg0: i32) -> (i32, i32) {
    %c0_i32 = arith.constant 0 : i32
    %c0_i32_0 = arith.constant 0 : i32
    %c0_i32_1 = arith.constant 0 : i32
    return %c0_i32, %c0_i32_0 : i32, i32
  }
  func.func @transform_2(%arg0: i32) -> (i32, i32) {
    %c0_i32 = arith.constant 0 : i32
    %c0_i32_0 = arith.constant 0 : i32
    %c0_i32_1 = arith.constant 0 : i32
    return %c0_i32, %c0_i32_0 : i32, i32
  }
  func.func @transform_3(%arg0: i32) -> (i32, i32) {
    %c0_i32 = arith.constant 0 : i32
    %c0_i32_0 = arith.constant 0 : i32
    return %c0_i32, %arg0 : i32, i32
  }
}

module attributes {stable_mosaic.version = 11 : i64} {
  func.func @_conv2_pool_fc_kernel(%arg0: i32, %arg1: memref<8x1176xbf16, #tpu.memory_space<vmem>>, %arg2: memref<4x1176x400xbf16, #tpu.memory_space<vmem>>, %arg3: memref<1x400xf32, #tpu.memory_space<vmem>>, %arg4: memref<400x256xbf16, #tpu.memory_space<vmem>>, %arg5: memref<1x256xf32, #tpu.memory_space<vmem>>, %arg6: memref<256x128xbf16, #tpu.memory_space<vmem>>, %arg7: memref<1x128xf32, #tpu.memory_space<vmem>>, %arg8: memref<128x128xbf16, #tpu.memory_space<vmem>>, %arg9: memref<1x128xf32, #tpu.memory_space<vmem>>, %arg10: memref<8x128xf32, #tpu.memory_space<vmem>>) attributes {dimension_semantics = [#tpu.dimension_semantics<parallel>], iteration_bounds = array<i64: 2>, scalar_prefetch = 0 : i64, scratch_operands = 0 : i64, tpu.core_type = #tpu.core_type<tc>, window_params = [{transform_indices = @transform_0, window_bounds = array<i64: 8, 1176>}, {pipeline_mode = #tpu.pipeline_mode<synchronous>, transform_indices = @transform_1, window_bounds = array<i64: 4, 1176, 400>}, {pipeline_mode = #tpu.pipeline_mode<synchronous>, transform_indices = @transform_2, window_bounds = array<i64: 1, 400>}, {pipeline_mode = #tpu.pipeline_mode<synchronous>, transform_indices = @transform_3, window_bounds = array<i64: 400, 256>}, {pipeline_mode = #tpu.pipeline_mode<synchronous>, transform_indices = @transform_4, window_bounds = array<i64: 1, 256>}, {pipeline_mode = #tpu.pipeline_mode<synchronous>, transform_indices = @transform_5, window_bounds = array<i64: 256, 128>}, {pipeline_mode = #tpu.pipeline_mode<synchronous>, transform_indices = @transform_6, window_bounds = array<i64: 1, 128>}, {pipeline_mode = #tpu.pipeline_mode<synchronous>, transform_indices = @transform_7, window_bounds = array<i64: 128, 128>}, {pipeline_mode = #tpu.pipeline_mode<synchronous>, transform_indices = @transform_8, window_bounds = array<i64: 1, 128>}, {transform_indices = @transform_9, window_bounds = array<i64: 8, 128>}]} {
    %c0 = arith.constant 0 : index
    %c0_0 = arith.constant 0 : index
    %0 = vector.load %arg1[%c0, %c0_0] : memref<8x1176xbf16, #tpu.memory_space<vmem>>, vector<8x1176xbf16>
    %c0_1 = arith.constant 0 : index
    %c0_2 = arith.constant 0 : index
    %c0_3 = arith.constant 0 : index
    %1 = vector.load %arg2[%c0_1, %c0_2, %c0_3] : memref<4x1176x400xbf16, #tpu.memory_space<vmem>>, vector<1x1176x400xbf16>
    %2 = vector.shape_cast %1 : vector<1x1176x400xbf16> to vector<1176x400xbf16>
    %cst = arith.constant dense<0.000000e+00> : vector<8x400xf32>
    %3 = tpu.matmul %0, %2, %cst {dimension_numbers = #tpu.dot_dimension_numbers<[1], [0], [0], [1], [0, 0, 1, 1], [], []>} : vector<8x1176xbf16>, vector<1176x400xbf16>, vector<8x400xf32> -> vector<8x400xf32>
    %c1 = arith.constant 1 : index
    %c0_4 = arith.constant 0 : index
    %c0_5 = arith.constant 0 : index
    %4 = vector.load %arg2[%c1, %c0_4, %c0_5] : memref<4x1176x400xbf16, #tpu.memory_space<vmem>>, vector<1x1176x400xbf16>
    %5 = vector.shape_cast %4 : vector<1x1176x400xbf16> to vector<1176x400xbf16>
    %cst_6 = arith.constant dense<0.000000e+00> : vector<8x400xf32>
    %6 = tpu.matmul %0, %5, %cst_6 {dimension_numbers = #tpu.dot_dimension_numbers<[1], [0], [0], [1], [0, 0, 1, 1], [], []>} : vector<8x1176xbf16>, vector<1176x400xbf16>, vector<8x400xf32> -> vector<8x400xf32>
    %7 = arith.maximumf %3, %6 : vector<8x400xf32>
    %c2 = arith.constant 2 : index
    %c0_7 = arith.constant 0 : index
    %c0_8 = arith.constant 0 : index
    %8 = vector.load %arg2[%c2, %c0_7, %c0_8] : memref<4x1176x400xbf16, #tpu.memory_space<vmem>>, vector<1x1176x400xbf16>
    %9 = vector.shape_cast %8 : vector<1x1176x400xbf16> to vector<1176x400xbf16>
    %cst_9 = arith.constant dense<0.000000e+00> : vector<8x400xf32>
    %10 = tpu.matmul %0, %9, %cst_9 {dimension_numbers = #tpu.dot_dimension_numbers<[1], [0], [0], [1], [0, 0, 1, 1], [], []>} : vector<8x1176xbf16>, vector<1176x400xbf16>, vector<8x400xf32> -> vector<8x400xf32>
    %11 = arith.maximumf %7, %10 : vector<8x400xf32>
    %c3 = arith.constant 3 : index
    %c0_10 = arith.constant 0 : index
    %c0_11 = arith.constant 0 : index
    %12 = vector.load %arg2[%c3, %c0_10, %c0_11] : memref<4x1176x400xbf16, #tpu.memory_space<vmem>>, vector<1x1176x400xbf16>
    %13 = vector.shape_cast %12 : vector<1x1176x400xbf16> to vector<1176x400xbf16>
    %cst_12 = arith.constant dense<0.000000e+00> : vector<8x400xf32>
    %14 = tpu.matmul %0, %13, %cst_12 {dimension_numbers = #tpu.dot_dimension_numbers<[1], [0], [0], [1], [0, 0, 1, 1], [], []>} : vector<8x1176xbf16>, vector<1176x400xbf16>, vector<8x400xf32> -> vector<8x400xf32>
    %15 = arith.maximumf %11, %14 : vector<8x400xf32>
    %c0_13 = arith.constant 0 : index
    %c0_14 = arith.constant 0 : index
    %16 = vector.load %arg3[%c0_13, %c0_14] : memref<1x400xf32, #tpu.memory_space<vmem>>, vector<1x400xf32>
    %17 = vector.broadcast %16 : vector<1x400xf32> to vector<8x400xf32>
    %18 = arith.addf %15, %17 : vector<8x400xf32>
    %cst_15 = arith.constant 0.000000e+00 : f32
    %19 = vector.broadcast %cst_15 : f32 to vector<8x400xf32>
    %20 = arith.maximumf %18, %19 : vector<8x400xf32>
    %21 = arith.truncf %20 : vector<8x400xf32> to vector<8x400xbf16>
    %c0_16 = arith.constant 0 : index
    %c0_17 = arith.constant 0 : index
    %22 = vector.load %arg4[%c0_16, %c0_17] : memref<400x256xbf16, #tpu.memory_space<vmem>>, vector<400x256xbf16>
    %cst_18 = arith.constant dense<0.000000e+00> : vector<8x256xf32>
    %23 = tpu.matmul %21, %22, %cst_18 {dimension_numbers = #tpu.dot_dimension_numbers<[1], [0], [0], [1], [0, 0, 1, 1], [], []>} : vector<8x400xbf16>, vector<400x256xbf16>, vector<8x256xf32> -> vector<8x256xf32>
    %c0_19 = arith.constant 0 : index
    %c0_20 = arith.constant 0 : index
    %24 = vector.load %arg5[%c0_19, %c0_20] : memref<1x256xf32, #tpu.memory_space<vmem>>, vector<1x256xf32>
    %25 = vector.broadcast %24 : vector<1x256xf32> to vector<8x256xf32>
    %26 = arith.addf %23, %25 : vector<8x256xf32>
    %cst_21 = arith.constant 0.000000e+00 : f32
    %27 = vector.broadcast %cst_21 : f32 to vector<8x256xf32>
    %28 = arith.maximumf %26, %27 : vector<8x256xf32>
    %29 = arith.truncf %28 : vector<8x256xf32> to vector<8x256xbf16>
    %c0_22 = arith.constant 0 : index
    %c0_23 = arith.constant 0 : index
    %30 = vector.load %arg6[%c0_22, %c0_23] : memref<256x128xbf16, #tpu.memory_space<vmem>>, vector<256x128xbf16>
    %cst_24 = arith.constant dense<0.000000e+00> : vector<8x128xf32>
    %31 = tpu.matmul %29, %30, %cst_24 {dimension_numbers = #tpu.dot_dimension_numbers<[1], [0], [0], [1], [0, 0, 1, 1], [], []>} : vector<8x256xbf16>, vector<256x128xbf16>, vector<8x128xf32> -> vector<8x128xf32>
    %c0_25 = arith.constant 0 : index
    %c0_26 = arith.constant 0 : index
    %32 = vector.load %arg7[%c0_25, %c0_26] : memref<1x128xf32, #tpu.memory_space<vmem>>, vector<1x128xf32>
    %33 = vector.broadcast %32 : vector<1x128xf32> to vector<8x128xf32>
    %34 = arith.addf %31, %33 : vector<8x128xf32>
    %cst_27 = arith.constant 0.000000e+00 : f32
    %35 = vector.broadcast %cst_27 : f32 to vector<8x128xf32>
    %36 = arith.maximumf %34, %35 : vector<8x128xf32>
    %37 = arith.truncf %36 : vector<8x128xf32> to vector<8x128xbf16>
    %c0_28 = arith.constant 0 : index
    %c0_29 = arith.constant 0 : index
    %38 = vector.load %arg8[%c0_28, %c0_29] : memref<128x128xbf16, #tpu.memory_space<vmem>>, vector<128x128xbf16>
    %cst_30 = arith.constant dense<0.000000e+00> : vector<8x128xf32>
    %39 = tpu.matmul %37, %38, %cst_30 {dimension_numbers = #tpu.dot_dimension_numbers<[1], [0], [0], [1], [0, 0, 1, 1], [], []>} : vector<8x128xbf16>, vector<128x128xbf16>, vector<8x128xf32> -> vector<8x128xf32>
    %c0_31 = arith.constant 0 : index
    %c0_32 = arith.constant 0 : index
    %40 = vector.load %arg9[%c0_31, %c0_32] : memref<1x128xf32, #tpu.memory_space<vmem>>, vector<1x128xf32>
    %41 = vector.broadcast %40 : vector<1x128xf32> to vector<8x128xf32>
    %42 = arith.addf %39, %41 : vector<8x128xf32>
    %c0_33 = arith.constant 0 : index
    %c0_34 = arith.constant 0 : index
    %43 = vector.load %arg10[%c0_33, %c0_34] : memref<8x128xf32, #tpu.memory_space<vmem>>, vector<8x128xf32>
    tpu.vector_store %arg10[%c0_33, %c0_34], %42 {strides = array<i32>} : memref<8x128xf32, #tpu.memory_space<vmem>>, vector<8x128xf32>,
    return
  }
  func.func @transform_0(%arg0: i32) -> (i32, i32) {
    %c0_i32 = arith.constant 0 : i32
    %c0_i32_0 = arith.constant 0 : i32
    return %arg0, %c0_i32 : i32, i32
  }
  func.func @transform_1(%arg0: i32) -> (i32, i32, i32) {
    %c0_i32 = arith.constant 0 : i32
    %c0_i32_0 = arith.constant 0 : i32
    %c0_i32_1 = arith.constant 0 : i32
    %c0_i32_2 = arith.constant 0 : i32
    return %c0_i32, %c0_i32_0, %c0_i32_1 : i32, i32, i32
  }
  func.func @transform_2(%arg0: i32) -> (i32, i32) {
    %c0_i32 = arith.constant 0 : i32
    %c0_i32_0 = arith.constant 0 : i32
    %c0_i32_1 = arith.constant 0 : i32
    return %c0_i32, %c0_i32_0 : i32, i32
  }
  func.func @transform_3(%arg0: i32) -> (i32, i32) {
    %c0_i32 = arith.constant 0 : i32
    %c0_i32_0 = arith.constant 0 : i32
    %c0_i32_1 = arith.constant 0 : i32
    return %c0_i32, %c0_i32_0 : i32, i32
  }
  func.func @transform_4(%arg0: i32) -> (i32, i32) {
    %c0_i32 = arith.constant 0 : i32
    %c0_i32_0 = arith.constant 0 : i32
    %c0_i32_1 = arith.constant 0 : i32
    return %c0_i32, %c0_i32_0 : i32, i32
  }
  func.func @transform_5(%arg0: i32) -> (i32, i32) {
    %c0_i32 = arith.constant 0 : i32
    %c0_i32_0 = arith.constant 0 : i32
    %c0_i32_1 = arith.constant 0 : i32
    return %c0_i32, %c0_i32_0 : i32, i32
  }
  func.func @transform_6(%arg0: i32) -> (i32, i32) {
    %c0_i32 = arith.constant 0 : i32
    %c0_i32_0 = arith.constant 0 : i32
    %c0_i32_1 = arith.constant 0 : i32
    return %c0_i32, %c0_i32_0 : i32, i32
  }
  func.func @transform_7(%arg0: i32) -> (i32, i32) {
    %c0_i32 = arith.constant 0 : i32
    %c0_i32_0 = arith.constant 0 : i32
    %c0_i32_1 = arith.constant 0 : i32
    return %c0_i32, %c0_i32_0 : i32, i32
  }
  func.func @transform_8(%arg0: i32) -> (i32, i32) {
    %c0_i32 = arith.constant 0 : i32
    %c0_i32_0 = arith.constant 0 : i32
    %c0_i32_1 = arith.constant 0 : i32
    return %c0_i32, %c0_i32_0 : i32, i32
  }
  func.func @transform_9(%arg0: i32) -> (i32, i32) {
    %c0_i32 = arith.constant 0 : i32
    %c0_i32_0 = arith.constant 0 : i32
    return %arg0, %c0_i32 : i32, i32
  }
}

</mosaic_0001>

<bundles_post_ra>
// kernel: _lenet_logits.2
= control target key start
LH: loop header
LB: loop body
LE: loop exit
PB: predicated region body
PF: predicated region fallthrough
CT: control target
= control target key end

     0   :  { %s5120_s12 = smov 0   ;;  %s5122_s13 = smov 0   ;;  %s6459_s0 = inlined_call_operand.vmem [shape: bf16[4,75,4096], index: 0, kind: input, shape index: {}]   ;;  %s6460_s1 = inlined_call_operand.vmem [shape: bf16[8,75], index: 1, kind: input, shape index: {}]   ;;  %s6461_s2 = inlined_call_operand.vmem [shape: f32[8,1], index: 2, kind: input, shape index: {}]   ;;  %s6462_s3 = inlined_call_operand.vmem [shape: bf16[8,4096], index: 3, kind: output, shape index: {}]  }
   0x1   :  { %s5124_s14 = smov 0  }
   0x2 LB: > { %s4424_s15 = sadd.s32 4294967295, %s5096_s14   ;;  %s5137_s16 = sadd.s32 1, %s5096_s14   ;;  %s5096_s14 = sphi %s5124_s14, %s6465_s14   ;;  %s5092_s13 = sphi %s5122_s13, %s6464_s13   ;;  %s5088_s12 = sphi %s5120_s12, %s6463_s12  }
   0x3   : > { %s17_s17 = ssub.s32 %s5096_s14, %s5137_s16  ;;  %s20_s18 = sadd.s32 1, %s5092_s13 }
   0x4   : > { %p18_p0 = scmp.eq.s32.totalorder %s17_s17, 0  ;;  %p27_p1 = scmp.ne.s32.totalorder %s5092_s13, %s5088_s12 }
   0x5   : > { %p28_p2 = scmp.eq.s32.totalorder %s5096_s14, 0  ;;  %p4427_p4 = scmp.ge.s32.totalorder %s5096_s14, 2 }
   0x6   : > { %s5146_s19 = scalar_select %p18_p0, %s5092_s13, %s20_s18  }
   0x7   : > { %p29_p3 = por %p28_p2, %p27_p1  ;;  %127 = sbr.rel (%p4427_p4) target bundleno = 177 (0xb1), region = 24 }
   0xc   : > { %130 = sbr.rel (!%p29_p3) target bundleno = 177 (0xb1), region = 28  ;;  %s132_s20 = sand.u32 (%p29_p3), 1, %s5092_s13  }
   0xd   : > { %s5035_s21 = sshll.u32 (%p29_p3), %s5096_s14, 6  ;;  %s5044_s22 = smul.u32 (%p29_p3), 2560, %s132_s20 }
   0xe   : > { %s5154_s25 = scalar_lea.vmem (%p29_p3), %s6459_s0, %s5035_s21 }
   0xf   : > { %v150_v0 = vld [vmem:[%s5154_s25] sm:$0xff] (%p29_p3)  ;;  %v152_v1 = vld [vmem:[%s5154_s25 + $0x8] sm:$0xff] (%p29_p3)  ;;  %v154_v2 = vld [vmem:[%s5154_s25 + $0x10] sm:$0xff] (%p29_p3)  ;;  %s5162_s26 = scalar_lea.vmem (%p29_p3), [#allocation2], %s5044_s22 }
  0x10   : > { %v156_v3 = vld [vmem:[%s5154_s25 + $0x18] sm:$0xff] (%p29_p3)  ;;  %v158_v4 = vld [vmem:[%s5154_s25 + $0x20] sm:$0xff] (%p29_p3)  ;;  %v160_v5 = vld [vmem:[%s5154_s25 + $0x28] sm:$0xff] (%p29_p3)  ;;  %151 = vst [vmem:[%s5162_s26] sm:$0xff] (%p29_p3), %v150_v0 }
  0x11   : > { %153 = vst [vmem:[%s5162_s26 + $0x8] sm:$0xff] %v152_v1  ;;  %155 = vst [vmem:[%s5162_s26 + $0x10] sm:$0xff] %v154_v2  ;;  %v162_v6 = vld [vmem:[%s5154_s25 + $0x30] sm:$0xff]  ;;  %v164_v7 = vld [vmem:[%s5154_s25 + $0x38] sm:$0xff] }
  0x12   : > { %157 = vst [vmem:[%s5162_s26 + $0x18] sm:$0xff] %v156_v3  ;;  %159 = vst [vmem:[%s5162_s26 + $0x20] sm:$0xff] %v158_v4  ;;  %v166_v8 = vld [vmem:[%s5154_s25 + $0x80] sm:$0xff]  ;;  %v168_v9 = vld [vmem:[%s5154_s25 + $0x88] sm:$0xff] }
  0x13   : > { %161 = vst [vmem:[%s5162_s26 + $0x28] sm:$0xff] %v160_v5  ;;  %163 = vst [vmem:[%s5162_s26 + $0x30] sm:$0xff] %v162_v6  ;;  %v170_v10 = vld [vmem:[%s5154_s25 + $0x90] sm:$0xff]  ;;  %v172_v11 = vld [vmem:[%s5154_s25 + $0x98] sm:$0xff] }
  0x14   : > { %165 = vst [vmem:[%s5162_s26 + $0x38] sm:$0xff] %v164_v7  ;;  %167 = vst [vmem:[%s5162_s26 + $0x40] sm:$0xff] %v166_v8  ;;  %v174_v12 = vld [vmem:[%s5154_s25 + $0xa0] sm:$0xff]  ;;  %v176_v13 = vld [vmem:[%s5154_s25 + $0xa8] sm:$0xff] }
  0x15   : > { %169 = vst [vmem:[%s5162_s26 + $0x48] sm:$0xff] %v168_v9  ;;  %171 = vst [vmem:[%s5162_s26 + $0x50] sm:$0xff] %v170_v10  ;;  %v178_v14 = vld [vmem:[%s5154_s25 + $0xb0] sm:$0xff]  ;;  %v180_v15 = vld [vmem:[%s5154_s25 + $0xb8] sm:$0xff] }
  0x16   : > { %173 = vst [vmem:[%s5162_s26 + $0x58] sm:$0xff] %v172_v11  ;;  %175 = vst [vmem:[%s5162_s26 + $0x60] sm:$0xff] %v174_v12  ;;  %v182_v16 = vld [vmem:[%s5154_s25 + $0x100] sm:$0xff]  ;;  %v184_v17 = vld [vmem:[%s5154_s25 + $0x108] sm:$0xff] }
  0x17   : > { %177 = vst [vmem:[%s5162_s26 + $0x68] sm:$0xff] %v176_v13  ;;  %179 = vst [vmem:[%s5162_s26 + $0x70] sm:$0xff] %v178_v14  ;;  %v186_v18 = vld [vmem:[%s5154_s25 + $0x110] sm:$0xff]  ;;  %v188_v19 = vld [vmem:[%s5154_s25 + $0x118] sm:$0xff] }
  0x18   : > { %181 = vst [vmem:[%s5162_s26 + $0x78] sm:$0xff] %v180_v15  ;;  %183 = vst [vmem:[%s5162_s26 + $0x80] sm:$0xff] %v182_v16  ;;  %v190_v20 = vld [vmem:[%s5154_s25 + $0x120] sm:$0xff]  ;;  %v192_v21 = vld [vmem:[%s5154_s25 + $0x128] sm:$0xff] }
  0x19   : > { %185 = vst [vmem:[%s5162_s26 + $0x88] sm:$0xff] %v184_v17  ;;  %187 = vst [vmem:[%s5162_s26 + $0x90] sm:$0xff] %v186_v18  ;;  %v194_v22 = vld [vmem:[%s5154_s25 + $0x130] sm:$0xff]  ;;  %v196_v23 = vld [vmem:[%s5154_s25 + $0x138] sm:$0xff] }
  0x1a   : > { %189 = vst [vmem:[%s5162_s26 + $0x98] sm:$0xff] %v188_v19  ;;  %191 = vst [vmem:[%s5162_s26 + $0xa0] sm:$0xff] %v190_v20  ;;  %v198_v24 = vld [vmem:[%s5154_s25 + $0x180] sm:$0xff]  ;;  %v200_v25 = vld [vmem:[%s5154_s25 + $0x188] sm:$0xff] }
  0x1b   : > { %193 = vst [vmem:[%s5162_s26 + $0xa8] sm:$0xff] %v192_v21  ;;  %195 = vst [vmem:[%s5162_s26 + $0xb0] sm:$0xff] %v194_v22  ;;  %v202_v26 = vld [vmem:[%s5154_s25 + $0x190] sm:$0xff]  ;;  %v204_v27 = vld [vmem:[%s5154_s25 + $0x198] sm:$0xff] }
  0x1c   : > { %197 = vst [vmem:[%s5162_s26 + $0xb8] sm:$0xff] %v196_v23  ;;  %199 = vst [vmem:[%s5162_s26 + $0xc0] sm:$0xff] %v198_v24  ;;  %v206_v28 = vld [vmem:[%s5154_s25 + $0x1a0] sm:$0xff]  ;;  %v208_v29 = vld [vmem:[%s5154_s25 + $0x1a8] sm:$0xff] }
  0x1d   : > { %201 = vst [vmem:[%s5162_s26 + $0xc8] sm:$0xff] %v200_v25  ;;  %203 = vst [vmem:[%s5162_s26 + $0xd0] sm:$0xff] %v202_v26  ;;  %v210_v30 = vld [vmem:[%s5154_s25 + $0x1b0] sm:$0xff]  ;;  %v212_v31 = vld [vmem:[%s5154_s25 + $0x1b8] sm:$0xff] }
  0x1e   : > { %205 = vst [vmem:[%s5162_s26 + $0xd8] sm:$0xff] %v204_v27  ;;  %207 = vst [vmem:[%s5162_s26 + $0xe0] sm:$0xff] %v206_v28  ;;  %v214_v32 = vld [vmem:[%s5154_s25 + $0x200] sm:$0xff]  ;;  %v216_v33 = vld [vmem:[%s5154_s25 + $0x208] sm:$0xff] }
  0x1f   : > { %209 = vst [vmem:[%s5162_s26 + $0xe8] sm:$0xff] %v208_v29  ;;  %211 = vst [vmem:[%s5162_s26 + $0xf0] sm:$0xff] %v210_v30  ;;  %v218_v34 = vld [vmem:[%s5154_s25 + $0x210] sm:$0xff]  ;;  %v220_v35 = vld [vmem:[%s5154_s25 + $0x218] sm:$0xff] }
  0x20   : > { %213 = vst [vmem:[%s5162_s26 + $0xf8] sm:$0xff] %v212_v31  ;;  %215 = vst [vmem:[%s5162_s26 + $0x100] sm:$0xff] %v214_v32  ;;  %v222_v36 = vld [vmem:[%s5154_s25 + $0x220] sm:$0xff]  ;;  %v224_v37 = vld [vmem:[%s5154_s25 + $0x228] sm:$0xff] }
  0x21   : > { %217 = vst [vmem:[%s5162_s26 + $0x108] sm:$0xff] %v216_v33  ;;  %219 = vst [vmem:[%s5162_s26 + $0x110] sm:$0xff] %v218_v34  ;;  %v226_v38 = vld [vmem:[%s5154_s25 + $0x230] sm:$0xff]  ;;  %v228_v39 = vld [vmem:[%s5154_s25 + $0x238] sm:$0xff] }
  0x22   : > { %221 = vst [vmem:[%s5162_s26 + $0x118] sm:$0xff] %v220_v35  ;;  %223 = vst [vmem:[%s5162_s26 + $0x120] sm:$0xff] %v222_v36  ;;  %v230_v40 = vld [vmem:[%s5154_s25 + $0x280] sm:$0xff]  ;;  %v232_v41 = vld [vmem:[%s5154_s25 + $0x288] sm:$0xff] }
  0x23   : > { %225 = vst [vmem:[%s5162_s26 + $0x128] sm:$0xff] %v224_v37  ;;  %227 = vst [vmem:[%s5162_s26 + $0x130] sm:$0xff] %v226_v38  ;;  %v234_v42 = vld [vmem:[%s5154_s25 + $0x290] sm:$0xff]  ;;  %v236_v43 = vld [vmem:[%s5154_s25 + $0x298] sm:$0xff] }
  0x24   : > { %229 = vst [vmem:[%s5162_s26 + $0x138] sm:$0xff] %v228_v39  ;;  %231 = vst [vmem:[%s5162_s26 + $0x140] sm:$0xff] %v230_v40  ;;  %v238_v44 = vld [vmem:[%s5154_s25 + $0x2a0] sm:$0xff]  ;;  %v240_v45 = vld [vmem:[%s5154_s25 + $0x2a8] sm:$0xff] }
  0x25   : > { %233 = vst [vmem:[%s5162_s26 + $0x148] sm:$0xff] %v232_v41  ;;  %235 = vst [vmem:[%s5162_s26 + $0x150] sm:$0xff] %v234_v42  ;;  %v242_v46 = vld [vmem:[%s5154_s25 + $0x2b0] sm:$0xff]  ;;  %v244_v47 = vld [vmem:[%s5154_s25 + $0x2b8] sm:$0xff] }
  0x26   : > { %237 = vst [vmem:[%s5162_s26 + $0x158] sm:$0xff] %v236_v43  ;;  %239 = vst [vmem:[%s5162_s26 + $0x160] sm:$0xff] %v238_v44  ;;  %v246_v48 = vld [vmem:[%s5154_s25 + $0x300] sm:$0xff]  ;;  %v248_v49 = vld [vmem:[%s5154_s25 + $0x308] sm:$0xff] }
  0x27   : > { %241 = vst [vmem:[%s5162_s26 + $0x168] sm:$0xff] %v240_v45  ;;  %243 = vst [vmem:[%s5162_s26 + $0x170] sm:$0xff] %v242_v46  ;;  %v250_v50 = vld [vmem:[%s5154_s25 + $0x310] sm:$0xff]  ;;  %v252_v51 = vld [vmem:[%s5154_s25 + $0x318] sm:$0xff] }
  0x28   : > { %245 = vst [vmem:[%s5162_s26 + $0x178] sm:$0xff] %v244_v47  ;;  %247 = vst [vmem:[%s5162_s26 + $0x180] sm:$0xff] %v246_v48  ;;  %v254_v52 = vld [vmem:[%s5154_s25 + $0x320] sm:$0xff]  ;;  %v256_v53 = vld [vmem:[%s5154_s25 + $0x328] sm:$0xff] }
  0x29   : > { %249 = vst [vmem:[%s5162_s26 + $0x188] sm:$0xff] %v248_v49  ;;  %251 = vst [vmem:[%s5162_s26 + $0x190] sm:$0xff] %v250_v50  ;;  %v258_v54 = vld [vmem:[%s5154_s25 + $0x330] sm:$0xff]  ;;  %v260_v55 = vld [vmem:[%s5154_s25 + $0x338] sm:$0xff] }
  0x2a   : > { %253 = vst [vmem:[%s5162_s26 + $0x198] sm:$0xff] %v252_v51  ;;  %255 = vst [vmem:[%s5162_s26 + $0x1a0] sm:$0xff] %v254_v52  ;;  %v262_v56 = vld [vmem:[%s5154_s25 + $0x380] sm:$0xff]  ;;  %v264_v57 = vld [vmem:[%s5154_s25 + $0x388] sm:$0xff] }
  0x2b   : > { %257 = vst [vmem:[%s5162_s26 + $0x1a8] sm:$0xff] %v256_v53  ;;  %259 = vst [vmem:[%s5162_s26 + $0x1b0] sm:$0xff] %v258_v54  ;;  %v266_v58 = vld [vmem:[%s5154_s25 + $0x390] sm:$0xff]  ;;  %v268_v59 = vld [vmem:[%s5154_s25 + $0x398] sm:$0xff] }
  0x2c   : > { %261 = vst [vmem:[%s5162_s26 + $0x1b8] sm:$0xff] %v260_v55  ;;  %263 = vst [vmem:[%s5162_s26 + $0x1c0] sm:$0xff] %v262_v56  ;;  %v270_v60 = vld [vmem:[%s5154_s25 + $0x3a0] sm:$0xff]  ;;  %v272_v61 = vld [vmem:[%s5154_s25 + $0x3a8] sm:$0xff] }
  0x2d   : > { %265 = vst [vmem:[%s5162_s26 + $0x1c8] sm:$0xff] %v264_v57  ;;  %267 = vst [vmem:[%s5162_s26 + $0x1d0] sm:$0xff] %v266_v58  ;;  %v274_v62 = vld [vmem:[%s5154_s25 + $0x3b0] sm:$0xff]  ;;  %v276_v63 = vld [vmem:[%s5154_s25 + $0x3b8] sm:$0xff] }
  0x2e   : > { %269 = vst [vmem:[%s5162_s26 + $0x1d8] sm:$0xff] %v268_v59  ;;  %271 = vst [vmem:[%s5162_s26 + $0x1e0] sm:$0xff] %v270_v60  ;;  %v278_v0 = vld [vmem:[%s5154_s25 + $0x400] sm:$0xff]  ;;  %v280_v1 = vld [vmem:[%s5154_s25 + $0x408] sm:$0xff] }
  0x2f   : > { %273 = vst [vmem:[%s5162_s26 + $0x1e8] sm:$0xff] %v272_v61  ;;  %275 = vst [vmem:[%s5162_s26 + $0x1f0] sm:$0xff] %v274_v62  ;;  %v282_v2 = vld [vmem:[%s5154_s25 + $0x410] sm:$0xff]  ;;  %v284_v3 = vld [vmem:[%s5154_s25 + $0x418] sm:$0xff] }
  0x30   : > { %277 = vst [vmem:[%s5162_s26 + $0x1f8] sm:$0xff] %v276_v63  ;;  %279 = vst [vmem:[%s5162_s26 + $0x200] sm:$0xff] %v278_v0  ;;  %v286_v4 = vld [vmem:[%s5154_s25 + $0x420] sm:$0xff]  ;;  %v288_v5 = vld [vmem:[%s5154_s25 + $0x428] sm:$0xff] }
  0x31   : > { %281 = vst [vmem:[%s5162_s26 + $0x208] sm:$0xff] %v280_v1  ;;  %283 = vst [vmem:[%s5162_s26 + $0x210] sm:$0xff] %v282_v2  ;;  %v290_v6 = vld [vmem:[%s5154_s25 + $0x430] sm:$0xff]  ;;  %v292_v7 = vld [vmem:[%s5154_s25 + $0x438] sm:$0xff] }
  0x32   : > { %285 = vst [vmem:[%s5162_s26 + $0x218] sm:$0xff] %v284_v3  ;;  %287 = vst [vmem:[%s5162_s26 + $0x220] sm:$0xff] %v286_v4  ;;  %v294_v8 = vld [vmem:[%s5154_s25 + $0x480] sm:$0xff]  ;;  %v296_v9 = vld [vmem:[%s5154_s25 + $0x488] sm:$0xff] }
  0x33   : > { %289 = vst [vmem:[%s5162_s26 + $0x228] sm:$0xff] %v288_v5  ;;  %291 = vst [vmem:[%s5162_s26 + $0x230] sm:$0xff] %v290_v6  ;;  %v298_v10 = vld [vmem:[%s5154_s25 + $0x490] sm:$0xff]  ;;  %v300_v11 = vld [vmem:[%s5154_s25 + $0x498] sm:$0xff] }
  0x34   : > { %293 = vst [vmem:[%s5162_s26 + $0x238] sm:$0xff] %v292_v7  ;;  %295 = vst [vmem:[%s5162_s26 + $0x240] sm:$0xff] %v294_v8  ;;  %v302_v12 = vld [vmem:[%s5154_s25 + $0x4a0] sm:$0xff]  ;;  %v304_v13 = vld [vmem:[%s5154_s25 + $0x4a8] sm:$0xff] }
  0x35   : > { %297 = vst [vmem:[%s5162_s26 + $0x248] sm:$0xff] %v296_v9  ;;  %299 = vst [vmem:[%s5162_s26 + $0x250] sm:$0xff] %v298_v10  ;;  %v306_v14 = vld [vmem:[%s5154_s25 + $0x4b0] sm:$0xff]  ;;  %v308_v15 = vld [vmem:[%s5154_s25 + $0x4b8] sm:$0xff] }
  0x36   : > { %301 = vst [vmem:[%s5162_s26 + $0x258] sm:$0xff] %v300_v11  ;;  %303 = vst [vmem:[%s5162_s26 + $0x260] sm:$0xff] %v302_v12  ;;  %v310_v16 = vld [vmem:[%s5154_s25 + $0x500] sm:$0xff]  ;;  %v312_v17 = vld [vmem:[%s5154_s25 + $0x508] sm:$0xff] }
  0x37   : > { %305 = vst [vmem:[%s5162_s26 + $0x268] sm:$0xff] %v304_v13  ;;  %307 = vst [vmem:[%s5162_s26 + $0x270] sm:$0xff] %v306_v14  ;;  %v314_v18 = vld [vmem:[%s5154_s25 + $0x510] sm:$0xff]  ;;  %v316_v19 = vld [vmem:[%s5154_s25 + $0x518] sm:$0xff] }
  0x38   : > { %309 = vst [vmem:[%s5162_s26 + $0x278] sm:$0xff] %v308_v15  ;;  %311 = vst [vmem:[%s5162_s26 + $0x280] sm:$0xff] %v310_v16  ;;  %v318_v20 = vld [vmem:[%s5154_s25 + $0x520] sm:$0xff]  ;;  %v320_v21 = vld [vmem:[%s5154_s25 + $0x528] sm:$0xff] }
  0x39   : > { %313 = vst [vmem:[%s5162_s26 + $0x288] sm:$0xff] %v312_v17  ;;  %315 = vst [vmem:[%s5162_s26 + $0x290] sm:$0xff] %v314_v18  ;;  %v322_v22 = vld [vmem:[%s5154_s25 + $0x530] sm:$0xff]  ;;  %v324_v23 = vld [vmem:[%s5154_s25 + $0x538] sm:$0xff] }
  0x3a   : > { %317 = vst [vmem:[%s5162_s26 + $0x298] sm:$0xff] %v316_v19  ;;  %319 = vst [vmem:[%s5162_s26 + $0x2a0] sm:$0xff] %v318_v20  ;;  %v326_v24 = vld [vmem:[%s5154_s25 + $0x580] sm:$0xff]  ;;  %v328_v25 = vld [vmem:[%s5154_s25 + $0x588] sm:$0xff] }
  0x3b   : > { %321 = vst [vmem:[%s5162_s26 + $0x2a8] sm:$0xff] %v320_v21  ;;  %323 = vst [vmem:[%s5162_s26 + $0x2b0] sm:$0xff] %v322_v22  ;;  %v330_v26 = vld [vmem:[%s5154_s25 + $0x590] sm:$0xff]  ;;  %v332_v27 = vld [vmem:[%s5154_s25 + $0x598] sm:$0xff] }
  0x3c   : > { %325 = vst [vmem:[%s5162_s26 + $0x2b8] sm:$0xff] %v324_v23  ;;  %327 = vst [vmem:[%s5162_s26 + $0x2c0] sm:$0xff] %v326_v24  ;;  %v334_v28 = vld [vmem:[%s5154_s25 + $0x5a0] sm:$0xff]  ;;  %v336_v29 = vld [vmem:[%s5154_s25 + $0x5a8] sm:$0xff] }
  0x3d   : > { %329 = vst [vmem:[%s5162_s26 + $0x2c8] sm:$0xff] %v328_v25  ;;  %331 = vst [vmem:[%s5162_s26 + $0x2d0] sm:$0xff] %v330_v26  ;;  %v338_v30 = vld [vmem:[%s5154_s25 + $0x5b0] sm:$0xff]  ;;  %v340_v31 = vld [vmem:[%s5154_s25 + $0x5b8] sm:$0xff] }
  0x3e   : > { %333 = vst [vmem:[%s5162_s26 + $0x2d8] sm:$0xff] %v332_v27  ;;  %335 = vst [vmem:[%s5162_s26 + $0x2e0] sm:$0xff] %v334_v28  ;;  %v342_v32 = vld [vmem:[%s5154_s25 + $0x600] sm:$0xff]  ;;  %v344_v33 = vld [vmem:[%s5154_s25 + $0x608] sm:$0xff] }
  0x3f   : > { %337 = vst [vmem:[%s5162_s26 + $0x2e8] sm:$0xff] %v336_v29  ;;  %339 = vst [vmem:[%s5162_s26 + $0x2f0] sm:$0xff] %v338_v30  ;;  %v346_v34 = vld [vmem:[%s5154_s25 + $0x610] sm:$0xff]  ;;  %v348_v35 = vld [vmem:[%s5154_s25 + $0x618] sm:$0xff] }
  0x40   : > { %341 = vst [vmem:[%s5162_s26 + $0x2f8] sm:$0xff] %v340_v31  ;;  %343 = vst [vmem:[%s5162_s26 + $0x300] sm:$0xff] %v342_v32  ;;  %v350_v36 = vld [vmem:[%s5154_s25 + $0x620] sm:$0xff]  ;;  %v352_v37 = vld [vmem:[%s5154_s25 + $0x628] sm:$0xff] }
  0x41   : > { %345 = vst [vmem:[%s5162_s26 + $0x308] sm:$0xff] %v344_v33  ;;  %347 = vst [vmem:[%s5162_s26 + $0x310] sm:$0xff] %v346_v34  ;;  %v354_v38 = vld [vmem:[%s5154_s25 + $0x630] sm:$0xff]  ;;  %v356_v39 = vld [vmem:[%s5154_s25 + $0x638] sm:$0xff] }
  0x42   : > { %349 = vst [vmem:[%s5162_s26 + $0x318] sm:$0xff] %v348_v35  ;;  %351 = vst [vmem:[%s5162_s26 + $0x320] sm:$0xff] %v350_v36  ;;  %v358_v40 = vld [vmem:[%s5154_s25 + $0x680] sm:$0xff]  ;;  %v360_v41 = vld [vmem:[%s5154_s25 + $0x688] sm:$0xff] }
  0x43   : > { %353 = vst [vmem:[%s5162_s26 + $0x328] sm:$0xff] %v352_v37  ;;  %355 = vst [vmem:[%s5162_s26 + $0x330] sm:$0xff] %v354_v38  ;;  %v362_v42 = vld [vmem:[%s5154_s25 + $0x690] sm:$0xff]  ;;  %v364_v43 = vld [vmem:[%s5154_s25 + $0x698] sm:$0xff] }
  0x44   : > { %357 = vst [vmem:[%s5162_s26 + $0x338] sm:$0xff] %v356_v39  ;;  %359 = vst [vmem:[%s5162_s26 + $0x340] sm:$0xff] %v358_v40  ;;  %v366_v44 = vld [vmem:[%s5154_s25 + $0x6a0] sm:$0xff]  ;;  %v368_v45 = vld [vmem:[%s5154_s25 + $0x6a8] sm:$0xff] }
  0x45   : > { %361 = vst [vmem:[%s5162_s26 + $0x348] sm:$0xff] %v360_v41  ;;  %363 = vst [vmem:[%s5162_s26 + $0x350] sm:$0xff] %v362_v42  ;;  %v370_v46 = vld [vmem:[%s5154_s25 + $0x6b0] sm:$0xff]  ;;  %v372_v47 = vld [vmem:[%s5154_s25 + $0x6b8] sm:$0xff] }
  0x46   : > { %365 = vst [vmem:[%s5162_s26 + $0x358] sm:$0xff] %v364_v43  ;;  %367 = vst [vmem:[%s5162_s26 + $0x360] sm:$0xff] %v366_v44  ;;  %v374_v48 = vld [vmem:[%s5154_s25 + $0x700] sm:$0xff]  ;;  %v376_v49 = vld [vmem:[%s5154_s25 + $0x708] sm:$0xff] }
  0x47   : > { %369 = vst [vmem:[%s5162_s26 + $0x368] sm:$0xff] %v368_v45  ;;  %371 = vst [vmem:[%s5162_s26 + $0x370] sm:$0xff] %v370_v46  ;;  %v378_v50 = vld [vmem:[%s5154_s25 + $0x710] sm:$0xff]  ;;  %v380_v51 = vld [vmem:[%s5154_s25 + $0x718] sm:$0xff] }
  0x48   : > { %373 = vst [vmem:[%s5162_s26 + $0x378] sm:$0xff] %v372_v47  ;;  %375 = vst [vmem:[%s5162_s26 + $0x380] sm:$0xff] %v374_v48  ;;  %v382_v52 = vld [vmem:[%s5154_s25 + $0x720] sm:$0xff]  ;;  %v384_v53 = vld [vmem:[%s5154_s25 + $0x728] sm:$0xff] }
  0x49   : > { %377 = vst [vmem:[%s5162_s26 + $0x388] sm:$0xff] %v376_v49  ;;  %379 = vst [vmem:[%s5162_s26 + $0x390] sm:$0xff] %v378_v50  ;;  %v386_v54 = vld [vmem:[%s5154_s25 + $0x730] sm:$0xff]  ;;  %v388_v55 = vld [vmem:[%s5154_s25 + $0x738] sm:$0xff] }
  0x4a   : > { %381 = vst [vmem:[%s5162_s26 + $0x398] sm:$0xff] %v380_v51  ;;  %383 = vst [vmem:[%s5162_s26 + $0x3a0] sm:$0xff] %v382_v52  ;;  %v390_v56 = vld [vmem:[%s5154_s25 + $0x780] sm:$0xff]  ;;  %v392_v57 = vld [vmem:[%s5154_s25 + $0x788] sm:$0xff] }
  0x4b   : > { %385 = vst [vmem:[%s5162_s26 + $0x3a8] sm:$0xff] %v384_v53  ;;  %387 = vst [vmem:[%s5162_s26 + $0x3b0] sm:$0xff] %v386_v54  ;;  %v394_v58 = vld [vmem:[%s5154_s25 + $0x790] sm:$0xff]  ;;  %v396_v59 = vld [vmem:[%s5154_s25 + $0x798] sm:$0xff] }
  0x4c   : > { %389 = vst [vmem:[%s5162_s26 + $0x3b8] sm:$0xff] %v388_v55  ;;  %391 = vst [vmem:[%s5162_s26 + $0x3c0] sm:$0xff] %v390_v56  ;;  %v398_v60 = vld [vmem:[%s5154_s25 + $0x7a0] sm:$0xff]  ;;  %v400_v61 = vld [vmem:[%s5154_s25 + $0x7a8] sm:$0xff] }
  0x4d   : > { %393 = vst [vmem:[%s5162_s26 + $0x3c8] sm:$0xff] %v392_v57  ;;  %395 = vst [vmem:[%s5162_s26 + $0x3d0] sm:$0xff] %v394_v58  ;;  %v402_v62 = vld [vmem:[%s5154_s25 + $0x7b0] sm:$0xff]  ;;  %v404_v63 = vld [vmem:[%s5154_s25 + $0x7b8] sm:$0xff] }
  0x4e   : > { %397 = vst [vmem:[%s5162_s26 + $0x3d8] sm:$0xff] %v396_v59  ;;  %399 = vst [vmem:[%s5162_s26 + $0x3e0] sm:$0xff] %v398_v60  ;;  %v406_v0 = vld [vmem:[%s5154_s25 + $0x800] sm:$0xff]  ;;  %v408_v1 = vld [vmem:[%s5154_s25 + $0x808] sm:$0xff] }
  0x4f   : > { %401 = vst [vmem:[%s5162_s26 + $0x3e8] sm:$0xff] %v400_v61  ;;  %403 = vst [vmem:[%s5162_s26 + $0x3f0] sm:$0xff] %v402_v62  ;;  %v410_v2 = vld [vmem:[%s5154_s25 + $0x810] sm:$0xff]  ;;  %v412_v3 = vld [vmem:[%s5154_s25 + $0x818] sm:$0xff] }
  0x50   : > { %405 = vst [vmem:[%s5162_s26 + $0x3f8] sm:$0xff] %v404_v63  ;;  %407 = vst [vmem:[%s5162_s26 + $0x400] sm:$0xff] %v406_v0  ;;  %v414_v4 = vld [vmem:[%s5154_s25 + $0x820] sm:$0xff]  ;;  %v416_v5 = vld [vmem:[%s5154_s25 + $0x828] sm:$0xff] }
  0x51   : > { %409 = vst [vmem:[%s5162_s26 + $0x408] sm:$0xff] %v408_v1  ;;  %411 = vst [vmem:[%s5162_s26 + $0x410] sm:$0xff] %v410_v2  ;;  %v418_v6 = vld [vmem:[%s5154_s25 + $0x830] sm:$0xff]  ;;  %v420_v7 = vld [vmem:[%s5154_s25 + $0x838] sm:$0xff] }
  0x52   : > { %413 = vst [vmem:[%s5162_s26 + $0x418] sm:$0xff] %v412_v3  ;;  %415 = vst [vmem:[%s5162_s26 + $0x420] sm:$0xff] %v414_v4  ;;  %v422_v8 = vld [vmem:[%s5154_s25 + $0x880] sm:$0xff]  ;;  %v424_v9 = vld [vmem:[%s5154_s25 + $0x888] sm:$0xff] }
  0x53   : > { %417 = vst [vmem:[%s5162_s26 + $0x428] sm:$0xff] %v416_v5  ;;  %419 = vst [vmem:[%s5162_s26 + $0x430] sm:$0xff] %v418_v6  ;;  %v426_v10 = vld [vmem:[%s5154_s25 + $0x890] sm:$0xff]  ;;  %v428_v11 = vld [vmem:[%s5154_s25 + $0x898] sm:$0xff] }
  0x54   : > { %421 = vst [vmem:[%s5162_s26 + $0x438] sm:$0xff] %v420_v7  ;;  %423 = vst [vmem:[%s5162_s26 + $0x440] sm:$0xff] %v422_v8  ;;  %v430_v12 = vld [vmem:[%s5154_s25 + $0x8a0] sm:$0xff]  ;;  %v432_v13 = vld [vmem:[%s5154_s25 + $0x8a8] sm:$0xff] }
  0x55   : > { %425 = vst [vmem:[%s5162_s26 + $0x448] sm:$0xff] %v424_v9  ;;  %427 = vst [vmem:[%s5162_s26 + $0x450] sm:$0xff] %v426_v10  ;;  %v434_v14 = vld [vmem:[%s5154_s25 + $0x8b0] sm:$0xff]  ;;  %v436_v15 = vld [vmem:[%s5154_s25 + $0x8b8] sm:$0xff] }
  0x56   : > { %429 = vst [vmem:[%s5162_s26 + $0x458] sm:$0xff] %v428_v11  ;;  %431 = vst [vmem:[%s5162_s26 + $0x460] sm:$0xff] %v430_v12  ;;  %v438_v16 = vld [vmem:[%s5154_s25 + $0x900] sm:$0xff]  ;;  %v440_v17 = vld [vmem:[%s5154_s25 + $0x908] sm:$0xff] }
  0x57   : > { %433 = vst [vmem:[%s5162_s26 + $0x468] sm:$0xff] %v432_v13  ;;  %435 = vst [vmem:[%s5162_s26 + $0x470] sm:$0xff] %v434_v14  ;;  %v442_v18 = vld [vmem:[%s5154_s25 + $0x910] sm:$0xff]  ;;  %v444_v19 = vld [vmem:[%s5154_s25 + $0x918] sm:$0xff] }
  0x58   : > { %437 = vst [vmem:[%s5162_s26 + $0x478] sm:$0xff] %v436_v15  ;;  %439 = vst [vmem:[%s5162_s26 + $0x480] sm:$0xff] %v438_v16  ;;  %v446_v20 = vld [vmem:[%s5154_s25 + $0x920] sm:$0xff]  ;;  %v448_v21 = vld [vmem:[%s5154_s25 + $0x928] sm:$0xff] }
  0x59   : > { %441 = vst [vmem:[%s5162_s26 + $0x488] sm:$0xff] %v440_v17  ;;  %443 = vst [vmem:[%s5162_s26 + $0x490] sm:$0xff] %v442_v18  ;;  %v450_v22 = vld [vmem:[%s5154_s25 + $0x930] sm:$0xff]  ;;  %v452_v23 = vld [vmem:[%s5154_s25 + $0x938] sm:$0xff] }
  0x5a   : > { %445 = vst [vmem:[%s5162_s26 + $0x498] sm:$0xff] %v444_v19  ;;  %447 = vst [vmem:[%s5162_s26 + $0x4a0] sm:$0xff] %v446_v20  ;;  %v454_v24 = vld [vmem:[%s5154_s25 + $0x980] sm:$0xff]  ;;  %v456_v25 = vld [vmem:[%s5154_s25 + $0x988] sm:$0xff] }
  0x5b   : > { %449 = vst [vmem:[%s5162_s26 + $0x4a8] sm:$0xff] %v448_v21  ;;  %451 = vst [vmem:[%s5162_s26 + $0x4b0] sm:$0xff] %v450_v22  ;;  %v458_v26 = vld [vmem:[%s5154_s25 + $0x990] sm:$0xff]  ;;  %v460_v27 = vld [vmem:[%s5154_s25 + $0x998] sm:$0xff] }
  0x5c   : > { %453 = vst [vmem:[%s5162_s26 + $0x4b8] sm:$0xff] %v452_v23  ;;  %455 = vst [vmem:[%s5162_s26 + $0x4c0] sm:$0xff] %v454_v24  ;;  %v462_v28 = vld [vmem:[%s5154_s25 + $0x9a0] sm:$0xff]  ;;  %v464_v29 = vld [vmem:[%s5154_s25 + $0x9a8] sm:$0xff] }
  0x5d   : > { %457 = vst [vmem:[%s5162_s26 + $0x4c8] sm:$0xff] %v456_v25  ;;  %459 = vst [vmem:[%s5162_s26 + $0x4d0] sm:$0xff] %v458_v26  ;;  %v466_v30 = vld [vmem:[%s5154_s25 + $0x9b0] sm:$0xff]  ;;  %v468_v31 = vld [vmem:[%s5154_s25 + $0x9b8] sm:$0xff] }
  0x5e   : > { %461 = vst [vmem:[%s5162_s26 + $0x4d8] sm:$0xff] %v460_v27  ;;  %463 = vst [vmem:[%s5162_s26 + $0x4e0] sm:$0xff] %v462_v28  ;;  %v470_v32 = vld [vmem:[%s5154_s25 + $0xa00] sm:$0xff]  ;;  %v472_v33 = vld [vmem:[%s5154_s25 + $0xa08] sm:$0xff] }
  0x5f   : > { %465 = vst [vmem:[%s5162_s26 + $0x4e8] sm:$0xff] %v464_v29  ;;  %467 = vst [vmem:[%s5162_s26 + $0x4f0] sm:$0xff] %v466_v30  ;;  %v474_v34 = vld [vmem:[%s5154_s25 + $0xa10] sm:$0xff]  ;;  %v476_v35 = vld [vmem:[%s5154_s25 + $0xa18] sm:$0xff] }
  0x60   : > { %469 = vst [vmem:[%s5162_s26 + $0x4f8] sm:$0xff] %v468_v31  ;;  %471 = vst [vmem:[%s5162_s26 + $0x500] sm:$0xff] %v470_v32  ;;  %v478_v36 = vld [vmem:[%s5154_s25 + $0xa20] sm:$0xff]  ;;  %v480_v37 = vld [vmem:[%s5154_s25 + $0xa28] sm:$0xff] }
  0x61   : > { %473 = vst [vmem:[%s5162_s26 + $0x508] sm:$0xff] %v472_v33  ;;  %475 = vst [vmem:[%s5162_s26 + $0x510] sm:$0xff] %v474_v34  ;;  %v482_v38 = vld [vmem:[%s5154_s25 + $0xa30] sm:$0xff]  ;;  %v484_v39 = vld [vmem:[%s5154_s25 + $0xa38] sm:$0xff] }
  0x62   : > { %477 = vst [vmem:[%s5162_s26 + $0x518] sm:$0xff] %v476_v35  ;;  %479 = vst [vmem:[%s5162_s26 + $0x520] sm:$0xff] %v478_v36  ;;  %v486_v40 = vld [vmem:[%s5154_s25 + $0xa80] sm:$0xff]  ;;  %v488_v41 = vld [vmem:[%s5154_s25 + $0xa88] sm:$0xff] }
  0x63   : > { %481 = vst [vmem:[%s5162_s26 + $0x528] sm:$0xff] %v480_v37  ;;  %483 = vst [vmem:[%s5162_s26 + $0x530] sm:$0xff] %v482_v38  ;;  %v490_v42 = vld [vmem:[%s5154_s25 + $0xa90] sm:$0xff]  ;;  %v492_v43 = vld [vmem:[%s5154_s25 + $0xa98] sm:$0xff] }
  0x64   : > { %485 = vst [vmem:[%s5162_s26 + $0x538] sm:$0xff] %v484_v39  ;;  %487 = vst [vmem:[%s5162_s26 + $0x540] sm:$0xff] %v486_v40  ;;  %v494_v44 = vld [vmem:[%s5154_s25 + $0xaa0] sm:$0xff]  ;;  %v496_v45 = vld [vmem:[%s5154_s25 + $0xaa8] sm:$0xff] }
  0x65   : > { %489 = vst [vmem:[%s5162_s26 + $0x548] sm:$0xff] %v488_v41  ;;  %491 = vst [vmem:[%s5162_s26 + $0x550] sm:$0xff] %v490_v42  ;;  %v498_v46 = vld [vmem:[%s5154_s25 + $0xab0] sm:$0xff]  ;;  %v500_v47 = vld [vmem:[%s5154_s25 + $0xab8] sm:$0xff] }
  0x66   : > { %493 = vst [vmem:[%s5162_s26 + $0x558] sm:$0xff] %v492_v43  ;;  %495 = vst [vmem:[%s5162_s26 + $0x560] sm:$0xff] %v494_v44  ;;  %v502_v48 = vld [vmem:[%s5154_s25 + $0xb00] sm:$0xff]  ;;  %v504_v49 = vld [vmem:[%s5154_s25 + $0xb08] sm:$0xff] }
  0x67   : > { %497 = vst [vmem:[%s5162_s26 + $0x568] sm:$0xff] %v496_v45  ;;  %499 = vst [vmem:[%s5162_s26 + $0x570] sm:$0xff] %v498_v46  ;;  %v506_v50 = vld [vmem:[%s5154_s25 + $0xb10] sm:$0xff]  ;;  %v508_v51 = vld [vmem:[%s5154_s25 + $0xb18] sm:$0xff] }
  0x68   : > { %501 = vst [vmem:[%s5162_s26 + $0x578] sm:$0xff] %v500_v47  ;;  %503 = vst [vmem:[%s5162_s26 + $0x580] sm:$0xff] %v502_v48  ;;  %v510_v52 = vld [vmem:[%s5154_s25 + $0xb20] sm:$0xff]  ;;  %v512_v53 = vld [vmem:[%s5154_s25 + $0xb28] sm:$0xff] }
  0x69   : > { %505 = vst [vmem:[%s5162_s26 + $0x588] sm:$0xff] %v504_v49  ;;  %507 = vst [vmem:[%s5162_s26 + $0x590] sm:$0xff] %v506_v50  ;;  %v514_v54 = vld [vmem:[%s5154_s25 + $0xb30] sm:$0xff]  ;;  %v516_v55 = vld [vmem:[%s5154_s25 + $0xb38] sm:$0xff] }
  0x6a   : > { %509 = vst [vmem:[%s5162_s26 + $0x598] sm:$0xff] %v508_v51  ;;  %511 = vst [vmem:[%s5162_s26 + $0x5a0] sm:$0xff] %v510_v52  ;;  %v518_v56 = vld [vmem:[%s5154_s25 + $0xb80] sm:$0xff]  ;;  %v520_v57 = vld [vmem:[%s5154_s25 + $0xb88] sm:$0xff] }
  0x6b   : > { %513 = vst [vmem:[%s5162_s26 + $0x5a8] sm:$0xff] %v512_v53  ;;  %515 = vst [vmem:[%s5162_s26 + $0x5b0] sm:$0xff] %v514_v54  ;;  %v522_v58 = vld [vmem:[%s5154_s25 + $0xb90] sm:$0xff]  ;;  %v524_v59 = vld [vmem:[%s5154_s25 + $0xb98] sm:$0xff] }
  0x6c   : > { %517 = vst [vmem:[%s5162_s26 + $0x5b8] sm:$0xff] %v516_v55  ;;  %519 = vst [vmem:[%s5162_s26 + $0x5c0] sm:$0xff] %v518_v56  ;;  %v526_v60 = vld [vmem:[%s5154_s25 + $0xba0] sm:$0xff]  ;;  %v528_v61 = vld [vmem:[%s5154_s25 + $0xba8] sm:$0xff] }
  0x6d   : > { %521 = vst [vmem:[%s5162_s26 + $0x5c8] sm:$0xff] %v520_v57  ;;  %523 = vst [vmem:[%s5162_s26 + $0x5d0] sm:$0xff] %v522_v58  ;;  %v530_v62 = vld [vmem:[%s5154_s25 + $0xbb0] sm:$0xff]  ;;  %v532_v63 = vld [vmem:[%s5154_s25 + $0xbb8] sm:$0xff] }
  0x6e   : > { %525 = vst [vmem:[%s5162_s26 + $0x5d8] sm:$0xff] %v524_v59  ;;  %527 = vst [vmem:[%s5162_s26 + $0x5e0] sm:$0xff] %v526_v60  ;;  %v534_v0 = vld [vmem:[%s5154_s25 + $0xc00] sm:$0xff]  ;;  %v536_v1 = vld [vmem:[%s5154_s25 + $0xc08] sm:$0xff] }
  0x6f   : > { %529 = vst [vmem:[%s5162_s26 + $0x5e8] sm:$0xff] %v528_v61  ;;  %531 = vst [vmem:[%s5162_s26 + $0x5f0] sm:$0xff] %v530_v62  ;;  %v538_v2 = vld [vmem:[%s5154_s25 + $0xc10] sm:$0xff]  ;;  %v540_v3 = vld [vmem:[%s5154_s25 + $0xc18] sm:$0xff] }
  0x70   : > { %533 = vst [vmem:[%s5162_s26 + $0x5f8] sm:$0xff] %v532_v63  ;;  %535 = vst [vmem:[%s5162_s26 + $0x600] sm:$0xff] %v534_v0  ;;  %v542_v4 = vld [vmem:[%s5154_s25 + $0xc20] sm:$0xff]  ;;  %v544_v5 = vld [vmem:[%s5154_s25 + $0xc28] sm:$0xff] }
  0x71   : > { %537 = vst [vmem:[%s5162_s26 + $0x608] sm:$0xff] %v536_v1  ;;  %539 = vst [vmem:[%s5162_s26 + $0x610] sm:$0xff] %v538_v2  ;;  %v546_v6 = vld [vmem:[%s5154_s25 + $0xc30] sm:$0xff]  ;;  %v548_v7 = vld [vmem:[%s5154_s25 + $0xc38] sm:$0xff] }
  0x72   : > { %541 = vst [vmem:[%s5162_s26 + $0x618] sm:$0xff] %v540_v3  ;;  %543 = vst [vmem:[%s5162_s26 + $0x620] sm:$0xff] %v542_v4  ;;  %v550_v8 = vld [vmem:[%s5154_s25 + $0xc80] sm:$0xff]  ;;  %v552_v9 = vld [vmem:[%s5154_s25 + $0xc88] sm:$0xff] }
  0x73   : > { %545 = vst [vmem:[%s5162_s26 + $0x628] sm:$0xff] %v544_v5  ;;  %547 = vst [vmem:[%s5162_s26 + $0x630] sm:$0xff] %v546_v6  ;;  %v554_v10 = vld [vmem:[%s5154_s25 + $0xc90] sm:$0xff]  ;;  %v556_v11 = vld [vmem:[%s5154_s25 + $0xc98] sm:$0xff] }
  0x74   : > { %549 = vst [vmem:[%s5162_s26 + $0x638] sm:$0xff] %v548_v7  ;;  %551 = vst [vmem:[%s5162_s26 + $0x640] sm:$0xff] %v550_v8  ;;  %v558_v12 = vld [vmem:[%s5154_s25 + $0xca0] sm:$0xff]  ;;  %v560_v13 = vld [vmem:[%s5154_s25 + $0xca8] sm:$0xff] }
  0x75   : > { %553 = vst [vmem:[%s5162_s26 + $0x648] sm:$0xff] %v552_v9  ;;  %555 = vst [vmem:[%s5162_s26 + $0x650] sm:$0xff] %v554_v10  ;;  %v562_v14 = vld [vmem:[%s5154_s25 + $0xcb0] sm:$0xff]  ;;  %v564_v15 = vld [vmem:[%s5154_s25 + $0xcb8] sm:$0xff] }
  0x76   : > { %557 = vst [vmem:[%s5162_s26 + $0x658] sm:$0xff] %v556_v11  ;;  %559 = vst [vmem:[%s5162_s26 + $0x660] sm:$0xff] %v558_v12  ;;  %v566_v16 = vld [vmem:[%s5154_s25 + $0xd00] sm:$0xff]  ;;  %v568_v17 = vld [vmem:[%s5154_s25 + $0xd08] sm:$0xff] }
  0x77   : > { %561 = vst [vmem:[%s5162_s26 + $0x668] sm:$0xff] %v560_v13  ;;  %563 = vst [vmem:[%s5162_s26 + $0x670] sm:$0xff] %v562_v14  ;;  %v570_v18 = vld [vmem:[%s5154_s25 + $0xd10] sm:$0xff]  ;;  %v572_v19 = vld [vmem:[%s5154_s25 + $0xd18] sm:$0xff] }
  0x78   : > { %565 = vst [vmem:[%s5162_s26 + $0x678] sm:$0xff] %v564_v15  ;;  %567 = vst [vmem:[%s5162_s26 + $0x680] sm:$0xff] %v566_v16  ;;  %v574_v20 = vld [vmem:[%s5154_s25 + $0xd20] sm:$0xff]  ;;  %v576_v21 = vld [vmem:[%s5154_s25 + $0xd28] sm:$0xff] }
  0x79   : > { %569 = vst [vmem:[%s5162_s26 + $0x688] sm:$0xff] %v568_v17  ;;  %571 = vst [vmem:[%s5162_s26 + $0x690] sm:$0xff] %v570_v18  ;;  %v578_v22 = vld [vmem:[%s5154_s25 + $0xd30] sm:$0xff]  ;;  %v580_v23 = vld [vmem:[%s5154_s25 + $0xd38] sm:$0xff] }
  0x7a   : > { %573 = vst [vmem:[%s5162_s26 + $0x698] sm:$0xff] %v572_v19  ;;  %575 = vst [vmem:[%s5162_s26 + $0x6a0] sm:$0xff] %v574_v20  ;;  %v582_v24 = vld [vmem:[%s5154_s25 + $0xd80] sm:$0xff]  ;;  %v584_v25 = vld [vmem:[%s5154_s25 + $0xd88] sm:$0xff] }
  0x7b   : > { %577 = vst [vmem:[%s5162_s26 + $0x6a8] sm:$0xff] %v576_v21  ;;  %579 = vst [vmem:[%s5162_s26 + $0x6b0] sm:$0xff] %v578_v22  ;;  %v586_v26 = vld [vmem:[%s5154_s25 + $0xd90] sm:$0xff]  ;;  %v588_v27 = vld [vmem:[%s5154_s25 + $0xd98] sm:$0xff] }
  0x7c   : > { %581 = vst [vmem:[%s5162_s26 + $0x6b8] sm:$0xff] %v580_v23  ;;  %583 = vst [vmem:[%s5162_s26 + $0x6c0] sm:$0xff] %v582_v24  ;;  %v590_v28 = vld [vmem:[%s5154_s25 + $0xda0] sm:$0xff]  ;;  %v592_v29 = vld [vmem:[%s5154_s25 + $0xda8] sm:$0xff] }
  0x7d   : > { %585 = vst [vmem:[%s5162_s26 + $0x6c8] sm:$0xff] %v584_v25  ;;  %587 = vst [vmem:[%s5162_s26 + $0x6d0] sm:$0xff] %v586_v26  ;;  %v594_v30 = vld [vmem:[%s5154_s25 + $0xdb0] sm:$0xff]  ;;  %v596_v31 = vld [vmem:[%s5154_s25 + $0xdb8] sm:$0xff] }
  0x7e   : > { %589 = vst [vmem:[%s5162_s26 + $0x6d8] sm:$0xff] %v588_v27  ;;  %591 = vst [vmem:[%s5162_s26 + $0x6e0] sm:$0xff] %v590_v28  ;;  %v598_v32 = vld [vmem:[%s5154_s25 + $0xe00] sm:$0xff]  ;;  %v600_v33 = vld [vmem:[%s5154_s25 + $0xe08] sm:$0xff] }
  0x7f   : > { %593 = vst [vmem:[%s5162_s26 + $0x6e8] sm:$0xff] %v592_v29  ;;  %595 = vst [vmem:[%s5162_s26 + $0x6f0] sm:$0xff] %v594_v30  ;;  %v602_v34 = vld [vmem:[%s5154_s25 + $0xe10] sm:$0xff]  ;;  %v604_v35 = vld [vmem:[%s5154_s25 + $0xe18] sm:$0xff] }
  0x80   : > { %597 = vst [vmem:[%s5162_s26 + $0x6f8] sm:$0xff] %v596_v31  ;;  %599 = vst [vmem:[%s5162_s26 + $0x700] sm:$0xff] %v598_v32  ;;  %v606_v36 = vld [vmem:[%s5154_s25 + $0xe20] sm:$0xff]  ;;  %v608_v37 = vld [vmem:[%s5154_s25 + $0xe28] sm:$0xff] }
  0x81   : > { %601 = vst [vmem:[%s5162_s26 + $0x708] sm:$0xff] %v600_v33  ;;  %603 = vst [vmem:[%s5162_s26 + $0x710] sm:$0xff] %v602_v34  ;;  %v610_v38 = vld [vmem:[%s5154_s25 + $0xe30] sm:$0xff]  ;;  %v612_v39 = vld [vmem:[%s5154_s25 + $0xe38] sm:$0xff] }
  0x82   : > { %605 = vst [vmem:[%s5162_s26 + $0x718] sm:$0xff] %v604_v35  ;;  %607 = vst [vmem:[%s5162_s26 + $0x720] sm:$0xff] %v606_v36  ;;  %v614_v40 = vld [vmem:[%s5154_s25 + $0xe80] sm:$0xff]  ;;  %v616_v41 = vld [vmem:[%s5154_s25 + $0xe88] sm:$0xff] }
  0x83   : > { %609 = vst [vmem:[%s5162_s26 + $0x728] sm:$0xff] %v608_v37  ;;  %611 = vst [vmem:[%s5162_s26 + $0x730] sm:$0xff] %v610_v38  ;;  %v618_v42 = vld [vmem:[%s5154_s25 + $0xe90] sm:$0xff]  ;;  %v620_v43 = vld [vmem:[%s5154_s25 + $0xe98] sm:$0xff] }
  0x84   : > { %613 = vst [vmem:[%s5162_s26 + $0x738] sm:$0xff] %v612_v39  ;;  %615 = vst [vmem:[%s5162_s26 + $0x740] sm:$0xff] %v614_v40  ;;  %v622_v44 = vld [vmem:[%s5154_s25 + $0xea0] sm:$0xff]  ;;  %v624_v45 = vld [vmem:[%s5154_s25 + $0xea8] sm:$0xff] }
  0x85   : > { %617 = vst [vmem:[%s5162_s26 + $0x748] sm:$0xff] %v616_v41  ;;  %619 = vst [vmem:[%s5162_s26 + $0x750] sm:$0xff] %v618_v42  ;;  %v626_v46 = vld [vmem:[%s5154_s25 + $0xeb0] sm:$0xff]  ;;  %v628_v47 = vld [vmem:[%s5154_s25 + $0xeb8] sm:$0xff] }
  0x86   : > { %621 = vst [vmem:[%s5162_s26 + $0x758] sm:$0xff] %v620_v43  ;;  %623 = vst [vmem:[%s5162_s26 + $0x760] sm:$0xff] %v622_v44  ;;  %v630_v48 = vld [vmem:[%s5154_s25 + $0xf00] sm:$0xff]  ;;  %v632_v49 = vld [vmem:[%s5154_s25 + $0xf08] sm:$0xff] }
  0x87   : > { %625 = vst [vmem:[%s5162_s26 + $0x768] sm:$0xff] %v624_v45  ;;  %627 = vst [vmem:[%s5162_s26 + $0x770] sm:$0xff] %v626_v46  ;;  %v634_v50 = vld [vmem:[%s5154_s25 + $0xf10] sm:$0xff]  ;;  %v636_v51 = vld [vmem:[%s5154_s25 + $0xf18] sm:$0xff] }
  0x88   : > { %629 = vst [vmem:[%s5162_s26 + $0x778] sm:$0xff] %v628_v47  ;;  %631 = vst [vmem:[%s5162_s26 + $0x780] sm:$0xff] %v630_v48  ;;  %v638_v52 = vld [vmem:[%s5154_s25 + $0xf20] sm:$0xff]  ;;  %v640_v53 = vld [vmem:[%s5154_s25 + $0xf28] sm:$0xff] }
  0x89   : > { %633 = vst [vmem:[%s5162_s26 + $0x788] sm:$0xff] %v632_v49  ;;  %635 = vst [vmem:[%s5162_s26 + $0x790] sm:$0xff] %v634_v50  ;;  %v642_v54 = vld [vmem:[%s5154_s25 + $0xf30] sm:$0xff]  ;;  %v644_v55 = vld [vmem:[%s5154_s25 + $0xf38] sm:$0xff] }
  0x8a   : > { %637 = vst [vmem:[%s5162_s26 + $0x798] sm:$0xff] %v636_v51  ;;  %639 = vst [vmem:[%s5162_s26 + $0x7a0] sm:$0xff] %v638_v52  ;;  %v646_v56 = vld [vmem:[%s5154_s25 + $0xf80] sm:$0xff]  ;;  %v648_v57 = vld [vmem:[%s5154_s25 + $0xf88] sm:$0xff] }
  0x8b   : > { %641 = vst [vmem:[%s5162_s26 + $0x7a8] sm:$0xff] %v640_v53  ;;  %643 = vst [vmem:[%s5162_s26 + $0x7b0] sm:$0xff] %v642_v54  ;;  %v650_v58 = vld [vmem:[%s5154_s25 + $0xf90] sm:$0xff]  ;;  %v652_v59 = vld [vmem:[%s5154_s25 + $0xf98] sm:$0xff] }
  0x8c   : > { %645 = vst [vmem:[%s5162_s26 + $0x7b8] sm:$0xff] %v644_v55  ;;  %647 = vst [vmem:[%s5162_s26 + $0x7c0] sm:$0xff] %v646_v56  ;;  %v654_v60 = vld [vmem:[%s5154_s25 + $0xfa0] sm:$0xff]  ;;  %v656_v61 = vld [vmem:[%s5154_s25 + $0xfa8] sm:$0xff] }
  0x8d   : > { %649 = vst [vmem:[%s5162_s26 + $0x7c8] sm:$0xff] %v648_v57  ;;  %651 = vst [vmem:[%s5162_s26 + $0x7d0] sm:$0xff] %v650_v58  ;;  %v658_v62 = vld [vmem:[%s5154_s25 + $0xfb0] sm:$0xff]  ;;  %v660_v63 = vld [vmem:[%s5154_s25 + $0xfb8] sm:$0xff] }
  0x8e   : > { %653 = vst [vmem:[%s5162_s26 + $0x7d8] sm:$0xff] %v652_v59  ;;  %655 = vst [vmem:[%s5162_s26 + $0x7e0] sm:$0xff] %v654_v60  ;;  %v662_v0 = vld [vmem:[%s5154_s25 + $0x1000] sm:$0xff]  ;;  %v664_v1 = vld [vmem:[%s5154_s25 + $0x1008] sm:$0xff] }
  0x8f   : > { %657 = vst [vmem:[%s5162_s26 + $0x7e8] sm:$0xff] %v656_v61  ;;  %659 = vst [vmem:[%s5162_s26 + $0x7f0] sm:$0xff] %v658_v62  ;;  %v666_v2 = vld [vmem:[%s5154_s25 + $0x1010] sm:$0xff]  ;;  %v668_v3 = vld [vmem:[%s5154_s25 + $0x1018] sm:$0xff] }
  0x90   : > { %661 = vst [vmem:[%s5162_s26 + $0x7f8] sm:$0xff] %v660_v63  ;;  %663 = vst [vmem:[%s5162_s26 + $0x800] sm:$0xff] %v662_v0  ;;  %v670_v4 = vld [vmem:[%s5154_s25 + $0x1020] sm:$0xff]  ;;  %v672_v5 = vld [vmem:[%s5154_s25 + $0x1028] sm:$0xff] }
  0x91   : > { %665 = vst [vmem:[%s5162_s26 + $0x808] sm:$0xff] %v664_v1  ;;  %667 = vst [vmem:[%s5162_s26 + $0x810] sm:$0xff] %v666_v2  ;;  %v674_v6 = vld [vmem:[%s5154_s25 + $0x1030] sm:$0xff]  ;;  %v676_v7 = vld [vmem:[%s5154_s25 + $0x1038] sm:$0xff] }
  0x92   : > { %669 = vst [vmem:[%s5162_s26 + $0x818] sm:$0xff] %v668_v3  ;;  %671 = vst [vmem:[%s5162_s26 + $0x820] sm:$0xff] %v670_v4  ;;  %v678_v8 = vld [vmem:[%s5154_s25 + $0x1080] sm:$0xff]  ;;  %v680_v9 = vld [vmem:[%s5154_s25 + $0x1088] sm:$0xff] }
  0x93   : > { %673 = vst [vmem:[%s5162_s26 + $0x828] sm:$0xff] %v672_v5  ;;  %675 = vst [vmem:[%s5162_s26 + $0x830] sm:$0xff] %v674_v6  ;;  %v682_v10 = vld [vmem:[%s5154_s25 + $0x1090] sm:$0xff]  ;;  %v684_v11 = vld [vmem:[%s5154_s25 + $0x1098] sm:$0xff] }
  0x94   : > { %677 = vst [vmem:[%s5162_s26 + $0x838] sm:$0xff] %v676_v7  ;;  %679 = vst [vmem:[%s5162_s26 + $0x840] sm:$0xff] %v678_v8  ;;  %v686_v12 = vld [vmem:[%s5154_s25 + $0x10a0] sm:$0xff]  ;;  %v688_v13 = vld [vmem:[%s5154_s25 + $0x10a8] sm:$0xff] }
  0x95   : > { %681 = vst [vmem:[%s5162_s26 + $0x848] sm:$0xff] %v680_v9  ;;  %683 = vst [vmem:[%s5162_s26 + $0x850] sm:$0xff] %v682_v10  ;;  %v690_v14 = vld [vmem:[%s5154_s25 + $0x10b0] sm:$0xff]  ;;  %v692_v15 = vld [vmem:[%s5154_s25 + $0x10b8] sm:$0xff] }
  0x96   : > { %685 = vst [vmem:[%s5162_s26 + $0x858] sm:$0xff] %v684_v11  ;;  %687 = vst [vmem:[%s5162_s26 + $0x860] sm:$0xff] %v686_v12  ;;  %v694_v16 = vld [vmem:[%s5154_s25 + $0x1100] sm:$0xff]  ;;  %v696_v17 = vld [vmem:[%s5154_s25 + $0x1108] sm:$0xff] }
  0x97   : > { %689 = vst [vmem:[%s5162_s26 + $0x868] sm:$0xff] %v688_v13  ;;  %691 = vst [vmem:[%s5162_s26 + $0x870] sm:$0xff] %v690_v14  ;;  %v698_v18 = vld [vmem:[%s5154_s25 + $0x1110] sm:$0xff]  ;;  %v700_v19 = vld [vmem:[%s5154_s25 + $0x1118] sm:$0xff] }
  0x98   : > { %693 = vst [vmem:[%s5162_s26 + $0x878] sm:$0xff] %v692_v15  ;;  %695 = vst [vmem:[%s5162_s26 + $0x880] sm:$0xff] %v694_v16  ;;  %v702_v20 = vld [vmem:[%s5154_s25 + $0x1120] sm:$0xff]  ;;  %v704_v21 = vld [vmem:[%s5154_s25 + $0x1128] sm:$0xff] }
  0x99   : > { %697 = vst [vmem:[%s5162_s26 + $0x888] sm:$0xff] %v696_v17  ;;  %699 = vst [vmem:[%s5162_s26 + $0x890] sm:$0xff] %v698_v18  ;;  %v706_v22 = vld [vmem:[%s5154_s25 + $0x1130] sm:$0xff]  ;;  %v708_v23 = vld [vmem:[%s5154_s25 + $0x1138] sm:$0xff] }
  0x9a   : > { %701 = vst [vmem:[%s5162_s26 + $0x898] sm:$0xff] %v700_v19  ;;  %703 = vst [vmem:[%s5162_s26 + $0x8a0] sm:$0xff] %v702_v20  ;;  %v710_v24 = vld [vmem:[%s5154_s25 + $0x1180] sm:$0xff]  ;;  %v712_v25 = vld [vmem:[%s5154_s25 + $0x1188] sm:$0xff] }
  0x9b   : > { %705 = vst [vmem:[%s5162_s26 + $0x8a8] sm:$0xff] %v704_v21  ;;  %707 = vst [vmem:[%s5162_s26 + $0x8b0] sm:$0xff] %v706_v22  ;;  %v714_v26 = vld [vmem:[%s5154_s25 + $0x1190] sm:$0xff]  ;;  %v716_v27 = vld [vmem:[%s5154_s25 + $0x1198] sm:$0xff] }
  0x9c   : > { %709 = vst [vmem:[%s5162_s26 + $0x8b8] sm:$0xff] %v708_v23  ;;  %711 = vst [vmem:[%s5162_s26 + $0x8c0] sm:$0xff] %v710_v24  ;;  %v718_v28 = vld [vmem:[%s5154_s25 + $0x11a0] sm:$0xff]  ;;  %v720_v29 = vld [vmem:[%s5154_s25 + $0x11a8] sm:$0xff] }
  0x9d   : > { %713 = vst [vmem:[%s5162_s26 + $0x8c8] sm:$0xff] %v712_v25  ;;  %715 = vst [vmem:[%s5162_s26 + $0x8d0] sm:$0xff] %v714_v26  ;;  %v722_v30 = vld [vmem:[%s5154_s25 + $0x11b0] sm:$0xff]  ;;  %v724_v31 = vld [vmem:[%s5154_s25 + $0x11b8] sm:$0xff] }
  0x9e   : > { %717 = vst [vmem:[%s5162_s26 + $0x8d8] sm:$0xff] %v716_v27  ;;  %719 = vst [vmem:[%s5162_s26 + $0x8e0] sm:$0xff] %v718_v28  ;;  %v726_v32 = vld [vmem:[%s5154_s25 + $0x1200] sm:$0xff]  ;;  %v728_v33 = vld [vmem:[%s5154_s25 + $0x1208] sm:$0xff] }
  0x9f   : > { %721 = vst [vmem:[%s5162_s26 + $0x8e8] sm:$0xff] %v720_v29  ;;  %723 = vst [vmem:[%s5162_s26 + $0x8f0] sm:$0xff] %v722_v30  ;;  %v730_v34 = vld [vmem:[%s5154_s25 + $0x1210] sm:$0xff]  ;;  %v732_v35 = vld [vmem:[%s5154_s25 + $0x1218] sm:$0xff] }
  0xa0   : > { %725 = vst [vmem:[%s5162_s26 + $0x8f8] sm:$0xff] %v724_v31  ;;  %727 = vst [vmem:[%s5162_s26 + $0x900] sm:$0xff] %v726_v32  ;;  %v734_v36 = vld [vmem:[%s5154_s25 + $0x1220] sm:$0xff]  ;;  %v736_v37 = vld [vmem:[%s5154_s25 + $0x1228] sm:$0xff] }
  0xa1   : > { %729 = vst [vmem:[%s5162_s26 + $0x908] sm:$0xff] %v728_v33  ;;  %731 = vst [vmem:[%s5162_s26 + $0x910] sm:$0xff] %v730_v34  ;;  %v738_v38 = vld [vmem:[%s5154_s25 + $0x1230] sm:$0xff]  ;;  %v740_v39 = vld [vmem:[%s5154_s25 + $0x1238] sm:$0xff] }
  0xa2   : > { %733 = vst [vmem:[%s5162_s26 + $0x918] sm:$0xff] %v732_v35  ;;  %735 = vst [vmem:[%s5162_s26 + $0x920] sm:$0xff] %v734_v36  ;;  %v742_v40 = vld [vmem:[%s5154_s25 + $0x1280] sm:$0xff]  ;;  %v744_v41 = vld [vmem:[%s5154_s25 + $0x1288] sm:$0xff] }
  0xa3   : > { %737 = vst [vmem:[%s5162_s26 + $0x928] sm:$0xff] %v736_v37  ;;  %739 = vst [vmem:[%s5162_s26 + $0x930] sm:$0xff] %v738_v38  ;;  %v746_v42 = vld [vmem:[%s5154_s25 + $0x1290] sm:$0xff]  ;;  %v748_v43 = vld [vmem:[%s5154_s25 + $0x1298] sm:$0xff] }
  0xa4   : > { %741 = vst [vmem:[%s5162_s26 + $0x938] sm:$0xff] %v740_v39  ;;  %743 = vst [vmem:[%s5162_s26 + $0x940] sm:$0xff] %v742_v40  ;;  %v750_v44 = vld [vmem:[%s5154_s25 + $0x12a0] sm:$0xff]  ;;  %v752_v45 = vld [vmem:[%s5154_s25 + $0x12a8] sm:$0xff] }
  0xa5   : > { %745 = vst [vmem:[%s5162_s26 + $0x948] sm:$0xff] %v744_v41  ;;  %747 = vst [vmem:[%s5162_s26 + $0x950] sm:$0xff] %v746_v42  ;;  %v754_v46 = vld [vmem:[%s5154_s25 + $0x12b0] sm:$0xff]  ;;  %v756_v47 = vld [vmem:[%s5154_s25 + $0x12b8] sm:$0xff] }
  0xa6   : > { %749 = vst [vmem:[%s5162_s26 + $0x958] sm:$0xff] %v748_v43  ;;  %751 = vst [vmem:[%s5162_s26 + $0x960] sm:$0xff] %v750_v44  ;;  %v758_v48 = vld [vmem:[%s5154_s25 + $0x1300] sm:$0xff]  ;;  %v760_v49 = vld [vmem:[%s5154_s25 + $0x1308] sm:$0xff] }
  0xa7   : > { %753 = vst [vmem:[%s5162_s26 + $0x968] sm:$0xff] %v752_v45  ;;  %755 = vst [vmem:[%s5162_s26 + $0x970] sm:$0xff] %v754_v46  ;;  %v762_v50 = vld [vmem:[%s5154_s25 + $0x1310] sm:$0xff]  ;;  %v764_v51 = vld [vmem:[%s5154_s25 + $0x1318] sm:$0xff] }
  0xa8   : > { %757 = vst [vmem:[%s5162_s26 + $0x978] sm:$0xff] %v756_v47  ;;  %759 = vst [vmem:[%s5162_s26 + $0x980] sm:$0xff] %v758_v48  ;;  %v766_v52 = vld [vmem:[%s5154_s25 + $0x1320] sm:$0xff]  ;;  %v768_v53 = vld [vmem:[%s5154_s25 + $0x1328] sm:$0xff] }
  0xa9   : > { %761 = vst [vmem:[%s5162_s26 + $0x988] sm:$0xff] %v760_v49  ;;  %763 = vst [vmem:[%s5162_s26 + $0x990] sm:$0xff] %v762_v50  ;;  %v770_v54 = vld [vmem:[%s5154_s25 + $0x1330] sm:$0xff]  ;;  %v772_v55 = vld [vmem:[%s5154_s25 + $0x1338] sm:$0xff] }
  0xaa   : > { %765 = vst [vmem:[%s5162_s26 + $0x998] sm:$0xff] %v764_v51  ;;  %767 = vst [vmem:[%s5162_s26 + $0x9a0] sm:$0xff] %v766_v52  ;;  %v774_v56 = vld [vmem:[%s5154_s25 + $0x1380] sm:$0xff]  ;;  %v776_v57 = vld [vmem:[%s5154_s25 + $0x1388] sm:$0xff] }
  0xab   : > { %769 = vst [vmem:[%s5162_s26 + $0x9a8] sm:$0xff] %v768_v53  ;;  %771 = vst [vmem:[%s5162_s26 + $0x9b0] sm:$0xff] %v770_v54  ;;  %v778_v58 = vld [vmem:[%s5154_s25 + $0x1390] sm:$0xff]  ;;  %v780_v59 = vld [vmem:[%s5154_s25 + $0x1398] sm:$0xff] }
  0xac   : > { %773 = vst [vmem:[%s5162_s26 + $0x9b8] sm:$0xff] %v772_v55  ;;  %775 = vst [vmem:[%s5162_s26 + $0x9c0] sm:$0xff] %v774_v56  ;;  %v782_v60 = vld [vmem:[%s5154_s25 + $0x13a0] sm:$0xff]  ;;  %v784_v61 = vld [vmem:[%s5154_s25 + $0x13a8] sm:$0xff] }
  0xad   : > { %777 = vst [vmem:[%s5162_s26 + $0x9c8] sm:$0xff] %v776_v57  ;;  %779 = vst [vmem:[%s5162_s26 + $0x9d0] sm:$0xff] %v778_v58  ;;  %v786_v62 = vld [vmem:[%s5154_s25 + $0x13b0] sm:$0xff]  ;;  %v788_v63 = vld [vmem:[%s5154_s25 + $0x13b8] sm:$0xff] }
  0xae   : > { %781 = vst [vmem:[%s5162_s26 + $0x9d8] sm:$0xff] %v780_v59  ;;  %783 = vst [vmem:[%s5162_s26 + $0x9e0] sm:$0xff] %v782_v60 }
  0xaf   : > { %785 = vst [vmem:[%s5162_s26 + $0x9e8] sm:$0xff] %v784_v61  ;;  %787 = vst [vmem:[%s5162_s26 + $0x9f0] sm:$0xff] %v786_v62 }
  0xb0   : > { %789 = vst [vmem:[%s5162_s26 + $0x9f8] sm:$0xff] %v788_v63 }
  0xb1 PF: > { %p4430_p5 = scmp.ge.s32.totalorder %s5096_s14, 1  ;;  %p794_p6 = scmp.lt.s32.totalorder %s5096_s14, 3 }
  0xb3   : > { %p795_p7 = pnand %p4430_p5, %p794_p6 }
  0xb4   : > { %s801_s27 = sand.u32 (!%p795_p7), 1, %s5088_s12   ;;  %s4431_s9 = sshll.u32 (!%p795_p7), %s4424_s15, 4 }
  0xb5   : > { %798 = sbr.rel (%p795_p7) target bundleno = 716 (0x2cc), region = 51  ;;  %p826_p8 = scmp.lt.s32.totalorder (!%p795_p7), %s4431_s9, 31 }
  0xb6   : > { %s5045_s28 = smul.u32 (!%p795_p7), 2560, %s801_s27 }
  0xb8   : > { %s5804_s29 = scalar_lea.vmem (!%p795_p7), [#allocation2], %s5045_s28 }
  0xba   : > { %vm1301_vm0 = vcmask 1044480   ;;  %vm1302_vm1 = vcmask 1045504   ;;  %v5098_v0 = vmov 65535   ;;  %v5099_v2 = vmov 0   ;;  %v897_v3 = vld [vmem:[%s5804_s29 + $0x200] sm:$0xff]  ;;  %v898_v6 = vld [vmem:[%s5804_s29 + $0x208] sm:$0xff] }
  0xbb   : > { %v1303_v1 = vsel %vm1301_vm0, 4294967295, %v5098_v0  ;;  %1385 = vmatprep.mubr.bf16.mxu0 %v5099_v2  ;;  %1426 = vmatprep.mubr.bf16.mxu1 %v5099_v2  ;;  %v905_v4 = vld [vmem:[%s5804_s29 + $0x240] sm:$0x33]  ;;  %v906_v8 = vld [vmem:[%s5804_s29 + $0x248] sm:$0x33]  ;;  %v899_v41 = vld [vmem:[%s5804_s29 + $0x210] sm:$0xff] }
  0xbc   : > { %5072 = vset.pattern.permute.xlu0 %v5099_v2  ;;  %v5808_v5 = vsel %vm1302_vm1, %v1303_v1, 0  ;;  %v4498_v7 = vcombine.high %v897_v3, %v905_v4  ;;  %v4497_v9 = vcombine.low %v897_v3, %v905_v4  ;;  %v881_v10 = vld [vmem:[%s5804_s29 + $0x180] sm:$0xff]  ;;  %v4500_v12 = vcombine.high %v898_v6, %v906_v8  ;;  %v882_v14 = vld [vmem:[%s5804_s29 + $0x188] sm:$0xff]  ;;  %v907_v42 = vld [vmem:[%s5804_s29 + $0x250] sm:$0x33]  ;;  %s6467_s9 = smov (!%p826_p8, %s4431_s9), 31 }
  0xbd   : > { %v889_v11 = vld [vmem:[%s5804_s29 + $0x1c0] sm:$0xff]  ;;  %v4499_v13 = vcombine.low %v898_v6, %v906_v8  ;;  %v890_v15 = vld [vmem:[%s5804_s29 + $0x1c8] sm:$0xff]  ;;  %v900_v44 = vld [vmem:[%s5804_s29 + $0x218] sm:$0xff]  ;;  %v4502_v49 = vcombine.high %v899_v41, %v907_v42  ;;  %v4501_v53 = vcombine.low %v899_v41, %v907_v42  ;;  %vm1297_vm2 = vcmask 613376   ;;  %s4432_s10 = sshll.u32 %s6467_s9, 2 }
  0xbe   : > { %v1309_v16 = vand.u32 %v4498_v7, %v5808_v5  ;;  %v1306_v17 = vand.u32 %v4497_v9, %v5808_v5  ;;  %v4482_v18 = vcombine.high %v881_v10, %v889_v11  ;;  %v1315_v19 = vand.u32 %v4500_v12, %v5808_v5  ;;  %v865_v22 = vld [vmem:[%s5804_s29 + $0x100] sm:$0xff]  ;;  %v866_v24 = vld [vmem:[%s5804_s29 + $0x108] sm:$0xff]  ;;  %v908_v45 = vld [vmem:[%s5804_s29 + $0x258] sm:$0x33]  ;;  %s6415_s14 = scalar_lea.vmem %s6462_s3, %s4432_s10 }
  0xbf   : > { %v1312_v20 = vand.u32 %v4499_v13, %v5808_v5  ;;  %v4484_v21 = vcombine.high %v882_v14, %v890_v15  ;;  %v873_v23 = vld [vmem:[%s5804_s29 + $0x140] sm:$0xff]  ;;  %v874_v25 = vld [vmem:[%s5804_s29 + $0x148] sm:$0xff]  ;;  %v4481_v26 = vcombine.low %v881_v10, %v889_v11  ;;  %v4483_v27 = vcombine.low %v882_v14, %v890_v15  ;;  %v883_v58 = vld [vmem:[%s5804_s29 + $0x190] sm:$0xff] }
  0xc0   : > { %1359 = vmatprep.subr.bf16.mxu0 %v1309_v16  ;;  %1400 = vmatprep.subr.bf16.mxu1 %v1315_v19  ;;  %v4466_v28 = vcombine.high %v865_v22, %v873_v23  ;;  %v4468_v29 = vcombine.high %v866_v24, %v874_v25  ;;  %v849_v30 = vld [vmem:[%s5804_s29 + $0x80] sm:$0xff]  ;;  %v850_v32 = vld [vmem:[%s5804_s29 + $0x88] sm:$0xff]  ;;  %v4465_v34 = vcombine.low %v865_v22, %v873_v23  ;;  %v891_v59 = vld [vmem:[%s5804_s29 + $0x1d0] sm:$0xff] }
  0xc1   : > { %1360 = vmatpush1.bf16.msra.mxu0 %v1306_v17  ;;  %1401 = vmatpush1.bf16.msra.mxu1 %v1312_v20  ;;  %v857_v31 = vld [vmem:[%s5804_s29 + $0xc0] sm:$0xff]  ;;  %v858_v33 = vld [vmem:[%s5804_s29 + $0xc8] sm:$0xff]  ;;  %v4467_v35 = vcombine.low %v866_v24, %v874_v25  ;;  %v4504_v51 = vcombine.high %v900_v44, %v908_v45  ;;  %v1321_v55 = vand.u32 %v4502_v49, %v5808_v5  ;;  %v884_v60 = vld [vmem:[%s5804_s29 + $0x198] sm:$0xff] }
  0xc2   : > { %1361 = vmatprep.subr.bf16.mxu0 %v4482_v18  ;;  %1402 = vmatprep.subr.bf16.mxu1 %v4484_v21  ;;  %v4450_v36 = vcombine.high %v849_v30, %v857_v31  ;;  %v833_v37 = vld [vmem:[%s5804_s29] sm:$0xff]  ;;  %v4452_v39 = vcombine.high %v850_v32, %v858_v33  ;;  %v834_v40 = vld [vmem:[%s5804_s29 + $0x8] sm:$0xff]  ;;  %v4449_v46 = vcombine.low %v849_v30, %v857_v31  ;;  %v892_v61 = vld [vmem:[%s5804_s29 + $0x1d8] sm:$0xff] }
  0xc3   : > { %v841_v38 = vld [vmem:[%s5804_s29 + $0x40] sm:$0xff]  ;;  %v842_v43 = vld [vmem:[%s5804_s29 + $0x48] sm:$0xff]  ;;  %v4451_v47 = vcombine.low %v850_v32, %v858_v33  ;;  %v4503_v56 = vcombine.low %v900_v44, %v908_v45  ;;  %v1327_v57 = vand.u32 %v4504_v51, %v5808_v5  ;;  %v1318_v63 = vand.u32 %v4501_v53, %v5808_v5  ;;  %v867_v4 = vld [vmem:[%s5804_s29 + $0x110] sm:$0xff] }
  0xc4   : > { %v4434_v48 = vcombine.high %v833_v37, %v841_v38  ;;  %v4436_v50 = vcombine.high %v834_v40, %v842_v43  ;;  %v4433_v52 = vcombine.low %v833_v37, %v841_v38  ;;  %v4435_v54 = vcombine.low %v834_v40, %v842_v43  ;;  %v5845_v62 = vld [vmem:[%s6460_s1] sm:$0xf]  ;;  %v875_v6 = vld [vmem:[%s5804_s29 + $0x150] sm:$0xff]  ;;  %v868_v7 = vld [vmem:[%s5804_s29 + $0x118] sm:$0xff] }
  0xc5   : > { %1362 = vmatpush1.bf16.msra.mxu0 %v4481_v26  ;;  %1403 = vmatpush1.bf16.msra.mxu1 %v4483_v27  ;;  %v1324_v0 = vand.u32 %v4503_v56, %v5808_v5  ;;  %v4486_v1 = vcombine.high %v883_v58, %v891_v59  ;;  %v4488_v3 = vcombine.high %v884_v60, %v892_v61  ;;  %v876_v8 = vld [vmem:[%s5804_s29 + $0x158] sm:$0xff]  ;;  %v851_v13 = vld [vmem:[%s5804_s29 + $0x90] sm:$0xff]  ;;  %v901_v24 = vld [vmem:[%s5804_s29 + $0x220] sm:$0xff] }
  0xc6   : > { %1363 = vmatprep.subr.bf16.mxu0 %v4466_v28  ;;  %1404 = vmatprep.subr.bf16.mxu1 %v4468_v29  ;;  %v4485_v9 = vcombine.low %v883_v58, %v891_v59  ;;  %v4487_v10 = vcombine.low %v884_v60, %v892_v61  ;;  %v4470_v11 = vcombine.high %v867_v4, %v875_v6  ;;  %v859_v14 = vld [vmem:[%s5804_s29 + $0xd0] sm:$0xff]  ;;  %v852_v15 = vld [vmem:[%s5804_s29 + $0x98] sm:$0xff]  ;;  %v909_v25 = vld [vmem:[%s5804_s29 + $0x260] sm:$0x33] }
  0xc7   : > { %v4472_v12 = vcombine.high %v868_v7, %v876_v8  ;;  %v860_v16 = vld [vmem:[%s5804_s29 + $0xd8] sm:$0xff]  ;;  %v4469_v17 = vcombine.low %v867_v4, %v875_v6  ;;  %v4471_v18 = vcombine.low %v868_v7, %v876_v8  ;;  %v4454_v19 = vcombine.high %v851_v13, %v859_v14  ;;  %v835_v20 = vld [vmem:[%s5804_s29 + $0x10] sm:$0xff]  ;;  %v902_v27 = vld [vmem:[%s5804_s29 + $0x228] sm:$0xff] }
  0xc8   : > { %v843_v21 = vld [vmem:[%s5804_s29 + $0x50] sm:$0xff]  ;;  %v4456_v22 = vcombine.high %v852_v15, %v860_v16  ;;  %v836_v23 = vld [vmem:[%s5804_s29 + $0x18] sm:$0xff]  ;;  %v910_v28 = vld [vmem:[%s5804_s29 + $0x268] sm:$0x33]  ;;  %v4453_v29 = vcombine.low %v851_v13, %v859_v14  ;;  %v4455_v30 = vcombine.low %v852_v15, %v860_v16  ;;  %v4506_v32 = vcombine.high %v901_v24, %v909_v25 }
  0xc9   : > { %1364 = vmatpush1.bf16.msra.mxu0 %v4465_v34  ;;  %1405 = vmatpush1.bf16.msra.mxu1 %v4467_v35  ;;  %v844_v26 = vld [vmem:[%s5804_s29 + $0x58] sm:$0xff]  ;;  %v4438_v31 = vcombine.high %v835_v20, %v843_v21  ;;  %v4508_v34 = vcombine.high %v902_v27, %v910_v28  ;;  %v4437_v35 = vcombine.low %v835_v20, %v843_v21  ;;  %v885_v41 = vld [vmem:[%s5804_s29 + $0x1a0] sm:$0xff]  ;;  %v886_v43 = vld [vmem:[%s5804_s29 + $0x1a8] sm:$0xff] }
  0xca   : > { %1365 = vmatprep.subr.bf16.mxu0 %v4450_v36  ;;  %1406 = vmatprep.subr.bf16.mxu1 %v4452_v39  ;;  %v4440_v33 = vcombine.high %v836_v23, %v844_v26  ;;  %v4505_v36 = vcombine.low %v901_v24, %v909_v25  ;;  %v4439_v37 = vcombine.low %v836_v23, %v844_v26  ;;  %v893_v42 = vld [vmem:[%s5804_s29 + $0x1e0] sm:$0xff]  ;;  %v894_v44 = vld [vmem:[%s5804_s29 + $0x1e8] sm:$0xff]  ;;  %v903_v7 = vld [vmem:[%s5804_s29 + $0x230] sm:$0xff] }
  0xcb   : > { %v1333_v38 = vand.u32 %v4506_v32, %v5808_v5  ;;  %v4507_v39 = vcombine.low %v902_v27, %v910_v28  ;;  %v1339_v40 = vand.u32 %v4508_v34, %v5808_v5  ;;  %v869_v49 = vld [vmem:[%s5804_s29 + $0x120] sm:$0xff]  ;;  %v870_v51 = vld [vmem:[%s5804_s29 + $0x128] sm:$0xff]  ;;  %v4489_v53 = vcombine.low %v885_v41, %v893_v42  ;;  %v911_v8 = vld [vmem:[%s5804_s29 + $0x270] sm:$0x33] }
  0xcc   : > { %v1330_v45 = vand.u32 %v4505_v36, %v5808_v5  ;;  %v861_v58 = vld [vmem:[%s5804_s29 + $0xe0] sm:$0xff]  ;;  %v854_v59 = vld [vmem:[%s5804_s29 + $0xa8] sm:$0xff]  ;;  %v4510_v15 = vcombine.high %v903_v7, %v911_v8  ;;  %v887_v24 = vld [vmem:[%s5804_s29 + $0x1b0] sm:$0xff] }
  0xcd   : > { %1366 = vmatpush1.bf16.msra.mxu0 %v4449_v46  ;;  %1407 = vmatpush1.bf16.msra.mxu1 %v4451_v47  ;;  %v1336_v46 = vand.u32 %v4507_v39, %v5808_v5  ;;  %v4490_v47 = vcombine.high %v885_v41, %v893_v42  ;;  %v862_v60 = vld [vmem:[%s5804_s29 + $0xe8] sm:$0xff]  ;;  %v895_v25 = vld [vmem:[%s5804_s29 + $0x1f0] sm:$0xff]  ;;  %v888_v26 = vld [vmem:[%s5804_s29 + $0x1b8] sm:$0xff] }
  0xce   : > { %1367 = vmatprep.subr.bf16.mxu0 %v4434_v48  ;;  %1408 = vmatprep.subr.bf16.mxu1 %v4436_v50  ;;  %v4492_v48 = vcombine.high %v886_v43, %v894_v44  ;;  %v877_v50 = vld [vmem:[%s5804_s29 + $0x160] sm:$0xff]  ;;  %v4460_v4 = vcombine.high %v854_v59, %v862_v60  ;;  %v838_v6 = vld [vmem:[%s5804_s29 + $0x28] sm:$0xff]  ;;  %v4459_v13 = vcombine.low %v854_v59, %v862_v60  ;;  %v896_v27 = vld [vmem:[%s5804_s29 + $0x1f8] sm:$0xff] }
  0xcf   : > { %v4473_v61 = vcombine.low %v869_v49, %v877_v50  ;;  %v1345_v21 = vand.u32 %v4510_v15, %v5808_v5  ;;  %v871_v32 = vld [vmem:[%s5804_s29 + $0x130] sm:$0xff]  ;;  %v872_v34 = vld [vmem:[%s5804_s29 + $0x138] sm:$0xff]  ;;  %v4493_v36 = vcombine.low %v887_v24, %v895_v25  ;;  %v4553_v15 = vld [vmem:[%s5804_s29 + $0x380] sm:$0xff] }
  0xd0   : > { %v863_v41 = vld [vmem:[%s5804_s29 + $0xf0] sm:$0xff]  ;;  %v856_v42 = vld [vmem:[%s5804_s29 + $0xb8] sm:$0xff] }
  0xd1   : > { %1368 = vmatpush1.bf16.msra.mxu0 %v4433_v52  ;;  %1409 = vmatpush1.bf16.msra.mxu1 %v4435_v54  ;;  %v878_v52 = vld [vmem:[%s5804_s29 + $0x168] sm:$0xff]  ;;  %v4491_v54 = vcombine.low %v886_v43, %v894_v44  ;;  %v864_v43 = vld [vmem:[%s5804_s29 + $0xf8] sm:$0xff] }
  0xd2   : > { %1441 = vmatprep.subr.bf16.mxu0 %v1321_v55  ;;  %1482 = vmatprep.subr.bf16.mxu1 %v1327_v57  ;;  %v4474_v55 = vcombine.high %v869_v49, %v877_v50  ;;  %v4476_v56 = vcombine.high %v870_v51, %v878_v52  ;;  %v853_v57 = vld [vmem:[%s5804_s29 + $0xa0] sm:$0xff]  ;;  %v4464_v49 = vcombine.high %v856_v42, %v864_v43  ;;  %v840_v50 = vld [vmem:[%s5804_s29 + $0x38] sm:$0xff] }
  0xd4   : > { %4513 = vmatmul.mubr.msk.bf16.vlgmr.msra.gmra.mxu0 %vm1297_vm2, %v5845_v62  ;;  %4514 = vmatmul.mubr.msk.bf16.vlgmr.msra.gmra.mxu1 %vm1297_vm2, %v5845_v62 }
  0xd5   : > { %1442 = vmatpush1.bf16.msra.mxu0 %v1318_v63  ;;  %1483 = vmatpush1.bf16.msra.mxu1 %v1324_v0  ;;  %v4475_v63 = vcombine.low %v870_v51, %v878_v52  ;;  %v4458_v0 = vcombine.high %v853_v57, %v861_v58  ;;  %v4585_v51 = vld [vmem:[%s5804_s29 + $0x480] sm:$0xff] }
  0xd6   : > { %1443 = vmatprep.subr.bf16.mxu0 %v4486_v1  ;;  %1484 = vmatprep.subr.bf16.mxu1 %v4488_v3  ;;  %v837_v1 = vld [vmem:[%s5804_s29 + $0x20] sm:$0xff] }
  0xd7   : > { %1467 = vmatprep.mubr.bf16.mxu0 %v5099_v2  ;;  %1508 = vmatprep.mubr.bf16.mxu1 %v5099_v2  ;;  %v845_v3 = vld [vmem:[%s5804_s29 + $0x60] sm:$0xff] }
  0xd8   : > { %v4442_v14 = vcombine.high %v837_v1, %v845_v3  ;;  %v4593_v52 = vld [vmem:[%s5804_s29 + $0x4c0] sm:$0x33] }
  0xd9   : > { %1444 = vmatpush1.bf16.msra.mxu0 %v4485_v9  ;;  %1485 = vmatpush1.bf16.msra.mxu1 %v4487_v10  ;;  %v846_v9 = vld [vmem:[%s5804_s29 + $0x68] sm:$0xff]  ;;  %v904_v10 = vld [vmem:[%s5804_s29 + $0x238] sm:$0xff]  ;;  %v4666_v59 = vcombine.high %v4585_v51, %v4593_v52 }
  0xda   : > { %1445 = vmatprep.subr.bf16.mxu0 %v4470_v11  ;;  %1486 = vmatprep.subr.bf16.mxu1 %v4472_v12  ;;  %v912_v11 = vld [vmem:[%s5804_s29 + $0x278] sm:$0x33]  ;;  %v4457_v12 = vcombine.low %v853_v57, %v861_v58  ;;  %v4444_v16 = vcombine.high %v838_v6, %v846_v9  ;;  %v4443_v20 = vcombine.low %v838_v6, %v846_v9  ;;  %v4570_v9 = vld [vmem:[%s5804_s29 + $0x408] sm:$0xff] }
  0xdb   : > { %v4463_v57 = vcombine.low %v856_v42, %v864_v43 }
  0xdd   : > { %1446 = vmatpush1.bf16.msra.mxu0 %v4469_v17  ;;  %1487 = vmatpush1.bf16.msra.mxu1 %v4471_v18  ;;  %v4512_v17 = vcombine.high %v904_v10, %v912_v11  ;;  %v4441_v18 = vcombine.low %v837_v1, %v845_v3  ;;  %v2150_v3 = vand.u32 %v4666_v59, %v5808_v5  ;;  %v4555_v59 = vld [vmem:[%s5804_s29 + $0x390] sm:$0xff] }
  0xde   : > { %1447 = vmatprep.subr.bf16.mxu0 %v4454_v19  ;;  %1488 = vmatprep.subr.bf16.mxu1 %v4456_v22  ;;  %v4509_v19 = vcombine.low %v903_v7, %v911_v8  ;;  %v4511_v22 = vcombine.low %v904_v10, %v912_v11  ;;  %v4569_v7 = vld [vmem:[%s5804_s29 + $0x400] sm:$0xff]  ;;  %v4578_v10 = vld [vmem:[%s5804_s29 + $0x448] sm:$0xff] }
  0xdf   : > { %v1351_v23 = vand.u32 %v4512_v17, %v5808_v5  ;;  %v4577_v8 = vld [vmem:[%s5804_s29 + $0x440] sm:$0xff]  ;;  %v4554_v17 = vld [vmem:[%s5804_s29 + $0x388] sm:$0xff] }
  0xe0   : > { %v1342_v28 = vand.u32 %v4509_v19, %v5808_v5  ;;  %v4649_v19 = vcombine.low %v4569_v7, %v4577_v8 }
  0xe1   : > { %1448 = vmatpush1.bf16.msra.mxu0 %v4453_v29  ;;  %1489 = vmatpush1.bf16.msra.mxu1 %v4455_v30  ;;  %v1348_v29 = vand.u32 %v4511_v22, %v5808_v5  ;;  %v4494_v30 = vcombine.high %v887_v24, %v895_v25  ;;  %v4545_v24 = vld [vmem:[%s5804_s29 + $0x340] sm:$0xff]  ;;  %v4538_v25 = vld [vmem:[%s5804_s29 + $0x308] sm:$0xff] }
  0xe2   : > { %1449 = vmatprep.subr.bf16.mxu0 %v4438_v31  ;;  %1490 = vmatprep.subr.bf16.mxu1 %v4440_v33  ;;  %v4496_v31 = vcombine.high %v888_v26, %v896_v27  ;;  %v879_v33 = vld [vmem:[%s5804_s29 + $0x170] sm:$0xff] }
  0xe3   : > { %v4477_v44 = vcombine.low %v871_v32, %v879_v33 }
  0xe5   : > { %1450 = vmatpush1.bf16.msra.mxu0 %v4437_v35  ;;  %1491 = vmatpush1.bf16.msra.mxu1 %v4439_v37  ;;  %v880_v35 = vld [vmem:[%s5804_s29 + $0x178] sm:$0xff]  ;;  %v4495_v37 = vcombine.low %v888_v26, %v896_v27  ;;  %v4546_v26 = vld [vmem:[%s5804_s29 + $0x348] sm:$0xff] }
  0xe6   : > { %1523 = vmatprep.subr.bf16.mxu0 %v1333_v38  ;;  %1564 = vmatprep.subr.bf16.mxu1 %v1339_v40  ;;  %v4478_v38 = vcombine.high %v871_v32, %v879_v33  ;;  %v4480_v39 = vcombine.high %v872_v34, %v880_v35  ;;  %v855_v40 = vld [vmem:[%s5804_s29 + $0xb0] sm:$0xff]  ;;  %v4620_v32 = vcombine.high %v4538_v25, %v4546_v26  ;;  %v4522_v33 = vld [vmem:[%s5804_s29 + $0x288] sm:$0xff] }
  0xe8   : > { %4515 = vmatmul.mubr.msk.bf16.vlgmr.msra.gmra.mxu0 %vm1297_vm2, %v5845_v62  ;;  %4516 = vmatmul.mubr.msk.bf16.vlgmr.msra.gmra.mxu1 %vm1297_vm2, %v5845_v62 }
  0xe9   : > { %1524 = vmatpush1.bf16.msra.mxu0 %v1330_v45  ;;  %1565 = vmatpush1.bf16.msra.mxu1 %v1336_v46  ;;  %v4479_v45 = vcombine.low %v872_v34, %v880_v35  ;;  %v4462_v46 = vcombine.high %v855_v40, %v863_v41  ;;  %v4587_v34 = vld [vmem:[%s5804_s29 + $0x490] sm:$0xff] }
  0xea   : > { %1525 = vmatprep.subr.bf16.mxu0 %v4490_v47  ;;  %1566 = vmatprep.subr.bf16.mxu1 %v4492_v48  ;;  %v839_v47 = vld [vmem:[%s5804_s29 + $0x30] sm:$0xff] }
  0xeb   : > { %1549 = vmatprep.mubr.bf16.mxu0 %v5099_v2  ;;  %1590 = vmatprep.mubr.bf16.mxu1 %v5099_v2  ;;  %v847_v48 = vld [vmem:[%s5804_s29 + $0x70] sm:$0xff] }
  0xec   : > { %v4446_v58 = vcombine.high %v839_v47, %v847_v48  ;;  %v4595_v35 = vld [vmem:[%s5804_s29 + $0x4d0] sm:$0x33] }
  0xed   : > { %1526 = vmatpush1.bf16.msra.mxu0 %v4489_v53  ;;  %1567 = vmatpush1.bf16.msra.mxu1 %v4491_v54  ;;  %v848_v53 = vld [vmem:[%s5804_s29 + $0x78] sm:$0xff]  ;;  %v4586_v54 = vld [vmem:[%s5804_s29 + $0x488] sm:$0xff]  ;;  %v4670_v42 = vcombine.high %v4587_v34, %v4595_v35 }
  0xee   : > { %1527 = vmatprep.subr.bf16.mxu0 %v4474_v55  ;;  %1568 = vmatprep.subr.bf16.mxu1 %v4476_v56  ;;  %v4594_v55 = vld [vmem:[%s5804_s29 + $0x4c8] sm:$0x33]  ;;  %v4461_v56 = vcombine.low %v855_v40, %v863_v41  ;;  %v4448_v60 = vcombine.high %v840_v50, %v848_v53  ;;  %v4447_v1 = vcombine.low %v840_v50, %v848_v53  ;;  %v4572_v53 = vld [vmem:[%s5804_s29 + $0x418] sm:$0xff] }
  0xef   : > { %v4619_v40 = vcombine.low %v4538_v25, %v4546_v26 }
  0xf1   : > { %1528 = vmatpush1.bf16.msra.mxu0 %v4473_v61  ;;  %1569 = vmatpush1.bf16.msra.mxu1 %v4475_v63  ;;  %v4668_v61 = vcombine.high %v4586_v54, %v4594_v55  ;;  %v4445_v63 = vcombine.low %v839_v47, %v847_v48  ;;  %v2162_v48 = vand.u32 %v4670_v42, %v5808_v5  ;;  %v4557_v42 = vld [vmem:[%s5804_s29 + $0x3a0] sm:$0xff] }
  0xf2   : > { %1529 = vmatprep.subr.bf16.mxu0 %v4458_v0  ;;  %1570 = vmatprep.subr.bf16.mxu1 %v4460_v4  ;;  %v4665_v0 = vcombine.low %v4585_v51, %v4593_v52  ;;  %v4667_v4 = vcombine.low %v4586_v54, %v4594_v55  ;;  %v4571_v51 = vld [vmem:[%s5804_s29 + $0x410] sm:$0xff]  ;;  %v4580_v54 = vld [vmem:[%s5804_s29 + $0x458] sm:$0xff] }
  0xf3   : > { %v2156_v6 = vand.u32 %v4668_v61, %v5808_v5  ;;  %v4579_v52 = vld [vmem:[%s5804_s29 + $0x450] sm:$0xff]  ;;  %v4556_v61 = vld [vmem:[%s5804_s29 + $0x398] sm:$0xff] }
  0xf4   : > { %v2147_v11 = vand.u32 %v4665_v0, %v5808_v5  ;;  %v4653_v0 = vcombine.low %v4571_v51, %v4579_v52 }
  0xf5   : > { %1530 = vmatpush1.bf16.msra.mxu0 %v4457_v12  ;;  %1571 = vmatpush1.bf16.msra.mxu1 %v4459_v13  ;;  %v2153_v12 = vand.u32 %v4667_v4, %v5808_v5  ;;  %v4650_v13 = vcombine.high %v4569_v7, %v4577_v8  ;;  %v4547_v7 = vld [vmem:[%s5804_s29 + $0x350] sm:$0xff]  ;;  %v4540_v8 = vld [vmem:[%s5804_s29 + $0x318] sm:$0xff] }
  0xf6   : > { %1531 = vmatprep.subr.bf16.mxu0 %v4442_v14  ;;  %1572 = vmatprep.subr.bf16.mxu1 %v4444_v16  ;;  %v4652_v14 = vcombine.high %v4570_v9, %v4578_v10  ;;  %v4561_v16 = vld [vmem:[%s5804_s29 + $0x3c0] sm:$0xff] }
  0xf7   : > { %v4633_v27 = vcombine.low %v4553_v15, %v4561_v16 }
  0xf9   : > { %1532 = vmatpush1.bf16.msra.mxu0 %v4441_v18  ;;  %1573 = vmatpush1.bf16.msra.mxu1 %v4443_v20  ;;  %v4562_v18 = vld [vmem:[%s5804_s29 + $0x3c8] sm:$0xff]  ;;  %v4651_v20 = vcombine.low %v4570_v9, %v4578_v10  ;;  %v4548_v9 = vld [vmem:[%s5804_s29 + $0x358] sm:$0xff] }
  0xfa   : > { %1605 = vmatprep.subr.bf16.mxu0 %v1345_v21  ;;  %1646 = vmatprep.subr.bf16.mxu1 %v1351_v23  ;;  %v4634_v21 = vcombine.high %v4553_v15, %v4561_v16  ;;  %v4636_v22 = vcombine.high %v4554_v17, %v4562_v18  ;;  %v4537_v23 = vld [vmem:[%s5804_s29 + $0x300] sm:$0xff]  ;;  %v4624_v15 = vcombine.high %v4540_v8, %v4548_v9  ;;  %v4524_v16 = vld [vmem:[%s5804_s29 + $0x298] sm:$0xff] }
  0xfc   : > { %4517 = vmatmul.mubr.msk.bf16.vlgmr.msra.gmra.mxu0 %vm1297_vm2, %v5845_v62  ;;  %4518 = vmatmul.mubr.msk.bf16.vlgmr.msra.gmra.mxu1 %vm1297_vm2, %v5845_v62 }
  0xfd   : > { %1606 = vmatpush1.bf16.msra.mxu0 %v1342_v28  ;;  %1647 = vmatpush1.bf16.msra.mxu1 %v1348_v29  ;;  %v4635_v28 = vcombine.low %v4554_v17, %v4562_v18  ;;  %v4618_v29 = vcombine.high %v4537_v23, %v4545_v24  ;;  %v4589_v17 = vld [vmem:[%s5804_s29 + $0x4a0] sm:$0xff] }
  0xfe   : > { %1607 = vmatprep.subr.bf16.mxu0 %v4494_v30  ;;  %1648 = vmatprep.subr.bf16.mxu1 %v4496_v31  ;;  %v4521_v30 = vld [vmem:[%s5804_s29 + $0x280] sm:$0xff] }
  0xff   : > { %1631 = vmatprep.mubr.bf16.mxu0 %v5099_v2  ;;  %1672 = vmatprep.mubr.bf16.mxu1 %v5099_v2  ;;  %v4529_v31 = vld [vmem:[%s5804_s29 + $0x2c0] sm:$0xff] }
 0x100   : > { %v4602_v41 = vcombine.high %v4521_v30, %v4529_v31  ;;  %v4597_v18 = vld [vmem:[%s5804_s29 + $0x4e0] sm:$0x33] }
 0x101   : > { %1608 = vmatpush1.bf16.msra.mxu0 %v4493_v36  ;;  %1649 = vmatpush1.bf16.msra.mxu1 %v4495_v37  ;;  %v4530_v36 = vld [vmem:[%s5804_s29 + $0x2c8] sm:$0xff]  ;;  %v4588_v37 = vld [vmem:[%s5804_s29 + $0x498] sm:$0xff]  ;;  %v4674_v25 = vcombine.high %v4589_v17, %v4597_v18 }
 0x102   : > { %1609 = vmatprep.subr.bf16.mxu0 %v4478_v38  ;;  %1650 = vmatprep.subr.bf16.mxu1 %v4480_v39  ;;  %v4596_v38 = vld [vmem:[%s5804_s29 + $0x4d8] sm:$0x33]  ;;  %v4617_v39 = vcombine.low %v4537_v23, %v4545_v24  ;;  %v4604_v43 = vcombine.high %v4522_v33, %v4530_v36  ;;  %v4603_v47 = vcombine.low %v4522_v33, %v4530_v36  ;;  %v4574_v36 = vld [vmem:[%s5804_s29 + $0x428] sm:$0xff] }
 0x103   : > { %v4623_v23 = vcombine.low %v4540_v8, %v4548_v9 }
 0x105   : > { %1610 = vmatpush1.bf16.msra.mxu0 %v4477_v44  ;;  %1651 = vmatpush1.bf16.msra.mxu1 %v4479_v45  ;;  %v4672_v44 = vcombine.high %v4588_v37, %v4596_v38  ;;  %v4601_v45 = vcombine.low %v4521_v30, %v4529_v31  ;;  %v2174_v31 = vand.u32 %v4674_v25, %v5808_v5  ;;  %v4559_v25 = vld [vmem:[%s5804_s29 + $0x3b0] sm:$0xff] }
 0x106   : > { %1611 = vmatprep.subr.bf16.mxu0 %v4462_v46  ;;  %1652 = vmatprep.subr.bf16.mxu1 %v4464_v49  ;;  %v4669_v46 = vcombine.low %v4587_v34, %v4595_v35  ;;  %v4671_v49 = vcombine.low %v4588_v37, %v4596_v38  ;;  %v4573_v34 = vld [vmem:[%s5804_s29 + $0x420] sm:$0xff]  ;;  %v4582_v37 = vld [vmem:[%s5804_s29 + $0x468] sm:$0xff] }
 0x107   : > { %v2168_v50 = vand.u32 %v4672_v44, %v5808_v5  ;;  %v4581_v35 = vld [vmem:[%s5804_s29 + $0x460] sm:$0xff]  ;;  %v4558_v44 = vld [vmem:[%s5804_s29 + $0x3a8] sm:$0xff] }
 0x108   : > { %v2159_v55 = vand.u32 %v4669_v46, %v5808_v5  ;;  %v4657_v46 = vcombine.low %v4573_v34, %v4581_v35 }
 0x109   : > { %1612 = vmatpush1.bf16.msra.mxu0 %v4461_v56  ;;  %1653 = vmatpush1.bf16.msra.mxu1 %v4463_v57  ;;  %v2165_v56 = vand.u32 %v4671_v49, %v5808_v5  ;;  %v4654_v57 = vcombine.high %v4571_v51, %v4579_v52  ;;  %v4549_v51 = vld [vmem:[%s5804_s29 + $0x360] sm:$0xff]  ;;  %v4542_v52 = vld [vmem:[%s5804_s29 + $0x328] sm:$0xff] }
 0x10a   : > { %1613 = vmatprep.subr.bf16.mxu0 %v4446_v58  ;;  %1654 = vmatprep.subr.bf16.mxu1 %v4448_v60  ;;  %v4656_v58 = vcombine.high %v4572_v53, %v4580_v54  ;;  %v4563_v60 = vld [vmem:[%s5804_s29 + $0x3d0] sm:$0xff] }
 0x10b   : > { %v4637_v10 = vcombine.low %v4555_v59, %v4563_v60 }
 0x10d   : > { %1614 = vmatpush1.bf16.msra.mxu0 %v4445_v63  ;;  %1655 = vmatpush1.bf16.msra.mxu1 %v4447_v1  ;;  %v4564_v63 = vld [vmem:[%s5804_s29 + $0x3d8] sm:$0xff]  ;;  %v4655_v1 = vcombine.low %v4572_v53, %v4580_v54  ;;  %v4550_v53 = vld [vmem:[%s5804_s29 + $0x368] sm:$0xff] }
 0x10e   : > { %2200 = vmatprep.subr.bf16.mxu0 %v2150_v3  ;;  %2241 = vmatprep.subr.bf16.mxu1 %v2156_v6  ;;  %v4638_v3 = vcombine.high %v4555_v59, %v4563_v60  ;;  %v4640_v4 = vcombine.high %v4556_v61, %v4564_v63  ;;  %v4539_v6 = vld [vmem:[%s5804_s29 + $0x310] sm:$0xff]  ;;  %v4628_v59 = vcombine.high %v4542_v52, %v4550_v53  ;;  %v4526_v60 = vld [vmem:[%s5804_s29 + $0x2a8] sm:$0xff] }
 0x110   : > { %4519 = vmatmul.mubr.msk.bf16.vlgmr.msra.gmra.mxu0 %vm1297_vm2, %v5845_v62  ;;  %4520 = vmatmul.mubr.msk.bf16.vlgmr.msra.gmra.mxu1 %vm1297_vm2, %v5845_v62 }
 0x111   : > { %2201 = vmatpush1.bf16.msra.mxu0 %v2147_v11  ;;  %2242 = vmatpush1.bf16.msra.mxu1 %v2153_v12  ;;  %v4639_v11 = vcombine.low %v4556_v61, %v4564_v63  ;;  %v4622_v12 = vcombine.high %v4539_v6, %v4547_v7  ;;  %v4591_v61 = vld [vmem:[%s5804_s29 + $0x4b0] sm:$0xff] }
 0x112   : > { %2202 = vmatprep.subr.bf16.mxu0 %v4650_v13  ;;  %2243 = vmatprep.subr.bf16.mxu1 %v4652_v14  ;;  %v4523_v13 = vld [vmem:[%s5804_s29 + $0x290] sm:$0xff] }
 0x113   : > { %2226 = vmatprep.mubr.bf16.mxu0 %v5099_v2  ;;  %2267 = vmatprep.mubr.bf16.mxu1 %v5099_v2  ;;  %v4531_v14 = vld [vmem:[%s5804_s29 + $0x2d0] sm:$0xff] }
 0x114   : > { %v4606_v24 = vcombine.high %v4523_v13, %v4531_v14  ;;  %v4599_v63 = vld [vmem:[%s5804_s29 + $0x4f0] sm:$0x33] }
 0x115   : > { %2203 = vmatpush1.bf16.msra.mxu0 %v4649_v19  ;;  %2244 = vmatpush1.bf16.msra.mxu1 %v4651_v20  ;;  %v4532_v19 = vld [vmem:[%s5804_s29 + $0x2d8] sm:$0xff]  ;;  %v4590_v20 = vld [vmem:[%s5804_s29 + $0x4a8] sm:$0xff]  ;;  %v4678_v8 = vcombine.high %v4591_v61, %v4599_v63 }
 0x116   : > { %2204 = vmatprep.subr.bf16.mxu0 %v4634_v21  ;;  %2245 = vmatprep.subr.bf16.mxu1 %v4636_v22  ;;  %v4598_v21 = vld [vmem:[%s5804_s29 + $0x4e8] sm:$0x33]  ;;  %v4621_v22 = vcombine.low %v4539_v6, %v4547_v7  ;;  %v4608_v26 = vcombine.high %v4524_v16, %v4532_v19  ;;  %v4607_v30 = vcombine.low %v4524_v16, %v4532_v19  ;;  %v4576_v19 = vld [vmem:[%s5804_s29 + $0x438] sm:$0xff] }
 0x117   : > { %v4627_v6 = vcombine.low %v4542_v52, %v4550_v53 }
 0x119   : > { %2205 = vmatpush1.bf16.msra.mxu0 %v4633_v27  ;;  %2246 = vmatpush1.bf16.msra.mxu1 %v4635_v28  ;;  %v4676_v27 = vcombine.high %v4590_v20, %v4598_v21  ;;  %v4605_v28 = vcombine.low %v4523_v13, %v4531_v14  ;;  %v2186_v14 = vand.u32 %v4678_v8, %v5808_v5  ;;  %v4721_v8 = vld [vmem:[%s5804_s29 + $0x600] sm:$0xff] }
 0x11a   : > { %2206 = vmatprep.subr.bf16.mxu0 %v4618_v29  ;;  %2247 = vmatprep.subr.bf16.mxu1 %v4620_v32  ;;  %v4673_v29 = vcombine.low %v4589_v17, %v4597_v18  ;;  %v4675_v32 = vcombine.low %v4590_v20, %v4598_v21  ;;  %v4575_v17 = vld [vmem:[%s5804_s29 + $0x430] sm:$0xff]  ;;  %v4584_v20 = vld [vmem:[%s5804_s29 + $0x478] sm:$0xff] }
 0x11b   : > { %v2180_v33 = vand.u32 %v4676_v27, %v5808_v5  ;;  %v4583_v18 = vld [vmem:[%s5804_s29 + $0x470] sm:$0xff]  ;;  %v4560_v27 = vld [vmem:[%s5804_s29 + $0x3b8] sm:$0xff] }
 0x11c   : > { %v2171_v38 = vand.u32 %v4673_v29, %v5808_v5  ;;  %v4661_v29 = vcombine.low %v4575_v17, %v4583_v18 }
 0x11d   : > { %2207 = vmatpush1.bf16.msra.mxu0 %v4617_v39  ;;  %2248 = vmatpush1.bf16.msra.mxu1 %v4619_v40  ;;  %v2177_v39 = vand.u32 %v4675_v32, %v5808_v5  ;;  %v4658_v40 = vcombine.high %v4573_v34, %v4581_v35  ;;  %v4551_v34 = vld [vmem:[%s5804_s29 + $0x370] sm:$0xff]  ;;  %v4544_v35 = vld [vmem:[%s5804_s29 + $0x338] sm:$0xff] }
 0x11e   : > { %2208 = vmatprep.subr.bf16.mxu0 %v4602_v41  ;;  %2249 = vmatprep.subr.bf16.mxu1 %v4604_v43  ;;  %v4660_v41 = vcombine.high %v4574_v36, %v4582_v37  ;;  %v4565_v43 = vld [vmem:[%s5804_s29 + $0x3e0] sm:$0xff] }
 0x11f   : > { %v4641_v54 = vcombine.low %v4557_v42, %v4565_v43 }
 0x121   : > { %2209 = vmatpush1.bf16.msra.mxu0 %v4601_v45  ;;  %2250 = vmatpush1.bf16.msra.mxu1 %v4603_v47  ;;  %v4566_v45 = vld [vmem:[%s5804_s29 + $0x3e8] sm:$0xff]  ;;  %v4659_v47 = vcombine.low %v4574_v36, %v4582_v37  ;;  %v4552_v36 = vld [vmem:[%s5804_s29 + $0x378] sm:$0xff] }
 0x122   : > { %2282 = vmatprep.subr.bf16.mxu0 %v2162_v48  ;;  %2323 = vmatprep.subr.bf16.mxu1 %v2168_v50  ;;  %v4642_v48 = vcombine.high %v4557_v42, %v4565_v43  ;;  %v4644_v49 = vcombine.high %v4558_v44, %v4566_v45  ;;  %v4541_v50 = vld [vmem:[%s5804_s29 + $0x320] sm:$0xff]  ;;  %v4632_v42 = vcombine.high %v4544_v35, %v4552_v36  ;;  %v4528_v43 = vld [vmem:[%s5804_s29 + $0x2b8] sm:$0xff] }
 0x124   : > { %4681 = vmatmul.mubr.msk.bf16.vlgmr.msra.gmra.mxu0 %vm1297_vm2, %v5845_v62  ;;  %4682 = vmatmul.mubr.msk.bf16.vlgmr.msra.gmra.mxu1 %vm1297_vm2, %v5845_v62 }
 0x125   : > { %2283 = vmatpush1.bf16.msra.mxu0 %v2159_v55  ;;  %2324 = vmatpush1.bf16.msra.mxu1 %v2165_v56  ;;  %v4643_v55 = vcombine.low %v4558_v44, %v4566_v45  ;;  %v4626_v56 = vcombine.high %v4541_v50, %v4549_v51  ;;  %v4753_v44 = vld [vmem:[%s5804_s29 + $0x700] sm:$0xff] }
 0x126   : > { %2284 = vmatprep.subr.bf16.mxu0 %v4654_v57  ;;  %2325 = vmatprep.subr.bf16.mxu1 %v4656_v58  ;;  %v4525_v57 = vld [vmem:[%s5804_s29 + $0x2a0] sm:$0xff] }
 0x127   : > { %2308 = vmatprep.mubr.bf16.mxu0 %v5099_v2  ;;  %2349 = vmatprep.mubr.bf16.mxu1 %v5099_v2  ;;  %v4533_v58 = vld [vmem:[%s5804_s29 + $0x2e0] sm:$0xff] }
 0x128   : > { %v4610_v7 = vcombine.high %v4525_v57, %v4533_v58  ;;  %v4761_v45 = vld [vmem:[%s5804_s29 + $0x740] sm:$0x33] }
 0x129   : > { %2285 = vmatpush1.bf16.msra.mxu0 %v4653_v0  ;;  %2326 = vmatpush1.bf16.msra.mxu1 %v4655_v1  ;;  %v4534_v0 = vld [vmem:[%s5804_s29 + $0x2e8] sm:$0xff]  ;;  %v4592_v1 = vld [vmem:[%s5804_s29 + $0x4b8] sm:$0xff]  ;;  %v4834_v52 = vcombine.high %v4753_v44, %v4761_v45 }
 0x12a   : > { %2286 = vmatprep.subr.bf16.mxu0 %v4638_v3  ;;  %2327 = vmatprep.subr.bf16.mxu1 %v4640_v4  ;;  %v4600_v3 = vld [vmem:[%s5804_s29 + $0x4f8] sm:$0x33]  ;;  %v4625_v4 = vcombine.low %v4541_v50, %v4549_v51  ;;  %v4612_v9 = vcombine.high %v4526_v60, %v4534_v0  ;;  %v4611_v13 = vcombine.low %v4526_v60, %v4534_v0  ;;  %v4738_v0 = vld [vmem:[%s5804_s29 + $0x688] sm:$0xff] }
 0x12b   : > { %v4631_v50 = vcombine.low %v4544_v35, %v4552_v36 }
 0x12d   : > { %2287 = vmatpush1.bf16.msra.mxu0 %v4637_v10  ;;  %2328 = vmatpush1.bf16.msra.mxu1 %v4639_v11  ;;  %v4680_v10 = vcombine.high %v4592_v1, %v4600_v3  ;;  %v4609_v11 = vcombine.low %v4525_v57, %v4533_v58  ;;  %v3007_v58 = vand.u32 %v4834_v52, %v5808_v5  ;;  %v4731_v52 = vld [vmem:[%s5804_s29 + $0x650] sm:$0xff] }
 0x12e   : > { %2288 = vmatprep.subr.bf16.mxu0 %v4622_v12  ;;  %2329 = vmatprep.subr.bf16.mxu1 %v4624_v15  ;;  %v4677_v12 = vcombine.low %v4591_v61, %v4599_v63  ;;  %v4679_v15 = vcombine.low %v4592_v1, %v4600_v3  ;;  %v4737_v61 = vld [vmem:[%s5804_s29 + $0x680] sm:$0xff]  ;;  %v4746_v1 = vld [vmem:[%s5804_s29 + $0x6c8] sm:$0xff] }
 0x12f   : > { %v2192_v16 = vand.u32 %v4680_v10, %v5808_v5  ;;  %v4745_v63 = vld [vmem:[%s5804_s29 + $0x6c0] sm:$0xff]  ;;  %v4722_v10 = vld [vmem:[%s5804_s29 + $0x608] sm:$0xff] }
 0x130   : > { %v2183_v21 = vand.u32 %v4677_v12, %v5808_v5  ;;  %v4817_v12 = vcombine.low %v4737_v61, %v4745_v63 }
 0x131   : > { %2289 = vmatpush1.bf16.msra.mxu0 %v4621_v22  ;;  %2330 = vmatpush1.bf16.msra.mxu1 %v4623_v23  ;;  %v2189_v22 = vand.u32 %v4679_v15, %v5808_v5  ;;  %v4662_v23 = vcombine.high %v4575_v17, %v4583_v18  ;;  %v4713_v17 = vld [vmem:[%s5804_s29 + $0x5c0] sm:$0xff]  ;;  %v4706_v18 = vld [vmem:[%s5804_s29 + $0x588] sm:$0xff] }
 0x132   : > { %2290 = vmatprep.subr.bf16.mxu0 %v4606_v24  ;;  %2331 = vmatprep.subr.bf16.mxu1 %v4608_v26  ;;  %v4664_v24 = vcombine.high %v4576_v19, %v4584_v20  ;;  %v4567_v26 = vld [vmem:[%s5804_s29 + $0x3f0] sm:$0xff] }
 0x133   : > { %v4645_v37 = vcombine.low %v4559_v25, %v4567_v26 }
 0x135   : > { %2291 = vmatpush1.bf16.msra.mxu0 %v4605_v28  ;;  %2332 = vmatpush1.bf16.msra.mxu1 %v4607_v30  ;;  %v4568_v28 = vld [vmem:[%s5804_s29 + $0x3f8] sm:$0xff]  ;;  %v4663_v30 = vcombine.low %v4576_v19, %v4584_v20 }
 0x136   : > { %2364 = vmatprep.subr.bf16.mxu0 %v2174_v31  ;;  %2405 = vmatprep.subr.bf16.mxu1 %v2180_v33  ;;  %v4646_v31 = vcombine.high %v4559_v25, %v4567_v26  ;;  %v4648_v32 = vcombine.high %v4560_v27, %v4568_v28  ;;  %v4543_v33 = vld [vmem:[%s5804_s29 + $0x330] sm:$0xff]  ;;  %v4690_v25 = vld [vmem:[%s5804_s29 + $0x508] sm:$0xff] }
 0x137   : > { %v4755_v26 = vld [vmem:[%s5804_s29 + $0x710] sm:$0xff] }
 0x138   : > { %4683 = vmatmul.mubr.msk.bf16.vlgmr.msra.gmra.mxu0 %vm1297_vm2, %v5845_v62  ;;  %4684 = vmatmul.mubr.msk.bf16.vlgmr.msra.gmra.mxu1 %vm1297_vm2, %v5845_v62 }
 0x139   : > { %2365 = vmatpush1.bf16.msra.mxu0 %v2171_v38  ;;  %2406 = vmatpush1.bf16.msra.mxu1 %v2177_v39  ;;  %v4647_v38 = vcombine.low %v4560_v27, %v4568_v28  ;;  %v4630_v39 = vcombine.high %v4543_v33, %v4551_v34  ;;  %v4763_v27 = vld [vmem:[%s5804_s29 + $0x750] sm:$0x33]  ;;  %v4698_v28 = vld [vmem:[%s5804_s29 + $0x548] sm:$0xff] }
 0x13a   : > { %2366 = vmatprep.subr.bf16.mxu0 %v4658_v40  ;;  %2407 = vmatprep.subr.bf16.mxu1 %v4660_v41  ;;  %v4527_v40 = vld [vmem:[%s5804_s29 + $0x2b0] sm:$0xff]  ;;  %v4772_v35 = vcombine.high %v4690_v25, %v4698_v28 }
 0x13b   : > { %2390 = vmatprep.mubr.bf16.mxu0 %v5099_v2  ;;  %2431 = vmatprep.mubr.bf16.mxu1 %v5099_v2  ;;  %v4535_v41 = vld [vmem:[%s5804_s29 + $0x2f0] sm:$0xff] }
 0x13c   : > { %v4614_v51 = vcombine.high %v4527_v40, %v4535_v41 }
 0x13d   : > { %2367 = vmatpush1.bf16.msra.mxu0 %v4657_v46  ;;  %2408 = vmatpush1.bf16.msra.mxu1 %v4659_v47  ;;  %v4536_v46 = vld [vmem:[%s5804_s29 + $0x2f8] sm:$0xff]  ;;  %v4754_v47 = vld [vmem:[%s5804_s29 + $0x708] sm:$0xff] }
 0x13e   : > { %2368 = vmatprep.subr.bf16.mxu0 %v4642_v48  ;;  %2409 = vmatprep.subr.bf16.mxu1 %v4644_v49  ;;  %v4762_v48 = vld [vmem:[%s5804_s29 + $0x748] sm:$0x33]  ;;  %v4629_v49 = vcombine.low %v4543_v33, %v4551_v34  ;;  %v4616_v53 = vcombine.high %v4528_v43, %v4536_v46  ;;  %v4615_v57 = vcombine.low %v4528_v43, %v4536_v46  ;;  %v4739_v43 = vld [vmem:[%s5804_s29 + $0x690] sm:$0xff]  ;;  %v4748_v46 = vld [vmem:[%s5804_s29 + $0x6d8] sm:$0xff] }
 0x13f   : > { %v4838_v34 = vcombine.high %v4755_v26, %v4763_v27 }
 0x141   : > { %2369 = vmatpush1.bf16.msra.mxu0 %v4641_v54  ;;  %2410 = vmatpush1.bf16.msra.mxu1 %v4643_v55  ;;  %v4836_v54 = vcombine.high %v4754_v47, %v4762_v48  ;;  %v4613_v55 = vcombine.low %v4527_v40, %v4535_v41  ;;  %v3019_v40 = vand.u32 %v4838_v34, %v5808_v5 }
 0x142   : > { %2370 = vmatprep.subr.bf16.mxu0 %v4626_v56  ;;  %2411 = vmatprep.subr.bf16.mxu1 %v4628_v59  ;;  %v4833_v56 = vcombine.low %v4753_v44, %v4761_v45  ;;  %v4835_v59 = vcombine.low %v4754_v47, %v4762_v48  ;;  %v4747_v44 = vld [vmem:[%s5804_s29 + $0x6d0] sm:$0xff]  ;;  %v4740_v45 = vld [vmem:[%s5804_s29 + $0x698] sm:$0xff] }
 0x143   : > { %v3013_v60 = vand.u32 %v4836_v54, %v5808_v5  ;;  %v4724_v54 = vld [vmem:[%s5804_s29 + $0x618] sm:$0xff] }
 0x144   : > { %v3004_v3 = vand.u32 %v4833_v56, %v5808_v5  ;;  %v4821_v56 = vcombine.low %v4739_v43, %v4747_v44 }
 0x145   : > { %2371 = vmatpush1.bf16.msra.mxu0 %v4625_v4  ;;  %2412 = vmatpush1.bf16.msra.mxu1 %v4627_v6  ;;  %v3010_v4 = vand.u32 %v4835_v59, %v5808_v5  ;;  %v4818_v6 = vcombine.high %v4737_v61, %v4745_v63  ;;  %v4715_v61 = vld [vmem:[%s5804_s29 + $0x5d0] sm:$0xff]  ;;  %v4708_v63 = vld [vmem:[%s5804_s29 + $0x598] sm:$0xff] }
 0x146   : > { %2372 = vmatprep.subr.bf16.mxu0 %v4610_v7  ;;  %2413 = vmatprep.subr.bf16.mxu1 %v4612_v9  ;;  %v4820_v7 = vcombine.high %v4738_v0, %v4746_v1  ;;  %v4729_v9 = vld [vmem:[%s5804_s29 + $0x640] sm:$0xff] }
 0x147   : > { %v4801_v19 = vcombine.low %v4721_v8, %v4729_v9 }
 0x149   : > { %2373 = vmatpush1.bf16.msra.mxu0 %v4609_v11  ;;  %2414 = vmatpush1.bf16.msra.mxu1 %v4611_v13  ;;  %v4730_v11 = vld [vmem:[%s5804_s29 + $0x648] sm:$0xff]  ;;  %v4819_v13 = vcombine.low %v4738_v0, %v4746_v1  ;;  %v4716_v0 = vld [vmem:[%s5804_s29 + $0x5d8] sm:$0xff] }
 0x14a   : > { %2446 = vmatprep.subr.bf16.mxu0 %v2186_v14  ;;  %2487 = vmatprep.subr.bf16.mxu1 %v2192_v16  ;;  %v4802_v14 = vcombine.high %v4721_v8, %v4729_v9  ;;  %v4804_v15 = vcombine.high %v4722_v10, %v4730_v11  ;;  %v4705_v16 = vld [vmem:[%s5804_s29 + $0x580] sm:$0xff]  ;;  %v4803_v20 = vcombine.low %v4722_v10, %v4730_v11  ;;  %v4692_v9 = vld [vmem:[%s5804_s29 + $0x518] sm:$0xff] }
 0x14b   : > { %v4792_v8 = vcombine.high %v4708_v63, %v4716_v0  ;;  %v4757_v10 = vld [vmem:[%s5804_s29 + $0x720] sm:$0xff] }
 0x14c   : > { %4685 = vmatmul.mubr.msk.bf16.vlgmr.msra.gmra.mxu0 %vm1297_vm2, %v5845_v62  ;;  %4686 = vmatmul.mubr.msk.bf16.vlgmr.msra.gmra.mxu1 %vm1297_vm2, %v5845_v62  ;;  %v4765_v11 = vld [vmem:[%s5804_s29 + $0x760] sm:$0x33] }
 0x14d   : > { %2447 = vmatpush1.bf16.msra.mxu0 %v2183_v21  ;;  %2488 = vmatpush1.bf16.msra.mxu1 %v2189_v22  ;;  %v4786_v21 = vcombine.high %v4705_v16, %v4713_v17  ;;  %v4689_v22 = vld [vmem:[%s5804_s29 + $0x500] sm:$0xff] }
 0x14e   : > { %2448 = vmatprep.subr.bf16.mxu0 %v4662_v23  ;;  %2489 = vmatprep.subr.bf16.mxu1 %v4664_v24  ;;  %v4697_v23 = vld [vmem:[%s5804_s29 + $0x540] sm:$0xff] }
 0x14f   : > { %2472 = vmatprep.mubr.bf16.mxu0 %v5099_v2  ;;  %2513 = vmatprep.mubr.bf16.mxu1 %v5099_v2  ;;  %v4770_v33 = vcombine.high %v4689_v22, %v4697_v23 }
 0x151   : > { %2449 = vmatpush1.bf16.msra.mxu0 %v4661_v29  ;;  %2490 = vmatpush1.bf16.msra.mxu1 %v4663_v30  ;;  %v4756_v29 = vld [vmem:[%s5804_s29 + $0x718] sm:$0xff] }
 0x152   : > { %2450 = vmatprep.subr.bf16.mxu0 %v4646_v31  ;;  %2491 = vmatprep.subr.bf16.mxu1 %v4648_v32  ;;  %v4764_v30 = vld [vmem:[%s5804_s29 + $0x758] sm:$0x33]  ;;  %v4785_v31 = vcombine.low %v4705_v16, %v4713_v17  ;;  %v4791_v16 = vcombine.low %v4708_v63, %v4716_v0 }
 0x153   : > { %v4840_v36 = vcombine.high %v4756_v29, %v4764_v30  ;;  %v4839_v41 = vcombine.low %v4756_v29, %v4764_v30  ;;  %v4742_v29 = vld [vmem:[%s5804_s29 + $0x6a8] sm:$0xff] }
 0x154   : > { %v4750_v30 = vld [vmem:[%s5804_s29 + $0x6e8] sm:$0xff] }
 0x155   : > { %2451 = vmatpush1.bf16.msra.mxu0 %v4645_v37  ;;  %2492 = vmatpush1.bf16.msra.mxu1 %v4647_v38  ;;  %v4769_v37 = vcombine.low %v4689_v22, %v4697_v23  ;;  %v4837_v38 = vcombine.low %v4755_v26, %v4763_v27  ;;  %v3022_v48 = vand.u32 %v4839_v41, %v5808_v5  ;;  %v4252_v22 = vld [vmem:[%s6461_s2] sm:$0xff] }
 0x156   : > { %2452 = vmatprep.subr.bf16.mxu0 %v4630_v39  ;;  %2493 = vmatprep.subr.bf16.mxu1 %v4632_v42  ;;  %v4771_v39 = vcombine.low %v4690_v25, %v4698_v28  ;;  %v3025_v42 = vand.u32 %v4840_v36, %v5808_v5  ;;  %v4741_v27 = vld [vmem:[%s5804_s29 + $0x6a0] sm:$0xff]  ;;  %v4828_v34 = vcombine.high %v4742_v29, %v4750_v30 }
 0x157   : > { %v3016_v47 = vand.u32 %v4837_v38, %v5808_v5  ;;  %v4749_v28 = vld [vmem:[%s5804_s29 + $0x6e0] sm:$0xff]  ;;  %4255 = vperm.xlu0 %5072, %v4252_v22   ;;  %v4734_v38 = vld [vmem:[%s5804_s29 + $0x668] sm:$0xff] }
 0x158   : > { %v4733_v36 = vld [vmem:[%s5804_s29 + $0x660] sm:$0xff] }
 0x159   : > { %2453 = vmatpush1.bf16.msra.mxu0 %v4629_v49  ;;  %2494 = vmatpush1.bf16.msra.mxu1 %v4631_v50  ;;  %v4822_v49 = vcombine.high %v4739_v43, %v4747_v44  ;;  %v4824_v50 = vcombine.high %v4740_v45, %v4748_v46  ;;  %v4709_v43 = vld [vmem:[%s5804_s29 + $0x5a0] sm:$0xff] }
 0x15a   : > { %2454 = vmatprep.subr.bf16.mxu0 %v4614_v51  ;;  %2495 = vmatprep.subr.bf16.mxu1 %v4616_v53  ;;  %v4723_v51 = vld [vmem:[%s5804_s29 + $0x610] sm:$0xff]  ;;  %v6094_v53 = vld [vmem:[%s6460_s1] sm:$0xf] }
 0x15b   : > { %v4805_v1 = vcombine.low %v4723_v51, %v4731_v52  ;;  %v4717_v44 = vld [vmem:[%s5804_s29 + $0x5e0] sm:$0xff] }
 0x15d   : > { %2455 = vmatpush1.bf16.msra.mxu0 %v4613_v55  ;;  %2496 = vmatpush1.bf16.msra.mxu1 %v4615_v57  ;;  %v4732_v55 = vld [vmem:[%s5804_s29 + $0x658] sm:$0xff]  ;;  %v4823_v57 = vcombine.low %v4740_v45, %v4748_v46  ;;  %v4710_v45 = vld [vmem:[%s5804_s29 + $0x5a8] sm:$0xff] }
 0x15e   : > { %3057 = vmatprep.subr.bf16.mxu0 %v3007_v58  ;;  %3098 = vmatprep.subr.bf16.mxu1 %v3013_v60  ;;  %v4806_v58 = vcombine.high %v4723_v51, %v4731_v52  ;;  %v4808_v59 = vcombine.high %v4724_v54, %v4732_v55  ;;  %v4707_v60 = vld [vmem:[%s5804_s29 + $0x590] sm:$0xff]  ;;  %v4718_v46 = vld [vmem:[%s5804_s29 + $0x5e8] sm:$0xff]  ;;  %v4701_v51 = vld [vmem:[%s5804_s29 + $0x560] sm:$0xff] }
 0x15f   : > { %v4796_v52 = vcombine.high %v4710_v45, %v4718_v46 }
 0x160   : > { %4687 = vmatmul.mubr.msk.bf16.vlgmr.msra.gmra.mxu0 %vm1297_vm2, %v5845_v62  ;;  %4688 = vmatmul.mubr.msk.bf16.vlgmr.msra.gmra.mxu1 %vm1297_vm2, %v5845_v62  ;;  %v4714_v62 = vld [vmem:[%s5804_s29 + $0x5c8] sm:$0xff] }
 0x161   : > { %3058 = vmatpush1.bf16.msra.mxu0 %v3004_v3  ;;  %3099 = vmatpush1.bf16.msra.mxu1 %v3010_v4  ;;  %v4788_v24 = vcombine.high %v4706_v18, %v4714_v62  ;;  %v4787_v32 = vcombine.low %v4706_v18, %v4714_v62  ;;  %v4807_v3 = vcombine.low %v4724_v54, %v4732_v55  ;;  %v4694_v54 = vld [vmem:[%s5804_s29 + $0x528] sm:$0xff]  ;;  %v4759_v55 = vld [vmem:[%s5804_s29 + $0x730] sm:$0xff] }
 0x162   : > { %3059 = vmatprep.subr.bf16.mxu0 %v4818_v6  ;;  %3100 = vmatprep.subr.bf16.mxu1 %v4820_v7  ;;  %v4790_v4 = vcombine.high %v4707_v60, %v4715_v61  ;;  %v4691_v6 = vld [vmem:[%s5804_s29 + $0x510] sm:$0xff]  ;;  %v4842_v18 = vcombine.high %v4757_v10, %v4765_v11 }
 0x163   : > { %3083 = vmatprep.mubr.bf16.mxu0 %v5099_v2  ;;  %3124 = vmatprep.mubr.bf16.mxu1 %v5099_v2  ;;  %v4699_v7 = vld [vmem:[%s5804_s29 + $0x550] sm:$0xff] }
 0x164   : > { %v4774_v17 = vcombine.high %v4691_v6, %v4699_v7 }
 0x165   : > { %3060 = vmatpush1.bf16.msra.mxu0 %v4817_v12  ;;  %3101 = vmatpush1.bf16.msra.mxu1 %v4819_v13  ;;  %v4700_v12 = vld [vmem:[%s5804_s29 + $0x558] sm:$0xff]  ;;  %v4758_v13 = vld [vmem:[%s5804_s29 + $0x728] sm:$0xff] }
 0x166   : > { %3061 = vmatprep.subr.bf16.mxu0 %v4802_v14  ;;  %3102 = vmatprep.subr.bf16.mxu1 %v4804_v15  ;;  %v4766_v14 = vld [vmem:[%s5804_s29 + $0x768] sm:$0x33]  ;;  %v4789_v15 = vcombine.low %v4707_v60, %v4715_v61  ;;  %v4776_v62 = vcombine.high %v4692_v9, %v4700_v12  ;;  %v4775_v23 = vcombine.low %v4692_v9, %v4700_v12 }
 0x167   : > { %v4843_v25 = vcombine.low %v4758_v13, %v4766_v14  ;;  %v4793_v60 = vcombine.low %v4709_v43, %v4717_v44  ;;  %v4795_v61 = vcombine.low %v4710_v45, %v4718_v46  ;;  %v4921_v45 = vld [vmem:[%s5804_s29 + $0x980] sm:$0xff] }
 0x168   : > { %v4929_v46 = vld [vmem:[%s5804_s29 + $0x9c0] sm:$0x33] }
 0x169   : > { %3062 = vmatpush1.bf16.msra.mxu0 %v4801_v19  ;;  %3103 = vmatpush1.bf16.msra.mxu1 %v4803_v20  ;;  %v4844_v19 = vcombine.high %v4758_v13, %v4766_v14  ;;  %v4773_v20 = vcombine.low %v4691_v6, %v4699_v7 }
 0x16a   : > { %3063 = vmatprep.subr.bf16.mxu0 %v4786_v21  ;;  %3104 = vmatprep.subr.bf16.mxu1 %v4788_v24  ;;  %v4841_v21 = vcombine.low %v4757_v10, %v4765_v11  ;;  %v3031_v24 = vand.u32 %v4842_v18, %v5808_v5  ;;  %v4744_v18 = vld [vmem:[%s5804_s29 + $0x6b8] sm:$0xff] }
 0x16b   : > { %v3037_v26 = vand.u32 %v4844_v19, %v5808_v5 }
 0x16d   : > { %3064 = vmatpush1.bf16.msra.mxu0 %v4785_v31  ;;  %3105 = vmatpush1.bf16.msra.mxu1 %v4787_v32  ;;  %v3028_v31 = vand.u32 %v4841_v21, %v5808_v5  ;;  %v3034_v32 = vand.u32 %v4843_v25, %v5808_v5 }
 0x16e   : > { %3065 = vmatprep.subr.bf16.mxu0 %v4770_v33  ;;  %3106 = vmatprep.subr.bf16.mxu1 %v4772_v35  ;;  %v4826_v33 = vcombine.high %v4741_v27, %v4749_v28  ;;  %v4725_v35 = vld [vmem:[%s5804_s29 + $0x620] sm:$0xff] }
 0x16f   : > { %v4810_v41 = vcombine.high %v4725_v35, %v4733_v36 }
 0x171   : > { %3066 = vmatpush1.bf16.msra.mxu0 %v4769_v37  ;;  %3107 = vmatpush1.bf16.msra.mxu1 %v4771_v39  ;;  %v4726_v37 = vld [vmem:[%s5804_s29 + $0x628] sm:$0xff]  ;;  %v4825_v39 = vcombine.low %v4741_v27, %v4749_v28  ;;  %v4735_v27 = vld [vmem:[%s5804_s29 + $0x670] sm:$0xff]  ;;  %v4728_v28 = vld [vmem:[%s5804_s29 + $0x638] sm:$0xff] }
 0x172   : > { %3139 = vmatprep.subr.bf16.mxu0 %v3019_v40  ;;  %3180 = vmatprep.subr.bf16.mxu1 %v3025_v42  ;;  %v4827_v40 = vcombine.low %v4742_v29, %v4750_v30  ;;  %v4812_v42 = vcombine.high %v4726_v37, %v4734_v38  ;;  %v4736_v29 = vld [vmem:[%s5804_s29 + $0x678] sm:$0xff] }
 0x174   : > { %4849 = vmatmul.mubr.msk.bf16.vlgmr.msra.gmra.mxu0 %vm1297_vm2, %v6094_v53  ;;  %4850 = vmatmul.mubr.msk.bf16.vlgmr.msra.gmra.mxu1 %vm1297_vm2, %v6094_v53 }
 0x175   : > { %3140 = vmatpush1.bf16.msra.mxu0 %v3016_v47  ;;  %3181 = vmatpush1.bf16.msra.mxu1 %v3022_v48  ;;  %v4809_v47 = vcombine.low %v4725_v35, %v4733_v36  ;;  %v4811_v48 = vcombine.low %v4726_v37, %v4734_v38  ;;  %v4719_v35 = vld [vmem:[%s5804_s29 + $0x5f0] sm:$0xff]  ;;  %v4712_v36 = vld [vmem:[%s5804_s29 + $0x5b8] sm:$0xff] }
 0x176   : > { %3141 = vmatprep.subr.bf16.mxu0 %v4822_v49  ;;  %3182 = vmatprep.subr.bf16.mxu1 %v4824_v50  ;;  %v4794_v49 = vcombine.high %v4709_v43, %v4717_v44  ;;  %v4693_v50 = vld [vmem:[%s5804_s29 + $0x520] sm:$0xff]  ;;  %v4720_v37 = vld [vmem:[%s5804_s29 + $0x5f8] sm:$0xff] }
 0x177   : > { %3165 = vmatprep.mubr.bf16.mxu0 %v5099_v2  ;;  %3206 = vmatprep.mubr.bf16.mxu1 %v5099_v2  ;;  %v4778_v63 = vcombine.high %v4693_v50, %v4701_v51  ;;  %v4777_v7 = vcombine.low %v4693_v50, %v4701_v51  ;;  %v4800_v43 = vcombine.high %v4712_v36, %v4720_v37  ;;  %v4696_v44 = vld [vmem:[%s5804_s29 + $0x538] sm:$0xff] }
 0x178   : > { %v4799_v51 = vcombine.low %v4712_v36, %v4720_v37  ;;  %v4857_v36 = vld [vmem:[%s5804_s29 + $0x780] sm:$0xff] }
 0x179   : > { %3142 = vmatpush1.bf16.msra.mxu0 %v4821_v56  ;;  %3183 = vmatpush1.bf16.msra.mxu1 %v4823_v57  ;;  %v4767_v56 = vld [vmem:[%s5804_s29 + $0x770] sm:$0x33]  ;;  %v4702_v57 = vld [vmem:[%s5804_s29 + $0x568] sm:$0xff]  ;;  %v4865_v37 = vld [vmem:[%s5804_s29 + $0x7c0] sm:$0xff] }
 0x17a   : > { %3143 = vmatprep.subr.bf16.mxu0 %v4806_v58  ;;  %3184 = vmatprep.subr.bf16.mxu1 %v4808_v59  ;;  %v4760_v58 = vld [vmem:[%s5804_s29 + $0x738] sm:$0xff]  ;;  %v4846_v0 = vcombine.high %v4759_v55, %v4767_v56  ;;  %v4779_v10 = vcombine.low %v4694_v54, %v4702_v57 }
 0x17b   : > { %v4768_v59 = vld [vmem:[%s5804_s29 + $0x778] sm:$0x33] }
 0x17c   : > { %v3043_v11 = vand.u32 %v4846_v0, %v5808_v5  ;;  %v4847_v12 = vcombine.low %v4760_v58, %v4768_v59 }
 0x17d   : > { %3144 = vmatpush1.bf16.msra.mxu0 %v4805_v1  ;;  %3185 = vmatpush1.bf16.msra.mxu1 %v4807_v3  ;;  %v4780_v1 = vcombine.high %v4694_v54, %v4702_v57  ;;  %v4848_v3 = vcombine.high %v4760_v58, %v4768_v59  ;;  %v5002_v54 = vcombine.high %v4921_v45, %v4929_v46 }
 0x17e   : > { %3145 = vmatprep.subr.bf16.mxu0 %v4790_v4  ;;  %3186 = vmatprep.subr.bf16.mxu1 %v4792_v8  ;;  %v4845_v8 = vcombine.low %v4759_v55, %v4767_v56  ;;  %v3046_v22 = vand.u32 %v4847_v12, %v5808_v5  ;;  %v4906_v12 = vld [vmem:[%s5804_s29 + $0x908] sm:$0xff] }
 0x17f   : > { %v3049_v14 = vand.u32 %v4848_v3, %v5808_v5  ;;  %v3864_v0 = vand.u32 %v5002_v54, %v5808_v5  ;;  %v4937_v54 = vcombine.low %v4857_v36, %v4865_v37 }
 0x181   : > { %3146 = vmatpush1.bf16.msra.mxu0 %v4789_v15  ;;  %3187 = vmatpush1.bf16.msra.mxu1 %v4791_v16  ;;  %v4743_v15 = vld [vmem:[%s5804_s29 + $0x6b0] sm:$0xff] }
 0x182   : > { %3147 = vmatprep.subr.bf16.mxu0 %v4774_v17  ;;  %3188 = vmatprep.subr.bf16.mxu1 %v4776_v62  ;;  %v4751_v16 = vld [vmem:[%s5804_s29 + $0x6f0] sm:$0xff]  ;;  %v4752_v62 = vld [vmem:[%s5804_s29 + $0x6f8] sm:$0xff] }
 0x183   : > { %v4832_v25 = vcombine.high %v4744_v18, %v4752_v62  ;;  %v4829_v30 = vcombine.low %v4743_v15, %v4751_v16 }
 0x185   : > { %3148 = vmatpush1.bf16.msra.mxu0 %v4773_v20  ;;  %3189 = vmatpush1.bf16.msra.mxu1 %v4775_v23  ;;  %v3040_v20 = vand.u32 %v4845_v8, %v5808_v5  ;;  %v4830_v23 = vcombine.high %v4743_v15, %v4751_v16  ;;  %v4905_v8 = vld [vmem:[%s5804_s29 + $0x900] sm:$0xff] }
 0x186   : > { %3221 = vmatprep.subr.bf16.mxu0 %v3031_v24  ;;  %3262 = vmatprep.subr.bf16.mxu1 %v3037_v26  ;;  %v4727_v26 = vld [vmem:[%s5804_s29 + $0x630] sm:$0xff] }
 0x187   : > { %v4813_v38 = vcombine.low %v4727_v26, %v4735_v27 }
 0x188   : > { %4851 = vmatmul.mubr.msk.bf16.vlgmr.msra.gmra.mxu0 %vm1297_vm2, %v6094_v53  ;;  %4852 = vmatmul.mubr.msk.bf16.vlgmr.msra.gmra.mxu1 %vm1297_vm2, %v6094_v53 }
 0x189   : > { %3222 = vmatpush1.bf16.msra.mxu0 %v3028_v31  ;;  %3263 = vmatpush1.bf16.msra.mxu1 %v3034_v32  ;;  %v4831_v31 = vcombine.low %v4744_v18, %v4752_v62  ;;  %v4814_v32 = vcombine.high %v4727_v26, %v4735_v27 }
 0x18a   : > { %3223 = vmatprep.subr.bf16.mxu0 %v4826_v33  ;;  %3264 = vmatprep.subr.bf16.mxu1 %v4828_v34  ;;  %v4816_v33 = vcombine.high %v4728_v28, %v4736_v29  ;;  %v4711_v34 = vld [vmem:[%s5804_s29 + $0x5b0] sm:$0xff] }
 0x18b   : > { %3247 = vmatprep.mubr.bf16.mxu0 %v5099_v2  ;;  %3288 = vmatprep.mubr.bf16.mxu1 %v5099_v2  ;;  %v4797_v50 = vcombine.low %v4711_v34, %v4719_v35 }
 0x18d   : > { %3224 = vmatpush1.bf16.msra.mxu0 %v4825_v39  ;;  %3265 = vmatpush1.bf16.msra.mxu1 %v4827_v40  ;;  %v4815_v39 = vcombine.low %v4728_v28, %v4736_v29  ;;  %v4798_v40 = vcombine.high %v4711_v34, %v4719_v35  ;;  %v4873_v29 = vld [vmem:[%s5804_s29 + $0x800] sm:$0xff] }
 0x18e   : > { %3225 = vmatprep.subr.bf16.mxu0 %v4810_v41  ;;  %3266 = vmatprep.subr.bf16.mxu1 %v4812_v42  ;;  %v4695_v41 = vld [vmem:[%s5804_s29 + $0x530] sm:$0xff] }
 0x18f   : > { %v4703_v42 = vld [vmem:[%s5804_s29 + $0x570] sm:$0xff] }
 0x190   : > { %v4781_v59 = vcombine.low %v4695_v41, %v4703_v42 }
 0x191   : > { %3226 = vmatpush1.bf16.msra.mxu0 %v4809_v47  ;;  %3267 = vmatpush1.bf16.msra.mxu1 %v4811_v48  ;;  %v4704_v47 = vld [vmem:[%s5804_s29 + $0x578] sm:$0xff]  ;;  %v4922_v48 = vld [vmem:[%s5804_s29 + $0x988] sm:$0xff] }
 0x192   : > { %3227 = vmatprep.subr.bf16.mxu0 %v4794_v49  ;;  %3268 = vmatprep.subr.bf16.mxu1 %v4796_v52  ;;  %v4930_v49 = vld [vmem:[%s5804_s29 + $0x9c8] sm:$0x33]  ;;  %v4782_v52 = vcombine.high %v4695_v41, %v4703_v42  ;;  %v4784_v55 = vcombine.high %v4696_v44, %v4704_v47  ;;  %v4931_v41 = vld [vmem:[%s5804_s29 + $0x9d0] sm:$0x33] }
 0x193   : > { %v5004_v56 = vcombine.high %v4922_v48, %v4930_v49  ;;  %v4866_v42 = vld [vmem:[%s5804_s29 + $0x7c8] sm:$0xff] }
 0x194   : > { %v6149_v4 = vpop.f32.mrf.mxu0  ;;  %v6151_v6 = vpop.f32.mrf.mxu1 }
 0x195   : > { %3228 = vmatpush1.bf16.msra.mxu0 %v4793_v60  ;;  %3269 = vmatpush1.bf16.msra.mxu1 %v4795_v61  ;;  %v5001_v60 = vcombine.low %v4921_v45, %v4929_v46 }
 0x196   : > { %v6153_v9 = vpop.f32.mrf.mxu0  ;;  %3229 = vmatprep.subr.bf16.mxu0 %v4778_v63  ;;  %v6156_v13 = vpop.f32.mrf.mxu1  ;;  %3270 = vmatprep.subr.bf16.mxu1 %v4780_v1  ;;  %v4783_v63 = vcombine.low %v4696_v44, %v4704_v47  ;;  %v5003_v1 = vcombine.low %v4922_v48, %v4930_v49  ;;  %v4932_v44 = vld [vmem:[%s5804_s29 + $0x9d8] sm:$0x33]  ;;  %v4938_v47 = vcombine.high %v4857_v36, %v4865_v37  ;;  %v4867_v36 = vld [vmem:[%s5804_s29 + $0x7d0] sm:$0xff] }
 0x197   : > { %v3861_v16 = vand.u32 %v5001_v60, %v5808_v5 }
 0x198   : > { %v1391_v17 = vpop.f32.mrf.mxu0  ;;  %v1432_v19 = vpop.f32.mrf.mxu1  ;;  %v3867_v18 = vand.u32 %v5003_v1, %v5808_v5 }
 0x199   : > { %3230 = vmatpush1.bf16.msra.mxu0 %v4777_v7  ;;  %3271 = vmatpush1.bf16.msra.mxu1 %v4779_v10  ;;  %v3870_v7 = vand.u32 %v5004_v56, %v5808_v5  ;;  %v4913_v10 = vld [vmem:[%s5804_s29 + $0x940] sm:$0xff] }
 0x19a   : > { %v1392_v21 = vpop.f32.mrf.mxu0  ;;  %3303 = vmatprep.subr.bf16.mxu0 %v3043_v11  ;;  %v1433_v24 = vpop.f32.mrf.mxu1  ;;  %3344 = vmatprep.subr.bf16.mxu1 %v3049_v14  ;;  %v4914_v14 = vld [vmem:[%s5804_s29 + $0x948] sm:$0xff]  ;;  %v4986_v62 = vcombine.high %v4905_v8, %v4913_v10 }
 0x19b   : > { %v4889_v21 = vld [vmem:[%s5804_s29 + $0x880] sm:$0xff]  ;;  %v4898_v24 = vld [vmem:[%s5804_s29 + $0x8c8] sm:$0xff]  ;;  %v4987_v26 = vcombine.low %v4906_v12, %v4914_v14 }
 0x19c   : > { %4853 = vmatmul.mubr.msk.bf16.vlgmr.msra.gmra.mxu0 %vm1297_vm2, %v6094_v53  ;;  %4854 = vmatmul.mubr.msk.bf16.vlgmr.msra.gmra.mxu1 %vm1297_vm2, %v6094_v53 }
 0x19d   : > { %3304 = vmatpush1.bf16.msra.mxu0 %v3040_v20  ;;  %3345 = vmatpush1.bf16.msra.mxu1 %v3046_v22  ;;  %v4988_v20 = vcombine.high %v4906_v12, %v4914_v14  ;;  %v4897_v22 = vld [vmem:[%s5804_s29 + $0x8c0] sm:$0xff]  ;;  %v4916_v12 = vld [vmem:[%s5804_s29 + $0x958] sm:$0xff] }
 0x19e   : > { %3305 = vmatprep.subr.bf16.mxu0 %v4830_v23  ;;  %3346 = vmatprep.subr.bf16.mxu1 %v4832_v25  ;;  %v4890_v23 = vld [vmem:[%s5804_s29 + $0x888] sm:$0xff]  ;;  %v4985_v25 = vcombine.low %v4905_v8, %v4913_v10  ;;  %v4970_v27 = vcombine.high %v4889_v21, %v4897_v22  ;;  %v4915_v8 = vld [vmem:[%s5804_s29 + $0x950] sm:$0xff] }
 0x19f   : > { %3329 = vmatprep.mubr.bf16.mxu0 %v5099_v2  ;;  %3370 = vmatprep.mubr.bf16.mxu1 %v5099_v2  ;;  %v4972_v28 = vcombine.high %v4890_v23, %v4898_v24  ;;  %v4971_v34 = vcombine.low %v4890_v23, %v4898_v24  ;;  %v4900_v23 = vld [vmem:[%s5804_s29 + $0x8d8] sm:$0xff] }
 0x1a1   : > { %3306 = vmatpush1.bf16.msra.mxu0 %v4829_v30  ;;  %3347 = vmatpush1.bf16.msra.mxu1 %v4831_v31  ;;  %v4881_v30 = vld [vmem:[%s5804_s29 + $0x840] sm:$0xff]  ;;  %v4874_v31 = vld [vmem:[%s5804_s29 + $0x808] sm:$0xff] }
 0x1a2   : > { %3307 = vmatprep.subr.bf16.mxu0 %v4814_v32  ;;  %3348 = vmatprep.subr.bf16.mxu1 %v4816_v33  ;;  %v4882_v32 = vld [vmem:[%s5804_s29 + $0x848] sm:$0xff]  ;;  %v4969_v33 = vcombine.low %v4889_v21, %v4897_v22  ;;  %v4954_v35 = vcombine.high %v4873_v29, %v4881_v30  ;;  %v4953_v45 = vcombine.low %v4873_v29, %v4881_v30  ;;  %v4899_v21 = vld [vmem:[%s5804_s29 + $0x8d0] sm:$0xff]  ;;  %v4892_v22 = vld [vmem:[%s5804_s29 + $0x898] sm:$0xff] }
 0x1a3   : > { %v4955_v46 = vcombine.low %v4874_v31, %v4882_v32  ;;  %v4883_v29 = vld [vmem:[%s5804_s29 + $0x850] sm:$0xff]  ;;  %v4876_v30 = vld [vmem:[%s5804_s29 + $0x818] sm:$0xff] }
 0x1a5   : > { %3308 = vmatpush1.bf16.msra.mxu0 %v4813_v38  ;;  %3349 = vmatpush1.bf16.msra.mxu1 %v4815_v39  ;;  %v4956_v38 = vcombine.high %v4874_v31, %v4882_v32  ;;  %v4858_v39 = vld [vmem:[%s5804_s29 + $0x788] sm:$0xff]  ;;  %v4884_v31 = vld [vmem:[%s5804_s29 + $0x858] sm:$0xff] }
 0x1a6   : > { %3309 = vmatprep.subr.bf16.mxu0 %v4798_v40  ;;  %3350 = vmatprep.subr.bf16.mxu1 %v4800_v43  ;;  %v4923_v40 = vld [vmem:[%s5804_s29 + $0x990] sm:$0xff]  ;;  %v4924_v43 = vld [vmem:[%s5804_s29 + $0x998] sm:$0xff]  ;;  %v4940_v49 = vcombine.high %v4858_v39, %v4866_v42  ;;  %v4960_v37 = vcombine.high %v4876_v30, %v4884_v31 }
 0x1a7   : > { %v5006_v48 = vcombine.high %v4923_v40, %v4931_v41 }
 0x1a8   : > { %v6187_v57 = vpop.f32.mrf.mxu0  ;;  %v6189_v58 = vpop.f32.mrf.mxu1 }
 0x1a9   : > { %3310 = vmatpush1.bf16.msra.mxu0 %v4797_v50  ;;  %3351 = vmatpush1.bf16.msra.mxu1 %v4799_v51  ;;  %v5008_v50 = vcombine.high %v4924_v43, %v4932_v44  ;;  %v3876_v60 = vand.u32 %v5006_v48, %v5808_v5 }
 0x1aa   : > { %v6191_v61 = vpop.f32.mrf.mxu0  ;;  %3311 = vmatprep.subr.bf16.mxu0 %v4782_v52  ;;  %v6194_v3 = vpop.f32.mrf.mxu1  ;;  %3352 = vmatprep.subr.bf16.mxu1 %v4784_v55  ;;  %v5005_v55 = vcombine.low %v4923_v40, %v4931_v41  ;;  %v4933_v40 = vld [vmem:[%s5804_s29 + $0x9e0] sm:$0x33]  ;;  %v4868_v41 = vld [vmem:[%s5804_s29 + $0x7d8] sm:$0xff] }
 0x1ab   : > { %v3882_v1 = vand.u32 %v5008_v50, %v5808_v5 }
 0x1ac   : > { %v1473_v11 = vpop.f32.mrf.mxu0  ;;  %v1514_v15 = vpop.f32.mrf.mxu1 }
 0x1ad   : > { %3312 = vmatpush1.bf16.msra.mxu0 %v4781_v59  ;;  %3353 = vmatpush1.bf16.msra.mxu1 %v4783_v63  ;;  %v4939_v59 = vcombine.low %v4858_v39, %v4866_v42  ;;  %v5007_v63 = vcombine.low %v4924_v43, %v4932_v44  ;;  %v4908_v11 = vld [vmem:[%s5804_s29 + $0x918] sm:$0xff]  ;;  %v3873_v15 = vand.u32 %v5005_v55, %v5808_v5  ;;  %v4925_v39 = vld [vmem:[%s5804_s29 + $0x9a0] sm:$0xff]  ;;  %v4926_v42 = vld [vmem:[%s5804_s29 + $0x9a8] sm:$0xff] }
 0x1ae   : > { %v1474_v17 = vpop.f32.mrf.mxu0  ;;  %3914 = vmatprep.subr.bf16.mxu0 %v3864_v0  ;;  %v1515_v19 = vpop.f32.mrf.mxu1  ;;  %3955 = vmatprep.subr.bf16.mxu1 %v3870_v7  ;;  %v4907_v7 = vld [vmem:[%s5804_s29 + $0x910] sm:$0xff]  ;;  %v4934_v43 = vld [vmem:[%s5804_s29 + $0x9e8] sm:$0x33] }
 0x1af   : > { %v3879_v17 = vand.u32 %v5007_v63, %v5808_v5  ;;  %v4992_v19 = vcombine.high %v4908_v11, %v4916_v12  ;;  %v4989_v24 = vcombine.low %v4907_v7, %v4915_v8 }
 0x1b0   : > { %4855 = vmatmul.mubr.msk.bf16.vlgmr.msra.gmra.mxu0 %vm1297_vm2, %v6094_v53  ;;  %4856 = vmatmul.mubr.msk.bf16.vlgmr.msra.gmra.mxu1 %vm1297_vm2, %v6094_v53 }
 0x1b1   : > { %3915 = vmatpush1.bf16.msra.mxu0 %v3861_v16  ;;  %3956 = vmatpush1.bf16.msra.mxu1 %v3867_v18  ;;  %v4990_v18 = vcombine.high %v4907_v7, %v4915_v8  ;;  %v5011_v7 = vcombine.low %v4926_v42, %v4934_v43 }
 0x1b2   : > { %3916 = vmatprep.subr.bf16.mxu0 %v4986_v62  ;;  %3957 = vmatprep.subr.bf16.mxu1 %v4988_v20  ;;  %v4891_v20 = vld [vmem:[%s5804_s29 + $0x890] sm:$0xff] }
 0x1b3   : > { %3940 = vmatprep.mubr.bf16.mxu0 %v5099_v2  ;;  %3981 = vmatprep.mubr.bf16.mxu1 %v5099_v2  ;;  %v4973_v32 = vcombine.low %v4891_v20, %v4899_v21 }
 0x1b5   : > { %3917 = vmatpush1.bf16.msra.mxu0 %v4985_v25  ;;  %3958 = vmatpush1.bf16.msra.mxu1 %v4987_v26  ;;  %v4991_v25 = vcombine.low %v4908_v11, %v4916_v12  ;;  %v4974_v26 = vcombine.high %v4891_v20, %v4899_v21  ;;  %v4909_v11 = vld [vmem:[%s5804_s29 + $0x920] sm:$0xff] }
 0x1b6   : > { %3918 = vmatprep.subr.bf16.mxu0 %v4970_v27  ;;  %3959 = vmatprep.subr.bf16.mxu1 %v4972_v28  ;;  %v4976_v27 = vcombine.high %v4892_v22, %v4900_v23  ;;  %v4875_v28 = vld [vmem:[%s5804_s29 + $0x810] sm:$0xff]  ;;  %v4917_v12 = vld [vmem:[%s5804_s29 + $0x960] sm:$0xff] }
 0x1b7   : > { %v4957_v44 = vcombine.low %v4875_v28, %v4883_v29  ;;  %v4994_v20 = vcombine.high %v4909_v11, %v4917_v12 }
 0x1b9   : > { %3919 = vmatpush1.bf16.msra.mxu0 %v4969_v33  ;;  %3960 = vmatpush1.bf16.msra.mxu1 %v4971_v34  ;;  %v4975_v33 = vcombine.low %v4892_v22, %v4900_v23  ;;  %v4958_v34 = vcombine.high %v4875_v28, %v4883_v29  ;;  %v4893_v23 = vld [vmem:[%s5804_s29 + $0x8a0] sm:$0xff] }
 0x1ba   : > { %3920 = vmatprep.subr.bf16.mxu0 %v4954_v35  ;;  %3961 = vmatprep.subr.bf16.mxu1 %v4956_v38  ;;  %v4859_v35 = vld [vmem:[%s5804_s29 + $0x790] sm:$0xff]  ;;  %v4860_v38 = vld [vmem:[%s5804_s29 + $0x798] sm:$0xff] }
 0x1bb   : > { %v4944_v48 = vcombine.high %v4860_v38, %v4868_v41  ;;  %v4941_v55 = vcombine.low %v4859_v35, %v4867_v36  ;;  %v4943_v63 = vcombine.low %v4860_v38, %v4868_v41  ;;  %v4861_v38 = vld [vmem:[%s5804_s29 + $0x7a0] sm:$0xff]  ;;  %v4862_v41 = vld [vmem:[%s5804_s29 + $0x7a8] sm:$0xff] }
 0x1bc   : > { %v6225_v51 = vpop.f32.mrf.mxu0  ;;  %v6227_v52 = vpop.f32.mrf.mxu1 }
 0x1bd   : > { %3921 = vmatpush1.bf16.msra.mxu0 %v4953_v45  ;;  %3962 = vmatpush1.bf16.msra.mxu1 %v4955_v46  ;;  %v4959_v45 = vcombine.low %v4876_v30, %v4884_v31  ;;  %v4942_v46 = vcombine.high %v4859_v35, %v4867_v36  ;;  %v4877_v31 = vld [vmem:[%s5804_s29 + $0x820] sm:$0xff] }
 0x1be   : > { %v6229_v56 = vpop.f32.mrf.mxu0  ;;  %3922 = vmatprep.subr.bf16.mxu0 %v4938_v47  ;;  %v6232_v0 = vpop.f32.mrf.mxu1  ;;  %3963 = vmatprep.subr.bf16.mxu1 %v4940_v49  ;;  %v5010_v47 = vcombine.high %v4925_v39, %v4933_v40  ;;  %v5012_v49 = vcombine.high %v4926_v42, %v4934_v43  ;;  %v4927_v42 = vld [vmem:[%s5804_s29 + $0x9b0] sm:$0xff] }
 0x1bf   : > { %v4935_v43 = vld [vmem:[%s5804_s29 + $0x9f0] sm:$0x33] }
 0x1c0   : > { %v1555_v10 = vpop.f32.mrf.mxu0  ;;  %v1596_v14 = vpop.f32.mrf.mxu1 }
 0x1c1   : > { %3923 = vmatpush1.bf16.msra.mxu0 %v4937_v54  ;;  %3964 = vmatpush1.bf16.msra.mxu1 %v4939_v59  ;;  %v5009_v59 = vcombine.low %v4925_v39, %v4933_v40  ;;  %v3894_v10 = vand.u32 %v5012_v49, %v5808_v5  ;;  %v4869_v39 = vld [vmem:[%s5804_s29 + $0x7e0] sm:$0xff] }
 0x1c2   : > { %v1556_v16 = vpop.f32.mrf.mxu0  ;;  %3996 = vmatprep.subr.bf16.mxu0 %v3876_v60  ;;  %v1597_v62 = vpop.f32.mrf.mxu1  ;;  %4037 = vmatprep.subr.bf16.mxu1 %v3882_v1  ;;  %v3888_v1 = vand.u32 %v5010_v47, %v5808_v5  ;;  %v4946_v49 = vcombine.high %v4861_v38, %v4869_v39 }
 0x1c3   : > { %v4918_v16 = vld [vmem:[%s5804_s29 + $0x968] sm:$0xff] }
 0x1c4   : > { %5017 = vmatmul.mubr.msk.bf16.vlgmr.msra.gmra.mxu0 %vm1297_vm2, %v6094_v53  ;;  %5018 = vmatmul.mubr.msk.bf16.vlgmr.msra.gmra.mxu1 %vm1297_vm2, %v6094_v53 }
 0x1c5   : > { %3997 = vmatpush1.bf16.msra.mxu0 %v3873_v15  ;;  %4038 = vmatpush1.bf16.msra.mxu1 %v3879_v17  ;;  %v4910_v15 = vld [vmem:[%s5804_s29 + $0x928] sm:$0xff] }
 0x1c6   : > { %3998 = vmatprep.subr.bf16.mxu0 %v4990_v18  ;;  %4039 = vmatprep.subr.bf16.mxu1 %v4992_v19  ;;  %v3885_v18 = vand.u32 %v5009_v59, %v5808_v5  ;;  %v3891_v19 = vand.u32 %v5011_v7, %v5808_v5  ;;  %v4996_v22 = vcombine.high %v4910_v15, %v4918_v16 }
 0x1c7   : > { %4022 = vmatprep.mubr.bf16.mxu0 %v5099_v2  ;;  %4063 = vmatprep.mubr.bf16.mxu1 %v5099_v2  ;;  %v4995_v28 = vcombine.low %v4910_v15, %v4918_v16 }
 0x1c9   : > { %3999 = vmatpush1.bf16.msra.mxu0 %v4989_v24  ;;  %4040 = vmatpush1.bf16.msra.mxu1 %v4991_v25  ;;  %v4901_v24 = vld [vmem:[%s5804_s29 + $0x8e0] sm:$0xff]  ;;  %v4894_v25 = vld [vmem:[%s5804_s29 + $0x8a8] sm:$0xff] }
 0x1ca   : > { %4000 = vmatprep.subr.bf16.mxu0 %v4974_v26  ;;  %4041 = vmatprep.subr.bf16.mxu1 %v4976_v27  ;;  %v4902_v26 = vld [vmem:[%s5804_s29 + $0x8e8] sm:$0xff]  ;;  %v4993_v27 = vcombine.low %v4909_v11, %v4917_v12  ;;  %v4978_v29 = vcombine.high %v4893_v23, %v4901_v24  ;;  %v4977_v35 = vcombine.low %v4893_v23, %v4901_v24 }
 0x1cb   : > { %v4980_v30 = vcombine.high %v4894_v25, %v4902_v26  ;;  %v4979_v36 = vcombine.low %v4894_v25, %v4902_v26  ;;  %v5013_v11 = vcombine.low %v4927_v42, %v4935_v43 }
 0x1cd   : > { %4001 = vmatpush1.bf16.msra.mxu0 %v4973_v32  ;;  %4042 = vmatpush1.bf16.msra.mxu1 %v4975_v33  ;;  %v4885_v32 = vld [vmem:[%s5804_s29 + $0x860] sm:$0xff]  ;;  %v4878_v33 = vld [vmem:[%s5804_s29 + $0x828] sm:$0xff]  ;;  %v3897_v24 = vand.u32 %v5013_v11, %v5808_v5 }
 0x1ce   : > { %4002 = vmatprep.subr.bf16.mxu0 %v4958_v34  ;;  %4043 = vmatprep.subr.bf16.mxu1 %v4960_v37  ;;  %v4886_v34 = vld [vmem:[%s5804_s29 + $0x868] sm:$0xff]  ;;  %v4962_v37 = vcombine.high %v4877_v31, %v4885_v32  ;;  %v4961_v47 = vcombine.low %v4877_v31, %v4885_v32  ;;  %v4903_v31 = vld [vmem:[%s5804_s29 + $0x8f0] sm:$0xff]  ;;  %v4896_v32 = vld [vmem:[%s5804_s29 + $0x8b8] sm:$0xff] }
 0x1cf   : > { %v4964_v40 = vcombine.high %v4878_v33, %v4886_v34 }
 0x1d0   : > { %v6263_v50 = vpop.f32.mrf.mxu0  ;;  %v6265_v54 = vpop.f32.mrf.mxu1 }
 0x1d1   : > { %4003 = vmatpush1.bf16.msra.mxu0 %v4957_v44  ;;  %4044 = vmatpush1.bf16.msra.mxu1 %v4959_v45  ;;  %v4870_v44 = vld [vmem:[%s5804_s29 + $0x7e8] sm:$0xff]  ;;  %v4928_v45 = vld [vmem:[%s5804_s29 + $0x9b8] sm:$0xff] }
 0x1d2   : > { %v6267_v60 = vpop.f32.mrf.mxu0  ;;  %4004 = vmatprep.subr.bf16.mxu0 %v4942_v46  ;;  %v6270_v8 = vpop.f32.mrf.mxu1  ;;  %4045 = vmatprep.subr.bf16.mxu1 %v4944_v48  ;;  %v4936_v46 = vld [vmem:[%s5804_s29 + $0x9f8] sm:$0x33]  ;;  %v4963_v48 = vcombine.low %v4878_v33, %v4886_v34  ;;  %v4948_v59 = vcombine.high %v4862_v41, %v4870_v44 }
 0x1d3   : > { %v5015_v16 = vcombine.low %v4928_v45, %v4936_v46  ;;  %v4904_v33 = vld [vmem:[%s5804_s29 + $0x8f8] sm:$0xff] }
 0x1d4   : > { %v1637_v14 = vpop.f32.mrf.mxu0  ;;  %v1678_v17 = vpop.f32.mrf.mxu1 }
 0x1d5   : > { %4005 = vmatpush1.bf16.msra.mxu0 %v4941_v55  ;;  %4046 = vmatpush1.bf16.msra.mxu1 %v4943_v63  ;;  %v5014_v55 = vcombine.high %v4927_v42, %v4935_v43  ;;  %v5016_v63 = vcombine.high %v4928_v45, %v4936_v46  ;;  %v4947_v14 = vcombine.low %v4862_v41, %v4870_v44  ;;  %v4863_v45 = vld [vmem:[%s5804_s29 + $0x7b0] sm:$0xff] }
 0x1d6   : > { %v1638_v62 = vpop.f32.mrf.mxu0  ;;  %4078 = vmatprep.subr.bf16.mxu0 %v3888_v1  ;;  %v1679_v21 = vpop.f32.mrf.mxu1  ;;  %4119 = vmatprep.subr.bf16.mxu1 %v3894_v10  ;;  %v4945_v10 = vcombine.low %v4861_v38, %v4869_v39  ;;  %v3903_v26 = vand.u32 %v5015_v16, %v5808_v5  ;;  %v4887_v38 = vld [vmem:[%s5804_s29 + $0x870] sm:$0xff]  ;;  %v4880_v39 = vld [vmem:[%s5804_s29 + $0x838] sm:$0xff]  ;;  %v4983_v42 = vcombine.low %v4896_v32, %v4904_v33 }
 0x1d7   : > { %v3900_v15 = vand.u32 %v5014_v55, %v5808_v5  ;;  %v4911_v62 = vld [vmem:[%s5804_s29 + $0x930] sm:$0xff]  ;;  %v4912_v21 = vld [vmem:[%s5804_s29 + $0x938] sm:$0xff] }
 0x1d8   : > { %5019 = vmatmul.mubr.msk.bf16.vlgmr.msra.gmra.mxu0 %vm1297_vm2, %v6094_v53  ;;  %5020 = vmatmul.mubr.msk.bf16.vlgmr.msra.gmra.mxu1 %vm1297_vm2, %v6094_v53  ;;  %v4871_v46 = vld [vmem:[%s5804_s29 + $0x7f0] sm:$0xff] }
 0x1d9   : > { %4079 = vmatpush1.bf16.msra.mxu0 %v3885_v18  ;;  %4120 = vmatpush1.bf16.msra.mxu1 %v3891_v19  ;;  %v3906_v18 = vand.u32 %v5016_v63, %v5808_v5  ;;  %v4919_v19 = vld [vmem:[%s5804_s29 + $0x970] sm:$0xff]  ;;  %v4949_v11 = vcombine.low %v4863_v45, %v4871_v46 }
 0x1da   : > { %4080 = vmatprep.subr.bf16.mxu0 %v4994_v20  ;;  %4121 = vmatprep.subr.bf16.mxu1 %v4996_v22  ;;  %v4920_v22 = vld [vmem:[%s5804_s29 + $0x978] sm:$0xff]  ;;  %v4997_v5 = vcombine.low %v4911_v62, %v4919_v19 }
 0x1db   : > { %4104 = vmatprep.mubr.bf16.mxu0 %v5099_v2  ;;  %4145 = vmatprep.mubr.bf16.mxu1 %v5099_v2  ;;  %v4999_v34 = vcombine.low %v4912_v21, %v4920_v22 }
 0x1dd   : > { %4081 = vmatpush1.bf16.msra.mxu0 %v4993_v27  ;;  %4122 = vmatpush1.bf16.msra.mxu1 %v4995_v28  ;;  %v4998_v27 = vcombine.high %v4911_v62, %v4919_v19 }
 0x1de   : > { %4082 = vmatprep.subr.bf16.mxu0 %v4978_v29  ;;  %4123 = vmatprep.subr.bf16.mxu1 %v4980_v30  ;;  %v5000_v29 = vcombine.high %v4912_v21, %v4920_v22  ;;  %v4895_v30 = vld [vmem:[%s5804_s29 + $0x8b0] sm:$0xff] }
 0x1df   : > { %v4981_v41 = vcombine.low %v4895_v30, %v4903_v31 }
 0x1e1   : > { %4083 = vmatpush1.bf16.msra.mxu0 %v4977_v35  ;;  %4124 = vmatpush1.bf16.msra.mxu1 %v4979_v36  ;;  %v4982_v35 = vcombine.high %v4895_v30, %v4903_v31  ;;  %v4984_v36 = vcombine.high %v4896_v32, %v4904_v33 }
 0x1e2   : > { %4084 = vmatprep.subr.bf16.mxu0 %v4962_v37  ;;  %4125 = vmatprep.subr.bf16.mxu1 %v4964_v40  ;;  %v4879_v37 = vld [vmem:[%s5804_s29 + $0x830] sm:$0xff]  ;;  %v4888_v40 = vld [vmem:[%s5804_s29 + $0x878] sm:$0xff] }
 0x1e3   : > { %v4966_v43 = vcombine.high %v4879_v37, %v4887_v38  ;;  %v4968_v44 = vcombine.high %v4880_v39, %v4888_v40  ;;  %v4967_v55 = vcombine.low %v4880_v39, %v4888_v40 }
 0x1e4   : > { %v6301_v1 = vpop.f32.mrf.mxu0  ;;  %v6303_v7 = vpop.f32.mrf.mxu1 }
 0x1e5   : > { %4085 = vmatpush1.bf16.msra.mxu0 %v4961_v47  ;;  %4126 = vmatpush1.bf16.msra.mxu1 %v4963_v48  ;;  %v4864_v47 = vld [vmem:[%s5804_s29 + $0x7b8] sm:$0xff] }
 0x1e6   : > { %v6305_v12 = vpop.f32.mrf.mxu0  ;;  %4086 = vmatprep.subr.bf16.mxu0 %v4946_v49  ;;  %v6308_v17 = vpop.f32.mrf.mxu1  ;;  %4127 = vmatprep.subr.bf16.mxu1 %v4948_v59  ;;  %v4872_v48 = vld [vmem:[%s5804_s29 + $0x7f8] sm:$0xff]  ;;  %v4965_v49 = vcombine.low %v4879_v37, %v4887_v38  ;;  %v4950_v59 = vcombine.high %v4863_v45, %v4871_v46 }
 0x1e7   : > { %v2523_v38 = vmax.f32 %v6153_v9, %v6305_v12 }
 0x1e8   : > { %v2232_v20 = vpop.f32.mrf.mxu0  ;;  %v2273_v23 = vpop.f32.mrf.mxu1 }
 0x1e9   : > { %4087 = vmatpush1.bf16.msra.mxu0 %v4945_v10  ;;  %4128 = vmatpush1.bf16.msra.mxu1 %v4947_v14 }
 0x1ea   : > { %v2233_v25 = vpop.f32.mrf.mxu0  ;;  %4160 = vmatprep.subr.bf16.mxu0 %v3900_v15  ;;  %v2274_v28 = vpop.f32.mrf.mxu1  ;;  %4201 = vmatprep.subr.bf16.mxu1 %v3906_v18  ;;  %v4951_v15 = vcombine.low %v4864_v47, %v4872_v48 }
 0x1ec   : > { %5021 = vmatmul.mubr.msk.bf16.vlgmr.msra.gmra.mxu0 %vm1297_vm2, %v6094_v53  ;;  %5022 = vmatmul.mubr.msk.bf16.vlgmr.msra.gmra.mxu1 %vm1297_vm2, %v6094_v53 }
 0x1ed   : > { %4161 = vmatpush1.bf16.msra.mxu0 %v3897_v24  ;;  %4202 = vmatpush1.bf16.msra.mxu1 %v3903_v26 }
 0x1ee   : > { %4162 = vmatprep.subr.bf16.mxu0 %v4998_v27  ;;  %4203 = vmatprep.subr.bf16.mxu1 %v5000_v29 }
 0x1ef   : > { %4186 = vmatprep.mubr.bf16.mxu0 %v5099_v2  ;;  %4227 = vmatprep.mubr.bf16.mxu1 %v5099_v2  ;;  %v4952_v2 = vcombine.high %v4864_v47, %v4872_v48 }
 0x1f1   : > { %4163 = vmatpush1.bf16.msra.mxu0 %v4997_v5  ;;  %4204 = vmatpush1.bf16.msra.mxu1 %v4999_v34 }
 0x1f2   : > { %4164 = vmatprep.subr.bf16.mxu0 %v4982_v35  ;;  %4205 = vmatprep.subr.bf16.mxu1 %v4984_v36  ;;  %v2524_v36 = vmax.f32 %v6151_v6, %v6303_v7 }
 0x1f5   : > { %4165 = vmatpush1.bf16.msra.mxu0 %v4981_v41  ;;  %4206 = vmatpush1.bf16.msra.mxu1 %v4983_v42  ;;  %v2525_v41 = vmax.f32 %v6156_v13, %v6308_v17 }
 0x1f6   : > { %4166 = vmatprep.subr.bf16.mxu0 %v4966_v43  ;;  %4207 = vmatprep.subr.bf16.mxu1 %v4968_v44 }
 0x1f8   : > { %v2310_v63 = vpop.f32.mrf.mxu0  ;;  %v2351_v10 = vpop.f32.mrf.mxu1 }
 0x1f9   : > { %4167 = vmatpush1.bf16.msra.mxu0 %v4965_v49  ;;  %4208 = vmatpush1.bf16.msra.mxu1 %v4967_v55  ;;  %v2526_v9 = vmax.f32 %v6187_v57, %v2310_v63  ;;  %v2528_v12 = vmax.f32 %v6189_v58, %v2351_v10 }
 0x1fa   : > { %v2312_v14 = vpop.f32.mrf.mxu0  ;;  %4168 = vmatprep.subr.bf16.mxu0 %v4950_v59  ;;  %v2353_v16 = vpop.f32.mrf.mxu1  ;;  %4209 = vmatprep.subr.bf16.mxu1 %v4952_v2 }
 0x1fb   : > { %v2527_v48 = vmax.f32 %v6191_v61, %v2312_v14  ;;  %v2529_v49 = vmax.f32 %v6194_v3, %v2353_v16 }
 0x1fc   : > { %v2314_v18 = vpop.f32.mrf.mxu0  ;;  %v2355_v62 = vpop.f32.mrf.mxu1 }
 0x1fd   : > { %4169 = vmatpush1.bf16.msra.mxu0 %v4949_v11  ;;  %4210 = vmatpush1.bf16.msra.mxu1 %v4951_v15 }
 0x1fe   : > { %v2315_v19 = vpop.f32.mrf.mxu0  ;;  %v2356_v20 = vpop.f32.mrf.mxu1 }
 0x200   : > { %5023 = vmatmul.mubr.msk.bf16.vlgmr.msra.gmra.mxu0 %vm1297_vm2, %v6094_v53  ;;  %5024 = vmatmul.mubr.msk.bf16.vlgmr.msra.gmra.mxu1 %vm1297_vm2, %v6094_v53  ;;  %v2522_v53 = vmax.f32 %v6149_v4, %v6301_v1 }
 0x20c   : > { %v2392_v21 = vpop.f32.mrf.mxu0  ;;  %v2433_v22 = vpop.f32.mrf.mxu1 }
 0x20d   : > { %v2530_v10 = vmax.f32 %v6225_v51, %v2392_v21  ;;  %v2532_v61 = vmax.f32 %v6227_v52, %v2433_v22 }
 0x20e   : > { %v2394_v23 = vpop.f32.mrf.mxu0  ;;  %v2435_v24 = vpop.f32.mrf.mxu1 }
 0x20f   : > { %v2531_v62 = vmax.f32 %v6229_v56, %v2394_v23  ;;  %v2533_v19 = vmax.f32 %v6232_v0, %v2435_v24 }
 0x210   : > { %v2396_v25 = vpop.f32.mrf.mxu0  ;;  %v2437_v26 = vpop.f32.mrf.mxu1 }
 0x212   : > { %v2397_v27 = vpop.f32.mrf.mxu0  ;;  %v2438_v28 = vpop.f32.mrf.mxu1 }
 0x220   : > { %v2474_v29 = vpop.f32.mrf.mxu0  ;;  %v6339_v30 = vpop.f32.mrf.mxu1 }
 0x221   : > { %v2534_v22 = vmax.f32 %v6263_v50, %v2474_v29  ;;  %v2536_v56 = vmax.f32 %v6265_v54, %v6339_v30 }
 0x222   : > { %v6341_v31 = vpop.f32.mrf.mxu0  ;;  %v6343_v32 = vpop.f32.mrf.mxu1 }
 0x223   : > { %v2535_v0 = vmax.f32 %v6267_v60, %v6341_v31  ;;  %v6402_v31 = vpop.permute.xlu0 %4255 }
 0x224   : > { %v2478_v33 = vpop.f32.mrf.mxu0  ;;  %v2519_v5 = vpop.f32.mrf.mxu1 }
 0x226   : > { %v2479_v34 = vpop.f32.mrf.mxu0  ;;  %v2520_v35 = vpop.f32.mrf.mxu1 }
 0x227   : > { %v2537_v34 = vmax.f32 %v6270_v8, %v6343_v32 }
 0x234   : > { %v3085_v37 = vpop.f32.mrf.mxu0  ;;  %v3126_v40 = vpop.f32.mrf.mxu1 }
 0x235   : > { %v6351_v39 = vmax.f32 %v2522_v53, %v3085_v37  ;;  %v6355_v42 = vmax.f32 %v2524_v36, %v3126_v40 }
 0x236   : > { %v3087_v43 = vpop.f32.mrf.mxu0  ;;  %v3128_v45 = vpop.f32.mrf.mxu1 }
 0x237   : > { %v6357_v44 = vmax.f32 %v2523_v38, %v3087_v43  ;;  %v6359_v4 = vmax.f32 %v2525_v41, %v3128_v45 }
 0x238   : > { %v3089_v1 = vpop.f32.mrf.mxu0  ;;  %v3130_v6 = vpop.f32.mrf.mxu1 }
 0x23a   : > { %v3090_v7 = vpop.f32.mrf.mxu0  ;;  %v3131_v46 = vpop.f32.mrf.mxu1 }
 0x248   : > { %v3167_v47 = vpop.f32.mrf.mxu0  ;;  %v3208_v17 = vpop.f32.mrf.mxu1 }
 0x249   : > { %v6364_v13 = vmax.f32 %v2526_v9, %v3167_v47  ;;  %v6367_v55 = vmax.f32 %v2528_v12, %v3208_v17 }
 0x24a   : > { %v3169_v59 = vpop.f32.mrf.mxu0  ;;  %v3210_v11 = vpop.f32.mrf.mxu1 }
 0x24b   : > { %v6369_v2 = vmax.f32 %v2527_v48, %v3169_v59  ;;  %v6371_v15 = vmax.f32 %v2529_v49, %v3210_v11 }
 0x24c   : > { %v3171_v18 = vpop.f32.mrf.mxu0  ;;  %v3212_v57 = vpop.f32.mrf.mxu1 }
 0x24e   : > { %v3172_v63 = vpop.f32.mrf.mxu0  ;;  %v3213_v58 = vpop.f32.mrf.mxu1 }
 0x25c   : > { %v3249_v14 = vpop.f32.mrf.mxu0  ;;  %v3290_v16 = vpop.f32.mrf.mxu1 }
 0x25d   : > { %v6376_v3 = vmax.f32 %v2530_v10, %v3249_v14  ;;  %v6379_v20 = vmax.f32 %v2532_v61, %v3290_v16 }
 0x25e   : > { %v3251_v25 = vpop.f32.mrf.mxu0  ;;  %v3292_v27 = vpop.f32.mrf.mxu1 }
 0x25f   : > { %v6381_v26 = vmax.f32 %v2531_v62, %v3251_v25  ;;  %v6383_v28 = vmax.f32 %v2533_v19, %v3292_v27 }
 0x260   : > { %v3253_v33 = vpop.f32.mrf.mxu0  ;;  %v3294_v51 = vpop.f32.mrf.mxu1 }
 0x262   : > { %v3254_v21 = vpop.f32.mrf.mxu0  ;;  %v3295_v52 = vpop.f32.mrf.mxu1 }
 0x270   : > { %v3331_v23 = vpop.f32.mrf.mxu0  ;;  %v3372_v5 = vpop.f32.mrf.mxu1 }
 0x271   : > { %v6390_v24 = vmax.f32 %v2534_v22, %v3331_v23  ;;  %v6394_v35 = vmax.f32 %v2536_v56, %v3372_v5 }
 0x272   : > { %v3333_v53 = vpop.f32.mrf.mxu0  ;;  %v3374_v50 = vpop.f32.mrf.mxu1 }
 0x273   : > { %v6396_v36 = vmax.f32 %v2535_v0, %v3333_v53  ;;  %v6398_v29 = vmax.f32 %v2537_v34, %v3374_v50 }
 0x274   : > { %v3335_v37 = vpop.f32.mrf.mxu0  ;;  %v3376_v54 = vpop.f32.mrf.mxu1 }
 0x276   : > { %v3336_v30 = vpop.f32.mrf.mxu0  ;;  %v3377_v38 = vpop.f32.mrf.mxu1 }
 0x284   : > { %v3942_v60 = vpop.f32.mrf.mxu0  ;;  %v3983_v32 = vpop.f32.mrf.mxu1 }
 0x285   : > { %v4236_v8 = vmax.f32 %v6351_v39, %v3942_v60  ;;  %v4238_v40 = vmax.f32 %v6355_v42, %v3983_v32 }
 0x286   : > { %v3944_v41 = vpop.f32.mrf.mxu0  ;;  %v3985_v1 = vpop.f32.mrf.mxu1 }
 0x287   : > { %v4237_v43 = vmax.f32 %v6357_v44, %v3944_v41  ;;  %v4258_v45 = vadd.f32 %v6402_v31, %v4236_v8  ;;  %v4239_v6 = vmax.f32 %v6359_v4, %v3985_v1  ;;  %v4260_v7 = vadd.f32 %v6402_v31, %v4238_v40 }
 0x288   : > { %v3946_v46 = vpop.f32.mrf.mxu0  ;;  %v3987_v12 = vpop.f32.mrf.mxu1 }
 0x289   : > { %v4259_v9 = vadd.f32 %v6402_v31, %v4237_v43  ;;  %v4261_v39 = vadd.f32 %v6402_v31, %v4239_v6  ;;  %v4274_v48 = vmax.f32 %v4258_v45, 0.0  ;;  %v4276_v44 = vmax.f32 %v4260_v7, 0.0 }
 0x28a   : > { %v3947_v47 = vpop.f32.mrf.mxu0  ;;  %v3988_v17 = vpop.f32.mrf.mxu1 }
 0x28b   : > { %v4275_v42 = vmax.f32 %v4259_v9, 0.0  ;;  %v4277_v4 = vmax.f32 %v4261_v39, 0.0 }
 0x28d   : > { %v5036_v49 = vpack.c.bf16 %v4275_v42, %v4274_v48  ;;  %v5037_v59 = vpack.c.bf16 %v4277_v4, %v4276_v44 }
 0x28f   : > { %4354 = vst [vmem:[%s6415_s14] sm:$0xff] %v5036_v49  ;;  %4355 = vst [vmem:[%s6415_s14 + $0x8] sm:$0xff] %v5037_v59 }
 0x298   : > { %v4024_v11 = vpop.f32.mrf.mxu0  ;;  %v4065_v57 = vpop.f32.mrf.mxu1 }
 0x299   : > { %v4240_v18 = vmax.f32 %v6364_v13, %v4024_v11  ;;  %v4242_v63 = vmax.f32 %v6367_v55, %v4065_v57 }
 0x29a   : > { %v4026_v58 = vpop.f32.mrf.mxu0  ;;  %v4067_v14 = vpop.f32.mrf.mxu1 }
 0x29b   : > { %v4262_v10 = vadd.f32 %v6402_v31, %v4240_v18  ;;  %v4241_v61 = vmax.f32 %v6369_v2, %v4026_v58  ;;  %v4264_v62 = vadd.f32 %v6402_v31, %v4242_v63  ;;  %v4243_v16 = vmax.f32 %v6371_v15, %v4067_v14 }
 0x29c   : > { %v4028_v19 = vpop.f32.mrf.mxu0  ;;  %v4069_v27 = vpop.f32.mrf.mxu1 }
 0x29d   : > { %v4263_v25 = vadd.f32 %v6402_v31, %v4241_v61  ;;  %v4265_v13 = vadd.f32 %v6402_v31, %v4243_v16  ;;  %v4278_v55 = vmax.f32 %v4262_v10, 0.0  ;;  %v4280_v52 = vmax.f32 %v4264_v62, 0.0 }
 0x29e   : > { %v4029_v33 = vpop.f32.mrf.mxu0  ;;  %v4070_v21 = vpop.f32.mrf.mxu1 }
 0x29f   : > { %v4279_v51 = vmax.f32 %v4263_v25, 0.0  ;;  %v4281_v22 = vmax.f32 %v4265_v13, 0.0 }
 0x2a1   : > { %v5038_v2 = vpack.c.bf16 %v4279_v51, %v4278_v55  ;;  %v5039_v56 = vpack.c.bf16 %v4281_v22, %v4280_v52 }
 0x2a3   : > { %4356 = vst [vmem:[%s6415_s14 + $0x10] sm:$0xff] %v5038_v2  ;;  %4357 = vst [vmem:[%s6415_s14 + $0x18] sm:$0xff] %v5039_v56 }
 0x2ac   : > { %v4106_v23 = vpop.f32.mrf.mxu0  ;;  %v4147_v15 = vpop.f32.mrf.mxu1 }
 0x2ad   : > { %v4244_v0 = vmax.f32 %v6376_v3, %v4106_v23  ;;  %v4246_v5 = vmax.f32 %v6379_v20, %v4147_v15 }
 0x2ae   : > { %v4108_v34 = vpop.f32.mrf.mxu0  ;;  %v4149_v37 = vpop.f32.mrf.mxu1 }
 0x2af   : > { %v4266_v53 = vadd.f32 %v6402_v31, %v4244_v0  ;;  %v4245_v50 = vmax.f32 %v6381_v26, %v4108_v34  ;;  %v4268_v54 = vadd.f32 %v6402_v31, %v4246_v5  ;;  %v4247_v30 = vmax.f32 %v6383_v28, %v4149_v37 }
 0x2b0   : > { %v4110_v38 = vpop.f32.mrf.mxu0  ;;  %v4151_v8 = vpop.f32.mrf.mxu1 }
 0x2b1   : > { %v4267_v60 = vadd.f32 %v6402_v31, %v4245_v50  ;;  %v4269_v3 = vadd.f32 %v6402_v31, %v4247_v30  ;;  %v4282_v20 = vmax.f32 %v4266_v53, 0.0  ;;  %v4284_v43 = vmax.f32 %v4268_v54, 0.0 }
 0x2b2   : > { %v4111_v32 = vpop.f32.mrf.mxu0  ;;  %v4152_v41 = vpop.f32.mrf.mxu1 }
 0x2b3   : > { %v4283_v40 = vmax.f32 %v4267_v60, 0.0  ;;  %v4285_v45 = vmax.f32 %v4269_v3, 0.0 }
 0x2b5   : > { %v5040_v26 = vpack.c.bf16 %v4283_v40, %v4282_v20  ;;  %v5041_v1 = vpack.c.bf16 %v4285_v45, %v4284_v43 }
 0x2b7   : > { %4358 = vst [vmem:[%s6415_s14 + $0x20] sm:$0xff] %v5040_v26  ;;  %4359 = vst [vmem:[%s6415_s14 + $0x28] sm:$0xff] %v5041_v1 }
 0x2c0   : > { %v4188_v6 = vpop.f32.mrf.mxu0  ;;  %v4229_v28 = vpop.f32.mrf.mxu1 }
 0x2c1   : > { %v4248_v7 = vmax.f32 %v6390_v24, %v4188_v6  ;;  %v4250_v46 = vmax.f32 %v6394_v35, %v4229_v28 }
 0x2c2   : > { %v4190_v9 = vpop.f32.mrf.mxu0  ;;  %v4231_v47 = vpop.f32.mrf.mxu1 }
 0x2c3   : > { %v4270_v12 = vadd.f32 %v6402_v31, %v4248_v7  ;;  %v4249_v39 = vmax.f32 %v6396_v36, %v4190_v9  ;;  %v4272_v48 = vadd.f32 %v6402_v31, %v4250_v46  ;;  %v4251_v42 = vmax.f32 %v6398_v29, %v4231_v47 }
 0x2c4   : > { %v4192_v17 = vpop.f32.mrf.mxu0  ;;  %v4233_v4 = vpop.f32.mrf.mxu1 }
 0x2c5   : > { %v4271_v44 = vadd.f32 %v6402_v31, %v4249_v39  ;;  %v4273_v24 = vadd.f32 %v6402_v31, %v4251_v42  ;;  %v4286_v35 = vmax.f32 %v4270_v12, 0.0  ;;  %v4288_v18 = vmax.f32 %v4272_v48, 0.0 }
 0x2c6   : > { %v4193_v49 = vpop.f32.mrf.mxu0  ;;  %v4234_v11 = vpop.f32.mrf.mxu1 }
 0x2c7   : > { %v4287_v59 = vmax.f32 %v4271_v44, 0.0  ;;  %v4289_v57 = vmax.f32 %v4273_v24, 0.0 }
 0x2c9   : > { %v5042_v36 = vpack.c.bf16 %v4287_v59, %v4286_v35  ;;  %v5043_v63 = vpack.c.bf16 %v4289_v57, %v4288_v18 }
 0x2cb   : > { %4360 = vst [vmem:[%s6415_s14 + $0x30] sm:$0xff] %v5042_v36  ;;  %4361 = vst [vmem:[%s6415_s14 + $0x38] sm:$0xff] %v5043_v63 }
 0x2cc PF: > { %p10_p9 = scmp.ge.s32.totalorder %s5137_s16, 4   ;;  %s6463_s12 = smov %s5092_s13 }
 0x2cd   : > { %s6464_s13 = smov %s5146_s19  ;;  %s6465_s14 = smov %s5137_s16 }
 0x2ce   :  { %12 = sbr.rel (!%p10_p9) target bundleno = 2 (0x2), region = 93 }

// kernel: _lenet_logits.3
= control target key start
LH: loop header
LB: loop body
LE: loop exit
PB: predicated region body
PF: predicated region fallthrough
CT: control target
= control target key end

     0   :  { %14 = vsyncpa [#allocation3], 0  ;;  %s18362_s0 = inlined_call_operand.vmem [shape: bf16[16,1176], index: 0, kind: input, shape index: {}]   ;;  %s18363_s1 = inlined_call_operand.vmem [shape: bf16[4,1176,400], index: 1, kind: input, shape index: {}]   ;;  %s18364_s2 = inlined_call_operand.vmem [shape: f32[1,400], index: 2, kind: input, shape index: {}]   ;;  %s18365_s3 = inlined_call_operand.vmem [shape: bf16[400,256], index: 3, kind: input, shape index: {}]   ;;  %s18366_s4 = inlined_call_operand.vmem [shape: f32[1,256], index: 4, kind: input, shape index: {}]   ;;  %s18367_s5 = inlined_call_operand.vmem [shape: bf16[256,128], index: 5, kind: input, shape index: {}]   ;;  %s18368_s6 = inlined_call_operand.vmem [shape: f32[1,128], index: 6, kind: input, shape index: {}]   ;;  %s18369_s7 = inlined_call_operand.vmem [shape: bf16[128,128], index: 7, kind: input, shape index: {}]   ;;  %s18370_s8 = inlined_call_operand.vmem [shape: f32[1,128], index: 8, kind: input, shape index: {}]   ;;  %s18371_s9 = inlined_call_operand.hbm [shape: f32[16,128], index: 9, kind: output, shape index: {}]  }
   0x1   :  { %16 = vsyncpa [#allocation3 + $0x1], 0  ;;  %s14197_s30 = smov 0   ;;  %s14199_s10 = smov 0  }
   0x2   :  { %s14201_s11 = smov 0   ;;  %s14203_s12 = smov 0  }
   0x3 LB: > { %s14218_s13 = sadd.s32 4294967295, %s14142_s12   ;;  %s9933_s14 = sadd.s32 4294967294, %s14142_s12   ;;  %s14142_s12 = sphi %s14203_s12, %s18377_s12   ;;  %s14138_s11 = sphi %s14201_s11, %s18376_s11   ;;  %s14134_s10 = sphi %s14199_s10, %s18375_s10   ;;  %s14130_s30 = sphi %s14197_s30, %s18374_s30  }
   0x4   : > { %s14222_s15 = sadd.s32 1, %s14142_s12   ;;  %s223_s16 = sadd.s32 1, %s14138_s11 }
   0x5   : > { %s220_s17 = ssub.s32 %s14142_s12, %s14222_s15  ;;  %p233_p0 = scmp.ne.s32.totalorder %s14138_s11, %s14134_s10 }
   0x6   : > { %p221_p1 = scmp.eq.s32.totalorder %s220_s17, 0  ;;  %p234_p2 = scmp.eq.s32.totalorder %s14218_s13, 1 }
   0x7   : > { %p239_p3 = scmp.ne.s32.totalorder %s14134_s10, %s14130_s30  ;;  %p240_p4 = scmp.eq.s32.totalorder %s9933_s14, 1 }
   0x8   : > { %s14233_s18 = scalar_select %p221_p1, %s14138_s11, %s223_s16  }
   0x9   : > { %p14235_p5 = por %p234_p2, %p233_p0  ;;  %p14239_p6 = por %p240_p4, %p239_p3 }
   0xa   : > { %p9936_p7 = scmp.ge.s32.totalorder %s14142_s12, 1  ;;  %p290_p8 = scmp.lt.s32.totalorder %s14142_s12, 3 }
   0xc   : > { %p291_p9 = pnand %p9936_p7, %p290_p8 }
   0xd   : > { %p326_p10 = scmp.lt.s32.totalorder (!%p291_p9), %s14218_s13, 1  ;;  %s323_s27 = sand.u32 (!%p291_p9), 1, %s14134_s10  }
   0xe   : > { %294 = sbr.rel (%p291_p9) target bundleno = 2026 (0x7ea), region = 56  ;;  %s9937_s29 = sshll.u32 (!%p291_p9), %s323_s27, 3 }
   0xf   : > { %s12109_s22 = sshll.u32 (!%p291_p9), %s14218_s13, 7  ;;  %s325_s23 = scalar_lea.vmem (!%p291_p9), [#allocation2], %s9937_s29 }
  0x10   : > { %s18321_s25 = scalar_lea.hbm (!%p291_p9), %s18371_s9, %s12109_s22 }
  0x13   : > { %v12205_v0 = vld [vmem:[%s18363_s1 + $0xe4] ss:$16 sps:$4 sm:$0xff]   ;;  %v12209_v2 = vld [vmem:[%s18363_s1 + $0xe0] ss:$16 sps:$4 sm:$0xff]   ;;  %s327_s21 = scalar_select %p326_p10, %s14218_s13, 1  ;;  %vm2135_vm0 = vcmask 195584  }
  0x14   : > { %v12207_v1 = vld [vmem:[%s18363_s1 + $0x2e4] ss:$16 sps:$4 sm:$0xff]   ;;  %2152 = vmatprep.subr.bf16.mxu0 %v12205_v0  ;;  %v12210_v3 = vld [vmem:[%s18363_s1 + $0x2e0] ss:$16 sps:$4 sm:$0xff]   ;;  %vm2139_vm1 = vcmask 1043456   ;;  %vm9481_vm2 = vcmask 130048  }
  0x15   : > { %2193 = vmatprep.subr.bf16.mxu1 %v12207_v1  ;;  %v12211_v4 = vld [vmem:[%s18363_s1 + $0xc4] ss:$16 sps:$4 sm:$0xff]   ;;  %2153 = vmatpush1.bf16.msra.mxu0 %v12209_v2  ;;  %v12215_v6 = vld [vmem:[%s18363_s1 + $0xc0] ss:$16 sps:$4 sm:$0xff]   ;;  %s12163_s28 = smul.u32 40, %s327_s21  ;;  %vm14145_vm3 = vmmov 0  }
  0x16   : > { %2194 = vmatpush1.bf16.msra.mxu1 %v12210_v3  ;;  %v12213_v5 = vld [vmem:[%s18363_s1 + $0x2c4] ss:$16 sps:$4 sm:$0xff]   ;;  %2154 = vmatprep.subr.bf16.mxu0 %v12211_v4  ;;  %v12216_v7 = vld [vmem:[%s18363_s1 + $0x2c0] ss:$16 sps:$4 sm:$0xff]   ;;  %s9861_s21 = scalar_lea.sflag [#allocation3], %s323_s27  ;;  %s14146_s13 = smov [#allocation2]  }
  0x17   : > { %2195 = vmatprep.subr.bf16.mxu1 %v12213_v5  ;;  %v12217_v8 = vld [vmem:[%s18363_s1 + $0xa4] ss:$16 sps:$4 sm:$0xff]   ;;  %v12221_v10 = vld [vmem:[%s18363_s1 + $0xa0] ss:$16 sps:$4 sm:$0xff]   ;;  %s14382_s14 = scalar_lea.vmem %s18362_s0, %s12163_s28  ;;  %s14086_s29 = sshll.u32 %s14146_s13, 4  ;;  %s14087_s29 = int_to_ptr.vmem [resolvable:$false] %s14086_s29 }
  0x18   : > { %v12219_v9 = vld [vmem:[%s18363_s1 + $0x2a4] ss:$16 sps:$4 sm:$0xff]   ;;  %v12222_v11 = vld [vmem:[%s18363_s1 + $0x2a0] ss:$16 sps:$4 sm:$0xff]   ;;  %v333_v48 = vld [vmem:[%s14382_s14 + $0x8] sm:$0xff]  ;;  %s14088_s16 = scalar_lea.vmem %s14087_s29, 256 }
  0x19   : > { %2155 = vmatpush1.bf16.msra.mxu0 %v12215_v6  ;;  %v12223_v12 = vld [vmem:[%s18363_s1 + $0x84] ss:$16 sps:$4 sm:$0xff]   ;;  %v12227_v14 = vld [vmem:[%s18363_s1 + $0x80] ss:$16 sps:$4 sm:$0xff]   ;;  %v14400_v51 = vcombine.high %v333_v48, %v333_v48 }
  0x1a   : > { %2196 = vmatpush1.bf16.msra.mxu1 %v12216_v7  ;;  %2156 = vmatprep.subr.bf16.mxu0 %v12217_v8  ;;  %v12225_v13 = vld [vmem:[%s18363_s1 + $0x284] ss:$16 sps:$4 sm:$0xff]   ;;  %v12228_v15 = vld [vmem:[%s18363_s1 + $0x280] ss:$16 sps:$4 sm:$0xff]   ;;  %v14460_v7 = vcombine.low %v333_v48, %v333_v48 }
  0x1b   : > { %2197 = vmatprep.subr.bf16.mxu1 %v12219_v9  ;;  %v12229_v16 = vld [vmem:[%s18363_s1 + $0x64] ss:$16 sps:$4 sm:$0xff]   ;;  %v12233_v18 = vld [vmem:[%s18363_s1 + $0x60] ss:$16 sps:$4 sm:$0xff]   ;;  %2225 = vmatprep.mubr.bf16.mxu1 %v14400_v51 }
  0x1c   : > { %v12231_v17 = vld [vmem:[%s18363_s1 + $0x264] ss:$16 sps:$4 sm:$0xff]   ;;  %v12234_v19 = vld [vmem:[%s18363_s1 + $0x260] ss:$16 sps:$4 sm:$0xff]  }
  0x1d   : > { %2157 = vmatpush1.bf16.msra.mxu0 %v12221_v10  ;;  %v12235_v20 = vld [vmem:[%s18363_s1 + $0x44] ss:$16 sps:$4 sm:$0xff]   ;;  %v12239_v22 = vld [vmem:[%s18363_s1 + $0x40] ss:$16 sps:$4 sm:$0xff]  }
  0x1e   : > { %2198 = vmatpush1.bf16.msra.mxu1 %v12222_v11  ;;  %2158 = vmatprep.subr.bf16.mxu0 %v12223_v12  ;;  %v12237_v21 = vld [vmem:[%s18363_s1 + $0x244] ss:$16 sps:$4 sm:$0xff]   ;;  %v12240_v23 = vld [vmem:[%s18363_s1 + $0x240] ss:$16 sps:$4 sm:$0xff]  }
  0x1f   : > { %2199 = vmatprep.subr.bf16.mxu1 %v12225_v13  ;;  %v12241_v24 = vld [vmem:[%s18363_s1 + $0x24] ss:$16 sps:$4 sm:$0xff]   ;;  %v12245_v26 = vld [vmem:[%s18363_s1 + $0x20] ss:$16 sps:$4 sm:$0xff]  }
  0x20   : > { %v12243_v25 = vld [vmem:[%s18363_s1 + $0x224] ss:$16 sps:$4 sm:$0xff]   ;;  %v12246_v27 = vld [vmem:[%s18363_s1 + $0x220] ss:$16 sps:$4 sm:$0xff]  }
  0x21   : > { %2159 = vmatpush1.bf16.msra.mxu0 %v12227_v14  ;;  %v12247_v28 = vld [vmem:[%s18363_s1 + $0x4] ss:$16 sps:$4 sm:$0xff]   ;;  %v12251_v30 = vld [vmem:[%s18363_s1] ss:$16 sps:$4 sm:$0xff]  }
  0x22   : > { %2200 = vmatpush1.bf16.msra.mxu1 %v12228_v15  ;;  %2160 = vmatprep.subr.bf16.mxu0 %v12229_v16  ;;  %v12249_v29 = vld [vmem:[%s18363_s1 + $0x204] ss:$16 sps:$4 sm:$0xff]   ;;  %v12252_v31 = vld [vmem:[%s18363_s1 + $0x200] ss:$16 sps:$4 sm:$0xff]  }
  0x23   : > { %2201 = vmatprep.subr.bf16.mxu1 %v12231_v17  ;;  %v12253_v32 = vld [vmem:[%s18363_s1 + $0x1e4] ss:$16 sps:$4 sm:$0xff]   ;;  %v12257_v34 = vld [vmem:[%s18363_s1 + $0x1e0] ss:$16 sps:$4 sm:$0xff]  }
  0x24   : > { %v12255_v33 = vld [vmem:[%s18363_s1 + $0x3e4] ss:$16 sps:$4 sm:$0xff]   ;;  %v12258_v35 = vld [vmem:[%s18363_s1 + $0x3e0] ss:$16 sps:$4 sm:$0xff]  }
  0x25   : > { %2161 = vmatpush1.bf16.msra.mxu0 %v12233_v18  ;;  %v12259_v36 = vld [vmem:[%s18363_s1 + $0x1c4] ss:$16 sps:$4 sm:$0xff]   ;;  %v12263_v38 = vld [vmem:[%s18363_s1 + $0x1c0] ss:$16 sps:$4 sm:$0xff]  }
  0x26   : > { %2202 = vmatpush1.bf16.msra.mxu1 %v12234_v19  ;;  %2162 = vmatprep.subr.bf16.mxu0 %v12235_v20  ;;  %v12261_v37 = vld [vmem:[%s18363_s1 + $0x3c4] ss:$16 sps:$4 sm:$0xff]   ;;  %v12264_v39 = vld [vmem:[%s18363_s1 + $0x3c0] ss:$16 sps:$4 sm:$0xff]  }
  0x27   : > { %2203 = vmatprep.subr.bf16.mxu1 %v12237_v21  ;;  %v12265_v40 = vld [vmem:[%s18363_s1 + $0x1a4] ss:$16 sps:$4 sm:$0xff]   ;;  %v12269_v42 = vld [vmem:[%s18363_s1 + $0x1a0] ss:$16 sps:$4 sm:$0xff]  }
  0x28   : > { %v12267_v41 = vld [vmem:[%s18363_s1 + $0x3a4] ss:$16 sps:$4 sm:$0xff]   ;;  %v12270_v43 = vld [vmem:[%s18363_s1 + $0x3a0] ss:$16 sps:$4 sm:$0xff]  }
  0x29   : > { %2163 = vmatpush1.bf16.msra.mxu0 %v12239_v22  ;;  %v12271_v44 = vld [vmem:[%s18363_s1 + $0x184] ss:$16 sps:$4 sm:$0xff]   ;;  %v12275_v49 = vld [vmem:[%s18363_s1 + $0x180] ss:$16 sps:$4 sm:$0xff]  }
  0x2a   : > { %2204 = vmatpush1.bf16.msra.mxu1 %v12240_v23  ;;  %2164 = vmatprep.subr.bf16.mxu0 %v12241_v24  ;;  %v12273_v45 = vld [vmem:[%s18363_s1 + $0x384] ss:$16 sps:$4 sm:$0xff]   ;;  %v12276_v50 = vld [vmem:[%s18363_s1 + $0x380] ss:$16 sps:$4 sm:$0xff]  }
  0x2b   : > { %2205 = vmatprep.subr.bf16.mxu1 %v12243_v25  ;;  %v332_v46 = vld [vmem:[%s14382_s14] sm:$0xff] }
  0x2c   : > { %v14391_v47 = vcombine.high %v332_v46, %v332_v46  ;;  %v12277_v52 = vld [vmem:[%s18363_s1 + $0x164] ss:$16 sps:$4 sm:$0xff]   ;;  %v12281_v54 = vld [vmem:[%s18363_s1 + $0x160] ss:$16 sps:$4 sm:$0xff]   ;;  %v14458_v6 = vcombine.low %v332_v46, %v332_v46 }
  0x2d   : > { %2165 = vmatpush1.bf16.msra.mxu0 %v12245_v26  ;;  %v12279_v53 = vld [vmem:[%s18363_s1 + $0x364] ss:$16 sps:$4 sm:$0xff]   ;;  %v12282_v55 = vld [vmem:[%s18363_s1 + $0x360] ss:$16 sps:$4 sm:$0xff]  }
  0x2e   : > { %2206 = vmatpush1.bf16.msra.mxu1 %v12246_v27  ;;  %2166 = vmatprep.subr.bf16.mxu0 %v12247_v28  ;;  %v12283_v56 = vld [vmem:[%s18363_s1 + $0x144] ss:$16 sps:$4 sm:$0xff]   ;;  %v12287_v58 = vld [vmem:[%s18363_s1 + $0x140] ss:$16 sps:$4 sm:$0xff]  }
  0x2f   : > { %2207 = vmatprep.subr.bf16.mxu1 %v12249_v29  ;;  %2184 = vmatprep.mubr.bf16.mxu0 %v14391_v47  ;;  %v12285_v57 = vld [vmem:[%s18363_s1 + $0x344] ss:$16 sps:$4 sm:$0xff]   ;;  %v12288_v59 = vld [vmem:[%s18363_s1 + $0x340] ss:$16 sps:$4 sm:$0xff]  }
  0x30   : > { %v12289_v60 = vld [vmem:[%s18363_s1 + $0x124] ss:$16 sps:$4 sm:$0xff]   ;;  %v12293_v62 = vld [vmem:[%s18363_s1 + $0x120] ss:$16 sps:$4 sm:$0xff]  }
  0x31   : > { %2167 = vmatpush1.bf16.msra.mxu0 %v12251_v30  ;;  %v12291_v61 = vld [vmem:[%s18363_s1 + $0x324] ss:$16 sps:$4 sm:$0xff]   ;;  %v12294_v63 = vld [vmem:[%s18363_s1 + $0x320] ss:$16 sps:$4 sm:$0xff]  }
  0x32   : > { %2208 = vmatpush1.bf16.msra.mxu1 %v12252_v31  ;;  %2168 = vmatprep.subr.bf16.mxu0 %v12253_v32  ;;  %v12295_v0 = vld [vmem:[%s18363_s1 + $0x104] ss:$16 sps:$4 sm:$0xff]   ;;  %v12299_v2 = vld [vmem:[%s18363_s1 + $0x100] ss:$16 sps:$4 sm:$0xff]  }
  0x33   : > { %2209 = vmatprep.subr.bf16.mxu1 %v12255_v33  ;;  %v12297_v1 = vld [vmem:[%s18363_s1 + $0x304] ss:$16 sps:$4 sm:$0xff]   ;;  %v12300_v3 = vld [vmem:[%s18363_s1 + $0x300] ss:$16 sps:$4 sm:$0xff]   ;;  %v14540_v33 = vld [vmem:[%s14382_s14 + $0x18] sm:$0xff] }
  0x34   : > { %v12307_v4 = vld [vmem:[%s18363_s1 + $0x4e4] ss:$16 sps:$4 sm:$0xff]   ;;  %v12305_v8 = vld [vmem:[%s18363_s1 + $0x4e0] ss:$16 sps:$4 sm:$0xff]  }
  0x35   : > { %2169 = vmatpush2.bf16.msra.mxu0 %v12257_v34  ;;  %v12310_v5 = vld [vmem:[%s18363_s1 + $0x6e4] ss:$16 sps:$4 sm:$0xff]   ;;  %v12308_v9 = vld [vmem:[%s18363_s1 + $0x6e0] ss:$16 sps:$4 sm:$0xff]  }
  0x36   : > { %2210 = vmatpush2.bf16.msra.mxu1 %v12258_v35  ;;  %2170 = vmatprep.subr.bf16.mxu0 %v12259_v36  ;;  %v12313_v10 = vld [vmem:[%s18363_s1 + $0x4c4] ss:$16 sps:$4 sm:$0xff]   ;;  %v12311_v12 = vld [vmem:[%s18363_s1 + $0x4c0] ss:$16 sps:$4 sm:$0xff]  }
  0x37   : > { %2211 = vmatprep.subr.bf16.mxu1 %v12261_v37  ;;  %v12316_v11 = vld [vmem:[%s18363_s1 + $0x6c4] ss:$16 sps:$4 sm:$0xff]   ;;  %v12314_v13 = vld [vmem:[%s18363_s1 + $0x6c0] ss:$16 sps:$4 sm:$0xff]   ;;  %v14554_v37 = vcombine.high %v14540_v33, %v14540_v33 }
  0x38   : > { %v12319_v14 = vld [vmem:[%s18363_s1 + $0x4a4] ss:$16 sps:$4 sm:$0xff]   ;;  %v12317_v16 = vld [vmem:[%s18363_s1 + $0x4a0] ss:$16 sps:$4 sm:$0xff]  }
  0x39   : > { %2171 = vmatpush2.bf16.msra.mxu0 %v12263_v38  ;;  %v12322_v15 = vld [vmem:[%s18363_s1 + $0x6a4] ss:$16 sps:$4 sm:$0xff]   ;;  %v12320_v17 = vld [vmem:[%s18363_s1 + $0x6a0] ss:$16 sps:$4 sm:$0xff]  }
  0x3a   : > { %2212 = vmatpush2.bf16.msra.mxu1 %v12264_v39  ;;  %2172 = vmatprep.subr.bf16.mxu0 %v12265_v40  ;;  %v12325_v18 = vld [vmem:[%s18363_s1 + $0x484] ss:$16 sps:$4 sm:$0xff]   ;;  %v12323_v20 = vld [vmem:[%s18363_s1 + $0x480] ss:$16 sps:$4 sm:$0xff]  }
  0x3b   : > { %2213 = vmatprep.subr.bf16.mxu1 %v12267_v41  ;;  %v12328_v19 = vld [vmem:[%s18363_s1 + $0x684] ss:$16 sps:$4 sm:$0xff]   ;;  %v12326_v21 = vld [vmem:[%s18363_s1 + $0x680] ss:$16 sps:$4 sm:$0xff]  }
  0x3c   : > { %v12331_v22 = vld [vmem:[%s18363_s1 + $0x464] ss:$16 sps:$4 sm:$0xff]   ;;  %v12329_v24 = vld [vmem:[%s18363_s1 + $0x460] ss:$16 sps:$4 sm:$0xff]  }
  0x3d   : > { %2173 = vmatpush2.bf16.msra.mxu0 %v12269_v42  ;;  %v12334_v23 = vld [vmem:[%s18363_s1 + $0x664] ss:$16 sps:$4 sm:$0xff]   ;;  %v12332_v25 = vld [vmem:[%s18363_s1 + $0x660] ss:$16 sps:$4 sm:$0xff]  }
  0x3e   : > { %2214 = vmatpush2.bf16.msra.mxu1 %v12270_v43  ;;  %2174 = vmatprep.subr.bf16.mxu0 %v12271_v44  ;;  %v12337_v26 = vld [vmem:[%s18363_s1 + $0x444] ss:$16 sps:$4 sm:$0xff]   ;;  %v12335_v28 = vld [vmem:[%s18363_s1 + $0x440] ss:$16 sps:$4 sm:$0xff]  }
  0x3f   : > { %2215 = vmatprep.subr.bf16.mxu1 %v12273_v45  ;;  %v12340_v27 = vld [vmem:[%s18363_s1 + $0x644] ss:$16 sps:$4 sm:$0xff]   ;;  %v12338_v29 = vld [vmem:[%s18363_s1 + $0x640] ss:$16 sps:$4 sm:$0xff]  }
  0x40   : > { %v12343_v30 = vld [vmem:[%s18363_s1 + $0x424] ss:$16 sps:$4 sm:$0xff]   ;;  %v12341_v34 = vld [vmem:[%s18363_s1 + $0x420] ss:$16 sps:$4 sm:$0xff]  }
  0x41   : > { %2175 = vmatpush2.bf16.msra.mxu0 %v12275_v49  ;;  %v12346_v31 = vld [vmem:[%s18363_s1 + $0x624] ss:$16 sps:$4 sm:$0xff]   ;;  %v12344_v35 = vld [vmem:[%s18363_s1 + $0x620] ss:$16 sps:$4 sm:$0xff]  }
  0x42   : > { %2216 = vmatpush2.bf16.msra.mxu1 %v12276_v50  ;;  %2176 = vmatprep.subr.bf16.mxu0 %v12277_v52  ;;  %v14537_v32 = vld [vmem:[%s14382_s14 + $0x10] sm:$0xff] }
  0x43   : > { %2217 = vmatprep.subr.bf16.mxu1 %v12279_v53  ;;  %v14550_v36 = vcombine.high %v14537_v32, %v14537_v32  ;;  %v12349_v38 = vld [vmem:[%s18363_s1 + $0x404] ss:$16 sps:$4 sm:$0xff]   ;;  %v12347_v40 = vld [vmem:[%s18363_s1 + $0x400] ss:$16 sps:$4 sm:$0xff]  }
  0x44   : > { %v12352_v39 = vld [vmem:[%s18363_s1 + $0x604] ss:$16 sps:$4 sm:$0xff]   ;;  %v12350_v41 = vld [vmem:[%s18363_s1 + $0x600] ss:$16 sps:$4 sm:$0xff]  }
  0x45   : > { %2177 = vmatpush2.bf16.msra.mxu0 %v12281_v54  ;;  %v12355_v42 = vld [vmem:[%s18363_s1 + $0x5e4] ss:$16 sps:$4 sm:$0xff]   ;;  %v12353_v44 = vld [vmem:[%s18363_s1 + $0x5e0] ss:$16 sps:$4 sm:$0xff]  }
  0x46   : > { %2218 = vmatpush2.bf16.msra.mxu1 %v12282_v55  ;;  %2178 = vmatprep.subr.bf16.mxu0 %v12283_v56  ;;  %v12358_v43 = vld [vmem:[%s18363_s1 + $0x7e4] ss:$16 sps:$4 sm:$0xff]   ;;  %v12356_v45 = vld [vmem:[%s18363_s1 + $0x7e0] ss:$16 sps:$4 sm:$0xff]  }
  0x47   : > { %2219 = vmatprep.subr.bf16.mxu1 %v12285_v57  ;;  %v12361_v46 = vld [vmem:[%s18363_s1 + $0x5c4] ss:$16 sps:$4 sm:$0xff]   ;;  %v12359_v49 = vld [vmem:[%s18363_s1 + $0x5c0] ss:$16 sps:$4 sm:$0xff]  }
  0x48   : > { %v12364_v48 = vld [vmem:[%s18363_s1 + $0x7c4] ss:$16 sps:$4 sm:$0xff]   ;;  %v12362_v50 = vld [vmem:[%s18363_s1 + $0x7c0] ss:$16 sps:$4 sm:$0xff]  }
  0x49   : > { %2179 = vmatpush2.bf16.msra.mxu0 %v12287_v58  ;;  %v12367_v52 = vld [vmem:[%s18363_s1 + $0x5a4] ss:$16 sps:$4 sm:$0xff]   ;;  %v12365_v54 = vld [vmem:[%s18363_s1 + $0x5a0] ss:$16 sps:$4 sm:$0xff]  }
  0x4a   : > { %2220 = vmatpush2.bf16.msra.mxu1 %v12288_v59  ;;  %2180 = vmatprep.subr.bf16.mxu0 %v12289_v60  ;;  %v12370_v53 = vld [vmem:[%s18363_s1 + $0x7a4] ss:$16 sps:$4 sm:$0xff]   ;;  %v12368_v55 = vld [vmem:[%s18363_s1 + $0x7a0] ss:$16 sps:$4 sm:$0xff]  }
  0x4b   : > { %2221 = vmatprep.subr.bf16.mxu1 %v12291_v61  ;;  %v12373_v56 = vld [vmem:[%s18363_s1 + $0x584] ss:$16 sps:$4 sm:$0xff]   ;;  %v12371_v58 = vld [vmem:[%s18363_s1 + $0x580] ss:$16 sps:$4 sm:$0xff]  }
  0x4c   : > { %v12376_v57 = vld [vmem:[%s18363_s1 + $0x784] ss:$16 sps:$4 sm:$0xff]   ;;  %v12374_v59 = vld [vmem:[%s18363_s1 + $0x780] ss:$16 sps:$4 sm:$0xff]  }
  0x4d   : > { %2181 = vmatpush2.bf16.msra.mxu0 %v12293_v62  ;;  %v12379_v60 = vld [vmem:[%s18363_s1 + $0x564] ss:$16 sps:$4 sm:$0xff]   ;;  %v12377_v62 = vld [vmem:[%s18363_s1 + $0x560] ss:$16 sps:$4 sm:$0xff]  }
  0x4e   : > { %2222 = vmatpush2.bf16.msra.mxu1 %v12294_v63  ;;  %2182 = vmatprep.subr.bf16.mxu0 %v12295_v0  ;;  %v12382_v61 = vld [vmem:[%s18363_s1 + $0x764] ss:$16 sps:$4 sm:$0xff]   ;;  %v12380_v63 = vld [vmem:[%s18363_s1 + $0x760] ss:$16 sps:$4 sm:$0xff]  }
  0x4f   : > { %2223 = vmatprep.subr.bf16.mxu1 %v12297_v1  ;;  %v12385_v0 = vld [vmem:[%s18363_s1 + $0x544] ss:$16 sps:$4 sm:$0xff]  }
  0x50   : > { %v12388_v1 = vld [vmem:[%s18363_s1 + $0x744] ss:$16 sps:$4 sm:$0xff]  }
  0x51   : > { %2183 = vmatpush2.bf16.msra.mxu0 %v12299_v2  ;;  %v12383_v2 = vld [vmem:[%s18363_s1 + $0x540] ss:$16 sps:$4 sm:$0xff]  }
  0x52   : > { %2224 = vmatpush2.bf16.msra.mxu1 %v12300_v3  ;;  %2234 = vmatprep.subr.bf16.mxu0 %v12307_v4  ;;  %v12386_v3 = vld [vmem:[%s18363_s1 + $0x740] ss:$16 sps:$4 sm:$0xff]   ;;  %v12391_v4 = vld [vmem:[%s18363_s1 + $0x524] ss:$16 sps:$4 sm:$0xff]  }
  0x53   : > { %2275 = vmatprep.subr.bf16.mxu1 %v12310_v5  ;;  %v12394_v5 = vld [vmem:[%s18363_s1 + $0x724] ss:$16 sps:$4 sm:$0xff]  }
  0x54   : > { %2185 = vmatmul.mubr.bf16.vlgmr.msra.gmra.mxu0 %v14458_v6 }
  0x55   : > { %2226 = vmatmul.mubr.bf16.vlgmr.msra.gmra.mxu1 %v14460_v7  ;;  %2235 = vmatpush1.bf16.msra.mxu0 %v12305_v8  ;;  %v12389_v8 = vld [vmem:[%s18363_s1 + $0x520] ss:$16 sps:$4 sm:$0xff]  }
  0x56   : > { %2276 = vmatpush1.bf16.msra.mxu1 %v12308_v9  ;;  %2236 = vmatprep.subr.bf16.mxu0 %v12313_v10  ;;  %v12392_v9 = vld [vmem:[%s18363_s1 + $0x720] ss:$16 sps:$4 sm:$0xff]   ;;  %v12397_v10 = vld [vmem:[%s18363_s1 + $0x504] ss:$16 sps:$4 sm:$0xff]  }
  0x57   : > { %2277 = vmatprep.subr.bf16.mxu1 %v12316_v11  ;;  %2266 = vmatprep.mubr.bf16.mxu0 %v14550_v36  ;;  %v12400_v11 = vld [vmem:[%s18363_s1 + $0x704] ss:$16 sps:$4 sm:$0xff]  }
  0x58   : > { %2307 = vmatprep.mubr.bf16.mxu1 %v14554_v37 }
  0x59   : > { %2237 = vmatpush1.bf16.msra.mxu0 %v12311_v12  ;;  %v12395_v12 = vld [vmem:[%s18363_s1 + $0x500] ss:$16 sps:$4 sm:$0xff]  }
  0x5a   : > { %2278 = vmatpush1.bf16.msra.mxu1 %v12314_v13  ;;  %2238 = vmatprep.subr.bf16.mxu0 %v12319_v14  ;;  %v12398_v13 = vld [vmem:[%s18363_s1 + $0x700] ss:$16 sps:$4 sm:$0xff]   ;;  %v12407_v14 = vld [vmem:[%s18363_s1 + $0x8e4] ss:$16 sps:$4 sm:$0xff]  }
  0x5b   : > { %2279 = vmatprep.subr.bf16.mxu1 %v12322_v15  ;;  %v12410_v15 = vld [vmem:[%s18363_s1 + $0xec] ss:$16 sps:$4 sm:$0xff]  }
  0x5d   : > { %2239 = vmatpush1.bf16.msra.mxu0 %v12317_v16  ;;  %v14674_v16 = vcombine.low %v14537_v32, %v14537_v32  ;;  %v12423_v32 = vld [vmem:[%s18363_s1 + $0x880] ss:$16 sps:$4 sm:$0xff]  }
  0x5e   : > { %2280 = vmatpush1.bf16.msra.mxu1 %v12320_v17  ;;  %2240 = vmatprep.subr.bf16.mxu0 %v12325_v18  ;;  %v14678_v17 = vcombine.low %v14540_v33, %v14540_v33  ;;  %v14681_v18 = vld [vmem:[%s14382_s14 + $0x20] sm:$0xff]  ;;  %v12426_v33 = vld [vmem:[%s18363_s1 + $0x88] ss:$16 sps:$4 sm:$0xff]   ;;  %s9874_s14 = sshll.u32 %s325_s23, 4  ;;  %s18323_s14 = int_to_ptr.vmem [resolvable:$true] %s9874_s14 }
  0x5f   : > { %2281 = vmatprep.subr.bf16.mxu1 %v12328_v19  ;;  %v12405_v19 = vld [vmem:[%s18363_s1 + $0x8e0] ss:$16 sps:$4 sm:$0xff]   ;;  %s14082_s26 = scalar_lea.vmem %s18323_s14, 128  ;;  %p14089_p0 = scmp.lt.s32.totalorder %s18323_s14, %s14087_s29 }
  0x60   : > { %p14083_p11 = scmp.ne.s32.totalorder %s18323_s14, %s14082_s26  ;;  %p14090_p1 = scmp.lt.s32.totalorder %s14088_s16, %s14082_s26 }
  0x61   : > { %2241 = vmatpush1.bf16.msra.mxu0 %v12323_v20  ;;  %v12408_v20 = vld [vmem:[%s18363_s1 + $0xe8] ss:$16 sps:$4 sm:$0xff]  }
  0x62   : > { %2282 = vmatpush1.bf16.msra.mxu1 %v12326_v21  ;;  %2242 = vmatprep.subr.bf16.mxu0 %v12331_v22  ;;  %v12413_v21 = vld [vmem:[%s18363_s1 + $0x8c4] ss:$16 sps:$4 sm:$0xff]   ;;  %v12416_v22 = vld [vmem:[%s18363_s1 + $0xcc] ss:$16 sps:$4 sm:$0xff]   ;;  %p14084_p12 = pnand %p14083_p11, %p14235_p5  ;;  %p14091_p2 = por %p14090_p1, %p14089_p0 }
  0x63   : > { %2283 = vmatprep.subr.bf16.mxu1 %v12334_v23  ;;  %v14697_v23 = vcombine.high %v14681_v18, %v14681_v18 }
  0x64   : > { %p14085_p13 = pneg %p14084_p12 }
  0x65   : > { %2243 = vmatpush1.bf16.msra.mxu0 %v12329_v24  ;;  %v12411_v24 = vld [vmem:[%s18363_s1 + $0x8c0] ss:$16 sps:$4 sm:$0xff]  }
  0x66   : > { %2284 = vmatpush1.bf16.msra.mxu1 %v12332_v25  ;;  %2244 = vmatprep.subr.bf16.mxu0 %v12337_v26  ;;  %v12414_v25 = vld [vmem:[%s18363_s1 + $0xc8] ss:$16 sps:$4 sm:$0xff]   ;;  %v12419_v26 = vld [vmem:[%s18363_s1 + $0x8a4] ss:$16 sps:$4 sm:$0xff]   ;;  %p14092_p3 = pnand %p14091_p2, %p14085_p13 }
  0x67   : > { %2285 = vmatprep.subr.bf16.mxu1 %v12340_v27  ;;  %v12422_v27 = vld [vmem:[%s18363_s1 + $0xac] ss:$16 sps:$4 sm:$0xff]  }
  0x69   : > { %2245 = vmatpush1.bf16.msra.mxu0 %v12335_v28  ;;  %v12417_v28 = vld [vmem:[%s18363_s1 + $0x8a0] ss:$16 sps:$4 sm:$0xff]  }
  0x6a   : > { %2286 = vmatpush1.bf16.msra.mxu1 %v12338_v29  ;;  %2246 = vmatprep.subr.bf16.mxu0 %v12343_v30  ;;  %v12420_v29 = vld [vmem:[%s18363_s1 + $0xa8] ss:$16 sps:$4 sm:$0xff]   ;;  %v12425_v30 = vld [vmem:[%s18363_s1 + $0x884] ss:$16 sps:$4 sm:$0xff]  }
  0x6b   : > { %2287 = vmatprep.subr.bf16.mxu1 %v12346_v31  ;;  %v12428_v31 = vld [vmem:[%s18363_s1 + $0x8c] ss:$16 sps:$4 sm:$0xff]  }
  0x6d   : > { %2247 = vmatpush1.bf16.msra.mxu0 %v12341_v34  ;;  %v12431_v34 = vld [vmem:[%s18363_s1 + $0x864] ss:$16 sps:$4 sm:$0xff]  }
  0x6e   : > { %2288 = vmatpush1.bf16.msra.mxu1 %v12344_v35  ;;  %2248 = vmatprep.subr.bf16.mxu0 %v12349_v38  ;;  %v12434_v35 = vld [vmem:[%s18363_s1 + $0x6c] ss:$16 sps:$4 sm:$0xff]   ;;  %v12429_v38 = vld [vmem:[%s18363_s1 + $0x860] ss:$16 sps:$4 sm:$0xff]  }
  0x6f   : > { %2289 = vmatprep.subr.bf16.mxu1 %v12352_v39  ;;  %v12432_v39 = vld [vmem:[%s18363_s1 + $0x68] ss:$16 sps:$4 sm:$0xff]  }
  0x71   : > { %2249 = vmatpush1.bf16.msra.mxu0 %v12347_v40  ;;  %v12437_v40 = vld [vmem:[%s18363_s1 + $0x844] ss:$16 sps:$4 sm:$0xff]  }
  0x72   : > { %2290 = vmatpush1.bf16.msra.mxu1 %v12350_v41  ;;  %2250 = vmatprep.subr.bf16.mxu0 %v12355_v42  ;;  %v12440_v41 = vld [vmem:[%s18363_s1 + $0x4c] ss:$16 sps:$4 sm:$0xff]   ;;  %v12435_v42 = vld [vmem:[%s18363_s1 + $0x840] ss:$16 sps:$4 sm:$0xff]  }
  0x73   : > { %2291 = vmatprep.subr.bf16.mxu1 %v12358_v43  ;;  %v12438_v43 = vld [vmem:[%s18363_s1 + $0x48] ss:$16 sps:$4 sm:$0xff]  }
  0x75   : > { %2251 = vmatpush2.bf16.msra.mxu0 %v12353_v44  ;;  %v12443_v44 = vld [vmem:[%s18363_s1 + $0x824] ss:$16 sps:$4 sm:$0xff]  }
  0x76   : > { %2292 = vmatpush2.bf16.msra.mxu1 %v12356_v45  ;;  %2252 = vmatprep.subr.bf16.mxu0 %v12361_v46  ;;  %v12446_v45 = vld [vmem:[%s18363_s1 + $0x2c] ss:$16 sps:$4 sm:$0xff]   ;;  %v12441_v46 = vld [vmem:[%s18363_s1 + $0x820] ss:$16 sps:$4 sm:$0xff]  }
  0x77   : > { %2293 = vmatprep.subr.bf16.mxu1 %v12364_v48  ;;  %v12444_v48 = vld [vmem:[%s18363_s1 + $0x28] ss:$16 sps:$4 sm:$0xff]  }
  0x79   : > { %2253 = vmatpush2.bf16.msra.mxu0 %v12359_v49  ;;  %v12449_v49 = vld [vmem:[%s18363_s1 + $0x804] ss:$16 sps:$4 sm:$0xff]  }
  0x7a   : > { %2294 = vmatpush2.bf16.msra.mxu1 %v12362_v50  ;;  %2254 = vmatprep.subr.bf16.mxu0 %v12367_v52  ;;  %v12452_v50 = vld [vmem:[%s18363_s1 + $0xc] ss:$16 sps:$4 sm:$0xff]   ;;  %v629_v52 = vld [vmem:[%s18363_s1 + $0x920] sm:$0xff] }
  0x7b   : > { %2295 = vmatprep.subr.bf16.mxu1 %v12370_v53  ;;  %v12447_v53 = vld [vmem:[%s18363_s1 + $0x800] ss:$16 sps:$4 sm:$0xff]  }
  0x7d   : > { %2255 = vmatpush2.bf16.msra.mxu0 %v12365_v54  ;;  %v12450_v54 = vld [vmem:[%s18363_s1 + $0x8] ss:$16 sps:$4 sm:$0xff]  }
  0x7e   : > { %2296 = vmatpush2.bf16.msra.mxu1 %v12368_v55  ;;  %2256 = vmatprep.subr.bf16.mxu0 %v12373_v56  ;;  %v10242_v55 = vcombine.high %v629_v52, %v629_v52  ;;  %v12456_v56 = vld [vmem:[%s18363_s1 + $0x1ec] ss:$16 sps:$4 sm:$0xff]  }
  0x7f   : > { %2297 = vmatprep.subr.bf16.mxu1 %v12376_v57  ;;  %v10241_v57 = vcombine.low %v629_v52, %v629_v52  ;;  %v12526_v52 = vld [vmem:[%s18363_s1 + $0x3a8] ss:$16 sps:$4 sm:$0xff]  }
  0x81   : > { %2257 = vmatpush2.bf16.msra.mxu0 %v12371_v58  ;;  %v12454_v58 = vld [vmem:[%s18363_s1 + $0x1e8] ss:$16 sps:$4 sm:$0xff]  }
  0x82   : > { %2298 = vmatpush2.bf16.msra.mxu1 %v12374_v59  ;;  %2258 = vmatprep.subr.bf16.mxu0 %v12379_v60  ;;  %v2141_v59 = vsel %vm2139_vm1, %v10241_v57, 0  ;;  %v12460_v60 = vld [vmem:[%s18363_s1 + $0x904] ss:$16 sps:$4 sm:$0xff]   ;;  %v12535_v57 = vld [vmem:[%s18363_s1 + $0x448] ss:$16 sps:$4 sm:$0xff]  }
  0x83   : > { %2299 = vmatprep.subr.bf16.mxu1 %v12382_v61  ;;  %v12463_v61 = vld [vmem:[%s18363_s1 + $0x1cc] ss:$16 sps:$4 sm:$0xff]  }
  0x85   : > { %2259 = vmatpush2.bf16.msra.mxu0 %v12377_v62  ;;  %v12458_v62 = vld [vmem:[%s18363_s1 + $0x900] ss:$16 sps:$4 sm:$0xff]  }
  0x86   : > { %2300 = vmatpush2.bf16.msra.mxu1 %v12380_v63  ;;  %2260 = vmatprep.subr.bf16.mxu0 %v12385_v0  ;;  %v12461_v63 = vld [vmem:[%s18363_s1 + $0x1c8] ss:$16 sps:$4 sm:$0xff]   ;;  %v12468_v0 = vld [vmem:[%s18363_s1 + $0x1ac] ss:$16 sps:$4 sm:$0xff]  }
  0x87   : > { %2301 = vmatprep.subr.bf16.mxu1 %v12388_v1  ;;  %v12471_v1 = vld [vmem:[%s18363_s1 + $0x2ec] ss:$16 sps:$4 sm:$0xff]  }
  0x89   : > { %2261 = vmatpush2.bf16.msra.mxu0 %v12383_v2  ;;  %v14813_v2 = vcombine.low %v14681_v18, %v14681_v18  ;;  %v12489_v18 = vld [vmem:[%s18363_s1 + $0x28c] ss:$16 sps:$4 sm:$0xff]  }
  0x8a   : > { %2302 = vmatpush2.bf16.msra.mxu1 %v12386_v3  ;;  %2262 = vmatprep.subr.bf16.mxu0 %v12391_v4  ;;  %v12466_v3 = vld [vmem:[%s18363_s1 + $0x1a8] ss:$16 sps:$4 sm:$0xff]  }
  0x8b   : > { %2303 = vmatprep.subr.bf16.mxu1 %v12394_v5  ;;  %v12469_v4 = vld [vmem:[%s18363_s1 + $0x2e8] ss:$16 sps:$4 sm:$0xff]   ;;  %v12474_v5 = vld [vmem:[%s18363_s1 + $0x18c] ss:$16 sps:$4 sm:$0xff]  }
  0x8d   : > { %2263 = vmatpush2.bf16.msra.mxu0 %v12389_v8  ;;  %v12477_v8 = vld [vmem:[%s18363_s1 + $0x2cc] ss:$16 sps:$4 sm:$0xff]  }
  0x8e   : > { %2304 = vmatpush2.bf16.msra.mxu1 %v12392_v9  ;;  %2264 = vmatprep.subr.bf16.mxu0 %v12397_v10  ;;  %v12472_v9 = vld [vmem:[%s18363_s1 + $0x188] ss:$16 sps:$4 sm:$0xff]  }
  0x8f   : > { %2305 = vmatprep.subr.bf16.mxu1 %v12400_v11  ;;  %v12475_v10 = vld [vmem:[%s18363_s1 + $0x2c8] ss:$16 sps:$4 sm:$0xff]   ;;  %v12480_v11 = vld [vmem:[%s18363_s1 + $0x16c] ss:$16 sps:$4 sm:$0xff]  }
  0x91   : > { %2265 = vmatpush2.bf16.msra.mxu0 %v12395_v12  ;;  %v12483_v12 = vld [vmem:[%s18363_s1 + $0x2ac] ss:$16 sps:$4 sm:$0xff]  }
  0x92   : > { %2306 = vmatpush2.bf16.msra.mxu1 %v12398_v13  ;;  %2316 = vmatprep.subr.bf16.mxu0 %v12407_v14  ;;  %v12478_v13 = vld [vmem:[%s18363_s1 + $0x168] ss:$16 sps:$4 sm:$0xff]  }
  0x93   : > { %2357 = vmatprep.subr.bf16.mxu1 %v12410_v15  ;;  %v12481_v14 = vld [vmem:[%s18363_s1 + $0x2a8] ss:$16 sps:$4 sm:$0xff]   ;;  %v12486_v15 = vld [vmem:[%s18363_s1 + $0x14c] ss:$16 sps:$4 sm:$0xff]  }
  0x94   : > { %2267 = vmatmul.mubr.bf16.vlgmr.msra.gmra.mxu0 %v14674_v16 }
  0x95   : > { %2308 = vmatmul.mubr.bf16.vlgmr.msra.gmra.mxu1 %v14678_v17  ;;  %2317 = vmatpush1.bf16.msra.mxu0 %v12405_v19  ;;  %v12484_v19 = vld [vmem:[%s18363_s1 + $0x148] ss:$16 sps:$4 sm:$0xff]  }
  0x96   : > { %2358 = vmatpush1.bf16.msra.mxu1 %v12408_v20  ;;  %2318 = vmatprep.subr.bf16.mxu0 %v12413_v21  ;;  %v12487_v20 = vld [vmem:[%s18363_s1 + $0x288] ss:$16 sps:$4 sm:$0xff]   ;;  %v12492_v21 = vld [vmem:[%s18363_s1 + $0x12c] ss:$16 sps:$4 sm:$0xff]  }
  0x97   : > { %2359 = vmatprep.subr.bf16.mxu1 %v12416_v22  ;;  %10246 = vmatprep.mubr.msk.bf16.mxu0 %vm2135_vm0, %v14697_v23  ;;  %v12495_v22 = vld [vmem:[%s18363_s1 + $0x26c] ss:$16 sps:$4 sm:$0xff]  }
  0x98   : > { %2389 = vmatprep.mubr.bf16.mxu1 %v14391_v47 }
  0x99   : > { %2319 = vmatpush1.bf16.msra.mxu0 %v12411_v24  ;;  %v12490_v24 = vld [vmem:[%s18363_s1 + $0x128] ss:$16 sps:$4 sm:$0xff]  }
  0x9a   : > { %2360 = vmatpush1.bf16.msra.mxu1 %v12414_v25  ;;  %2320 = vmatprep.subr.bf16.mxu0 %v12419_v26  ;;  %v12493_v25 = vld [vmem:[%s18363_s1 + $0x268] ss:$16 sps:$4 sm:$0xff]   ;;  %v12498_v26 = vld [vmem:[%s18363_s1 + $0x10c] ss:$16 sps:$4 sm:$0xff]  }
  0x9b   : > { %2361 = vmatprep.subr.bf16.mxu1 %v12422_v27  ;;  %v12501_v27 = vld [vmem:[%s18363_s1 + $0x24c] ss:$16 sps:$4 sm:$0xff]  }
  0x9d   : > { %2321 = vmatpush1.bf16.msra.mxu0 %v12417_v28  ;;  %v12496_v28 = vld [vmem:[%s18363_s1 + $0x108] ss:$16 sps:$4 sm:$0xff]  }
  0x9e   : > { %2362 = vmatpush1.bf16.msra.mxu1 %v12420_v29  ;;  %2322 = vmatprep.subr.bf16.mxu0 %v12425_v30  ;;  %v12499_v29 = vld [vmem:[%s18363_s1 + $0x248] ss:$16 sps:$4 sm:$0xff]   ;;  %v12504_v30 = vld [vmem:[%s18363_s1 + $0x22c] ss:$16 sps:$4 sm:$0xff]  }
  0x9f   : > { %2363 = vmatprep.subr.bf16.mxu1 %v12428_v31  ;;  %v12507_v31 = vld [vmem:[%s18363_s1 + $0x4ec] ss:$16 sps:$4 sm:$0xff]  }
  0xa1   : > { %2323 = vmatpush1.bf16.msra.mxu0 %v12423_v32  ;;  %v12502_v32 = vld [vmem:[%s18363_s1 + $0x228] ss:$16 sps:$4 sm:$0xff]  }
  0xa2   : > { %2364 = vmatpush1.bf16.msra.mxu1 %v12426_v33  ;;  %2324 = vmatprep.subr.bf16.mxu0 %v12431_v34  ;;  %v12505_v33 = vld [vmem:[%s18363_s1 + $0x4e8] ss:$16 sps:$4 sm:$0xff]   ;;  %v12510_v34 = vld [vmem:[%s18363_s1 + $0x20c] ss:$16 sps:$4 sm:$0xff]  }
  0xa3   : > { %2365 = vmatprep.subr.bf16.mxu1 %v12434_v35  ;;  %v12513_v35 = vld [vmem:[%s18363_s1 + $0x4cc] ss:$16 sps:$4 sm:$0xff]  }
  0xa5   : > { %2325 = vmatpush1.bf16.msra.mxu0 %v12429_v38  ;;  %v12508_v38 = vld [vmem:[%s18363_s1 + $0x208] ss:$16 sps:$4 sm:$0xff]  }
  0xa6   : > { %2366 = vmatpush1.bf16.msra.mxu1 %v12432_v39  ;;  %2326 = vmatprep.subr.bf16.mxu0 %v12437_v40  ;;  %v12511_v39 = vld [vmem:[%s18363_s1 + $0x4c8] ss:$16 sps:$4 sm:$0xff]   ;;  %v12516_v40 = vld [vmem:[%s18363_s1 + $0x3ec] ss:$16 sps:$4 sm:$0xff]  }
  0xa7   : > { %2367 = vmatprep.subr.bf16.mxu1 %v12440_v41  ;;  %v12519_v41 = vld [vmem:[%s18363_s1 + $0x4ac] ss:$16 sps:$4 sm:$0xff]  }
  0xa9   : > { %2327 = vmatpush1.bf16.msra.mxu0 %v12435_v42  ;;  %v12514_v42 = vld [vmem:[%s18363_s1 + $0x3e8] ss:$16 sps:$4 sm:$0xff]  }
  0xaa   : > { %2368 = vmatpush1.bf16.msra.mxu1 %v12438_v43  ;;  %2328 = vmatprep.subr.bf16.mxu0 %v12443_v44  ;;  %v12517_v43 = vld [vmem:[%s18363_s1 + $0x4a8] ss:$16 sps:$4 sm:$0xff]   ;;  %v12522_v44 = vld [vmem:[%s18363_s1 + $0x3cc] ss:$16 sps:$4 sm:$0xff]  }
  0xab   : > { %2369 = vmatprep.subr.bf16.mxu1 %v12446_v45  ;;  %v12525_v45 = vld [vmem:[%s18363_s1 + $0x48c] ss:$16 sps:$4 sm:$0xff]  }
  0xad   : > { %2329 = vmatpush1.bf16.msra.mxu0 %v12441_v46  ;;  %v12520_v46 = vld [vmem:[%s18363_s1 + $0x3c8] ss:$16 sps:$4 sm:$0xff]  }
  0xae   : > { %2370 = vmatpush1.bf16.msra.mxu1 %v12444_v48  ;;  %2330 = vmatprep.subr.bf16.mxu0 %v12449_v49  ;;  %v12523_v48 = vld [vmem:[%s18363_s1 + $0x488] ss:$16 sps:$4 sm:$0xff]   ;;  %v12528_v49 = vld [vmem:[%s18363_s1 + $0x3ac] ss:$16 sps:$4 sm:$0xff]  }
  0xaf   : > { %2371 = vmatprep.subr.bf16.mxu1 %v12452_v50  ;;  %v12531_v50 = vld [vmem:[%s18363_s1 + $0x46c] ss:$16 sps:$4 sm:$0xff]  }
  0xb1   : > { %2331 = vmatpush1.bf16.msra.mxu0 %v12447_v53  ;;  %v12529_v53 = vld [vmem:[%s18363_s1 + $0x468] ss:$16 sps:$4 sm:$0xff]  }
  0xb2   : > { %2372 = vmatpush1.bf16.msra.mxu1 %v12450_v54  ;;  %10245 = vmatprep.subr.msk.bf16.mxu0 %vm2139_vm1, %v10242_v55  ;;  %v12534_v54 = vld [vmem:[%s18363_s1 + $0x38c] ss:$16 sps:$4 sm:$0xff]  }
  0xb3   : > { %2373 = vmatprep.subr.bf16.mxu1 %v12456_v56  ;;  %v12537_v55 = vld [vmem:[%s18363_s1 + $0x44c] ss:$16 sps:$4 sm:$0xff]   ;;  %v12532_v56 = vld [vmem:[%s18363_s1 + $0x388] ss:$16 sps:$4 sm:$0xff]  }
  0xb5   : > { %2345 = vmatpush2.bf16.msra.mxu0 %v2141_v59  ;;  %v12543_v59 = vld [vmem:[%s18363_s1 + $0x42c] ss:$16 sps:$4 sm:$0xff]  }
  0xb6   : > { %2374 = vmatpush2.bf16.msra.mxu1 %v12454_v58  ;;  %2346 = vmatprep.subr.bf16.mxu0 %v12460_v60  ;;  %v12540_v58 = vld [vmem:[%s18363_s1 + $0x36c] ss:$16 sps:$4 sm:$0xff]   ;;  %v12538_v60 = vld [vmem:[%s18363_s1 + $0x368] ss:$16 sps:$4 sm:$0xff]  }
  0xb7   : > { %2375 = vmatprep.subr.bf16.mxu1 %v12463_v61  ;;  %v12541_v61 = vld [vmem:[%s18363_s1 + $0x428] ss:$16 sps:$4 sm:$0xff]  }
  0xb9   : > { %2347 = vmatpush2.bf16.msra.mxu0 %v12458_v62  ;;  %v12546_v62 = vld [vmem:[%s18363_s1 + $0x34c] ss:$16 sps:$4 sm:$0xff]  }
  0xba   : > { %2376 = vmatpush2.bf16.msra.mxu1 %v12461_v63  ;;  %2398 = vmatprep.subr.bf16.mxu0 %v12471_v1  ;;  %v12549_v63 = vld [vmem:[%s18363_s1 + $0x40c] ss:$16 sps:$4 sm:$0xff]   ;;  %v12547_v1 = vld [vmem:[%s18363_s1 + $0x408] ss:$16 sps:$4 sm:$0xff]  }
  0xbb   : > { %2377 = vmatprep.subr.bf16.mxu1 %v12468_v0  ;;  %v12544_v0 = vld [vmem:[%s18363_s1 + $0x348] ss:$16 sps:$4 sm:$0xff]  }
  0xbc   : > { %2349 = vmatmul.mubr.bf16.vlgmr.msra.gmra.mxu0 %v14813_v2 }
  0xbd   : > { %2399 = vmatpush1.bf16.msra.mxu0 %v12469_v4  ;;  %2430 = vmatprep.mubr.bf16.mxu0 %v14400_v51  ;;  %v12555_v4 = vld [vmem:[%s18363_s1 + $0x5ec] ss:$16 sps:$4 sm:$0xff]  }
  0xbe   : > { %2378 = vmatpush2.bf16.msra.mxu1 %v12466_v3  ;;  %2400 = vmatprep.subr.bf16.mxu0 %v12477_v8  ;;  %v12552_v3 = vld [vmem:[%s18363_s1 + $0x32c] ss:$16 sps:$4 sm:$0xff]   ;;  %v12553_v8 = vld [vmem:[%s18363_s1 + $0x5e8] ss:$16 sps:$4 sm:$0xff]  }
  0xbf   : > { %2379 = vmatprep.subr.bf16.mxu1 %v12474_v5  ;;  %v12550_v5 = vld [vmem:[%s18363_s1 + $0x328] ss:$16 sps:$4 sm:$0xff]  }
  0xc1   : > { %2401 = vmatpush1.bf16.msra.mxu0 %v12475_v10  ;;  %v12561_v10 = vld [vmem:[%s18363_s1 + $0x5cc] ss:$16 sps:$4 sm:$0xff]  }
  0xc2   : > { %2380 = vmatpush2.bf16.msra.mxu1 %v12472_v9  ;;  %2402 = vmatprep.subr.bf16.mxu0 %v12483_v12  ;;  %v12558_v9 = vld [vmem:[%s18363_s1 + $0x30c] ss:$16 sps:$4 sm:$0xff]   ;;  %v12559_v12 = vld [vmem:[%s18363_s1 + $0x5c8] ss:$16 sps:$4 sm:$0xff]  }
  0xc3   : > { %2381 = vmatprep.subr.bf16.mxu1 %v12480_v11  ;;  %v12556_v11 = vld [vmem:[%s18363_s1 + $0x308] ss:$16 sps:$4 sm:$0xff]  }
  0xc5   : > { %2403 = vmatpush1.bf16.msra.mxu0 %v12481_v14  ;;  %v12567_v14 = vld [vmem:[%s18363_s1 + $0x6ec] ss:$16 sps:$4 sm:$0xff]  }
  0xc6   : > { %2382 = vmatpush2.bf16.msra.mxu1 %v12478_v13  ;;  %2404 = vmatprep.subr.bf16.mxu0 %v12489_v18  ;;  %v12564_v13 = vld [vmem:[%s18363_s1 + $0x5ac] ss:$16 sps:$4 sm:$0xff]   ;;  %v12565_v18 = vld [vmem:[%s18363_s1 + $0x6e8] ss:$16 sps:$4 sm:$0xff]  }
  0xc7   : > { %2383 = vmatprep.subr.bf16.mxu1 %v12486_v15  ;;  %v12562_v15 = vld [vmem:[%s18363_s1 + $0x5a8] ss:$16 sps:$4 sm:$0xff]  }
  0xc9   : > { %2405 = vmatpush1.bf16.msra.mxu0 %v12487_v20  ;;  %v12573_v20 = vld [vmem:[%s18363_s1 + $0x6cc] ss:$16 sps:$4 sm:$0xff]  }
  0xca   : > { %2384 = vmatpush2.bf16.msra.mxu1 %v12484_v19  ;;  %2406 = vmatprep.subr.bf16.mxu0 %v12495_v22  ;;  %v12570_v19 = vld [vmem:[%s18363_s1 + $0x58c] ss:$16 sps:$4 sm:$0xff]   ;;  %v12571_v22 = vld [vmem:[%s18363_s1 + $0x6c8] ss:$16 sps:$4 sm:$0xff]  }
  0xcb   : > { %2385 = vmatprep.subr.bf16.mxu1 %v12492_v21  ;;  %v12568_v21 = vld [vmem:[%s18363_s1 + $0x588] ss:$16 sps:$4 sm:$0xff]  }
  0xcd   : > { %2407 = vmatpush1.bf16.msra.mxu0 %v12493_v25  ;;  %v12579_v25 = vld [vmem:[%s18363_s1 + $0x6ac] ss:$16 sps:$4 sm:$0xff]  }
  0xce   : > { %2386 = vmatpush2.bf16.msra.mxu1 %v12490_v24  ;;  %2408 = vmatprep.subr.bf16.mxu0 %v12501_v27  ;;  %v12576_v24 = vld [vmem:[%s18363_s1 + $0x56c] ss:$16 sps:$4 sm:$0xff]   ;;  %v12577_v27 = vld [vmem:[%s18363_s1 + $0x6a8] ss:$16 sps:$4 sm:$0xff]  }
  0xcf   : > { %2387 = vmatprep.subr.bf16.mxu1 %v12498_v26  ;;  %v12574_v26 = vld [vmem:[%s18363_s1 + $0x568] ss:$16 sps:$4 sm:$0xff]  }
  0xd1   : > { %2409 = vmatpush1.bf16.msra.mxu0 %v12499_v29  ;;  %v12585_v29 = vld [vmem:[%s18363_s1 + $0x68c] ss:$16 sps:$4 sm:$0xff]  }
  0xd2   : > { %2388 = vmatpush2.bf16.msra.mxu1 %v12496_v28  ;;  %2410 = vmatprep.subr.bf16.mxu0 %v12504_v30  ;;  %v12582_v28 = vld [vmem:[%s18363_s1 + $0x54c] ss:$16 sps:$4 sm:$0xff]   ;;  %v12580_v30 = vld [vmem:[%s18363_s1 + $0x548] ss:$16 sps:$4 sm:$0xff]  }
  0xd3   : > { %2439 = vmatprep.subr.bf16.mxu1 %v12507_v31  ;;  %v12583_v31 = vld [vmem:[%s18363_s1 + $0x688] ss:$16 sps:$4 sm:$0xff]  }
  0xd5   : > { %2390 = vmatmul.mubr.bf16.vlgmr.msra.gmra.mxu1 %v14458_v6  ;;  %2411 = vmatpush1.bf16.msra.mxu0 %v12502_v32  ;;  %v12588_v32 = vld [vmem:[%s18363_s1 + $0x52c] ss:$16 sps:$4 sm:$0xff]  }
  0xd6   : > { %2440 = vmatpush1.bf16.msra.mxu1 %v12505_v33  ;;  %2412 = vmatprep.subr.bf16.mxu0 %v12510_v34  ;;  %v12591_v33 = vld [vmem:[%s18363_s1 + $0x66c] ss:$16 sps:$4 sm:$0xff]   ;;  %v12586_v34 = vld [vmem:[%s18363_s1 + $0x528] ss:$16 sps:$4 sm:$0xff]  }
  0xd7   : > { %2441 = vmatprep.subr.bf16.mxu1 %v12513_v35  ;;  %2471 = vmatprep.mubr.bf16.mxu1 %v14550_v36  ;;  %v12589_v35 = vld [vmem:[%s18363_s1 + $0x668] ss:$16 sps:$4 sm:$0xff]  }
  0xd9   : > { %2413 = vmatpush1.bf16.msra.mxu0 %v12508_v38  ;;  %v12594_v38 = vld [vmem:[%s18363_s1 + $0x50c] ss:$16 sps:$4 sm:$0xff]  }
  0xda   : > { %2442 = vmatpush1.bf16.msra.mxu1 %v12511_v39  ;;  %2414 = vmatprep.subr.bf16.mxu0 %v12516_v40  ;;  %v12597_v39 = vld [vmem:[%s18363_s1 + $0x64c] ss:$16 sps:$4 sm:$0xff]   ;;  %v12592_v40 = vld [vmem:[%s18363_s1 + $0x508] ss:$16 sps:$4 sm:$0xff]  }
  0xdb   : > { %2443 = vmatprep.subr.bf16.mxu1 %v12519_v41  ;;  %v12595_v41 = vld [vmem:[%s18363_s1 + $0x648] ss:$16 sps:$4 sm:$0xff]  }
  0xdd   : > { %2415 = vmatpush2.bf16.msra.mxu0 %v12514_v42  ;;  %v12600_v42 = vld [vmem:[%s18363_s1 + $0x62c] ss:$16 sps:$4 sm:$0xff]  }
  0xde   : > { %2444 = vmatpush1.bf16.msra.mxu1 %v12517_v43  ;;  %2416 = vmatprep.subr.bf16.mxu0 %v12522_v44  ;;  %v12603_v43 = vld [vmem:[%s18363_s1 + $0x8ec] ss:$16 sps:$4 sm:$0xff]   ;;  %v12598_v44 = vld [vmem:[%s18363_s1 + $0x628] ss:$16 sps:$4 sm:$0xff]  }
  0xdf   : > { %2445 = vmatprep.subr.bf16.mxu1 %v12525_v45  ;;  %v12601_v45 = vld [vmem:[%s18363_s1 + $0x8e8] ss:$16 sps:$4 sm:$0xff]  }
  0xe1   : > { %2417 = vmatpush2.bf16.msra.mxu0 %v12520_v46  ;;  %v12606_v46 = vld [vmem:[%s18363_s1 + $0x60c] ss:$16 sps:$4 sm:$0xff]  }
  0xe2   : > { %2446 = vmatpush1.bf16.msra.mxu1 %v12523_v48  ;;  %2418 = vmatprep.subr.bf16.mxu0 %v12528_v49  ;;  %v12609_v48 = vld [vmem:[%s18363_s1 + $0x8cc] ss:$16 sps:$4 sm:$0xff]   ;;  %v12604_v49 = vld [vmem:[%s18363_s1 + $0x608] ss:$16 sps:$4 sm:$0xff]  }
  0xe3   : > { %2447 = vmatprep.subr.bf16.mxu1 %v12531_v50  ;;  %v12607_v50 = vld [vmem:[%s18363_s1 + $0x8c8] ss:$16 sps:$4 sm:$0xff]  }
  0xe5   : > { %2419 = vmatpush2.bf16.msra.mxu0 %v12526_v52 }
  0xe6   : > { %2448 = vmatpush1.bf16.msra.mxu1 %v12529_v53  ;;  %2420 = vmatprep.subr.bf16.mxu0 %v12534_v54 }
  0xe7   : > { %2449 = vmatprep.subr.bf16.mxu1 %v12537_v55 }
  0xe9   : > { %2421 = vmatpush2.bf16.msra.mxu0 %v12532_v56 }
  0xea   : > { %2450 = vmatpush1.bf16.msra.mxu1 %v12535_v57  ;;  %2422 = vmatprep.subr.bf16.mxu0 %v12540_v58  ;;  %v12612_v57 = vld [vmem:[%s18363_s1 + $0x7ec] ss:$16 sps:$4 sm:$0xff]  }
  0xeb   : > { %2451 = vmatprep.subr.bf16.mxu1 %v12543_v59  ;;  %v12615_v58 = vld [vmem:[%s18363_s1 + $0x8ac] ss:$16 sps:$4 sm:$0xff]  }
  0xed   : > { %2423 = vmatpush2.bf16.msra.mxu0 %v12538_v60  ;;  %v12610_v60 = vld [vmem:[%s18363_s1 + $0x7e8] ss:$16 sps:$4 sm:$0xff]  }
  0xee   : > { %2452 = vmatpush1.bf16.msra.mxu1 %v12541_v61  ;;  %2424 = vmatprep.subr.bf16.mxu0 %v12546_v62  ;;  %v12613_v61 = vld [vmem:[%s18363_s1 + $0x8a8] ss:$16 sps:$4 sm:$0xff]  }
  0xef   : > { %2453 = vmatprep.subr.bf16.mxu1 %v12549_v63 }
  0xf1   : > { %2425 = vmatpush2.bf16.msra.mxu0 %v12544_v0 }
  0xf2   : > { %2454 = vmatpush1.bf16.msra.mxu1 %v12547_v1  ;;  %2426 = vmatprep.subr.bf16.mxu0 %v12552_v3  ;;  %v12618_v3 = vld [vmem:[%s18363_s1 + $0x7cc] ss:$16 sps:$4 sm:$0xff]  }
  0xf3   : > { %2455 = vmatprep.subr.bf16.mxu1 %v12555_v4  ;;  %v12621_v4 = vld [vmem:[%s18363_s1 + $0x88c] ss:$16 sps:$4 sm:$0xff]  }
  0xf5   : > { %2427 = vmatpush2.bf16.msra.mxu0 %v12550_v5  ;;  %v12616_v5 = vld [vmem:[%s18363_s1 + $0x7c8] ss:$16 sps:$4 sm:$0xff]  }
  0xf6   : > { %2456 = vmatpush2.bf16.msra.mxu1 %v12553_v8  ;;  %2428 = vmatprep.subr.bf16.mxu0 %v12558_v9  ;;  %v12619_v8 = vld [vmem:[%s18363_s1 + $0x888] ss:$16 sps:$4 sm:$0xff]   ;;  %v12624_v9 = vld [vmem:[%s18363_s1 + $0x7ac] ss:$16 sps:$4 sm:$0xff]  }
  0xf7   : > { %2457 = vmatprep.subr.bf16.mxu1 %v12561_v10  ;;  %v12627_v10 = vld [vmem:[%s18363_s1 + $0x86c] ss:$16 sps:$4 sm:$0xff]  }
  0xf9   : > { %2429 = vmatpush2.bf16.msra.mxu0 %v12556_v11  ;;  %v12622_v11 = vld [vmem:[%s18363_s1 + $0x7a8] ss:$16 sps:$4 sm:$0xff]  }
  0xfa   : > { %2458 = vmatpush2.bf16.msra.mxu1 %v12559_v12  ;;  %2480 = vmatprep.subr.bf16.mxu0 %v12567_v14  ;;  %v12625_v12 = vld [vmem:[%s18363_s1 + $0x868] ss:$16 sps:$4 sm:$0xff]   ;;  %v12633_v14 = vld [vmem:[%s18363_s1 + $0x84c] ss:$16 sps:$4 sm:$0xff]  }
  0xfb   : > { %2459 = vmatprep.subr.bf16.mxu1 %v12564_v13  ;;  %v12630_v13 = vld [vmem:[%s18363_s1 + $0x78c] ss:$16 sps:$4 sm:$0xff]  }
  0xfc   : > { %2431 = vmatmul.mubr.bf16.vlgmr.msra.gmra.mxu0 %v14460_v7 }
  0xfd   : > { %2481 = vmatpush1.bf16.msra.mxu0 %v12565_v18  ;;  %2512 = vmatprep.mubr.bf16.mxu0 %v14554_v37  ;;  %v12631_v18 = vld [vmem:[%s18363_s1 + $0x848] ss:$16 sps:$4 sm:$0xff]  }
  0xfe   : > { %2460 = vmatpush2.bf16.msra.mxu1 %v12562_v15  ;;  %2482 = vmatprep.subr.bf16.mxu0 %v12573_v20  ;;  %v12628_v15 = vld [vmem:[%s18363_s1 + $0x788] ss:$16 sps:$4 sm:$0xff]   ;;  %v12639_v20 = vld [vmem:[%s18363_s1 + $0x82c] ss:$16 sps:$4 sm:$0xff]  }
  0xff   : > { %2461 = vmatprep.subr.bf16.mxu1 %v12570_v19  ;;  %v12636_v19 = vld [vmem:[%s18363_s1 + $0x76c] ss:$16 sps:$4 sm:$0xff]  }
 0x101   : > { %2483 = vmatpush1.bf16.msra.mxu0 %v12571_v22  ;;  %v12637_v22 = vld [vmem:[%s18363_s1 + $0x828] ss:$16 sps:$4 sm:$0xff]  }
 0x102   : > { %2462 = vmatpush2.bf16.msra.mxu1 %v12568_v21  ;;  %2484 = vmatprep.subr.bf16.mxu0 %v12579_v25  ;;  %v12634_v21 = vld [vmem:[%s18363_s1 + $0x768] ss:$16 sps:$4 sm:$0xff]   ;;  %v12645_v25 = vld [vmem:[%s18363_s1 + $0x80c] ss:$16 sps:$4 sm:$0xff]  }
 0x103   : > { %2463 = vmatprep.subr.bf16.mxu1 %v12576_v24  ;;  %v12642_v24 = vld [vmem:[%s18363_s1 + $0x74c] ss:$16 sps:$4 sm:$0xff]  }
 0x105   : > { %2485 = vmatpush1.bf16.msra.mxu0 %v12577_v27  ;;  %v12640_v27 = vld [vmem:[%s18363_s1 + $0x748] ss:$16 sps:$4 sm:$0xff]  }
 0x106   : > { %2464 = vmatpush2.bf16.msra.mxu1 %v12574_v26  ;;  %2486 = vmatprep.subr.bf16.mxu0 %v12585_v29  ;;  %v630_v26 = vld [vmem:[%s18363_s1 + $0x928] sm:$0xff] }
 0x107   : > { %2465 = vmatprep.subr.bf16.mxu1 %v12582_v28  ;;  %v12643_v28 = vld [vmem:[%s18363_s1 + $0x808] ss:$16 sps:$4 sm:$0xff]   ;;  %v12648_v29 = vld [vmem:[%s18363_s1 + $0x72c] ss:$16 sps:$4 sm:$0xff]  }
 0x109   : > { %2487 = vmatpush1.bf16.msra.mxu0 %v12583_v31  ;;  %v10243_v31 = vcombine.low %v630_v26, %v630_v26 }
 0x10a   : > { %2466 = vmatpush2.bf16.msra.mxu1 %v12580_v30  ;;  %2488 = vmatprep.subr.bf16.mxu0 %v12591_v33  ;;  %v10244_v30 = vcombine.high %v630_v26, %v630_v26 }
 0x10b   : > { %2467 = vmatprep.subr.bf16.mxu1 %v12588_v32  ;;  %v12646_v32 = vld [vmem:[%s18363_s1 + $0x728] ss:$16 sps:$4 sm:$0xff]   ;;  %v2147_v33 = vsel %vm2139_vm1, %v10243_v31, 0 }
 0x10d   : > { %2489 = vmatpush1.bf16.msra.mxu0 %v12589_v35  ;;  %v12656_v35 = vld [vmem:[%s18363_s1 + $0x90c] ss:$16 sps:$4 sm:$0xff]  }
 0x10e   : > { %2468 = vmatpush2.bf16.msra.mxu1 %v12586_v34  ;;  %2490 = vmatprep.subr.bf16.mxu0 %v12597_v39  ;;  %v12653_v34 = vld [vmem:[%s18363_s1 + $0x70c] ss:$16 sps:$4 sm:$0xff]   ;;  %v12654_v39 = vld [vmem:[%s18363_s1 + $0x908] ss:$16 sps:$4 sm:$0xff]  }
 0x10f   : > { %2469 = vmatprep.subr.bf16.mxu1 %v12594_v38  ;;  %v12651_v38 = vld [vmem:[%s18363_s1 + $0x708] ss:$16 sps:$4 sm:$0xff]  }
 0x111   : > { %2491 = vmatpush1.bf16.msra.mxu0 %v12595_v41  ;;  %v12662_v41 = vld [vmem:[%s18363_s1 + $0xc14] ss:$16 sps:$4 sm:$0xff]  }
 0x112   : > { %2470 = vmatpush2.bf16.msra.mxu1 %v12592_v40  ;;  %2492 = vmatprep.subr.bf16.mxu0 %v12600_v42  ;;  %v12659_v40 = vld [vmem:[%s18363_s1 + $0xa14] ss:$16 sps:$4 sm:$0xff]   ;;  %v12657_v42 = vld [vmem:[%s18363_s1 + $0xa10] ss:$16 sps:$4 sm:$0xff]  }
 0x113   : > { %2521 = vmatprep.subr.bf16.mxu1 %v12603_v43  ;;  %v12660_v43 = vld [vmem:[%s18363_s1 + $0xc10] ss:$16 sps:$4 sm:$0xff]  }
 0x114   : > { %v2186_v52 = vpop.f32.mrf.mxu0 }
 0x115   : > { %v2227_v53 = vpop.f32.mrf.mxu1  ;;  %2472 = vmatmul.mubr.bf16.vlgmr.msra.gmra.mxu1 %v14674_v16  ;;  %2493 = vmatpush1.bf16.msra.mxu0 %v12598_v44  ;;  %v12665_v44 = vld [vmem:[%s18363_s1 + $0x9f4] ss:$16 sps:$4 sm:$0xff]  }
 0x116   : > { %v15104_v54 = vadd.f32 %v2227_v53, %v2186_v52  ;;  %2522 = vmatpush1.bf16.msra.mxu1 %v12601_v45  ;;  %v2188_v55 = vpop.f32.mrf.mxu0  ;;  %2494 = vmatprep.subr.bf16.mxu0 %v12606_v46  ;;  %v12668_v45 = vld [vmem:[%s18363_s1 + $0xbf4] ss:$16 sps:$4 sm:$0xff]   ;;  %v12663_v46 = vld [vmem:[%s18363_s1 + $0x9f0] ss:$16 sps:$4 sm:$0xff]  }
 0x117   : > { %v2229_v56 = vpop.f32.mrf.mxu1  ;;  %2523 = vmatprep.subr.bf16.mxu1 %v12609_v48  ;;  %10248 = vmatprep.mubr.msk.bf16.mxu1 %vm2135_vm0, %v14697_v23  ;;  %v12666_v48 = vld [vmem:[%s18363_s1 + $0xbf0] ss:$16 sps:$4 sm:$0xff]  }
 0x118   : > { %v15112_v59 = vadd.f32 %v2229_v56, %v2188_v55  ;;  %v2190_v62 = vpop.f32.mrf.mxu0  ;;  %v12669_v52 = vld [vmem:[%s18363_s1 + $0x9d0] ss:$16 sps:$4 sm:$0xff]   ;;  %v12677_v55 = vld [vmem:[%s18363_s1 + $0x9b4] ss:$16 sps:$4 sm:$0xff]  }
 0x119   : > { %v2231_v63 = vpop.f32.mrf.mxu1  ;;  %2495 = vmatpush1.bf16.msra.mxu0 %v12604_v49  ;;  %v12671_v49 = vld [vmem:[%s18363_s1 + $0x9d4] ss:$16 sps:$4 sm:$0xff]   ;;  %v12672_v53 = vld [vmem:[%s18363_s1 + $0xbd0] ss:$16 sps:$4 sm:$0xff]  }
 0x11a   : > { %2524 = vmatpush1.bf16.msra.mxu1 %v12607_v50  ;;  %v2191_v0 = vpop.f32.mrf.mxu0  ;;  %2496 = vmatprep.subr.bf16.mxu0 %v12612_v57  ;;  %v12674_v50 = vld [vmem:[%s18363_s1 + $0xbd4] ss:$16 sps:$4 sm:$0xff]   ;;  %v12675_v57 = vld [vmem:[%s18363_s1 + $0x9b0] ss:$16 sps:$4 sm:$0xff]  }
 0x11b   : > { %v2232_v1 = vpop.f32.mrf.mxu1  ;;  %2525 = vmatprep.subr.bf16.mxu1 %v12615_v58  ;;  %v12680_v56 = vld [vmem:[%s18363_s1 + $0xbb4] ss:$16 sps:$4 sm:$0xff]   ;;  %v12678_v58 = vld [vmem:[%s18363_s1 + $0xbb0] ss:$16 sps:$4 sm:$0xff]  }
 0x11c   : > { %v12681_v62 = vld [vmem:[%s18363_s1 + $0x990] ss:$16 sps:$4 sm:$0xff]   ;;  %v12689_v0 = vld [vmem:[%s18363_s1 + $0x974] ss:$16 sps:$4 sm:$0xff]  }
 0x11d   : > { %2497 = vmatpush2.bf16.msra.mxu0 %v12610_v60  ;;  %v12683_v60 = vld [vmem:[%s18363_s1 + $0x994] ss:$16 sps:$4 sm:$0xff]   ;;  %v12684_v63 = vld [vmem:[%s18363_s1 + $0xb90] ss:$16 sps:$4 sm:$0xff]  }
 0x11e   : > { %2526 = vmatpush1.bf16.msra.mxu1 %v12613_v61  ;;  %2498 = vmatprep.subr.bf16.mxu0 %v12618_v3  ;;  %v12686_v61 = vld [vmem:[%s18363_s1 + $0xb94] ss:$16 sps:$4 sm:$0xff]   ;;  %v12687_v3 = vld [vmem:[%s18363_s1 + $0x970] ss:$16 sps:$4 sm:$0xff]  }
 0x11f   : > { %2527 = vmatprep.subr.bf16.mxu1 %v12621_v4  ;;  %v12692_v1 = vld [vmem:[%s18363_s1 + $0xb74] ss:$16 sps:$4 sm:$0xff]   ;;  %v12690_v4 = vld [vmem:[%s18363_s1 + $0xb70] ss:$16 sps:$4 sm:$0xff]  }
 0x121   : > { %2499 = vmatpush2.bf16.msra.mxu0 %v12616_v5  ;;  %v12695_v5 = vld [vmem:[%s18363_s1 + $0x954] ss:$16 sps:$4 sm:$0xff]  }
 0x122   : > { %2528 = vmatpush1.bf16.msra.mxu1 %v12619_v8  ;;  %2500 = vmatprep.subr.bf16.mxu0 %v12624_v9  ;;  %v12698_v8 = vld [vmem:[%s18363_s1 + $0xb54] ss:$16 sps:$4 sm:$0xff]   ;;  %v12693_v9 = vld [vmem:[%s18363_s1 + $0x950] ss:$16 sps:$4 sm:$0xff]  }
 0x123   : > { %2529 = vmatprep.subr.bf16.mxu1 %v12627_v10  ;;  %v12696_v10 = vld [vmem:[%s18363_s1 + $0xb50] ss:$16 sps:$4 sm:$0xff]  }
 0x125   : > { %2501 = vmatpush2.bf16.msra.mxu0 %v12622_v11  ;;  %v12701_v11 = vld [vmem:[%s18363_s1 + $0x934] ss:$16 sps:$4 sm:$0xff]  }
 0x126   : > { %2530 = vmatpush1.bf16.msra.mxu1 %v12625_v12  ;;  %2502 = vmatprep.subr.bf16.mxu0 %v12630_v13  ;;  %v12704_v12 = vld [vmem:[%s18363_s1 + $0xb34] ss:$16 sps:$4 sm:$0xff]   ;;  %v12699_v13 = vld [vmem:[%s18363_s1 + $0x930] ss:$16 sps:$4 sm:$0xff]  }
 0x127   : > { %2531 = vmatprep.subr.bf16.mxu1 %v12633_v14  ;;  %v12702_v14 = vld [vmem:[%s18363_s1 + $0xb30] ss:$16 sps:$4 sm:$0xff]  }
 0x129   : > { %2503 = vmatpush2.bf16.msra.mxu0 %v12628_v15 }
 0x12a   : > { %2532 = vmatpush1.bf16.msra.mxu1 %v12631_v18  ;;  %2504 = vmatprep.subr.bf16.mxu0 %v12636_v19 }
 0x12b   : > { %2533 = vmatprep.subr.bf16.mxu1 %v12639_v20 }
 0x12d   : > { %2505 = vmatpush2.bf16.msra.mxu0 %v12634_v21 }
 0x12e   : > { %2534 = vmatpush1.bf16.msra.mxu1 %v12637_v22  ;;  %2506 = vmatprep.subr.bf16.mxu0 %v12642_v24  ;;  %v12707_v22 = vld [vmem:[%s18363_s1 + $0xb14] ss:$16 sps:$4 sm:$0xff]  }
 0x12f   : > { %2535 = vmatprep.subr.bf16.mxu1 %v12645_v25  ;;  %v12710_v24 = vld [vmem:[%s18363_s1 + $0xd14] ss:$16 sps:$4 sm:$0xff]  }
 0x131   : > { %2507 = vmatpush2.bf16.msra.mxu0 %v12640_v27 }
 0x132   : > { %2536 = vmatpush1.bf16.msra.mxu1 %v12643_v28  ;;  %2508 = vmatprep.subr.bf16.mxu0 %v12648_v29 }
 0x133   : > { %10247 = vmatprep.subr.msk.bf16.mxu1 %vm2139_vm1, %v10244_v30  ;;  %v12708_v30 = vld [vmem:[%s18363_s1 + $0xd10] ss:$16 sps:$4 sm:$0xff]  }
 0x135   : > { %2509 = vmatpush2.bf16.msra.mxu0 %v12646_v32 }
 0x136   : > { %2550 = vmatpush2.bf16.msra.mxu1 %v2147_v33  ;;  %2510 = vmatprep.subr.bf16.mxu0 %v12653_v34  ;;  %v12716_v33 = vld [vmem:[%s18363_s1 + $0xcf4] ss:$16 sps:$4 sm:$0xff]   ;;  %v12711_v34 = vld [vmem:[%s18363_s1 + $0xaf0] ss:$16 sps:$4 sm:$0xff]  }
 0x137   : > { %2551 = vmatprep.subr.bf16.mxu1 %v12656_v35  ;;  %v12714_v35 = vld [vmem:[%s18363_s1 + $0xcf0] ss:$16 sps:$4 sm:$0xff]  }
 0x139   : > { %2511 = vmatpush2.bf16.msra.mxu0 %v12651_v38  ;;  %v12719_v38 = vld [vmem:[%s18363_s1 + $0xad4] ss:$16 sps:$4 sm:$0xff]  }
 0x13a   : > { %2552 = vmatpush2.bf16.msra.mxu1 %v12654_v39  ;;  %4339 = vmatprep.subr.bf16.mxu0 %v12659_v40  ;;  %v12722_v39 = vld [vmem:[%s18363_s1 + $0xcd4] ss:$16 sps:$4 sm:$0xff]   ;;  %v12717_v40 = vld [vmem:[%s18363_s1 + $0xad0] ss:$16 sps:$4 sm:$0xff]  }
 0x13b   : > { %4380 = vmatprep.subr.bf16.mxu1 %v12662_v41  ;;  %v12720_v41 = vld [vmem:[%s18363_s1 + $0xcd0] ss:$16 sps:$4 sm:$0xff]  }
 0x13c   : > { %2513 = vmatmul.mubr.bf16.vlgmr.msra.gmra.mxu0 %v14678_v17 }
 0x13d   : > { %2554 = vmatmul.mubr.bf16.vlgmr.msra.gmra.mxu1 %v14813_v2  ;;  %4340 = vmatpush1.bf16.msra.mxu0 %v12657_v42  ;;  %v12725_v42 = vld [vmem:[%s18363_s1 + $0xab4] ss:$16 sps:$4 sm:$0xff]  }
 0x13e   : > { %4381 = vmatpush1.bf16.msra.mxu1 %v12660_v43  ;;  %4341 = vmatprep.subr.bf16.mxu0 %v12665_v44  ;;  %v12728_v43 = vld [vmem:[%s18363_s1 + $0xcb4] ss:$16 sps:$4 sm:$0xff]   ;;  %v12723_v44 = vld [vmem:[%s18363_s1 + $0xab0] ss:$16 sps:$4 sm:$0xff]  }
 0x13f   : > { %4382 = vmatprep.subr.bf16.mxu1 %v12668_v45  ;;  %4371 = vmatprep.mubr.bf16.mxu0 %v14391_v47  ;;  %v12726_v45 = vld [vmem:[%s18363_s1 + $0xcb0] ss:$16 sps:$4 sm:$0xff]  }
 0x140   : > { %4412 = vmatprep.mubr.bf16.mxu1 %v14400_v51 }
 0x141   : > { %4342 = vmatpush1.bf16.msra.mxu0 %v12663_v46  ;;  %v12731_v46 = vld [vmem:[%s18363_s1 + $0xa94] ss:$16 sps:$4 sm:$0xff]  }
 0x142   : > { %4383 = vmatpush1.bf16.msra.mxu1 %v12666_v48  ;;  %4343 = vmatprep.subr.bf16.mxu0 %v12671_v49  ;;  %v12734_v48 = vld [vmem:[%s18363_s1 + $0xc94] ss:$16 sps:$4 sm:$0xff]   ;;  %v12729_v49 = vld [vmem:[%s18363_s1 + $0xa90] ss:$16 sps:$4 sm:$0xff]  }
 0x143   : > { %4384 = vmatprep.subr.bf16.mxu1 %v12674_v50  ;;  %v12732_v50 = vld [vmem:[%s18363_s1 + $0xc90] ss:$16 sps:$4 sm:$0xff]  }
 0x145   : > { %4344 = vmatpush1.bf16.msra.mxu0 %v12669_v52  ;;  %v12737_v52 = vld [vmem:[%s18363_s1 + $0xa74] ss:$16 sps:$4 sm:$0xff]  }
 0x146   : > { %4385 = vmatpush1.bf16.msra.mxu1 %v12672_v53  ;;  %4345 = vmatprep.subr.bf16.mxu0 %v12677_v55  ;;  %v12740_v53 = vld [vmem:[%s18363_s1 + $0xc74] ss:$16 sps:$4 sm:$0xff]   ;;  %v12735_v55 = vld [vmem:[%s18363_s1 + $0xa70] ss:$16 sps:$4 sm:$0xff]  }
 0x147   : > { %4386 = vmatprep.subr.bf16.mxu1 %v12680_v56  ;;  %v12738_v56 = vld [vmem:[%s18363_s1 + $0xc70] ss:$16 sps:$4 sm:$0xff]  }
 0x149   : > { %4346 = vmatpush1.bf16.msra.mxu0 %v12675_v57  ;;  %v12743_v57 = vld [vmem:[%s18363_s1 + $0xa54] ss:$16 sps:$4 sm:$0xff]  }
 0x14a   : > { %4387 = vmatpush1.bf16.msra.mxu1 %v12678_v58  ;;  %4347 = vmatprep.subr.bf16.mxu0 %v12683_v60  ;;  %v12746_v58 = vld [vmem:[%s18363_s1 + $0xc54] ss:$16 sps:$4 sm:$0xff]   ;;  %v12741_v60 = vld [vmem:[%s18363_s1 + $0xa50] ss:$16 sps:$4 sm:$0xff]  }
 0x14b   : > { %4388 = vmatprep.subr.bf16.mxu1 %v12686_v61  ;;  %v12744_v61 = vld [vmem:[%s18363_s1 + $0xc50] ss:$16 sps:$4 sm:$0xff]  }
 0x14d   : > { %4348 = vmatpush1.bf16.msra.mxu0 %v12681_v62  ;;  %v12749_v62 = vld [vmem:[%s18363_s1 + $0xa34] ss:$16 sps:$4 sm:$0xff]  }
 0x14e   : > { %4389 = vmatpush1.bf16.msra.mxu1 %v12684_v63  ;;  %4349 = vmatprep.subr.bf16.mxu0 %v12689_v0  ;;  %v12752_v63 = vld [vmem:[%s18363_s1 + $0xc34] ss:$16 sps:$4 sm:$0xff]   ;;  %v12747_v0 = vld [vmem:[%s18363_s1 + $0xa30] ss:$16 sps:$4 sm:$0xff]  }
 0x14f   : > { %4390 = vmatprep.subr.bf16.mxu1 %v12692_v1  ;;  %v12750_v1 = vld [vmem:[%s18363_s1 + $0xc30] ss:$16 sps:$4 sm:$0xff]  }
 0x151   : > { %4350 = vmatpush1.bf16.msra.mxu0 %v12687_v3  ;;  %v12755_v3 = vld [vmem:[%s18363_s1 + $0xe14] ss:$16 sps:$4 sm:$0xff]  }
 0x152   : > { %4391 = vmatpush1.bf16.msra.mxu1 %v12690_v4  ;;  %4351 = vmatprep.subr.bf16.mxu0 %v12695_v5  ;;  %v12758_v4 = vld [vmem:[%s18363_s1 + $0x1014] ss:$16 sps:$4 sm:$0xff]   ;;  %v12753_v5 = vld [vmem:[%s18363_s1 + $0xe10] ss:$16 sps:$4 sm:$0xff]  }
 0x153   : > { %4392 = vmatprep.subr.bf16.mxu1 %v12698_v8  ;;  %v12756_v8 = vld [vmem:[%s18363_s1 + $0x1010] ss:$16 sps:$4 sm:$0xff]  }
 0x154   : > { %v2268_v15 = vpop.f32.mrf.mxu0 }
 0x155   : > { %v2309_v18 = vpop.f32.mrf.mxu1  ;;  %v2269_v19 = vadd.f32 %v2268_v15, %v15104_v54  ;;  %4352 = vmatpush1.bf16.msra.mxu0 %v12693_v9  ;;  %v12705_v54 = vld [vmem:[%s18363_s1 + $0xb10] ss:$16 sps:$4 sm:$0xff]   ;;  %v12761_v9 = vld [vmem:[%s18363_s1 + $0xdf4] ss:$16 sps:$4 sm:$0xff]  }
 0x156   : > { %4393 = vmatpush1.bf16.msra.mxu1 %v12696_v10  ;;  %v2270_v20 = vpop.f32.mrf.mxu0  ;;  %4353 = vmatprep.subr.bf16.mxu0 %v12701_v11  ;;  %v12764_v10 = vld [vmem:[%s18363_s1 + $0xff4] ss:$16 sps:$4 sm:$0xff]   ;;  %v12759_v11 = vld [vmem:[%s18363_s1 + $0xdf0] ss:$16 sps:$4 sm:$0xff]  }
 0x157   : > { %v2311_v21 = vpop.f32.mrf.mxu1  ;;  %4394 = vmatprep.subr.bf16.mxu1 %v12704_v12  ;;  %v15312_v25 = vadd.f32 %v2309_v18, %v2269_v19  ;;  %v2271_v26 = vadd.f32 %v2270_v20, %v15112_v59  ;;  %v12713_v59 = vld [vmem:[%s18363_s1 + $0xaf4] ss:$16 sps:$4 sm:$0xff]   ;;  %v12762_v12 = vld [vmem:[%s18363_s1 + $0xff0] ss:$16 sps:$4 sm:$0xff]  }
 0x158   : > { %v2272_v27 = vpop.f32.mrf.mxu0  ;;  %v12767_v18 = vld [vmem:[%s18363_s1 + $0xdd4] ss:$16 sps:$4 sm:$0xff]  }
 0x159   : > { %v2313_v28 = vpop.f32.mrf.mxu1  ;;  %v15318_v29 = vadd.f32 %v2311_v21, %v2271_v26  ;;  %4354 = vmatpush1.bf16.msra.mxu0 %v12699_v13  ;;  %v12770_v19 = vld [vmem:[%s18363_s1 + $0xfd4] ss:$16 sps:$4 sm:$0xff]   ;;  %v12765_v21 = vld [vmem:[%s18363_s1 + $0xdd0] ss:$16 sps:$4 sm:$0xff]  }
 0x15a   : > { %4395 = vmatpush1.bf16.msra.mxu1 %v12702_v14  ;;  %v2273_v31 = vpop.f32.mrf.mxu0  ;;  %4355 = vmatprep.subr.bf16.mxu0 %v12707_v22  ;;  %v12768_v22 = vld [vmem:[%s18363_s1 + $0xfd0] ss:$16 sps:$4 sm:$0xff]   ;;  %v12773_v26 = vld [vmem:[%s18363_s1 + $0xdb4] ss:$16 sps:$4 sm:$0xff]  }
 0x15b   : > { %v2314_v32 = vpop.f32.mrf.mxu1  ;;  %4396 = vmatprep.subr.bf16.mxu1 %v12710_v24  ;;  %v12771_v27 = vld [vmem:[%s18363_s1 + $0xdb0] ss:$16 sps:$4 sm:$0xff]  }
 0x15c   : > { %v12774_v28 = vld [vmem:[%s18363_s1 + $0xfb0] ss:$16 sps:$4 sm:$0xff]  }
 0x15d   : > { %4356 = vmatpush2.bf16.msra.mxu0 %v12705_v54  ;;  %v12776_v54 = vld [vmem:[%s18363_s1 + $0xfb4] ss:$16 sps:$4 sm:$0xff]   ;;  %v12777_v31 = vld [vmem:[%s18363_s1 + $0xd90] ss:$16 sps:$4 sm:$0xff]  }
 0x15e   : > { %4397 = vmatpush2.bf16.msra.mxu1 %v12708_v30  ;;  %4357 = vmatprep.subr.bf16.mxu0 %v12713_v59  ;;  %v12782_v30 = vld [vmem:[%s18363_s1 + $0xf94] ss:$16 sps:$4 sm:$0xff]   ;;  %v12780_v32 = vld [vmem:[%s18363_s1 + $0xf90] ss:$16 sps:$4 sm:$0xff]  }
 0x15f   : > { %4398 = vmatprep.subr.bf16.mxu1 %v12716_v33  ;;  %v12785_v59 = vld [vmem:[%s18363_s1 + $0xd74] ss:$16 sps:$4 sm:$0xff]  }
 0x160   : > { %v12788_v33 = vld [vmem:[%s18363_s1 + $0xf74] ss:$16 sps:$4 sm:$0xff]  }
 0x161   : > { %4358 = vmatpush2.bf16.msra.mxu0 %v12711_v34  ;;  %v12783_v34 = vld [vmem:[%s18363_s1 + $0xd70] ss:$16 sps:$4 sm:$0xff]  }
 0x162   : > { %4399 = vmatpush2.bf16.msra.mxu1 %v12714_v35  ;;  %4359 = vmatprep.subr.bf16.mxu0 %v12719_v38  ;;  %v12786_v35 = vld [vmem:[%s18363_s1 + $0xf70] ss:$16 sps:$4 sm:$0xff]   ;;  %v12791_v38 = vld [vmem:[%s18363_s1 + $0xd54] ss:$16 sps:$4 sm:$0xff]  }
 0x163   : > { %4400 = vmatprep.subr.bf16.mxu1 %v12722_v39  ;;  %v12794_v39 = vld [vmem:[%s18363_s1 + $0xf54] ss:$16 sps:$4 sm:$0xff]  }
 0x165   : > { %4360 = vmatpush2.bf16.msra.mxu0 %v12717_v40  ;;  %v12789_v40 = vld [vmem:[%s18363_s1 + $0xd50] ss:$16 sps:$4 sm:$0xff]  }
 0x166   : > { %4401 = vmatpush2.bf16.msra.mxu1 %v12720_v41  ;;  %4361 = vmatprep.subr.bf16.mxu0 %v12725_v42  ;;  %v12792_v41 = vld [vmem:[%s18363_s1 + $0xf50] ss:$16 sps:$4 sm:$0xff]   ;;  %v12797_v42 = vld [vmem:[%s18363_s1 + $0xd34] ss:$16 sps:$4 sm:$0xff]  }
 0x167   : > { %4402 = vmatprep.subr.bf16.mxu1 %v12728_v43  ;;  %v12800_v43 = vld [vmem:[%s18363_s1 + $0xf34] ss:$16 sps:$4 sm:$0xff]  }
 0x169   : > { %4362 = vmatpush2.bf16.msra.mxu0 %v12723_v44 }
 0x16a   : > { %4403 = vmatpush2.bf16.msra.mxu1 %v12726_v45  ;;  %4363 = vmatprep.subr.bf16.mxu0 %v12731_v46  ;;  %v12795_v45 = vld [vmem:[%s18363_s1 + $0xd30] ss:$16 sps:$4 sm:$0xff]  }
 0x16b   : > { %4404 = vmatprep.subr.bf16.mxu1 %v12734_v48  ;;  %v12798_v46 = vld [vmem:[%s18363_s1 + $0xf30] ss:$16 sps:$4 sm:$0xff]  }
 0x16d   : > { %4364 = vmatpush2.bf16.msra.mxu0 %v12729_v49  ;;  %v12803_v49 = vld [vmem:[%s18363_s1 + $0xf14] ss:$16 sps:$4 sm:$0xff]  }
 0x16e   : > { %4405 = vmatpush2.bf16.msra.mxu1 %v12732_v50  ;;  %4365 = vmatprep.subr.bf16.mxu0 %v12737_v52  ;;  %v12806_v50 = vld [vmem:[%s18363_s1 + $0x1114] ss:$16 sps:$4 sm:$0xff]  }
 0x16f   : > { %4406 = vmatprep.subr.bf16.mxu1 %v12740_v53  ;;  %v12801_v53 = vld [vmem:[%s18363_s1 + $0xf10] ss:$16 sps:$4 sm:$0xff]  }
 0x171   : > { %4366 = vmatpush2.bf16.msra.mxu0 %v12735_v55  ;;  %v12804_v55 = vld [vmem:[%s18363_s1 + $0x1110] ss:$16 sps:$4 sm:$0xff]  }
 0x172   : > { %4407 = vmatpush2.bf16.msra.mxu1 %v12738_v56  ;;  %4367 = vmatprep.subr.bf16.mxu0 %v12743_v57  ;;  %v12809_v57 = vld [vmem:[%s18363_s1 + $0xef4] ss:$16 sps:$4 sm:$0xff]  }
 0x173   : > { %4408 = vmatprep.subr.bf16.mxu1 %v12746_v58  ;;  %v12812_v58 = vld [vmem:[%s18363_s1 + $0x10f4] ss:$16 sps:$4 sm:$0xff]  }
 0x175   : > { %4368 = vmatpush2.bf16.msra.mxu0 %v12741_v60  ;;  %v12807_v60 = vld [vmem:[%s18363_s1 + $0xef0] ss:$16 sps:$4 sm:$0xff]  }
 0x176   : > { %4409 = vmatpush2.bf16.msra.mxu1 %v12744_v61  ;;  %4369 = vmatprep.subr.bf16.mxu0 %v12749_v62  ;;  %v12810_v61 = vld [vmem:[%s18363_s1 + $0x10f0] ss:$16 sps:$4 sm:$0xff]   ;;  %v12815_v62 = vld [vmem:[%s18363_s1 + $0xed4] ss:$16 sps:$4 sm:$0xff]  }
 0x177   : > { %4410 = vmatprep.subr.bf16.mxu1 %v12752_v63  ;;  %v12818_v63 = vld [vmem:[%s18363_s1 + $0x10d4] ss:$16 sps:$4 sm:$0xff]  }
 0x179   : > { %4370 = vmatpush2.bf16.msra.mxu0 %v12747_v0  ;;  %v12813_v0 = vld [vmem:[%s18363_s1 + $0xed0] ss:$16 sps:$4 sm:$0xff]  }
 0x17a   : > { %4411 = vmatpush2.bf16.msra.mxu1 %v12750_v1  ;;  %4421 = vmatprep.subr.bf16.mxu0 %v12755_v3  ;;  %v12816_v1 = vld [vmem:[%s18363_s1 + $0x10d0] ss:$16 sps:$4 sm:$0xff]   ;;  %v12821_v3 = vld [vmem:[%s18363_s1 + $0xeb4] ss:$16 sps:$4 sm:$0xff]  }
 0x17b   : > { %4462 = vmatprep.subr.bf16.mxu1 %v12758_v4  ;;  %v12824_v4 = vld [vmem:[%s18363_s1 + $0x10b4] ss:$16 sps:$4 sm:$0xff]  }
 0x17c   : > { %v2350_v13 = vpop.f32.mrf.mxu0  ;;  %4372 = vmatmul.mubr.bf16.vlgmr.msra.gmra.mxu0 %v14458_v6 }
 0x17d   : > { %4413 = vmatmul.mubr.bf16.vlgmr.msra.gmra.mxu1 %v14460_v7  ;;  %v15434_v14 = vadd.f32 %v2350_v13, %v15312_v25  ;;  %4422 = vmatpush1.bf16.msra.mxu0 %v12753_v5  ;;  %v12819_v5 = vld [vmem:[%s18363_s1 + $0xeb0] ss:$16 sps:$4 sm:$0xff]   ;;  %v12833_v13 = vld [vmem:[%s18363_s1 + $0xe74] ss:$16 sps:$4 sm:$0xff]  }
 0x17e   : > { %4463 = vmatpush1.bf16.msra.mxu1 %v12756_v8  ;;  %v2352_v15 = vpop.f32.mrf.mxu0  ;;  %4423 = vmatprep.subr.bf16.mxu0 %v12761_v9  ;;  %v12822_v8 = vld [vmem:[%s18363_s1 + $0x10b0] ss:$16 sps:$4 sm:$0xff]   ;;  %v12827_v9 = vld [vmem:[%s18363_s1 + $0xe94] ss:$16 sps:$4 sm:$0xff]  }
 0x17f   : > { %4464 = vmatprep.subr.bf16.mxu1 %v12764_v10  ;;  %v15443_v20 = vadd.f32 %v2352_v15, %v15318_v29  ;;  %4453 = vmatprep.mubr.bf16.mxu0 %v14550_v36  ;;  %v12779_v29 = vld [vmem:[%s18363_s1 + $0xd94] ss:$16 sps:$4 sm:$0xff]  }
 0x180   : > { %4494 = vmatprep.mubr.bf16.mxu1 %v14554_v37  ;;  %v2354_v24 = vpop.f32.mrf.mxu0  ;;  %v12830_v10 = vld [vmem:[%s18363_s1 + $0x1094] ss:$16 sps:$4 sm:$0xff]  }
 0x181   : > { %4424 = vmatpush1.bf16.msra.mxu0 %v12759_v11  ;;  %v12825_v11 = vld [vmem:[%s18363_s1 + $0xe90] ss:$16 sps:$4 sm:$0xff]   ;;  %v12836_v15 = vld [vmem:[%s18363_s1 + $0x1074] ss:$16 sps:$4 sm:$0xff]  }
 0x182   : > { %4465 = vmatpush1.bf16.msra.mxu1 %v12762_v12  ;;  %v2355_v25 = vpop.f32.mrf.mxu0  ;;  %4425 = vmatprep.subr.bf16.mxu0 %v12767_v18  ;;  %v12828_v12 = vld [vmem:[%s18363_s1 + $0x1090] ss:$16 sps:$4 sm:$0xff]  }
 0x183   : > { %4466 = vmatprep.subr.bf16.mxu1 %v12770_v19  ;;  %v12831_v18 = vld [vmem:[%s18363_s1 + $0xe70] ss:$16 sps:$4 sm:$0xff]  }
 0x184   : > { %v12834_v19 = vld [vmem:[%s18363_s1 + $0x1070] ss:$16 sps:$4 sm:$0xff]  }
 0x185   : > { %4426 = vmatpush1.bf16.msra.mxu0 %v12765_v21  ;;  %v12839_v21 = vld [vmem:[%s18363_s1 + $0xe54] ss:$16 sps:$4 sm:$0xff]   ;;  %v12837_v24 = vld [vmem:[%s18363_s1 + $0xe50] ss:$16 sps:$4 sm:$0xff]  }
 0x186   : > { %4467 = vmatpush1.bf16.msra.mxu1 %v12768_v22  ;;  %4427 = vmatprep.subr.bf16.mxu0 %v12773_v26  ;;  %v12842_v22 = vld [vmem:[%s18363_s1 + $0x1054] ss:$16 sps:$4 sm:$0xff]   ;;  %v12840_v25 = vld [vmem:[%s18363_s1 + $0x1050] ss:$16 sps:$4 sm:$0xff]  }
 0x187   : > { %4468 = vmatprep.subr.bf16.mxu1 %v12776_v54  ;;  %v12845_v26 = vld [vmem:[%s18363_s1 + $0xe34] ss:$16 sps:$4 sm:$0xff]  }
 0x188   : > { %v12848_v54 = vld [vmem:[%s18363_s1 + $0x1034] ss:$16 sps:$4 sm:$0xff]  }
 0x189   : > { %4428 = vmatpush1.bf16.msra.mxu0 %v12771_v27  ;;  %v12843_v27 = vld [vmem:[%s18363_s1 + $0xe30] ss:$16 sps:$4 sm:$0xff]  }
 0x18a   : > { %4469 = vmatpush1.bf16.msra.mxu1 %v12774_v28  ;;  %4429 = vmatprep.subr.bf16.mxu0 %v12779_v29  ;;  %v12846_v28 = vld [vmem:[%s18363_s1 + $0x1030] ss:$16 sps:$4 sm:$0xff]   ;;  %v12851_v29 = vld [vmem:[%s18363_s1 + $0x1214] ss:$16 sps:$4 sm:$0xff]  }
 0x18b   : > { %4470 = vmatprep.subr.bf16.mxu1 %v12782_v30  ;;  %v12854_v30 = vld [vmem:[%s18363_s1 + $0xa1c] ss:$16 sps:$4 sm:$0xff]  }
 0x18d   : > { %4430 = vmatpush1.bf16.msra.mxu0 %v12777_v31  ;;  %v12849_v31 = vld [vmem:[%s18363_s1 + $0x1210] ss:$16 sps:$4 sm:$0xff]  }
 0x18e   : > { %4471 = vmatpush1.bf16.msra.mxu1 %v12780_v32  ;;  %4431 = vmatprep.subr.bf16.mxu0 %v12785_v59  ;;  %v12852_v32 = vld [vmem:[%s18363_s1 + $0xa18] ss:$16 sps:$4 sm:$0xff]   ;;  %v12857_v59 = vld [vmem:[%s18363_s1 + $0x11f4] ss:$16 sps:$4 sm:$0xff]  }
 0x18f   : > { %4472 = vmatprep.subr.bf16.mxu1 %v12788_v33  ;;  %v12860_v33 = vld [vmem:[%s18363_s1 + $0x9fc] ss:$16 sps:$4 sm:$0xff]  }
 0x191   : > { %4432 = vmatpush1.bf16.msra.mxu0 %v12783_v34  ;;  %v12855_v34 = vld [vmem:[%s18363_s1 + $0x11f0] ss:$16 sps:$4 sm:$0xff]  }
 0x192   : > { %4473 = vmatpush1.bf16.msra.mxu1 %v12786_v35  ;;  %4433 = vmatprep.subr.bf16.mxu0 %v12791_v38  ;;  %v12858_v35 = vld [vmem:[%s18363_s1 + $0x9f8] ss:$16 sps:$4 sm:$0xff]  }
 0x193   : > { %4474 = vmatprep.subr.bf16.mxu1 %v12794_v39 }
 0x195   : > { %v15507_v44 = vpop.f32.mrf.mxu1  ;;  %4434 = vmatpush1.bf16.msra.mxu0 %v12789_v40 }
 0x196   : > { %4475 = vmatpush1.bf16.msra.mxu1 %v12792_v41  ;;  %4435 = vmatprep.subr.bf16.mxu0 %v12797_v42  ;;  %v12863_v41 = vld [vmem:[%s18363_s1 + $0x11d4] ss:$16 sps:$4 sm:$0xff]   ;;  %v12866_v42 = vld [vmem:[%s18363_s1 + $0x9dc] ss:$16 sps:$4 sm:$0xff]  }
 0x197   : > { %v15515_v48 = vpop.f32.mrf.mxu1  ;;  %4476 = vmatprep.subr.bf16.mxu1 %v12800_v43 }
 0x199   : > { %v2395_v52 = vpop.f32.mrf.mxu1  ;;  %4436 = vmatpush1.bf16.msra.mxu0 %v12795_v45  ;;  %v12861_v45 = vld [vmem:[%s18363_s1 + $0x11d0] ss:$16 sps:$4 sm:$0xff]  }
 0x19a   : > { %4477 = vmatpush1.bf16.msra.mxu1 %v12798_v46  ;;  %4437 = vmatprep.subr.bf16.mxu0 %v12803_v49  ;;  %v12867_v52 = vld [vmem:[%s18363_s1 + $0x11b0] ss:$16 sps:$4 sm:$0xff]  }
 0x19b   : > { %v2396_v56 = vpop.f32.mrf.mxu1  ;;  %4478 = vmatprep.subr.bf16.mxu1 %v12806_v50  ;;  %v12872_v50 = vld [vmem:[%s18363_s1 + $0x9bc] ss:$16 sps:$4 sm:$0xff]  }
 0x19c   : > { %v12878_v56 = vld [vmem:[%s18363_s1 + $0x99c] ss:$16 sps:$4 sm:$0xff]  }
 0x19d   : > { %4438 = vmatpush2.bf16.msra.mxu0 %v12801_v53  ;;  %v12870_v53 = vld [vmem:[%s18363_s1 + $0x9b8] ss:$16 sps:$4 sm:$0xff]  }
 0x19e   : > { %4479 = vmatpush2.bf16.msra.mxu1 %v12804_v55  ;;  %4439 = vmatprep.subr.bf16.mxu0 %v12809_v57  ;;  %v12875_v55 = vld [vmem:[%s18363_s1 + $0x1194] ss:$16 sps:$4 sm:$0xff]   ;;  %v12873_v57 = vld [vmem:[%s18363_s1 + $0x1190] ss:$16 sps:$4 sm:$0xff]  }
 0x19f   : > { %4480 = vmatprep.subr.bf16.mxu1 %v12812_v58  ;;  %v12876_v58 = vld [vmem:[%s18363_s1 + $0x998] ss:$16 sps:$4 sm:$0xff]  }
 0x1a1   : > { %4440 = vmatpush2.bf16.msra.mxu0 %v12807_v60  ;;  %v12881_v60 = vld [vmem:[%s18363_s1 + $0x1174] ss:$16 sps:$4 sm:$0xff]  }
 0x1a2   : > { %4481 = vmatpush2.bf16.msra.mxu1 %v12810_v61  ;;  %4441 = vmatprep.subr.bf16.mxu0 %v12815_v62  ;;  %v12884_v61 = vld [vmem:[%s18363_s1 + $0x97c] ss:$16 sps:$4 sm:$0xff]   ;;  %v12879_v62 = vld [vmem:[%s18363_s1 + $0x1170] ss:$16 sps:$4 sm:$0xff]  }
 0x1a3   : > { %4482 = vmatprep.subr.bf16.mxu1 %v12818_v63  ;;  %v12882_v63 = vld [vmem:[%s18363_s1 + $0x978] ss:$16 sps:$4 sm:$0xff]  }
 0x1a5   : > { %4442 = vmatpush2.bf16.msra.mxu0 %v12813_v0  ;;  %v12887_v0 = vld [vmem:[%s18363_s1 + $0x1154] ss:$16 sps:$4 sm:$0xff]  }
 0x1a6   : > { %4483 = vmatpush2.bf16.msra.mxu1 %v12816_v1  ;;  %4443 = vmatprep.subr.bf16.mxu0 %v12821_v3  ;;  %v12890_v1 = vld [vmem:[%s18363_s1 + $0x95c] ss:$16 sps:$4 sm:$0xff]   ;;  %v12885_v3 = vld [vmem:[%s18363_s1 + $0x1150] ss:$16 sps:$4 sm:$0xff]  }
 0x1a7   : > { %4484 = vmatprep.subr.bf16.mxu1 %v12824_v4  ;;  %v12888_v4 = vld [vmem:[%s18363_s1 + $0x958] ss:$16 sps:$4 sm:$0xff]  }
 0x1a9   : > { %4444 = vmatpush2.bf16.msra.mxu0 %v12819_v5  ;;  %v12893_v5 = vld [vmem:[%s18363_s1 + $0x1134] ss:$16 sps:$4 sm:$0xff]  }
 0x1aa   : > { %4485 = vmatpush2.bf16.msra.mxu1 %v12822_v8  ;;  %4445 = vmatprep.subr.bf16.mxu0 %v12827_v9  ;;  %v12896_v8 = vld [vmem:[%s18363_s1 + $0x93c] ss:$16 sps:$4 sm:$0xff]   ;;  %v10541_v9 = vld [vmem:[%s18363_s1 + $0x1250] sm:$0xff] }
 0x1ab   : > { %4486 = vmatprep.subr.bf16.mxu1 %v12830_v10 }
 0x1ad   : > { %4446 = vmatpush2.bf16.msra.mxu0 %v12825_v11 }
 0x1ae   : > { %4487 = vmatpush2.bf16.msra.mxu1 %v12828_v12  ;;  %4447 = vmatprep.subr.bf16.mxu0 %v12833_v13  ;;  %v12891_v12 = vld [vmem:[%s18363_s1 + $0x1130] ss:$16 sps:$4 sm:$0xff]   ;;  %v12894_v13 = vld [vmem:[%s18363_s1 + $0x938] ss:$16 sps:$4 sm:$0xff]  }
 0x1af   : > { %4488 = vmatprep.subr.bf16.mxu1 %v12836_v15 }
 0x1b1   : > { %4448 = vmatpush2.bf16.msra.mxu0 %v12831_v18  ;;  %v10836_v18 = vcombine.high %v10541_v9, %v10541_v9 }
 0x1b2   : > { %4489 = vmatpush2.bf16.msra.mxu1 %v12834_v19  ;;  %4449 = vmatprep.subr.bf16.mxu0 %v12839_v21  ;;  %v12900_v19 = vld [vmem:[%s18363_s1 + $0xb1c] ss:$16 sps:$4 sm:$0xff]   ;;  %v10835_v21 = vcombine.low %v10541_v9, %v10541_v9 }
 0x1b3   : > { %4490 = vmatprep.subr.bf16.mxu1 %v12842_v22 }
 0x1b5   : > { %4450 = vmatpush2.bf16.msra.mxu0 %v12837_v24 }
 0x1b6   : > { %4491 = vmatpush2.bf16.msra.mxu1 %v12840_v25  ;;  %4451 = vmatprep.subr.bf16.mxu0 %v12845_v26  ;;  %v12898_v25 = vld [vmem:[%s18363_s1 + $0xb18] ss:$16 sps:$4 sm:$0xff]   ;;  %v12904_v26 = vld [vmem:[%s18363_s1 + $0x1234] ss:$16 sps:$4 sm:$0xff]  }
 0x1b7   : > { %4492 = vmatprep.subr.bf16.mxu1 %v12848_v54  ;;  %v12907_v54 = vld [vmem:[%s18363_s1 + $0xafc] ss:$16 sps:$4 sm:$0xff]  }
 0x1b9   : > { %4452 = vmatpush2.bf16.msra.mxu0 %v12843_v27 }
 0x1ba   : > { %4493 = vmatpush2.bf16.msra.mxu1 %v12846_v28  ;;  %4503 = vmatprep.subr.bf16.mxu0 %v12851_v29  ;;  %v4328_v28 = vsel %vm2139_vm1, %v10835_v21, 0  ;;  %v12902_v29 = vld [vmem:[%s18363_s1 + $0x1230] ss:$16 sps:$4 sm:$0xff]   ;;  %v12959_v21 = vld [vmem:[%s18363_s1 + $0xdd8] ss:$16 sps:$4 sm:$0xff]  }
 0x1bb   : > { %4544 = vmatprep.subr.bf16.mxu1 %v12854_v30  ;;  %v12905_v30 = vld [vmem:[%s18363_s1 + $0xaf8] ss:$16 sps:$4 sm:$0xff]  }
 0x1bc   : > { %v2432_v38 = vpop.f32.mrf.mxu0  ;;  %4454 = vmatmul.mubr.bf16.vlgmr.msra.gmra.mxu0 %v14674_v16 }
 0x1bd   : > { %4495 = vmatmul.mubr.bf16.vlgmr.msra.gmra.mxu1 %v14678_v17  ;;  %v2433_v39 = vadd.f32 %v2432_v38, %v15507_v44  ;;  %4504 = vmatpush1.bf16.msra.mxu0 %v12849_v31  ;;  %v12864_v44 = vld [vmem:[%s18363_s1 + $0x9d8] ss:$16 sps:$4 sm:$0xff]   ;;  %v12910_v31 = vld [vmem:[%s18363_s1 + $0xadc] ss:$16 sps:$4 sm:$0xff]  }
 0x1be   : > { %4545 = vmatpush1.bf16.msra.mxu1 %v12852_v32  ;;  %v2434_v40 = vpop.f32.mrf.mxu0  ;;  %4505 = vmatprep.subr.bf16.mxu0 %v12857_v59  ;;  %v12913_v32 = vld [vmem:[%s18363_s1 + $0xc1c] ss:$16 sps:$4 sm:$0xff]   ;;  %v12908_v59 = vld [vmem:[%s18363_s1 + $0xad8] ss:$16 sps:$4 sm:$0xff]  }
 0x1bf   : > { %4546 = vmatprep.subr.bf16.mxu1 %v12860_v33  ;;  %v2435_v43 = vadd.f32 %v2434_v40, %v15515_v48  ;;  %10840 = vmatprep.mubr.msk.bf16.mxu0 %vm2135_vm0, %v14697_v23  ;;  %v12869_v48 = vld [vmem:[%s18363_s1 + $0x11b4] ss:$16 sps:$4 sm:$0xff]   ;;  %v12911_v33 = vld [vmem:[%s18363_s1 + $0xc18] ss:$16 sps:$4 sm:$0xff]   ;;  %v12922_v40 = vld [vmem:[%s18363_s1 + $0xa9c] ss:$16 sps:$4 sm:$0xff]  }
 0x1c0   : > { %4576 = vmatprep.mubr.bf16.mxu1 %v14391_v47  ;;  %v2436_v46 = vpop.f32.mrf.mxu0  ;;  %v12914_v38 = vld [vmem:[%s18363_s1 + $0xab8] ss:$16 sps:$4 sm:$0xff]  }
 0x1c1   : > { %4506 = vmatpush1.bf16.msra.mxu0 %v12855_v34  ;;  %v12916_v34 = vld [vmem:[%s18363_s1 + $0xabc] ss:$16 sps:$4 sm:$0xff]   ;;  %v12926_v46 = vld [vmem:[%s18363_s1 + $0xa78] ss:$16 sps:$4 sm:$0xff]  }
 0x1c2   : > { %4547 = vmatpush1.bf16.msra.mxu1 %v12858_v35  ;;  %v2437_v49 = vpop.f32.mrf.mxu0  ;;  %4507 = vmatprep.subr.bf16.mxu0 %v12863_v41  ;;  %v12919_v35 = vld [vmem:[%s18363_s1 + $0xbfc] ss:$16 sps:$4 sm:$0xff]  }
 0x1c3   : > { %4548 = vmatprep.subr.bf16.mxu1 %v12866_v42  ;;  %v12925_v41 = vld [vmem:[%s18363_s1 + $0xbdc] ss:$16 sps:$4 sm:$0xff]   ;;  %v12920_v42 = vld [vmem:[%s18363_s1 + $0xa98] ss:$16 sps:$4 sm:$0xff]  }
 0x1c4   : > { %v12929_v49 = vld [vmem:[%s18363_s1 + $0xbb8] ss:$16 sps:$4 sm:$0xff]  }
 0x1c5   : > { %4508 = vmatpush1.bf16.msra.mxu0 %v12861_v45  ;;  %v12928_v45 = vld [vmem:[%s18363_s1 + $0xa7c] ss:$16 sps:$4 sm:$0xff]  }
 0x1c6   : > { %4549 = vmatpush1.bf16.msra.mxu1 %v12864_v44  ;;  %4509 = vmatprep.subr.bf16.mxu0 %v12869_v48  ;;  %v12931_v44 = vld [vmem:[%s18363_s1 + $0xbbc] ss:$16 sps:$4 sm:$0xff]  }
 0x1c7   : > { %4550 = vmatprep.subr.bf16.mxu1 %v12872_v50  ;;  %v12934_v48 = vld [vmem:[%s18363_s1 + $0xa5c] ss:$16 sps:$4 sm:$0xff]  }
 0x1c8   : > { %v12937_v50 = vld [vmem:[%s18363_s1 + $0xb9c] ss:$16 sps:$4 sm:$0xff]  }
 0x1c9   : > { %4510 = vmatpush1.bf16.msra.mxu0 %v12867_v52  ;;  %v12932_v52 = vld [vmem:[%s18363_s1 + $0xa58] ss:$16 sps:$4 sm:$0xff]  }
 0x1ca   : > { %4551 = vmatpush1.bf16.msra.mxu1 %v12870_v53  ;;  %4511 = vmatprep.subr.bf16.mxu0 %v12875_v55  ;;  %v12935_v53 = vld [vmem:[%s18363_s1 + $0xb98] ss:$16 sps:$4 sm:$0xff]   ;;  %v12940_v55 = vld [vmem:[%s18363_s1 + $0xa3c] ss:$16 sps:$4 sm:$0xff]  }
 0x1cb   : > { %4552 = vmatprep.subr.bf16.mxu1 %v12878_v56  ;;  %v12943_v56 = vld [vmem:[%s18363_s1 + $0xb7c] ss:$16 sps:$4 sm:$0xff]  }
 0x1cd   : > { %4512 = vmatpush1.bf16.msra.mxu0 %v12873_v57  ;;  %v12938_v57 = vld [vmem:[%s18363_s1 + $0xa38] ss:$16 sps:$4 sm:$0xff]  }
 0x1ce   : > { %4553 = vmatpush1.bf16.msra.mxu1 %v12876_v58  ;;  %4513 = vmatprep.subr.bf16.mxu0 %v12881_v60  ;;  %v12941_v58 = vld [vmem:[%s18363_s1 + $0xb78] ss:$16 sps:$4 sm:$0xff]   ;;  %v12946_v60 = vld [vmem:[%s18363_s1 + $0xb5c] ss:$16 sps:$4 sm:$0xff]  }
 0x1cf   : > { %4554 = vmatprep.subr.bf16.mxu1 %v12884_v61  ;;  %v12949_v61 = vld [vmem:[%s18363_s1 + $0xe1c] ss:$16 sps:$4 sm:$0xff]  }
 0x1d1   : > { %4514 = vmatpush1.bf16.msra.mxu0 %v12879_v62  ;;  %v12944_v62 = vld [vmem:[%s18363_s1 + $0xb58] ss:$16 sps:$4 sm:$0xff]  }
 0x1d2   : > { %4555 = vmatpush1.bf16.msra.mxu1 %v12882_v63  ;;  %4515 = vmatprep.subr.bf16.mxu0 %v12887_v0  ;;  %v12947_v63 = vld [vmem:[%s18363_s1 + $0xe18] ss:$16 sps:$4 sm:$0xff]   ;;  %v12952_v0 = vld [vmem:[%s18363_s1 + $0xb3c] ss:$16 sps:$4 sm:$0xff]  }
 0x1d3   : > { %4556 = vmatprep.subr.bf16.mxu1 %v12890_v1  ;;  %v12955_v1 = vld [vmem:[%s18363_s1 + $0xdfc] ss:$16 sps:$4 sm:$0xff]  }
 0x1d5   : > { %v2473_v10 = vpop.f32.mrf.mxu1  ;;  %4516 = vmatpush1.bf16.msra.mxu0 %v12885_v3  ;;  %v12950_v3 = vld [vmem:[%s18363_s1 + $0xb38] ss:$16 sps:$4 sm:$0xff]  }
 0x1d6   : > { %v15713_v11 = vadd.f32 %v2473_v10, %v2433_v39  ;;  %4557 = vmatpush1.bf16.msra.mxu1 %v12888_v4  ;;  %4517 = vmatprep.subr.bf16.mxu0 %v12893_v5  ;;  %v12917_v39 = vld [vmem:[%s18363_s1 + $0xbf8] ss:$16 sps:$4 sm:$0xff]  }
 0x1d7   : > { %v2475_v15 = vpop.f32.mrf.mxu1  ;;  %4558 = vmatprep.subr.bf16.mxu1 %v12896_v8  ;;  %v12953_v4 = vld [vmem:[%s18363_s1 + $0xdf8] ss:$16 sps:$4 sm:$0xff]  }
 0x1d8   : > { %v15724_v22 = vadd.f32 %v2475_v15, %v2435_v43  ;;  %v12923_v43 = vld [vmem:[%s18363_s1 + $0xbd8] ss:$16 sps:$4 sm:$0xff]   ;;  %v12961_v15 = vld [vmem:[%s18363_s1 + $0xddc] ss:$16 sps:$4 sm:$0xff]  }
 0x1d9   : > { %v2477_v24 = vpop.f32.mrf.mxu1  ;;  %4518 = vmatpush1.bf16.msra.mxu0 %v12891_v12 }
 0x1da   : > { %4559 = vmatpush1.bf16.msra.mxu1 %v12894_v13  ;;  %10839 = vmatprep.subr.msk.bf16.mxu0 %vm2139_vm1, %v10836_v18  ;;  %v12958_v13 = vld [vmem:[%s18363_s1 + $0xd1c] ss:$16 sps:$4 sm:$0xff]  }
 0x1db   : > { %v2478_v27 = vpop.f32.mrf.mxu1  ;;  %4560 = vmatprep.subr.bf16.mxu1 %v12900_v19 }
 0x1dd   : > { %4532 = vmatpush2.bf16.msra.mxu0 %v4328_v28  ;;  %v12967_v28 = vld [vmem:[%s18363_s1 + $0xdbc] ss:$16 sps:$4 sm:$0xff]  }
 0x1de   : > { %4561 = vmatpush2.bf16.msra.mxu1 %v12898_v25  ;;  %4533 = vmatprep.subr.bf16.mxu0 %v12904_v26 }
 0x1df   : > { %4562 = vmatprep.subr.bf16.mxu1 %v12907_v54 }
 0x1e1   : > { %4534 = vmatpush2.bf16.msra.mxu0 %v12902_v29  ;;  %v12962_v29 = vld [vmem:[%s18363_s1 + $0xcf8] ss:$16 sps:$4 sm:$0xff]  }
 0x1e2   : > { %4563 = vmatpush2.bf16.msra.mxu1 %v12905_v30  ;;  %4585 = vmatprep.subr.bf16.mxu0 %v12913_v32  ;;  %v12965_v30 = vld [vmem:[%s18363_s1 + $0xdb8] ss:$16 sps:$4 sm:$0xff]   ;;  %v12973_v32 = vld [vmem:[%s18363_s1 + $0xd9c] ss:$16 sps:$4 sm:$0xff]  }
 0x1e3   : > { %4564 = vmatprep.subr.bf16.mxu1 %v12910_v31  ;;  %v12970_v31 = vld [vmem:[%s18363_s1 + $0xcdc] ss:$16 sps:$4 sm:$0xff]  }
 0x1e4   : > { %4536 = vmatmul.mubr.bf16.vlgmr.msra.gmra.mxu0 %v14813_v2 }
 0x1e5   : > { %4586 = vmatpush1.bf16.msra.mxu0 %v12911_v33  ;;  %4617 = vmatprep.mubr.bf16.mxu0 %v14400_v51  ;;  %v12971_v33 = vld [vmem:[%s18363_s1 + $0xd98] ss:$16 sps:$4 sm:$0xff]  }
 0x1e6   : > { %4565 = vmatpush2.bf16.msra.mxu1 %v12908_v59  ;;  %4587 = vmatprep.subr.bf16.mxu0 %v12919_v35  ;;  %v12968_v59 = vld [vmem:[%s18363_s1 + $0xcd8] ss:$16 sps:$4 sm:$0xff]   ;;  %v12979_v35 = vld [vmem:[%s18363_s1 + $0xd7c] ss:$16 sps:$4 sm:$0xff]  }
 0x1e7   : > { %4566 = vmatprep.subr.bf16.mxu1 %v12916_v34  ;;  %v12976_v34 = vld [vmem:[%s18363_s1 + $0xcbc] ss:$16 sps:$4 sm:$0xff]  }
 0x1e9   : > { %4588 = vmatpush1.bf16.msra.mxu0 %v12917_v39  ;;  %v12977_v39 = vld [vmem:[%s18363_s1 + $0xd78] ss:$16 sps:$4 sm:$0xff]  }
 0x1ea   : > { %4567 = vmatpush2.bf16.msra.mxu1 %v12914_v38  ;;  %4589 = vmatprep.subr.bf16.mxu0 %v12925_v41  ;;  %v12974_v38 = vld [vmem:[%s18363_s1 + $0xcb8] ss:$16 sps:$4 sm:$0xff]   ;;  %v12985_v41 = vld [vmem:[%s18363_s1 + $0xd5c] ss:$16 sps:$4 sm:$0xff]  }
 0x1eb   : > { %4568 = vmatprep.subr.bf16.mxu1 %v12922_v40  ;;  %v12982_v40 = vld [vmem:[%s18363_s1 + $0xc9c] ss:$16 sps:$4 sm:$0xff]  }
 0x1ed   : > { %4590 = vmatpush1.bf16.msra.mxu0 %v12923_v43  ;;  %v12983_v43 = vld [vmem:[%s18363_s1 + $0xd58] ss:$16 sps:$4 sm:$0xff]  }
 0x1ee   : > { %4569 = vmatpush2.bf16.msra.mxu1 %v12920_v42  ;;  %4591 = vmatprep.subr.bf16.mxu0 %v12931_v44  ;;  %v12980_v42 = vld [vmem:[%s18363_s1 + $0xc98] ss:$16 sps:$4 sm:$0xff]   ;;  %v12991_v44 = vld [vmem:[%s18363_s1 + $0xd3c] ss:$16 sps:$4 sm:$0xff]  }
 0x1ef   : > { %4570 = vmatprep.subr.bf16.mxu1 %v12928_v45  ;;  %v12988_v45 = vld [vmem:[%s18363_s1 + $0xc7c] ss:$16 sps:$4 sm:$0xff]  }
 0x1f1   : > { %4592 = vmatpush1.bf16.msra.mxu0 %v12929_v49  ;;  %v12989_v49 = vld [vmem:[%s18363_s1 + $0xd38] ss:$16 sps:$4 sm:$0xff]  }
 0x1f2   : > { %4571 = vmatpush2.bf16.msra.mxu1 %v12926_v46  ;;  %4593 = vmatprep.subr.bf16.mxu0 %v12937_v50  ;;  %v12986_v46 = vld [vmem:[%s18363_s1 + $0xc78] ss:$16 sps:$4 sm:$0xff]   ;;  %v12997_v50 = vld [vmem:[%s18363_s1 + $0xf1c] ss:$16 sps:$4 sm:$0xff]  }
 0x1f3   : > { %4572 = vmatprep.subr.bf16.mxu1 %v12934_v48  ;;  %v12994_v48 = vld [vmem:[%s18363_s1 + $0xc5c] ss:$16 sps:$4 sm:$0xff]  }
 0x1f5   : > { %4594 = vmatpush1.bf16.msra.mxu0 %v12935_v53  ;;  %v12995_v53 = vld [vmem:[%s18363_s1 + $0xf18] ss:$16 sps:$4 sm:$0xff]  }
 0x1f6   : > { %4573 = vmatpush2.bf16.msra.mxu1 %v12932_v52  ;;  %4595 = vmatprep.subr.bf16.mxu0 %v12943_v56  ;;  %v12992_v52 = vld [vmem:[%s18363_s1 + $0xc58] ss:$16 sps:$4 sm:$0xff]   ;;  %v13003_v56 = vld [vmem:[%s18363_s1 + $0xefc] ss:$16 sps:$4 sm:$0xff]  }
 0x1f7   : > { %4574 = vmatprep.subr.bf16.mxu1 %v12940_v55  ;;  %v13000_v55 = vld [vmem:[%s18363_s1 + $0xc3c] ss:$16 sps:$4 sm:$0xff]  }
 0x1f9   : > { %4596 = vmatpush1.bf16.msra.mxu0 %v12941_v58  ;;  %v13001_v58 = vld [vmem:[%s18363_s1 + $0xef8] ss:$16 sps:$4 sm:$0xff]  }
 0x1fa   : > { %4575 = vmatpush2.bf16.msra.mxu1 %v12938_v57  ;;  %4597 = vmatprep.subr.bf16.mxu0 %v12946_v60  ;;  %v12998_v57 = vld [vmem:[%s18363_s1 + $0xc38] ss:$16 sps:$4 sm:$0xff]   ;;  %v13006_v60 = vld [vmem:[%s18363_s1 + $0xedc] ss:$16 sps:$4 sm:$0xff]  }
 0x1fb   : > { %4626 = vmatprep.subr.bf16.mxu1 %v12949_v61  ;;  %v13009_v61 = vld [vmem:[%s18363_s1 + $0x101c] ss:$16 sps:$4 sm:$0xff]  }
 0x1fc   : > { %v2514_v5 = vpop.f32.mrf.mxu0 }
 0x1fd   : > { %v2555_v8 = vpop.f32.mrf.mxu1  ;;  %4577 = vmatmul.mubr.bf16.vlgmr.msra.gmra.mxu1 %v14458_v6  ;;  %v2515_v9 = vadd.f32 %v2514_v5, %v15713_v11  ;;  %4598 = vmatpush1.bf16.msra.mxu0 %v12944_v62  ;;  %v12956_v11 = vld [vmem:[%s18363_s1 + $0xd18] ss:$16 sps:$4 sm:$0xff]   ;;  %v13018_v5 = vld [vmem:[%s18363_s1 + $0xe9c] ss:$16 sps:$4 sm:$0xff]  }
 0x1fe   : > { %4627 = vmatpush1.bf16.msra.mxu1 %v12947_v63  ;;  %v2516_v10 = vpop.f32.mrf.mxu0  ;;  %4599 = vmatprep.subr.bf16.mxu0 %v12952_v0  ;;  %v13004_v62 = vld [vmem:[%s18363_s1 + $0xed8] ss:$16 sps:$4 sm:$0xff]   ;;  %v13012_v0 = vld [vmem:[%s18363_s1 + $0xebc] ss:$16 sps:$4 sm:$0xff]  }
 0x1ff   : > { %v2557_v12 = vpop.f32.mrf.mxu1  ;;  %4628 = vmatprep.subr.bf16.mxu1 %v12955_v1  ;;  %v15849_v18 = vadd.f32 %v2555_v8, %v2515_v9  ;;  %v2517_v19 = vadd.f32 %v2516_v10, %v15724_v22  ;;  %4658 = vmatprep.mubr.bf16.mxu1 %v14550_v36  ;;  %v12964_v22 = vld [vmem:[%s18363_s1 + $0xcfc] ss:$16 sps:$4 sm:$0xff]   ;;  %v13007_v63 = vld [vmem:[%s18363_s1 + $0x1018] ss:$16 sps:$4 sm:$0xff]  }
 0x200   : > { %v2518_v24 = vpop.f32.mrf.mxu0  ;;  %v13015_v1 = vld [vmem:[%s18363_s1 + $0xffc] ss:$16 sps:$4 sm:$0xff]   ;;  %v13016_v9 = vld [vmem:[%s18363_s1 + $0xe98] ss:$16 sps:$4 sm:$0xff]  }
 0x201   : > { %v2559_v25 = vpop.f32.mrf.mxu1  ;;  %v15859_v26 = vadd.f32 %v2557_v12, %v2517_v19  ;;  %4600 = vmatpush1.bf16.msra.mxu0 %v12950_v3  ;;  %v13010_v3 = vld [vmem:[%s18363_s1 + $0xeb8] ss:$16 sps:$4 sm:$0xff]   ;;  %v13021_v8 = vld [vmem:[%s18363_s1 + $0xfdc] ss:$16 sps:$4 sm:$0xff]  }
 0x202   : > { %4629 = vmatpush1.bf16.msra.mxu1 %v12953_v4  ;;  %v2519_v54 = vpop.f32.mrf.mxu0  ;;  %4601 = vmatprep.subr.bf16.mxu0 %v12958_v13  ;;  %v13013_v4 = vld [vmem:[%s18363_s1 + $0xff8] ss:$16 sps:$4 sm:$0xff]   ;;  %v13024_v12 = vld [vmem:[%s18363_s1 + $0xe7c] ss:$16 sps:$4 sm:$0xff]  }
 0x203   : > { %v2560_v27 = vpop.f32.mrf.mxu1  ;;  %4630 = vmatprep.subr.bf16.mxu1 %v12961_v15  ;;  %v13019_v10 = vld [vmem:[%s18363_s1 + $0xfd8] ss:$16 sps:$4 sm:$0xff]   ;;  %v13027_v13 = vld [vmem:[%s18363_s1 + $0xfbc] ss:$16 sps:$4 sm:$0xff]  }
 0x204   : > { %v13022_v15 = vld [vmem:[%s18363_s1 + $0xe78] ss:$16 sps:$4 sm:$0xff]   ;;  %v13036_v54 = vld [vmem:[%s18363_s1 + $0xe3c] ss:$16 sps:$4 sm:$0xff]  }
 0x205   : > { %4602 = vmatpush2.bf16.msra.mxu0 %v12956_v11  ;;  %v13025_v19 = vld [vmem:[%s18363_s1 + $0xfb8] ss:$16 sps:$4 sm:$0xff]   ;;  %v13030_v11 = vld [vmem:[%s18363_s1 + $0xe5c] ss:$16 sps:$4 sm:$0xff]  }
 0x206   : > { %4631 = vmatpush1.bf16.msra.mxu1 %v12959_v21  ;;  %4603 = vmatprep.subr.bf16.mxu0 %v12964_v22  ;;  %v13033_v21 = vld [vmem:[%s18363_s1 + $0xf9c] ss:$16 sps:$4 sm:$0xff]   ;;  %v13028_v24 = vld [vmem:[%s18363_s1 + $0xe58] ss:$16 sps:$4 sm:$0xff]  }
 0x207   : > { %4632 = vmatprep.subr.bf16.mxu1 %v12967_v28  ;;  %v13031_v25 = vld [vmem:[%s18363_s1 + $0xf98] ss:$16 sps:$4 sm:$0xff]   ;;  %v13039_v27 = vld [vmem:[%s18363_s1 + $0xf7c] ss:$16 sps:$4 sm:$0xff]  }
 0x208   : > { %v13034_v22 = vld [vmem:[%s18363_s1 + $0xe38] ss:$16 sps:$4 sm:$0xff]  }
 0x209   : > { %4604 = vmatpush2.bf16.msra.mxu0 %v12962_v29  ;;  %v13037_v28 = vld [vmem:[%s18363_s1 + $0xf78] ss:$16 sps:$4 sm:$0xff]   ;;  %v13042_v29 = vld [vmem:[%s18363_s1 + $0xf5c] ss:$16 sps:$4 sm:$0xff]  }
 0x20a   : > { %4633 = vmatpush1.bf16.msra.mxu1 %v12965_v30  ;;  %4605 = vmatprep.subr.bf16.mxu0 %v12970_v31  ;;  %v13045_v30 = vld [vmem:[%s18363_s1 + $0x121c] ss:$16 sps:$4 sm:$0xff]   ;;  %v13040_v31 = vld [vmem:[%s18363_s1 + $0xf58] ss:$16 sps:$4 sm:$0xff]  }
 0x20b   : > { %4634 = vmatprep.subr.bf16.mxu1 %v12973_v32  ;;  %v13043_v32 = vld [vmem:[%s18363_s1 + $0x1218] ss:$16 sps:$4 sm:$0xff]  }
 0x20d   : > { %4606 = vmatpush2.bf16.msra.mxu0 %v12968_v59  ;;  %v13048_v59 = vld [vmem:[%s18363_s1 + $0xf3c] ss:$16 sps:$4 sm:$0xff]  }
 0x20e   : > { %4635 = vmatpush1.bf16.msra.mxu1 %v12971_v33  ;;  %4607 = vmatprep.subr.bf16.mxu0 %v12976_v34  ;;  %v13051_v33 = vld [vmem:[%s18363_s1 + $0x11fc] ss:$16 sps:$4 sm:$0xff]   ;;  %v13046_v34 = vld [vmem:[%s18363_s1 + $0xf38] ss:$16 sps:$4 sm:$0xff]  }
 0x20f   : > { %4636 = vmatprep.subr.bf16.mxu1 %v12979_v35  ;;  %v13049_v35 = vld [vmem:[%s18363_s1 + $0x11f8] ss:$16 sps:$4 sm:$0xff]  }
 0x211   : > { %4608 = vmatpush2.bf16.msra.mxu0 %v12974_v38 }
 0x212   : > { %4637 = vmatpush1.bf16.msra.mxu1 %v12977_v39  ;;  %4609 = vmatprep.subr.bf16.mxu0 %v12982_v40 }
 0x213   : > { %4638 = vmatprep.subr.bf16.mxu1 %v12985_v41 }
 0x215   : > { %4610 = vmatpush2.bf16.msra.mxu0 %v12980_v42 }
 0x216   : > { %4639 = vmatpush1.bf16.msra.mxu1 %v12983_v43  ;;  %4611 = vmatprep.subr.bf16.mxu0 %v12988_v45  ;;  %v13054_v43 = vld [vmem:[%s18363_s1 + $0x111c] ss:$16 sps:$4 sm:$0xff]  }
 0x217   : > { %4640 = vmatprep.subr.bf16.mxu1 %v12991_v44  ;;  %v13057_v45 = vld [vmem:[%s18363_s1 + $0x11dc] ss:$16 sps:$4 sm:$0xff]  }
 0x219   : > { %4612 = vmatpush2.bf16.msra.mxu0 %v12986_v46  ;;  %v13052_v46 = vld [vmem:[%s18363_s1 + $0x1118] ss:$16 sps:$4 sm:$0xff]  }
 0x21a   : > { %4641 = vmatpush1.bf16.msra.mxu1 %v12989_v49  ;;  %4613 = vmatprep.subr.bf16.mxu0 %v12994_v48  ;;  %v13055_v49 = vld [vmem:[%s18363_s1 + $0x11d8] ss:$16 sps:$4 sm:$0xff]  }
 0x21b   : > { %4642 = vmatprep.subr.bf16.mxu1 %v12997_v50 }
 0x21d   : > { %4614 = vmatpush2.bf16.msra.mxu0 %v12992_v52 }
 0x21e   : > { %4643 = vmatpush2.bf16.msra.mxu1 %v12995_v53  ;;  %4615 = vmatprep.subr.bf16.mxu0 %v13000_v55  ;;  %v13060_v55 = vld [vmem:[%s18363_s1 + $0x10fc] ss:$16 sps:$4 sm:$0xff]  }
 0x21f   : > { %4644 = vmatprep.subr.bf16.mxu1 %v13003_v56  ;;  %v13063_v56 = vld [vmem:[%s18363_s1 + $0x11bc] ss:$16 sps:$4 sm:$0xff]  }
 0x221   : > { %4616 = vmatpush2.bf16.msra.mxu0 %v12998_v57  ;;  %v13058_v57 = vld [vmem:[%s18363_s1 + $0x10f8] ss:$16 sps:$4 sm:$0xff]  }
 0x222   : > { %4645 = vmatpush2.bf16.msra.mxu1 %v13001_v58  ;;  %4667 = vmatprep.subr.bf16.mxu0 %v13009_v61  ;;  %v13061_v58 = vld [vmem:[%s18363_s1 + $0x11b8] ss:$16 sps:$4 sm:$0xff]   ;;  %v13069_v61 = vld [vmem:[%s18363_s1 + $0x119c] ss:$16 sps:$4 sm:$0xff]  }
 0x223   : > { %4646 = vmatprep.subr.bf16.mxu1 %v13006_v60  ;;  %v13066_v60 = vld [vmem:[%s18363_s1 + $0x10dc] ss:$16 sps:$4 sm:$0xff]  }
 0x224   : > { %4618 = vmatmul.mubr.bf16.vlgmr.msra.gmra.mxu0 %v14460_v7 }
 0x225   : > { %4668 = vmatpush1.bf16.msra.mxu0 %v13007_v63  ;;  %4699 = vmatprep.mubr.bf16.mxu0 %v14554_v37  ;;  %v13067_v63 = vld [vmem:[%s18363_s1 + $0x1198] ss:$16 sps:$4 sm:$0xff]  }
 0x226   : > { %4647 = vmatpush2.bf16.msra.mxu1 %v13004_v62  ;;  %4669 = vmatprep.subr.bf16.mxu0 %v13015_v1  ;;  %v13064_v62 = vld [vmem:[%s18363_s1 + $0x10d8] ss:$16 sps:$4 sm:$0xff]   ;;  %v13075_v1 = vld [vmem:[%s18363_s1 + $0x117c] ss:$16 sps:$4 sm:$0xff]  }
 0x227   : > { %4648 = vmatprep.subr.bf16.mxu1 %v13012_v0  ;;  %v13072_v0 = vld [vmem:[%s18363_s1 + $0x10bc] ss:$16 sps:$4 sm:$0xff]  }
 0x229   : > { %4670 = vmatpush1.bf16.msra.mxu0 %v13013_v4  ;;  %v13073_v4 = vld [vmem:[%s18363_s1 + $0x1178] ss:$16 sps:$4 sm:$0xff]  }
 0x22a   : > { %4649 = vmatpush2.bf16.msra.mxu1 %v13010_v3  ;;  %4671 = vmatprep.subr.bf16.mxu0 %v13021_v8  ;;  %v13070_v3 = vld [vmem:[%s18363_s1 + $0x10b8] ss:$16 sps:$4 sm:$0xff]   ;;  %v13081_v8 = vld [vmem:[%s18363_s1 + $0x115c] ss:$16 sps:$4 sm:$0xff]  }
 0x22b   : > { %4650 = vmatprep.subr.bf16.mxu1 %v13018_v5  ;;  %v13078_v5 = vld [vmem:[%s18363_s1 + $0x109c] ss:$16 sps:$4 sm:$0xff]  }
 0x22d   : > { %4672 = vmatpush1.bf16.msra.mxu0 %v13019_v10  ;;  %v13079_v10 = vld [vmem:[%s18363_s1 + $0x1158] ss:$16 sps:$4 sm:$0xff]  }
 0x22e   : > { %4651 = vmatpush2.bf16.msra.mxu1 %v13016_v9  ;;  %4673 = vmatprep.subr.bf16.mxu0 %v13027_v13  ;;  %v13076_v9 = vld [vmem:[%s18363_s1 + $0x1098] ss:$16 sps:$4 sm:$0xff]   ;;  %v13087_v13 = vld [vmem:[%s18363_s1 + $0x113c] ss:$16 sps:$4 sm:$0xff]  }
 0x22f   : > { %4652 = vmatprep.subr.bf16.mxu1 %v13024_v12  ;;  %v13084_v12 = vld [vmem:[%s18363_s1 + $0x107c] ss:$16 sps:$4 sm:$0xff]  }
 0x231   : > { %4674 = vmatpush1.bf16.msra.mxu0 %v13025_v19  ;;  %v13082_v19 = vld [vmem:[%s18363_s1 + $0x1078] ss:$16 sps:$4 sm:$0xff]  }
 0x232   : > { %4653 = vmatpush2.bf16.msra.mxu1 %v13022_v15  ;;  %4675 = vmatprep.subr.bf16.mxu0 %v13033_v21  ;;  %v10542_v15 = vld [vmem:[%s18363_s1 + $0x1258] sm:$0xff] }
 0x233   : > { %4654 = vmatprep.subr.bf16.mxu1 %v13030_v11  ;;  %v13085_v11 = vld [vmem:[%s18363_s1 + $0x1138] ss:$16 sps:$4 sm:$0xff]   ;;  %v13090_v21 = vld [vmem:[%s18363_s1 + $0x105c] ss:$16 sps:$4 sm:$0xff]  }
 0x235   : > { %4676 = vmatpush1.bf16.msra.mxu0 %v13031_v25  ;;  %v10837_v25 = vcombine.low %v10542_v15, %v10542_v15 }
 0x236   : > { %4655 = vmatpush2.bf16.msra.mxu1 %v13028_v24  ;;  %4677 = vmatprep.subr.bf16.mxu0 %v13039_v27  ;;  %v10838_v24 = vcombine.high %v10542_v15, %v10542_v15 }
 0x237   : > { %4656 = vmatprep.subr.bf16.mxu1 %v13036_v54  ;;  %v13088_v54 = vld [vmem:[%s18363_s1 + $0x1058] ss:$16 sps:$4 sm:$0xff]   ;;  %v4334_v27 = vsel %vm2139_vm1, %v10837_v25, 0 }
 0x239   : > { %4678 = vmatpush1.bf16.msra.mxu0 %v13037_v28  ;;  %v13098_v28 = vld [vmem:[%s18363_s1 + $0x123c] ss:$16 sps:$4 sm:$0xff]  }
 0x23a   : > { %4657 = vmatpush2.bf16.msra.mxu1 %v13034_v22  ;;  %4679 = vmatprep.subr.bf16.mxu0 %v13042_v29  ;;  %v13095_v22 = vld [vmem:[%s18363_s1 + $0x103c] ss:$16 sps:$4 sm:$0xff]   ;;  %v13093_v29 = vld [vmem:[%s18363_s1 + $0x1038] ss:$16 sps:$4 sm:$0xff]  }
 0x23b   : > { %4708 = vmatprep.subr.bf16.mxu1 %v13045_v30  ;;  %v13096_v30 = vld [vmem:[%s18363_s1 + $0x1238] ss:$16 sps:$4 sm:$0xff]  }
 0x23c   : > { %v4373_v38 = vpop.f32.mrf.mxu0 }
 0x23d   : > { %v4414_v39 = vpop.f32.mrf.mxu1  ;;  %4659 = vmatmul.mubr.bf16.vlgmr.msra.gmra.mxu1 %v14674_v16  ;;  %4680 = vmatpush1.bf16.msra.mxu0 %v13040_v31  ;;  %v13101_v31 = vld [vmem:[%s18363_s1 + $0x1344] ss:$16 sps:$4 sm:$0xff]  }
 0x23e   : > { %v16044_v40 = vadd.f32 %v4414_v39, %v4373_v38  ;;  %4709 = vmatpush1.bf16.msra.mxu1 %v13043_v32  ;;  %v4375_v41 = vpop.f32.mrf.mxu0  ;;  %4681 = vmatprep.subr.bf16.mxu0 %v13048_v59  ;;  %v13104_v32 = vld [vmem:[%s18363_s1 + $0x1544] ss:$16 sps:$4 sm:$0xff]   ;;  %v13099_v59 = vld [vmem:[%s18363_s1 + $0x1340] ss:$16 sps:$4 sm:$0xff]  }
 0x23f   : > { %v4416_v42 = vpop.f32.mrf.mxu1  ;;  %4710 = vmatprep.subr.bf16.mxu1 %v13051_v33  ;;  %10842 = vmatprep.mubr.msk.bf16.mxu1 %vm2135_vm0, %v14697_v23  ;;  %v13102_v33 = vld [vmem:[%s18363_s1 + $0x1540] ss:$16 sps:$4 sm:$0xff]  }
 0x240   : > { %v16052_v44 = vadd.f32 %v4416_v42, %v4375_v41  ;;  %v4377_v48 = vpop.f32.mrf.mxu0  ;;  %v13105_v38 = vld [vmem:[%s18363_s1 + $0x1320] ss:$16 sps:$4 sm:$0xff]   ;;  %v13113_v41 = vld [vmem:[%s18363_s1 + $0x1304] ss:$16 sps:$4 sm:$0xff]  }
 0x241   : > { %v4418_v50 = vpop.f32.mrf.mxu1  ;;  %4682 = vmatpush1.bf16.msra.mxu0 %v13046_v34  ;;  %v13107_v34 = vld [vmem:[%s18363_s1 + $0x1324] ss:$16 sps:$4 sm:$0xff]   ;;  %v13108_v39 = vld [vmem:[%s18363_s1 + $0x1520] ss:$16 sps:$4 sm:$0xff]  }
 0x242   : > { %4711 = vmatpush1.bf16.msra.mxu1 %v13049_v35  ;;  %v4378_v52 = vpop.f32.mrf.mxu0  ;;  %4683 = vmatprep.subr.bf16.mxu0 %v13054_v43  ;;  %v13110_v35 = vld [vmem:[%s18363_s1 + $0x1524] ss:$16 sps:$4 sm:$0xff]   ;;  %v13111_v43 = vld [vmem:[%s18363_s1 + $0x1300] ss:$16 sps:$4 sm:$0xff]  }
 0x243   : > { %v4419_v53 = vpop.f32.mrf.mxu1  ;;  %4712 = vmatprep.subr.bf16.mxu1 %v13057_v45  ;;  %v13116_v42 = vld [vmem:[%s18363_s1 + $0x1504] ss:$16 sps:$4 sm:$0xff]   ;;  %v13114_v45 = vld [vmem:[%s18363_s1 + $0x1500] ss:$16 sps:$4 sm:$0xff]  }
 0x244   : > { %v13117_v48 = vld [vmem:[%s18363_s1 + $0x12e0] ss:$16 sps:$4 sm:$0xff]   ;;  %v13125_v52 = vld [vmem:[%s18363_s1 + $0x12c4] ss:$16 sps:$4 sm:$0xff]  }
 0x245   : > { %4684 = vmatpush2.bf16.msra.mxu0 %v13052_v46  ;;  %v13119_v46 = vld [vmem:[%s18363_s1 + $0x12e4] ss:$16 sps:$4 sm:$0xff]   ;;  %v13120_v50 = vld [vmem:[%s18363_s1 + $0x14e0] ss:$16 sps:$4 sm:$0xff]  }
 0x246   : > { %4713 = vmatpush1.bf16.msra.mxu1 %v13055_v49  ;;  %4685 = vmatprep.subr.bf16.mxu0 %v13060_v55  ;;  %v13122_v49 = vld [vmem:[%s18363_s1 + $0x14e4] ss:$16 sps:$4 sm:$0xff]   ;;  %v13123_v55 = vld [vmem:[%s18363_s1 + $0x12c0] ss:$16 sps:$4 sm:$0xff]  }
 0x247   : > { %4714 = vmatprep.subr.bf16.mxu1 %v13063_v56  ;;  %v13128_v53 = vld [vmem:[%s18363_s1 + $0x14c4] ss:$16 sps:$4 sm:$0xff]   ;;  %v13126_v56 = vld [vmem:[%s18363_s1 + $0x14c0] ss:$16 sps:$4 sm:$0xff]  }
 0x249   : > { %4686 = vmatpush2.bf16.msra.mxu0 %v13058_v57  ;;  %v13131_v57 = vld [vmem:[%s18363_s1 + $0x12a4] ss:$16 sps:$4 sm:$0xff]  }
 0x24a   : > { %4715 = vmatpush1.bf16.msra.mxu1 %v13061_v58  ;;  %4687 = vmatprep.subr.bf16.mxu0 %v13066_v60  ;;  %v13134_v58 = vld [vmem:[%s18363_s1 + $0x14a4] ss:$16 sps:$4 sm:$0xff]   ;;  %v13129_v60 = vld [vmem:[%s18363_s1 + $0x12a0] ss:$16 sps:$4 sm:$0xff]  }
 0x24b   : > { %4716 = vmatprep.subr.bf16.mxu1 %v13069_v61  ;;  %v13132_v61 = vld [vmem:[%s18363_s1 + $0x14a0] ss:$16 sps:$4 sm:$0xff]  }
 0x24d   : > { %4688 = vmatpush2.bf16.msra.mxu0 %v13064_v62  ;;  %v13137_v62 = vld [vmem:[%s18363_s1 + $0x1284] ss:$16 sps:$4 sm:$0xff]  }
 0x24e   : > { %4717 = vmatpush1.bf16.msra.mxu1 %v13067_v63  ;;  %4689 = vmatprep.subr.bf16.mxu0 %v13072_v0  ;;  %v13140_v63 = vld [vmem:[%s18363_s1 + $0x1484] ss:$16 sps:$4 sm:$0xff]   ;;  %v13135_v0 = vld [vmem:[%s18363_s1 + $0x1280] ss:$16 sps:$4 sm:$0xff]  }
 0x24f   : > { %4718 = vmatprep.subr.bf16.mxu1 %v13075_v1  ;;  %v13138_v1 = vld [vmem:[%s18363_s1 + $0x1480] ss:$16 sps:$4 sm:$0xff]  }
 0x251   : > { %4690 = vmatpush2.bf16.msra.mxu0 %v13070_v3  ;;  %v13143_v3 = vld [vmem:[%s18363_s1 + $0x1264] ss:$16 sps:$4 sm:$0xff]  }
 0x252   : > { %4719 = vmatpush1.bf16.msra.mxu1 %v13073_v4  ;;  %4691 = vmatprep.subr.bf16.mxu0 %v13078_v5  ;;  %v13146_v4 = vld [vmem:[%s18363_s1 + $0x1464] ss:$16 sps:$4 sm:$0xff]   ;;  %v13141_v5 = vld [vmem:[%s18363_s1 + $0x1260] ss:$16 sps:$4 sm:$0xff]  }
 0x253   : > { %4720 = vmatprep.subr.bf16.mxu1 %v13081_v8  ;;  %v13144_v8 = vld [vmem:[%s18363_s1 + $0x1460] ss:$16 sps:$4 sm:$0xff]  }
 0x255   : > { %4692 = vmatpush2.bf16.msra.mxu0 %v13076_v9 }
 0x256   : > { %4721 = vmatpush1.bf16.msra.mxu1 %v13079_v10  ;;  %4693 = vmatprep.subr.bf16.mxu0 %v13084_v12 }
 0x257   : > { %4722 = vmatprep.subr.bf16.mxu1 %v13087_v13 }
 0x259   : > { %4694 = vmatpush2.bf16.msra.mxu0 %v13082_v19  ;;  %v13149_v19 = vld [vmem:[%s18363_s1 + $0x1444] ss:$16 sps:$4 sm:$0xff]  }
 0x25a   : > { %4723 = vmatpush1.bf16.msra.mxu1 %v13085_v11  ;;  %4695 = vmatprep.subr.bf16.mxu0 %v13090_v21  ;;  %v13152_v11 = vld [vmem:[%s18363_s1 + $0x1644] ss:$16 sps:$4 sm:$0xff]  }
 0x25b   : > { %10841 = vmatprep.subr.msk.bf16.mxu1 %vm2139_vm1, %v10838_v24 }
 0x25d   : > { %4696 = vmatpush2.bf16.msra.mxu0 %v13088_v54 }
 0x25e   : > { %4737 = vmatpush2.bf16.msra.mxu1 %v4334_v27  ;;  %4697 = vmatprep.subr.bf16.mxu0 %v13095_v22  ;;  %v13150_v22 = vld [vmem:[%s18363_s1 + $0x1640] ss:$16 sps:$4 sm:$0xff]  }
 0x25f   : > { %4738 = vmatprep.subr.bf16.mxu1 %v13098_v28 }
 0x261   : > { %4698 = vmatpush2.bf16.msra.mxu0 %v13093_v29 }
 0x262   : > { %4739 = vmatpush2.bf16.msra.mxu1 %v13096_v30  ;;  %6530 = vmatprep.subr.bf16.mxu0 %v13101_v31  ;;  %v13158_v30 = vld [vmem:[%s18363_s1 + $0x1624] ss:$16 sps:$4 sm:$0xff]   ;;  %v13153_v31 = vld [vmem:[%s18363_s1 + $0x1420] ss:$16 sps:$4 sm:$0xff]  }
 0x263   : > { %6571 = vmatprep.subr.bf16.mxu1 %v13104_v32  ;;  %v13156_v32 = vld [vmem:[%s18363_s1 + $0x1620] ss:$16 sps:$4 sm:$0xff]  }
 0x264   : > { %4700 = vmatmul.mubr.bf16.vlgmr.msra.gmra.mxu0 %v14678_v17 }
 0x265   : > { %4741 = vmatmul.mubr.bf16.vlgmr.msra.gmra.mxu1 %v14813_v2  ;;  %6531 = vmatpush1.bf16.msra.mxu0 %v13099_v59  ;;  %v13161_v59 = vld [vmem:[%s18363_s1 + $0x1404] ss:$16 sps:$4 sm:$0xff]  }
 0x266   : > { %6572 = vmatpush1.bf16.msra.mxu1 %v13102_v33  ;;  %6532 = vmatprep.subr.bf16.mxu0 %v13107_v34  ;;  %v13164_v33 = vld [vmem:[%s18363_s1 + $0x1604] ss:$16 sps:$4 sm:$0xff]   ;;  %v13159_v34 = vld [vmem:[%s18363_s1 + $0x1400] ss:$16 sps:$4 sm:$0xff]  }
 0x267   : > { %6573 = vmatprep.subr.bf16.mxu1 %v13110_v35  ;;  %6562 = vmatprep.mubr.bf16.mxu0 %v14391_v47  ;;  %v13162_v35 = vld [vmem:[%s18363_s1 + $0x1600] ss:$16 sps:$4 sm:$0xff]  }
 0x268   : > { %6603 = vmatprep.mubr.bf16.mxu1 %v14400_v51 }
 0x269   : > { %6533 = vmatpush1.bf16.msra.mxu0 %v13105_v38  ;;  %v13167_v38 = vld [vmem:[%s18363_s1 + $0x13e4] ss:$16 sps:$4 sm:$0xff]  }
 0x26a   : > { %6574 = vmatpush1.bf16.msra.mxu1 %v13108_v39  ;;  %6534 = vmatprep.subr.bf16.mxu0 %v13113_v41  ;;  %v13170_v39 = vld [vmem:[%s18363_s1 + $0x15e4] ss:$16 sps:$4 sm:$0xff]   ;;  %v13165_v41 = vld [vmem:[%s18363_s1 + $0x13e0] ss:$16 sps:$4 sm:$0xff]  }
 0x26b   : > { %6575 = vmatprep.subr.bf16.mxu1 %v13116_v42  ;;  %v13168_v42 = vld [vmem:[%s18363_s1 + $0x15e0] ss:$16 sps:$4 sm:$0xff]  }
 0x26d   : > { %6535 = vmatpush1.bf16.msra.mxu0 %v13111_v43  ;;  %v13173_v43 = vld [vmem:[%s18363_s1 + $0x13c4] ss:$16 sps:$4 sm:$0xff]  }
 0x26e   : > { %6576 = vmatpush1.bf16.msra.mxu1 %v13114_v45  ;;  %6536 = vmatprep.subr.bf16.mxu0 %v13119_v46  ;;  %v13176_v45 = vld [vmem:[%s18363_s1 + $0x15c4] ss:$16 sps:$4 sm:$0xff]   ;;  %v13171_v46 = vld [vmem:[%s18363_s1 + $0x13c0] ss:$16 sps:$4 sm:$0xff]  }
 0x26f   : > { %6577 = vmatprep.subr.bf16.mxu1 %v13122_v49  ;;  %v13174_v49 = vld [vmem:[%s18363_s1 + $0x15c0] ss:$16 sps:$4 sm:$0xff]  }
 0x271   : > { %6537 = vmatpush1.bf16.msra.mxu0 %v13117_v48  ;;  %v13179_v48 = vld [vmem:[%s18363_s1 + $0x13a4] ss:$16 sps:$4 sm:$0xff]  }
 0x272   : > { %6578 = vmatpush1.bf16.msra.mxu1 %v13120_v50  ;;  %6538 = vmatprep.subr.bf16.mxu0 %v13125_v52  ;;  %v13182_v50 = vld [vmem:[%s18363_s1 + $0x15a4] ss:$16 sps:$4 sm:$0xff]   ;;  %v13177_v52 = vld [vmem:[%s18363_s1 + $0x13a0] ss:$16 sps:$4 sm:$0xff]  }
 0x273   : > { %6579 = vmatprep.subr.bf16.mxu1 %v13128_v53  ;;  %v13180_v53 = vld [vmem:[%s18363_s1 + $0x15a0] ss:$16 sps:$4 sm:$0xff]  }
 0x275   : > { %6539 = vmatpush1.bf16.msra.mxu0 %v13123_v55  ;;  %v13185_v55 = vld [vmem:[%s18363_s1 + $0x1384] ss:$16 sps:$4 sm:$0xff]  }
 0x276   : > { %6580 = vmatpush1.bf16.msra.mxu1 %v13126_v56  ;;  %6540 = vmatprep.subr.bf16.mxu0 %v13131_v57  ;;  %v13188_v56 = vld [vmem:[%s18363_s1 + $0x1584] ss:$16 sps:$4 sm:$0xff]   ;;  %v13183_v57 = vld [vmem:[%s18363_s1 + $0x1380] ss:$16 sps:$4 sm:$0xff]  }
 0x277   : > { %6581 = vmatprep.subr.bf16.mxu1 %v13134_v58  ;;  %v13186_v58 = vld [vmem:[%s18363_s1 + $0x1580] ss:$16 sps:$4 sm:$0xff]  }
 0x279   : > { %6541 = vmatpush1.bf16.msra.mxu0 %v13129_v60  ;;  %v13191_v60 = vld [vmem:[%s18363_s1 + $0x1364] ss:$16 sps:$4 sm:$0xff]  }
 0x27a   : > { %6582 = vmatpush1.bf16.msra.mxu1 %v13132_v61  ;;  %6542 = vmatprep.subr.bf16.mxu0 %v13137_v62  ;;  %v13194_v61 = vld [vmem:[%s18363_s1 + $0x1564] ss:$16 sps:$4 sm:$0xff]   ;;  %v13189_v62 = vld [vmem:[%s18363_s1 + $0x1360] ss:$16 sps:$4 sm:$0xff]  }
 0x27b   : > { %6583 = vmatprep.subr.bf16.mxu1 %v13140_v63  ;;  %v13192_v63 = vld [vmem:[%s18363_s1 + $0x1560] ss:$16 sps:$4 sm:$0xff]  }
 0x27c   : > { %v4455_v9 = vpop.f32.mrf.mxu0 }
 0x27d   : > { %v4496_v10 = vpop.f32.mrf.mxu1  ;;  %v4456_v12 = vadd.f32 %v4455_v9, %v16044_v40  ;;  %6543 = vmatpush1.bf16.msra.mxu0 %v13135_v0  ;;  %v13147_v40 = vld [vmem:[%s18363_s1 + $0x1440] ss:$16 sps:$4 sm:$0xff]   ;;  %v13197_v0 = vld [vmem:[%s18363_s1 + $0x1744] ss:$16 sps:$4 sm:$0xff]  }
 0x27e   : > { %6584 = vmatpush1.bf16.msra.mxu1 %v13138_v1  ;;  %v4457_v13 = vpop.f32.mrf.mxu0  ;;  %6544 = vmatprep.subr.bf16.mxu0 %v13143_v3  ;;  %v13200_v1 = vld [vmem:[%s18363_s1 + $0x1944] ss:$16 sps:$4 sm:$0xff]   ;;  %v13195_v3 = vld [vmem:[%s18363_s1 + $0x1740] ss:$16 sps:$4 sm:$0xff]  }
 0x27f   : > { %v4498_v15 = vpop.f32.mrf.mxu1  ;;  %6585 = vmatprep.subr.bf16.mxu1 %v13146_v4  ;;  %v16252_v21 = vadd.f32 %v4496_v10, %v4456_v12  ;;  %v4458_v24 = vadd.f32 %v4457_v13, %v16052_v44  ;;  %v13155_v44 = vld [vmem:[%s18363_s1 + $0x1424] ss:$16 sps:$4 sm:$0xff]   ;;  %v13198_v4 = vld [vmem:[%s18363_s1 + $0x1940] ss:$16 sps:$4 sm:$0xff]  }
 0x280   : > { %v4459_v25 = vpop.f32.mrf.mxu0  ;;  %v13201_v9 = vld [vmem:[%s18363_s1 + $0x1720] ss:$16 sps:$4 sm:$0xff]  }
 0x281   : > { %v4500_v54 = vpop.f32.mrf.mxu1  ;;  %v16258_v27 = vadd.f32 %v4498_v15, %v4458_v24  ;;  %6545 = vmatpush1.bf16.msra.mxu0 %v13141_v5  ;;  %v13203_v5 = vld [vmem:[%s18363_s1 + $0x1724] ss:$16 sps:$4 sm:$0xff]   ;;  %v13204_v10 = vld [vmem:[%s18363_s1 + $0x1920] ss:$16 sps:$4 sm:$0xff]  }
 0x282   : > { %6586 = vmatpush1.bf16.msra.mxu1 %v13144_v8  ;;  %v4460_v28 = vpop.f32.mrf.mxu0  ;;  %6546 = vmatprep.subr.bf16.mxu0 %v13149_v19  ;;  %v13206_v8 = vld [vmem:[%s18363_s1 + $0x1924] ss:$16 sps:$4 sm:$0xff]   ;;  %v13210_v25 = vld [vmem:[%s18363_s1 + $0x1900] ss:$16 sps:$4 sm:$0xff]  }
 0x283   : > { %v4501_v29 = vpop.f32.mrf.mxu1  ;;  %6587 = vmatprep.subr.bf16.mxu1 %v13152_v11  ;;  %v13209_v19 = vld [vmem:[%s18363_s1 + $0x1704] ss:$16 sps:$4 sm:$0xff]  }
 0x284   : > { %v13212_v11 = vld [vmem:[%s18363_s1 + $0x1904] ss:$16 sps:$4 sm:$0xff]  }
 0x285   : > { %6547 = vmatpush2.bf16.msra.mxu0 %v13147_v40  ;;  %v13215_v28 = vld [vmem:[%s18363_s1 + $0x16e4] ss:$16 sps:$4 sm:$0xff]  }
 0x286   : > { %6588 = vmatpush2.bf16.msra.mxu1 %v13150_v22  ;;  %6548 = vmatprep.subr.bf16.mxu0 %v13155_v44  ;;  %v13218_v29 = vld [vmem:[%s18363_s1 + $0x18e4] ss:$16 sps:$4 sm:$0xff]   ;;  %v13213_v44 = vld [vmem:[%s18363_s1 + $0x16e0] ss:$16 sps:$4 sm:$0xff]  }
 0x287   : > { %6589 = vmatprep.subr.bf16.mxu1 %v13158_v30  ;;  %v13216_v30 = vld [vmem:[%s18363_s1 + $0x18e0] ss:$16 sps:$4 sm:$0xff]  }
 0x289   : > { %6549 = vmatpush2.bf16.msra.mxu0 %v13153_v31  ;;  %v13221_v31 = vld [vmem:[%s18363_s1 + $0x16c4] ss:$16 sps:$4 sm:$0xff]  }
 0x28a   : > { %6590 = vmatpush2.bf16.msra.mxu1 %v13156_v32  ;;  %6550 = vmatprep.subr.bf16.mxu0 %v13161_v59  ;;  %v13224_v32 = vld [vmem:[%s18363_s1 + $0x18c4] ss:$16 sps:$4 sm:$0xff]   ;;  %v13219_v59 = vld [vmem:[%s18363_s1 + $0x16c0] ss:$16 sps:$4 sm:$0xff]  }
 0x28b   : > { %6591 = vmatprep.subr.bf16.mxu1 %v13164_v33  ;;  %v13222_v33 = vld [vmem:[%s18363_s1 + $0x18c0] ss:$16 sps:$4 sm:$0xff]  }
 0x28d   : > { %6551 = vmatpush2.bf16.msra.mxu0 %v13159_v34  ;;  %v13227_v34 = vld [vmem:[%s18363_s1 + $0x16a4] ss:$16 sps:$4 sm:$0xff]  }
 0x28e   : > { %6592 = vmatpush2.bf16.msra.mxu1 %v13162_v35  ;;  %6552 = vmatprep.subr.bf16.mxu0 %v13167_v38  ;;  %v13230_v35 = vld [vmem:[%s18363_s1 + $0x18a4] ss:$16 sps:$4 sm:$0xff]   ;;  %v13225_v38 = vld [vmem:[%s18363_s1 + $0x16a0] ss:$16 sps:$4 sm:$0xff]  }
 0x28f   : > { %6593 = vmatprep.subr.bf16.mxu1 %v13170_v39  ;;  %v13228_v39 = vld [vmem:[%s18363_s1 + $0x18a0] ss:$16 sps:$4 sm:$0xff]  }
 0x291   : > { %6553 = vmatpush2.bf16.msra.mxu0 %v13165_v41  ;;  %v13233_v41 = vld [vmem:[%s18363_s1 + $0x1684] ss:$16 sps:$4 sm:$0xff]  }
 0x292   : > { %6594 = vmatpush2.bf16.msra.mxu1 %v13168_v42  ;;  %6554 = vmatprep.subr.bf16.mxu0 %v13173_v43  ;;  %v13236_v42 = vld [vmem:[%s18363_s1 + $0x1884] ss:$16 sps:$4 sm:$0xff]   ;;  %v13231_v43 = vld [vmem:[%s18363_s1 + $0x1680] ss:$16 sps:$4 sm:$0xff]  }
 0x293   : > { %6595 = vmatprep.subr.bf16.mxu1 %v13176_v45  ;;  %v13234_v45 = vld [vmem:[%s18363_s1 + $0x1880] ss:$16 sps:$4 sm:$0xff]  }
 0x295   : > { %6555 = vmatpush2.bf16.msra.mxu0 %v13171_v46  ;;  %v13239_v46 = vld [vmem:[%s18363_s1 + $0x1664] ss:$16 sps:$4 sm:$0xff]  }
 0x296   : > { %6596 = vmatpush2.bf16.msra.mxu1 %v13174_v49  ;;  %6556 = vmatprep.subr.bf16.mxu0 %v13179_v48  ;;  %v13242_v49 = vld [vmem:[%s18363_s1 + $0x1864] ss:$16 sps:$4 sm:$0xff]  }
 0x297   : > { %6597 = vmatprep.subr.bf16.mxu1 %v13182_v50  ;;  %v13237_v50 = vld [vmem:[%s18363_s1 + $0x1660] ss:$16 sps:$4 sm:$0xff]  }
 0x299   : > { %6557 = vmatpush2.bf16.msra.mxu0 %v13177_v52  ;;  %v13240_v52 = vld [vmem:[%s18363_s1 + $0x1860] ss:$16 sps:$4 sm:$0xff]  }
 0x29a   : > { %6598 = vmatpush2.bf16.msra.mxu1 %v13180_v53  ;;  %6558 = vmatprep.subr.bf16.mxu0 %v13185_v55  ;;  %v13245_v55 = vld [vmem:[%s18363_s1 + $0x1844] ss:$16 sps:$4 sm:$0xff]  }
 0x29b   : > { %6599 = vmatprep.subr.bf16.mxu1 %v13188_v56  ;;  %v13248_v56 = vld [vmem:[%s18363_s1 + $0x1a44] ss:$16 sps:$4 sm:$0xff]  }
 0x29d   : > { %6559 = vmatpush2.bf16.msra.mxu0 %v13183_v57 }
 0x29e   : > { %6600 = vmatpush2.bf16.msra.mxu1 %v13186_v58  ;;  %6560 = vmatprep.subr.bf16.mxu0 %v13191_v60  ;;  %v13243_v58 = vld [vmem:[%s18363_s1 + $0x1840] ss:$16 sps:$4 sm:$0xff]  }
 0x29f   : > { %6601 = vmatprep.subr.bf16.mxu1 %v13194_v61  ;;  %v13246_v60 = vld [vmem:[%s18363_s1 + $0x1a40] ss:$16 sps:$4 sm:$0xff]  }
 0x2a1   : > { %6561 = vmatpush2.bf16.msra.mxu0 %v13189_v62  ;;  %v13251_v62 = vld [vmem:[%s18363_s1 + $0x1824] ss:$16 sps:$4 sm:$0xff]  }
 0x2a2   : > { %6602 = vmatpush2.bf16.msra.mxu1 %v13192_v63  ;;  %6612 = vmatprep.subr.bf16.mxu0 %v13197_v0  ;;  %v13254_v63 = vld [vmem:[%s18363_s1 + $0x1a24] ss:$16 sps:$4 sm:$0xff]   ;;  %v13249_v0 = vld [vmem:[%s18363_s1 + $0x1820] ss:$16 sps:$4 sm:$0xff]  }
 0x2a3   : > { %6653 = vmatprep.subr.bf16.mxu1 %v13200_v1  ;;  %v13252_v1 = vld [vmem:[%s18363_s1 + $0x1a20] ss:$16 sps:$4 sm:$0xff]  }
 0x2a4   : > { %v4537_v12 = vpop.f32.mrf.mxu0  ;;  %6563 = vmatmul.mubr.bf16.vlgmr.msra.gmra.mxu0 %v14458_v6 }
 0x2a5   : > { %6604 = vmatmul.mubr.bf16.vlgmr.msra.gmra.mxu1 %v14460_v7  ;;  %v16374_v13 = vadd.f32 %v4537_v12, %v16252_v21  ;;  %6613 = vmatpush1.bf16.msra.mxu0 %v13195_v3  ;;  %v13207_v21 = vld [vmem:[%s18363_s1 + $0x1700] ss:$16 sps:$4 sm:$0xff]   ;;  %v13257_v3 = vld [vmem:[%s18363_s1 + $0x1804] ss:$16 sps:$4 sm:$0xff]  }
 0x2a6   : > { %6654 = vmatpush1.bf16.msra.mxu1 %v13198_v4  ;;  %v4539_v15 = vpop.f32.mrf.mxu0  ;;  %6614 = vmatprep.subr.bf16.mxu0 %v13203_v5  ;;  %v13260_v4 = vld [vmem:[%s18363_s1 + $0x1a04] ss:$16 sps:$4 sm:$0xff]   ;;  %v13255_v5 = vld [vmem:[%s18363_s1 + $0x1800] ss:$16 sps:$4 sm:$0xff]  }
 0x2a7   : > { %6655 = vmatprep.subr.bf16.mxu1 %v13206_v8  ;;  %v4749_v24 = vmax.f32 %v15434_v14, %v16374_v13  ;;  %v16385_v40 = vadd.f32 %v4539_v15, %v16258_v27  ;;  %6644 = vmatprep.mubr.bf16.mxu0 %v14550_v36  ;;  %v13258_v8 = vld [vmem:[%s18363_s1 + $0x1a00] ss:$16 sps:$4 sm:$0xff]  }
 0x2a8   : > { %6685 = vmatprep.mubr.bf16.mxu1 %v14554_v37  ;;  %v4541_v54 = vpop.f32.mrf.mxu0  ;;  %v13261_v12 = vld [vmem:[%s18363_s1 + $0x17e0] ss:$16 sps:$4 sm:$0xff]  }
 0x2a9   : > { %v4750_v22 = vmax.f32 %v15443_v20, %v16385_v40  ;;  %6615 = vmatpush1.bf16.msra.mxu0 %v13201_v9  ;;  %v13263_v9 = vld [vmem:[%s18363_s1 + $0x17e4] ss:$16 sps:$4 sm:$0xff]   ;;  %v13264_v15 = vld [vmem:[%s18363_s1 + $0x19e0] ss:$16 sps:$4 sm:$0xff]  }
 0x2aa   : > { %6656 = vmatpush1.bf16.msra.mxu1 %v13204_v10  ;;  %v4542_v27 = vpop.f32.mrf.mxu0  ;;  %6616 = vmatprep.subr.bf16.mxu0 %v13209_v19  ;;  %v13266_v10 = vld [vmem:[%s18363_s1 + $0x19e4] ss:$16 sps:$4 sm:$0xff]   ;;  %v13649_v14 = vld [vmem:[%s18363_s1 + $0x2030] ss:$16 sps:$4 sm:$0xff]  }
 0x2ab   : > { %6657 = vmatprep.subr.bf16.mxu1 %v13212_v11  ;;  %v13269_v19 = vld [vmem:[%s18363_s1 + $0x17c4] ss:$16 sps:$4 sm:$0xff]   ;;  %v13652_v13 = vld [vmem:[%s18363_s1 + $0x2230] ss:$16 sps:$4 sm:$0xff]  }
 0x2ac   : > { %v13272_v11 = vld [vmem:[%s18363_s1 + $0x19c4] ss:$16 sps:$4 sm:$0xff]   ;;  %v13655_v40 = vld [vmem:[%s18363_s1 + $0x2010] ss:$16 sps:$4 sm:$0xff]  }
 0x2ad   : > { %6617 = vmatpush1.bf16.msra.mxu0 %v13207_v21  ;;  %v13267_v21 = vld [vmem:[%s18363_s1 + $0x17c0] ss:$16 sps:$4 sm:$0xff]   ;;  %v13275_v54 = vld [vmem:[%s18363_s1 + $0x17a4] ss:$16 sps:$4 sm:$0xff]  }
 0x2ae   : > { %6658 = vmatpush1.bf16.msra.mxu1 %v13210_v25  ;;  %6618 = vmatprep.subr.bf16.mxu0 %v13215_v28  ;;  %v13270_v25 = vld [vmem:[%s18363_s1 + $0x19c0] ss:$16 sps:$4 sm:$0xff]   ;;  %v13278_v27 = vld [vmem:[%s18363_s1 + $0x19a4] ss:$16 sps:$4 sm:$0xff]  }
 0x2af   : > { %6659 = vmatprep.subr.bf16.mxu1 %v13218_v29  ;;  %v13273_v28 = vld [vmem:[%s18363_s1 + $0x17a0] ss:$16 sps:$4 sm:$0xff]   ;;  %v13660_v20 = vld [vmem:[%s18363_s1 + $0x2214] ss:$16 sps:$4 sm:$0xff]  }
 0x2b0   : > { %v13276_v29 = vld [vmem:[%s18363_s1 + $0x19a0] ss:$16 sps:$4 sm:$0xff]  }
 0x2b1   : > { %6619 = vmatpush1.bf16.msra.mxu0 %v13213_v44  ;;  %v13281_v44 = vld [vmem:[%s18363_s1 + $0x1784] ss:$16 sps:$4 sm:$0xff]  }
 0x2b2   : > { %6660 = vmatpush1.bf16.msra.mxu1 %v13216_v30  ;;  %6620 = vmatprep.subr.bf16.mxu0 %v13221_v31  ;;  %v13284_v30 = vld [vmem:[%s18363_s1 + $0x1984] ss:$16 sps:$4 sm:$0xff]   ;;  %v13279_v31 = vld [vmem:[%s18363_s1 + $0x1780] ss:$16 sps:$4 sm:$0xff]  }
 0x2b3   : > { %6661 = vmatprep.subr.bf16.mxu1 %v13224_v32  ;;  %v13282_v32 = vld [vmem:[%s18363_s1 + $0x1980] ss:$16 sps:$4 sm:$0xff]  }
 0x2b5   : > { %6621 = vmatpush1.bf16.msra.mxu0 %v13219_v59  ;;  %v13287_v59 = vld [vmem:[%s18363_s1 + $0x1764] ss:$16 sps:$4 sm:$0xff]  }
 0x2b6   : > { %6662 = vmatpush1.bf16.msra.mxu1 %v13222_v33  ;;  %6622 = vmatprep.subr.bf16.mxu0 %v13227_v34  ;;  %v13290_v33 = vld [vmem:[%s18363_s1 + $0x1964] ss:$16 sps:$4 sm:$0xff]   ;;  %v13285_v34 = vld [vmem:[%s18363_s1 + $0x1760] ss:$16 sps:$4 sm:$0xff]  }
 0x2b7   : > { %6663 = vmatprep.subr.bf16.mxu1 %v13230_v35  ;;  %v13288_v35 = vld [vmem:[%s18363_s1 + $0x1960] ss:$16 sps:$4 sm:$0xff]  }
 0x2b9   : > { %6623 = vmatpush1.bf16.msra.mxu0 %v13225_v38  ;;  %v13293_v38 = vld [vmem:[%s18363_s1 + $0x1b44] ss:$16 sps:$4 sm:$0xff]  }
 0x2ba   : > { %6664 = vmatpush1.bf16.msra.mxu1 %v13228_v39  ;;  %6624 = vmatprep.subr.bf16.mxu0 %v13233_v41  ;;  %v13296_v39 = vld [vmem:[%s18363_s1 + $0x134c] ss:$16 sps:$4 sm:$0xff]   ;;  %v13291_v41 = vld [vmem:[%s18363_s1 + $0x1b40] ss:$16 sps:$4 sm:$0xff]  }
 0x2bb   : > { %6665 = vmatprep.subr.bf16.mxu1 %v13236_v42  ;;  %v13294_v42 = vld [vmem:[%s18363_s1 + $0x1348] ss:$16 sps:$4 sm:$0xff]  }
 0x2bd   : > { %v16451_v48 = vpop.f32.mrf.mxu1  ;;  %6625 = vmatpush1.bf16.msra.mxu0 %v13231_v43  ;;  %v13299_v43 = vld [vmem:[%s18363_s1 + $0x1b24] ss:$16 sps:$4 sm:$0xff]  }
 0x2be   : > { %6666 = vmatpush1.bf16.msra.mxu1 %v13234_v45  ;;  %6626 = vmatprep.subr.bf16.mxu0 %v13239_v46  ;;  %v13302_v45 = vld [vmem:[%s18363_s1 + $0x132c] ss:$16 sps:$4 sm:$0xff]  }
 0x2bf   : > { %v16459_v53 = vpop.f32.mrf.mxu1  ;;  %6667 = vmatprep.subr.bf16.mxu1 %v13242_v49 }
 0x2c1   : > { %v4582_v57 = vpop.f32.mrf.mxu1  ;;  %6627 = vmatpush1.bf16.msra.mxu0 %v13237_v50  ;;  %v13297_v50 = vld [vmem:[%s18363_s1 + $0x1b20] ss:$16 sps:$4 sm:$0xff]  }
 0x2c2   : > { %6668 = vmatpush1.bf16.msra.mxu1 %v13240_v52  ;;  %6628 = vmatprep.subr.bf16.mxu0 %v13245_v55  ;;  %v13300_v52 = vld [vmem:[%s18363_s1 + $0x1328] ss:$16 sps:$4 sm:$0xff]  }
 0x2c3   : > { %v4583_v61 = vpop.f32.mrf.mxu1  ;;  %6669 = vmatprep.subr.bf16.mxu1 %v13248_v56  ;;  %v13305_v56 = vld [vmem:[%s18363_s1 + $0x1b04] ss:$16 sps:$4 sm:$0xff]  }
 0x2c4   : > { %v13306_v61 = vld [vmem:[%s18363_s1 + $0x1308] ss:$16 sps:$4 sm:$0xff]  }
 0x2c5   : > { %6629 = vmatpush2.bf16.msra.mxu0 %v13243_v58 }
 0x2c6   : > { %6670 = vmatpush2.bf16.msra.mxu1 %v13246_v60  ;;  %6630 = vmatprep.subr.bf16.mxu0 %v13251_v62  ;;  %v13303_v60 = vld [vmem:[%s18363_s1 + $0x1b00] ss:$16 sps:$4 sm:$0xff]  }
 0x2c7   : > { %6671 = vmatprep.subr.bf16.mxu1 %v13254_v63  ;;  %v13314_v63 = vld [vmem:[%s18363_s1 + $0x12ec] ss:$16 sps:$4 sm:$0xff]  }
 0x2c9   : > { %6631 = vmatpush2.bf16.msra.mxu0 %v13249_v0  ;;  %v13309_v0 = vld [vmem:[%s18363_s1 + $0x1ae0] ss:$16 sps:$4 sm:$0xff]  }
 0x2ca   : > { %6672 = vmatpush2.bf16.msra.mxu1 %v13252_v1  ;;  %6632 = vmatprep.subr.bf16.mxu0 %v13257_v3  ;;  %v13312_v1 = vld [vmem:[%s18363_s1 + $0x12e8] ss:$16 sps:$4 sm:$0xff]   ;;  %v13317_v3 = vld [vmem:[%s18363_s1 + $0x1ac4] ss:$16 sps:$4 sm:$0xff]  }
 0x2cb   : > { %6673 = vmatprep.subr.bf16.mxu1 %v13260_v4  ;;  %v13320_v4 = vld [vmem:[%s18363_s1 + $0x12cc] ss:$16 sps:$4 sm:$0xff]  }
 0x2cd   : > { %6633 = vmatpush2.bf16.msra.mxu0 %v13255_v5  ;;  %v13315_v5 = vld [vmem:[%s18363_s1 + $0x1ac0] ss:$16 sps:$4 sm:$0xff]  }
 0x2ce   : > { %6674 = vmatpush2.bf16.msra.mxu1 %v13258_v8  ;;  %6634 = vmatprep.subr.bf16.mxu0 %v13263_v9  ;;  %v13318_v8 = vld [vmem:[%s18363_s1 + $0x12c8] ss:$16 sps:$4 sm:$0xff]   ;;  %v13323_v9 = vld [vmem:[%s18363_s1 + $0x1aa4] ss:$16 sps:$4 sm:$0xff]  }
 0x2cf   : > { %6675 = vmatprep.subr.bf16.mxu1 %v13266_v10  ;;  %v13326_v10 = vld [vmem:[%s18363_s1 + $0x12ac] ss:$16 sps:$4 sm:$0xff]  }
 0x2d1   : > { %6635 = vmatpush2.bf16.msra.mxu0 %v13261_v12  ;;  %v13321_v12 = vld [vmem:[%s18363_s1 + $0x1aa0] ss:$16 sps:$4 sm:$0xff]  }
 0x2d2   : > { %6676 = vmatpush2.bf16.msra.mxu1 %v13264_v15  ;;  %6636 = vmatprep.subr.bf16.mxu0 %v13269_v19  ;;  %v13324_v15 = vld [vmem:[%s18363_s1 + $0x12a8] ss:$16 sps:$4 sm:$0xff]   ;;  %v13329_v19 = vld [vmem:[%s18363_s1 + $0x1a84] ss:$16 sps:$4 sm:$0xff]  }
 0x2d3   : > { %6677 = vmatprep.subr.bf16.mxu1 %v13272_v11  ;;  %v13332_v11 = vld [vmem:[%s18363_s1 + $0x128c] ss:$16 sps:$4 sm:$0xff]  }
 0x2d5   : > { %6637 = vmatpush2.bf16.msra.mxu0 %v13267_v21  ;;  %v13327_v21 = vld [vmem:[%s18363_s1 + $0x1a80] ss:$16 sps:$4 sm:$0xff]  }
 0x2d6   : > { %6678 = vmatpush2.bf16.msra.mxu1 %v13270_v25  ;;  %6638 = vmatprep.subr.bf16.mxu0 %v13275_v54  ;;  %v13330_v25 = vld [vmem:[%s18363_s1 + $0x1288] ss:$16 sps:$4 sm:$0xff]   ;;  %v13335_v54 = vld [vmem:[%s18363_s1 + $0x1a64] ss:$16 sps:$4 sm:$0xff]  }
 0x2d7   : > { %6679 = vmatprep.subr.bf16.mxu1 %v13278_v27  ;;  %v13338_v27 = vld [vmem:[%s18363_s1 + $0x126c] ss:$16 sps:$4 sm:$0xff]  }
 0x2d9   : > { %6639 = vmatpush2.bf16.msra.mxu0 %v13273_v28  ;;  %v11135_v28 = vld [vmem:[%s18363_s1 + $0x1b80] sm:$0xff] }
 0x2da   : > { %6680 = vmatpush2.bf16.msra.mxu1 %v13276_v29  ;;  %6640 = vmatprep.subr.bf16.mxu0 %v13281_v44 }
 0x2db   : > { %6681 = vmatprep.subr.bf16.mxu1 %v13284_v30  ;;  %v13333_v30 = vld [vmem:[%s18363_s1 + $0x1a60] ss:$16 sps:$4 sm:$0xff]  }
 0x2dd   : > { %6641 = vmatpush2.bf16.msra.mxu0 %v13279_v31  ;;  %v13336_v31 = vld [vmem:[%s18363_s1 + $0x1268] ss:$16 sps:$4 sm:$0xff]  }
 0x2de   : > { %6682 = vmatpush2.bf16.msra.mxu1 %v13282_v32  ;;  %6642 = vmatprep.subr.bf16.mxu0 %v13287_v59  ;;  %v11430_v59 = vcombine.high %v11135_v28, %v11135_v28 }
 0x2df   : > { %6683 = vmatprep.subr.bf16.mxu1 %v13290_v33  ;;  %v13342_v33 = vld [vmem:[%s18363_s1 + $0x144c] ss:$16 sps:$4 sm:$0xff]  }
 0x2e1   : > { %6643 = vmatpush2.bf16.msra.mxu0 %v13285_v34  ;;  %v11429_v34 = vcombine.low %v11135_v28, %v11135_v28  ;;  %v13394_v28 = vld [vmem:[%s18363_s1 + $0x146c] ss:$16 sps:$4 sm:$0xff]  }
 0x2e2   : > { %6684 = vmatpush2.bf16.msra.mxu1 %v13288_v35  ;;  %6694 = vmatprep.subr.bf16.mxu0 %v13293_v38 }
 0x2e3   : > { %6735 = vmatprep.subr.bf16.mxu1 %v13296_v39  ;;  %v13340_v39 = vld [vmem:[%s18363_s1 + $0x1448] ss:$16 sps:$4 sm:$0xff]  }
 0x2e4   : > { %v4619_v46 = vpop.f32.mrf.mxu0  ;;  %6645 = vmatmul.mubr.bf16.vlgmr.msra.gmra.mxu0 %v14674_v16 }
 0x2e5   : > { %6686 = vmatmul.mubr.bf16.vlgmr.msra.gmra.mxu1 %v14678_v17  ;;  %v4620_v49 = vadd.f32 %v4619_v46, %v16451_v48  ;;  %6695 = vmatpush1.bf16.msra.mxu0 %v13291_v41  ;;  %v13308_v48 = vld [vmem:[%s18363_s1 + $0x130c] ss:$16 sps:$4 sm:$0xff]   ;;  %v13344_v46 = vld [vmem:[%s18363_s1 + $0x1b60] ss:$16 sps:$4 sm:$0xff]  }
 0x2e6   : > { %6736 = vmatpush1.bf16.msra.mxu1 %v13294_v42  ;;  %v4621_v55 = vpop.f32.mrf.mxu0  ;;  %6696 = vmatprep.subr.bf16.mxu0 %v13299_v43  ;;  %v6519_v42 = vsel %vm2139_vm1, %v11429_v34, 0  ;;  %v13346_v43 = vld [vmem:[%s18363_s1 + $0x1b64] ss:$16 sps:$4 sm:$0xff]  }
 0x2e7   : > { %6737 = vmatprep.subr.bf16.mxu1 %v13302_v45  ;;  %v4622_v57 = vadd.f32 %v4621_v55, %v16459_v53  ;;  %11434 = vmatprep.mubr.msk.bf16.mxu0 %vm2135_vm0, %v14697_v23  ;;  %v13311_v53 = vld [vmem:[%s18363_s1 + $0x1ae4] ss:$16 sps:$4 sm:$0xff]   ;;  %v13349_v45 = vld [vmem:[%s18363_s1 + $0x142c] ss:$16 sps:$4 sm:$0xff]   ;;  %v13350_v55 = vld [vmem:[%s18363_s1 + $0x1408] ss:$16 sps:$4 sm:$0xff]  }
 0x2e8   : > { %6767 = vmatprep.mubr.bf16.mxu1 %v14391_v47  ;;  %v4623_v58 = vpop.f32.mrf.mxu0 }
 0x2e9   : > { %6697 = vmatpush1.bf16.msra.mxu0 %v13297_v50  ;;  %v13352_v50 = vld [vmem:[%s18363_s1 + $0x140c] ss:$16 sps:$4 sm:$0xff]   ;;  %v13356_v58 = vld [vmem:[%s18363_s1 + $0x13e8] ss:$16 sps:$4 sm:$0xff]  }
 0x2ea   : > { %6738 = vmatpush1.bf16.msra.mxu1 %v13300_v52  ;;  %v4624_v62 = vpop.f32.mrf.mxu0  ;;  %6698 = vmatprep.subr.bf16.mxu0 %v13305_v56  ;;  %v13355_v52 = vld [vmem:[%s18363_s1 + $0x154c] ss:$16 sps:$4 sm:$0xff]   ;;  %v13353_v56 = vld [vmem:[%s18363_s1 + $0x1548] ss:$16 sps:$4 sm:$0xff]  }
 0x2eb   : > { %6739 = vmatprep.subr.bf16.mxu1 %v13308_v48  ;;  %v13358_v48 = vld [vmem:[%s18363_s1 + $0x13ec] ss:$16 sps:$4 sm:$0xff]  }
 0x2ec   : > { %v13367_v62 = vld [vmem:[%s18363_s1 + $0x150c] ss:$16 sps:$4 sm:$0xff]  }
 0x2ed   : > { %6699 = vmatpush1.bf16.msra.mxu0 %v13303_v60  ;;  %v13359_v60 = vld [vmem:[%s18363_s1 + $0x1528] ss:$16 sps:$4 sm:$0xff]  }
 0x2ee   : > { %6740 = vmatpush1.bf16.msra.mxu1 %v13306_v61  ;;  %6700 = vmatprep.subr.bf16.mxu0 %v13311_v53  ;;  %v13364_v61 = vld [vmem:[%s18363_s1 + $0x13cc] ss:$16 sps:$4 sm:$0xff]   ;;  %v13362_v53 = vld [vmem:[%s18363_s1 + $0x13c8] ss:$16 sps:$4 sm:$0xff]  }
 0x2ef   : > { %6741 = vmatprep.subr.bf16.mxu1 %v13314_v63  ;;  %v13365_v63 = vld [vmem:[%s18363_s1 + $0x1508] ss:$16 sps:$4 sm:$0xff]  }
 0x2f1   : > { %6701 = vmatpush1.bf16.msra.mxu0 %v13309_v0  ;;  %v13370_v0 = vld [vmem:[%s18363_s1 + $0x13ac] ss:$16 sps:$4 sm:$0xff]  }
 0x2f2   : > { %6742 = vmatpush1.bf16.msra.mxu1 %v13312_v1  ;;  %6702 = vmatprep.subr.bf16.mxu0 %v13317_v3  ;;  %v13373_v1 = vld [vmem:[%s18363_s1 + $0x14ec] ss:$16 sps:$4 sm:$0xff]   ;;  %v13368_v3 = vld [vmem:[%s18363_s1 + $0x13a8] ss:$16 sps:$4 sm:$0xff]  }
 0x2f3   : > { %6743 = vmatprep.subr.bf16.mxu1 %v13320_v4  ;;  %v13371_v4 = vld [vmem:[%s18363_s1 + $0x14e8] ss:$16 sps:$4 sm:$0xff]  }
 0x2f5   : > { %6703 = vmatpush1.bf16.msra.mxu0 %v13315_v5  ;;  %v13376_v5 = vld [vmem:[%s18363_s1 + $0x138c] ss:$16 sps:$4 sm:$0xff]  }
 0x2f6   : > { %6744 = vmatpush1.bf16.msra.mxu1 %v13318_v8  ;;  %6704 = vmatprep.subr.bf16.mxu0 %v13323_v9  ;;  %v13379_v8 = vld [vmem:[%s18363_s1 + $0x14cc] ss:$16 sps:$4 sm:$0xff]   ;;  %v13374_v9 = vld [vmem:[%s18363_s1 + $0x1388] ss:$16 sps:$4 sm:$0xff]  }
 0x2f7   : > { %6745 = vmatprep.subr.bf16.mxu1 %v13326_v10  ;;  %v13377_v10 = vld [vmem:[%s18363_s1 + $0x14c8] ss:$16 sps:$4 sm:$0xff]  }
 0x2f9   : > { %6705 = vmatpush1.bf16.msra.mxu0 %v13321_v12  ;;  %v13382_v12 = vld [vmem:[%s18363_s1 + $0x136c] ss:$16 sps:$4 sm:$0xff]  }
 0x2fa   : > { %6746 = vmatpush1.bf16.msra.mxu1 %v13324_v15  ;;  %6706 = vmatprep.subr.bf16.mxu0 %v13329_v19  ;;  %v13385_v15 = vld [vmem:[%s18363_s1 + $0x14ac] ss:$16 sps:$4 sm:$0xff]   ;;  %v13380_v19 = vld [vmem:[%s18363_s1 + $0x1368] ss:$16 sps:$4 sm:$0xff]  }
 0x2fb   : > { %6747 = vmatprep.subr.bf16.mxu1 %v13332_v11  ;;  %v13383_v11 = vld [vmem:[%s18363_s1 + $0x14a8] ss:$16 sps:$4 sm:$0xff]  }
 0x2fd   : > { %v4660_v29 = vpop.f32.mrf.mxu1  ;;  %6707 = vmatpush1.bf16.msra.mxu0 %v13327_v21  ;;  %v13388_v21 = vld [vmem:[%s18363_s1 + $0x148c] ss:$16 sps:$4 sm:$0xff]  }
 0x2fe   : > { %v16657_v44 = vadd.f32 %v4660_v29, %v4620_v49  ;;  %6748 = vmatpush1.bf16.msra.mxu1 %v13330_v25  ;;  %6708 = vmatprep.subr.bf16.mxu0 %v13335_v54  ;;  %v13347_v49 = vld [vmem:[%s18363_s1 + $0x1428] ss:$16 sps:$4 sm:$0xff]   ;;  %v13391_v25 = vld [vmem:[%s18363_s1 + $0x174c] ss:$16 sps:$4 sm:$0xff]  }
 0x2ff   : > { %v4662_v32 = vpop.f32.mrf.mxu1  ;;  %6749 = vmatprep.subr.bf16.mxu1 %v13338_v27  ;;  %v13386_v54 = vld [vmem:[%s18363_s1 + $0x1488] ss:$16 sps:$4 sm:$0xff]   ;;  %v13397_v29 = vld [vmem:[%s18363_s1 + $0x172c] ss:$16 sps:$4 sm:$0xff]  }
 0x300   : > { %v16668_v35 = vadd.f32 %v4662_v32, %v4622_v57  ;;  %v13361_v57 = vld [vmem:[%s18363_s1 + $0x152c] ss:$16 sps:$4 sm:$0xff]   ;;  %v13389_v27 = vld [vmem:[%s18363_s1 + $0x1748] ss:$16 sps:$4 sm:$0xff]  }
 0x301   : > { %v4664_v38 = vpop.f32.mrf.mxu1  ;;  %6709 = vmatpush1.bf16.msra.mxu0 %v13333_v30 }
 0x302   : > { %6750 = vmatpush1.bf16.msra.mxu1 %v13336_v31  ;;  %11433 = vmatprep.subr.msk.bf16.mxu0 %vm2139_vm1, %v11430_v59  ;;  %v13392_v59 = vld [vmem:[%s18363_s1 + $0x1468] ss:$16 sps:$4 sm:$0xff]  }
 0x303   : > { %v4665_v41 = vpop.f32.mrf.mxu1  ;;  %6751 = vmatprep.subr.bf16.mxu1 %v13342_v33  ;;  %v13395_v33 = vld [vmem:[%s18363_s1 + $0x1728] ss:$16 sps:$4 sm:$0xff]  }
 0x305   : > { %6723 = vmatpush2.bf16.msra.mxu0 %v6519_v42 }
 0x306   : > { %6752 = vmatpush2.bf16.msra.mxu1 %v13340_v39  ;;  %6724 = vmatprep.subr.bf16.mxu0 %v13346_v43  ;;  %v13400_v39 = vld [vmem:[%s18363_s1 + $0x164c] ss:$16 sps:$4 sm:$0xff]  }
 0x307   : > { %6753 = vmatprep.subr.bf16.mxu1 %v13349_v45 }
 0x309   : > { %6725 = vmatpush2.bf16.msra.mxu0 %v13344_v46 }
 0x30a   : > { %6754 = vmatpush2.bf16.msra.mxu1 %v13347_v49  ;;  %6776 = vmatprep.subr.bf16.mxu0 %v13355_v52  ;;  %v13401_v52 = vld [vmem:[%s18363_s1 + $0x1708] ss:$16 sps:$4 sm:$0xff]  }
 0x30b   : > { %6755 = vmatprep.subr.bf16.mxu1 %v13352_v50  ;;  %v13398_v50 = vld [vmem:[%s18363_s1 + $0x1648] ss:$16 sps:$4 sm:$0xff]  }
 0x30c   : > { %6727 = vmatmul.mubr.bf16.vlgmr.msra.gmra.mxu0 %v14813_v2 }
 0x30d   : > { %6777 = vmatpush1.bf16.msra.mxu0 %v13353_v56  ;;  %6808 = vmatprep.mubr.bf16.mxu0 %v14400_v51  ;;  %v13406_v56 = vld [vmem:[%s18363_s1 + $0x162c] ss:$16 sps:$4 sm:$0xff]  }
 0x30e   : > { %6756 = vmatpush2.bf16.msra.mxu1 %v13350_v55  ;;  %6778 = vmatprep.subr.bf16.mxu0 %v13361_v57 }
 0x30f   : > { %6757 = vmatprep.subr.bf16.mxu1 %v13358_v48  ;;  %v13409_v48 = vld [vmem:[%s18363_s1 + $0x16ec] ss:$16 sps:$4 sm:$0xff]  }
 0x311   : > { %6779 = vmatpush1.bf16.msra.mxu0 %v13359_v60  ;;  %v13407_v60 = vld [vmem:[%s18363_s1 + $0x16e8] ss:$16 sps:$4 sm:$0xff]  }
 0x312   : > { %6758 = vmatpush2.bf16.msra.mxu1 %v13356_v58  ;;  %6780 = vmatprep.subr.bf16.mxu0 %v13367_v62  ;;  %v13404_v58 = vld [vmem:[%s18363_s1 + $0x1628] ss:$16 sps:$4 sm:$0xff]   ;;  %v13415_v62 = vld [vmem:[%s18363_s1 + $0x16cc] ss:$16 sps:$4 sm:$0xff]  }
 0x313   : > { %6759 = vmatprep.subr.bf16.mxu1 %v13364_v61  ;;  %v13412_v61 = vld [vmem:[%s18363_s1 + $0x160c] ss:$16 sps:$4 sm:$0xff]  }
 0x315   : > { %6781 = vmatpush1.bf16.msra.mxu0 %v13365_v63  ;;  %v13413_v63 = vld [vmem:[%s18363_s1 + $0x16c8] ss:$16 sps:$4 sm:$0xff]  }
 0x316   : > { %6760 = vmatpush2.bf16.msra.mxu1 %v13362_v53  ;;  %6782 = vmatprep.subr.bf16.mxu0 %v13373_v1  ;;  %v13410_v53 = vld [vmem:[%s18363_s1 + $0x1608] ss:$16 sps:$4 sm:$0xff]   ;;  %v13421_v1 = vld [vmem:[%s18363_s1 + $0x16ac] ss:$16 sps:$4 sm:$0xff]  }
 0x317   : > { %6761 = vmatprep.subr.bf16.mxu1 %v13370_v0  ;;  %v13418_v0 = vld [vmem:[%s18363_s1 + $0x15ec] ss:$16 sps:$4 sm:$0xff]  }
 0x319   : > { %6783 = vmatpush1.bf16.msra.mxu0 %v13371_v4  ;;  %v13419_v4 = vld [vmem:[%s18363_s1 + $0x16a8] ss:$16 sps:$4 sm:$0xff]  }
 0x31a   : > { %6762 = vmatpush2.bf16.msra.mxu1 %v13368_v3  ;;  %6784 = vmatprep.subr.bf16.mxu0 %v13379_v8  ;;  %v13416_v3 = vld [vmem:[%s18363_s1 + $0x15e8] ss:$16 sps:$4 sm:$0xff]   ;;  %v13427_v8 = vld [vmem:[%s18363_s1 + $0x168c] ss:$16 sps:$4 sm:$0xff]  }
 0x31b   : > { %6763 = vmatprep.subr.bf16.mxu1 %v13376_v5  ;;  %v13424_v5 = vld [vmem:[%s18363_s1 + $0x15cc] ss:$16 sps:$4 sm:$0xff]  }
 0x31d   : > { %6785 = vmatpush1.bf16.msra.mxu0 %v13377_v10  ;;  %v13425_v10 = vld [vmem:[%s18363_s1 + $0x1688] ss:$16 sps:$4 sm:$0xff]  }
 0x31e   : > { %6764 = vmatpush2.bf16.msra.mxu1 %v13374_v9  ;;  %6786 = vmatprep.subr.bf16.mxu0 %v13385_v15  ;;  %v13422_v9 = vld [vmem:[%s18363_s1 + $0x15c8] ss:$16 sps:$4 sm:$0xff]   ;;  %v13433_v15 = vld [vmem:[%s18363_s1 + $0x166c] ss:$16 sps:$4 sm:$0xff]  }
 0x31f   : > { %6765 = vmatprep.subr.bf16.mxu1 %v13382_v12  ;;  %v13430_v12 = vld [vmem:[%s18363_s1 + $0x15ac] ss:$16 sps:$4 sm:$0xff]  }
 0x321   : > { %6787 = vmatpush1.bf16.msra.mxu0 %v13383_v11  ;;  %v13431_v11 = vld [vmem:[%s18363_s1 + $0x1668] ss:$16 sps:$4 sm:$0xff]  }
 0x322   : > { %6766 = vmatpush2.bf16.msra.mxu1 %v13380_v19  ;;  %6788 = vmatprep.subr.bf16.mxu0 %v13388_v21  ;;  %v13428_v19 = vld [vmem:[%s18363_s1 + $0x15a8] ss:$16 sps:$4 sm:$0xff]   ;;  %v13436_v21 = vld [vmem:[%s18363_s1 + $0x158c] ss:$16 sps:$4 sm:$0xff]  }
 0x323   : > { %6817 = vmatprep.subr.bf16.mxu1 %v13391_v25  ;;  %v13439_v25 = vld [vmem:[%s18363_s1 + $0x184c] ss:$16 sps:$4 sm:$0xff]  }
 0x324   : > { %v4701_v30 = vpop.f32.mrf.mxu0 }
 0x325   : > { %v4742_v31 = vpop.f32.mrf.mxu1  ;;  %6768 = vmatmul.mubr.bf16.vlgmr.msra.gmra.mxu1 %v14458_v6  ;;  %v4702_v32 = vadd.f32 %v4701_v30, %v16657_v44  ;;  %6789 = vmatpush1.bf16.msra.mxu0 %v13386_v54  ;;  %v13403_v44 = vld [vmem:[%s18363_s1 + $0x170c] ss:$16 sps:$4 sm:$0xff]   ;;  %v13434_v54 = vld [vmem:[%s18363_s1 + $0x1588] ss:$16 sps:$4 sm:$0xff]  }
 0x326   : > { %6818 = vmatpush1.bf16.msra.mxu1 %v13389_v27  ;;  %v4703_v34 = vpop.f32.mrf.mxu0  ;;  %6790 = vmatprep.subr.bf16.mxu0 %v13394_v28  ;;  %v13437_v27 = vld [vmem:[%s18363_s1 + $0x1848] ss:$16 sps:$4 sm:$0xff]   ;;  %v13442_v28 = vld [vmem:[%s18363_s1 + $0x156c] ss:$16 sps:$4 sm:$0xff]  }
 0x327   : > { %v4744_v38 = vpop.f32.mrf.mxu1  ;;  %6819 = vmatprep.subr.bf16.mxu1 %v13397_v29  ;;  %v16793_v41 = vadd.f32 %v4742_v31, %v4702_v32  ;;  %v4704_v42 = vadd.f32 %v4703_v34, %v16668_v35  ;;  %6849 = vmatprep.mubr.bf16.mxu1 %v14550_v36  ;;  %v13445_v29 = vld [vmem:[%s18363_s1 + $0x182c] ss:$16 sps:$4 sm:$0xff]   ;;  %v13440_v30 = vld [vmem:[%s18363_s1 + $0x1568] ss:$16 sps:$4 sm:$0xff]  }
 0x328   : > { %v4705_v43 = vpop.f32.mrf.mxu0  ;;  %v13443_v31 = vld [vmem:[%s18363_s1 + $0x1828] ss:$16 sps:$4 sm:$0xff]   ;;  %v13448_v32 = vld [vmem:[%s18363_s1 + $0x180c] ss:$16 sps:$4 sm:$0xff]  }
 0x329   : > { %v4746_v45 = vpop.f32.mrf.mxu1  ;;  %v4751_v46 = vmax.f32 %v15849_v18, %v16793_v41  ;;  %v16799_v49 = vadd.f32 %v4744_v38, %v4704_v42  ;;  %6791 = vmatpush1.bf16.msra.mxu0 %v13392_v59  ;;  %v13451_v59 = vld [vmem:[%s18363_s1 + $0x194c] ss:$16 sps:$4 sm:$0xff]   ;;  %v13449_v34 = vld [vmem:[%s18363_s1 + $0x1948] ss:$16 sps:$4 sm:$0xff]  }
 0x32a   : > { %6820 = vmatpush1.bf16.msra.mxu1 %v13395_v33  ;;  %v4706_v35 = vpop.f32.mrf.mxu0  ;;  %6792 = vmatprep.subr.bf16.mxu0 %v13400_v39  ;;  %v13446_v33 = vld [vmem:[%s18363_s1 + $0x1808] ss:$16 sps:$4 sm:$0xff]   ;;  %v13454_v38 = vld [vmem:[%s18363_s1 + $0x17ec] ss:$16 sps:$4 sm:$0xff]  }
 0x32b   : > { %v4747_v55 = vpop.f32.mrf.mxu1  ;;  %6821 = vmatprep.subr.bf16.mxu1 %v13403_v44  ;;  %v4752_v57 = vmax.f32 %v15859_v26, %v16799_v49  ;;  %v13457_v39 = vld [vmem:[%s18363_s1 + $0x192c] ss:$16 sps:$4 sm:$0xff]   ;;  %v13452_v44 = vld [vmem:[%s18363_s1 + $0x17e8] ss:$16 sps:$4 sm:$0xff]  }
 0x32c   : > { %v13455_v42 = vld [vmem:[%s18363_s1 + $0x1928] ss:$16 sps:$4 sm:$0xff]   ;;  %v13460_v43 = vld [vmem:[%s18363_s1 + $0x17cc] ss:$16 sps:$4 sm:$0xff]  }
 0x32d   : > { %6793 = vmatpush2.bf16.msra.mxu0 %v13398_v50  ;;  %v13463_v45 = vld [vmem:[%s18363_s1 + $0x190c] ss:$16 sps:$4 sm:$0xff]   ;;  %v13458_v50 = vld [vmem:[%s18363_s1 + $0x17c8] ss:$16 sps:$4 sm:$0xff]  }
 0x32e   : > { %6822 = vmatpush1.bf16.msra.mxu1 %v13401_v52  ;;  %6794 = vmatprep.subr.bf16.mxu0 %v13406_v56  ;;  %v13461_v52 = vld [vmem:[%s18363_s1 + $0x1908] ss:$16 sps:$4 sm:$0xff]   ;;  %v13466_v35 = vld [vmem:[%s18363_s1 + $0x17ac] ss:$16 sps:$4 sm:$0xff]  }
 0x32f   : > { %6823 = vmatprep.subr.bf16.mxu1 %v13409_v48  ;;  %v13469_v55 = vld [vmem:[%s18363_s1 + $0x18ec] ss:$16 sps:$4 sm:$0xff]   ;;  %v13464_v56 = vld [vmem:[%s18363_s1 + $0x17a8] ss:$16 sps:$4 sm:$0xff]  }
 0x330   : > { %v13467_v48 = vld [vmem:[%s18363_s1 + $0x18e8] ss:$16 sps:$4 sm:$0xff]   ;;  %v13848_v18 = vld [vmem:[%s18363_s1 + $0x1f5c] ss:$16 sps:$4 sm:$0xff]  }
 0x331   : > { %6795 = vmatpush2.bf16.msra.mxu0 %v13404_v58  ;;  %v13472_v58 = vld [vmem:[%s18363_s1 + $0x178c] ss:$16 sps:$4 sm:$0xff]   ;;  %v13852_v49 = vld [vmem:[%s18363_s1 + $0x1f38] ss:$16 sps:$4 sm:$0xff]  }
 0x332   : > { %6824 = vmatpush1.bf16.msra.mxu1 %v13407_v60  ;;  %6796 = vmatprep.subr.bf16.mxu0 %v13412_v61  ;;  %v13475_v60 = vld [vmem:[%s18363_s1 + $0x18cc] ss:$16 sps:$4 sm:$0xff]   ;;  %v13470_v61 = vld [vmem:[%s18363_s1 + $0x1788] ss:$16 sps:$4 sm:$0xff]  }
 0x333   : > { %6825 = vmatprep.subr.bf16.mxu1 %v13415_v62  ;;  %v13473_v62 = vld [vmem:[%s18363_s1 + $0x18c8] ss:$16 sps:$4 sm:$0xff]   ;;  %v13851_v41 = vld [vmem:[%s18363_s1 + $0x201c] ss:$16 sps:$4 sm:$0xff]  }
 0x334   : > { %v13857_v26 = vld [vmem:[%s18363_s1 + $0x1ffc] ss:$16 sps:$4 sm:$0xff]  }
 0x335   : > { %6797 = vmatpush2.bf16.msra.mxu0 %v13410_v53  ;;  %v13478_v53 = vld [vmem:[%s18363_s1 + $0x176c] ss:$16 sps:$4 sm:$0xff]  }
 0x336   : > { %6826 = vmatpush1.bf16.msra.mxu1 %v13413_v63  ;;  %6798 = vmatprep.subr.bf16.mxu0 %v13418_v0  ;;  %v13481_v63 = vld [vmem:[%s18363_s1 + $0x18ac] ss:$16 sps:$4 sm:$0xff]   ;;  %v13476_v0 = vld [vmem:[%s18363_s1 + $0x1768] ss:$16 sps:$4 sm:$0xff]  }
 0x337   : > { %6827 = vmatprep.subr.bf16.mxu1 %v13421_v1  ;;  %v13479_v1 = vld [vmem:[%s18363_s1 + $0x18a8] ss:$16 sps:$4 sm:$0xff]  }
 0x339   : > { %6799 = vmatpush2.bf16.msra.mxu0 %v13416_v3  ;;  %v13484_v3 = vld [vmem:[%s18363_s1 + $0x188c] ss:$16 sps:$4 sm:$0xff]  }
 0x33a   : > { %6828 = vmatpush1.bf16.msra.mxu1 %v13419_v4  ;;  %6800 = vmatprep.subr.bf16.mxu0 %v13424_v5  ;;  %v13487_v4 = vld [vmem:[%s18363_s1 + $0x1b4c] ss:$16 sps:$4 sm:$0xff]   ;;  %v13482_v5 = vld [vmem:[%s18363_s1 + $0x1888] ss:$16 sps:$4 sm:$0xff]  }
 0x33b   : > { %6829 = vmatprep.subr.bf16.mxu1 %v13427_v8  ;;  %v13485_v8 = vld [vmem:[%s18363_s1 + $0x1b48] ss:$16 sps:$4 sm:$0xff]  }
 0x33d   : > { %6801 = vmatpush2.bf16.msra.mxu0 %v13422_v9  ;;  %v13490_v9 = vld [vmem:[%s18363_s1 + $0x186c] ss:$16 sps:$4 sm:$0xff]  }
 0x33e   : > { %6830 = vmatpush1.bf16.msra.mxu1 %v13425_v10  ;;  %6802 = vmatprep.subr.bf16.mxu0 %v13430_v12  ;;  %v13493_v10 = vld [vmem:[%s18363_s1 + $0x1b2c] ss:$16 sps:$4 sm:$0xff]  }
 0x33f   : > { %6831 = vmatprep.subr.bf16.mxu1 %v13433_v15 }
 0x341   : > { %6803 = vmatpush2.bf16.msra.mxu0 %v13428_v19 }
 0x342   : > { %6832 = vmatpush1.bf16.msra.mxu1 %v13431_v11  ;;  %6804 = vmatprep.subr.bf16.mxu0 %v13436_v21  ;;  %v13488_v11 = vld [vmem:[%s18363_s1 + $0x1868] ss:$16 sps:$4 sm:$0xff]  }
 0x343   : > { %6833 = vmatprep.subr.bf16.mxu1 %v13439_v25  ;;  %v13491_v21 = vld [vmem:[%s18363_s1 + $0x1b28] ss:$16 sps:$4 sm:$0xff]  }
 0x345   : > { %6805 = vmatpush2.bf16.msra.mxu0 %v13434_v54 }
 0x346   : > { %6834 = vmatpush2.bf16.msra.mxu1 %v13437_v27  ;;  %6806 = vmatprep.subr.bf16.mxu0 %v13442_v28  ;;  %v13496_v27 = vld [vmem:[%s18363_s1 + $0x1a4c] ss:$16 sps:$4 sm:$0xff]  }
 0x347   : > { %6835 = vmatprep.subr.bf16.mxu1 %v13445_v29  ;;  %v13499_v28 = vld [vmem:[%s18363_s1 + $0x1b0c] ss:$16 sps:$4 sm:$0xff]  }
 0x349   : > { %6807 = vmatpush2.bf16.msra.mxu0 %v13440_v30 }
 0x34a   : > { %6836 = vmatpush2.bf16.msra.mxu1 %v13443_v31  ;;  %6858 = vmatprep.subr.bf16.mxu0 %v13451_v59  ;;  %v13497_v59 = vld [vmem:[%s18363_s1 + $0x1b08] ss:$16 sps:$4 sm:$0xff]  }
 0x34b   : > { %6837 = vmatprep.subr.bf16.mxu1 %v13448_v32  ;;  %v13494_v32 = vld [vmem:[%s18363_s1 + $0x1a48] ss:$16 sps:$4 sm:$0xff]  }
 0x34c   : > { %6809 = vmatmul.mubr.bf16.vlgmr.msra.gmra.mxu0 %v14460_v7 }
 0x34d   : > { %6859 = vmatpush1.bf16.msra.mxu0 %v13449_v34  ;;  %6890 = vmatprep.mubr.bf16.mxu0 %v14554_v37 }
 0x34e   : > { %6838 = vmatpush2.bf16.msra.mxu1 %v13446_v33  ;;  %6860 = vmatprep.subr.bf16.mxu0 %v13457_v39  ;;  %v13505_v39 = vld [vmem:[%s18363_s1 + $0x1aec] ss:$16 sps:$4 sm:$0xff]  }
 0x34f   : > { %6839 = vmatprep.subr.bf16.mxu1 %v13454_v38  ;;  %v13502_v38 = vld [vmem:[%s18363_s1 + $0x1a2c] ss:$16 sps:$4 sm:$0xff]  }
 0x351   : > { %6861 = vmatpush1.bf16.msra.mxu0 %v13455_v42  ;;  %v13503_v42 = vld [vmem:[%s18363_s1 + $0x1ae8] ss:$16 sps:$4 sm:$0xff]  }
 0x352   : > { %6840 = vmatpush2.bf16.msra.mxu1 %v13452_v44  ;;  %6862 = vmatprep.subr.bf16.mxu0 %v13463_v45  ;;  %v13500_v44 = vld [vmem:[%s18363_s1 + $0x1a28] ss:$16 sps:$4 sm:$0xff]   ;;  %v13511_v45 = vld [vmem:[%s18363_s1 + $0x1acc] ss:$16 sps:$4 sm:$0xff]  }
 0x353   : > { %6841 = vmatprep.subr.bf16.mxu1 %v13460_v43  ;;  %v13508_v43 = vld [vmem:[%s18363_s1 + $0x1a0c] ss:$16 sps:$4 sm:$0xff]  }
 0x355   : > { %6863 = vmatpush1.bf16.msra.mxu0 %v13461_v52  ;;  %v13509_v52 = vld [vmem:[%s18363_s1 + $0x1ac8] ss:$16 sps:$4 sm:$0xff]  }
 0x356   : > { %6842 = vmatpush2.bf16.msra.mxu1 %v13458_v50  ;;  %6864 = vmatprep.subr.bf16.mxu0 %v13469_v55  ;;  %v13506_v50 = vld [vmem:[%s18363_s1 + $0x1a08] ss:$16 sps:$4 sm:$0xff]   ;;  %v13517_v55 = vld [vmem:[%s18363_s1 + $0x1aac] ss:$16 sps:$4 sm:$0xff]  }
 0x357   : > { %6843 = vmatprep.subr.bf16.mxu1 %v13466_v35  ;;  %v13514_v35 = vld [vmem:[%s18363_s1 + $0x19ec] ss:$16 sps:$4 sm:$0xff]  }
 0x359   : > { %6865 = vmatpush1.bf16.msra.mxu0 %v13467_v48  ;;  %v13515_v48 = vld [vmem:[%s18363_s1 + $0x1aa8] ss:$16 sps:$4 sm:$0xff]  }
 0x35a   : > { %6844 = vmatpush2.bf16.msra.mxu1 %v13464_v56  ;;  %6866 = vmatprep.subr.bf16.mxu0 %v13475_v60  ;;  %v13512_v56 = vld [vmem:[%s18363_s1 + $0x19e8] ss:$16 sps:$4 sm:$0xff]   ;;  %v13523_v60 = vld [vmem:[%s18363_s1 + $0x1a8c] ss:$16 sps:$4 sm:$0xff]  }
 0x35b   : > { %6845 = vmatprep.subr.bf16.mxu1 %v13472_v58  ;;  %v13520_v58 = vld [vmem:[%s18363_s1 + $0x19cc] ss:$16 sps:$4 sm:$0xff]  }
 0x35d   : > { %6867 = vmatpush1.bf16.msra.mxu0 %v13473_v62  ;;  %v13521_v62 = vld [vmem:[%s18363_s1 + $0x1a88] ss:$16 sps:$4 sm:$0xff]  }
 0x35e   : > { %6846 = vmatpush2.bf16.msra.mxu1 %v13470_v61  ;;  %6868 = vmatprep.subr.bf16.mxu0 %v13481_v63  ;;  %v13518_v61 = vld [vmem:[%s18363_s1 + $0x19c8] ss:$16 sps:$4 sm:$0xff]   ;;  %v13529_v63 = vld [vmem:[%s18363_s1 + $0x1a6c] ss:$16 sps:$4 sm:$0xff]  }
 0x35f   : > { %6847 = vmatprep.subr.bf16.mxu1 %v13478_v53  ;;  %v13526_v53 = vld [vmem:[%s18363_s1 + $0x19ac] ss:$16 sps:$4 sm:$0xff]  }
 0x361   : > { %6869 = vmatpush1.bf16.msra.mxu0 %v13479_v1  ;;  %v13524_v1 = vld [vmem:[%s18363_s1 + $0x19a8] ss:$16 sps:$4 sm:$0xff]  }
 0x362   : > { %6848 = vmatpush2.bf16.msra.mxu1 %v13476_v0  ;;  %6870 = vmatprep.subr.bf16.mxu0 %v13484_v3  ;;  %v11136_v0 = vld [vmem:[%s18363_s1 + $0x1b88] sm:$0xff] }
 0x363   : > { %6899 = vmatprep.subr.bf16.mxu1 %v13487_v4  ;;  %v13527_v3 = vld [vmem:[%s18363_s1 + $0x1a68] ss:$16 sps:$4 sm:$0xff]   ;;  %v13532_v4 = vld [vmem:[%s18363_s1 + $0x198c] ss:$16 sps:$4 sm:$0xff]  }
 0x364   : > { %v6564_v12 = vpop.f32.mrf.mxu0 }
 0x365   : > { %v6605_v15 = vpop.f32.mrf.mxu1  ;;  %6850 = vmatmul.mubr.bf16.vlgmr.msra.gmra.mxu1 %v14674_v16  ;;  %6871 = vmatpush1.bf16.msra.mxu0 %v13482_v5  ;;  %v11432_v5 = vcombine.high %v11136_v0, %v11136_v0 }
 0x366   : > { %v16986_v19 = vadd.f32 %v6605_v15, %v6564_v12  ;;  %6900 = vmatpush1.bf16.msra.mxu1 %v13485_v8  ;;  %v6566_v25 = vpop.f32.mrf.mxu0  ;;  %6872 = vmatprep.subr.bf16.mxu0 %v13490_v9  ;;  %v11431_v8 = vcombine.low %v11136_v0, %v11136_v0  ;;  %v13530_v9 = vld [vmem:[%s18363_s1 + $0x1988] ss:$16 sps:$4 sm:$0xff]   ;;  %v13537_v12 = vld [vmem:[%s18363_s1 + $0x196c] ss:$16 sps:$4 sm:$0xff]   ;;  %v13585_v0 = vld [vmem:[%s18363_s1 + $0x1b94] ss:$16 sps:$4 sm:$0xff]  }
 0x367   : > { %v6607_v54 = vpop.f32.mrf.mxu1  ;;  %6901 = vmatprep.subr.bf16.mxu1 %v13493_v10  ;;  %11436 = vmatprep.mubr.msk.bf16.mxu1 %vm2135_vm0, %v14697_v23  ;;  %v13540_v15 = vld [vmem:[%s18363_s1 + $0x1b6c] ss:$16 sps:$4 sm:$0xff]  }
 0x368   : > { %v17000_v29 = vadd.f32 %v6607_v54, %v6566_v25  ;;  %v6568_v30 = vpop.f32.mrf.mxu0  ;;  %v6525_v10 = vsel %vm2139_vm1, %v11431_v8, 0  ;;  %v13543_v25 = vld [vmem:[%s18363_s1 + $0x1c74] ss:$16 sps:$4 sm:$0xff]   ;;  %v13583_v8 = vld [vmem:[%s18363_s1 + $0x1b90] ss:$16 sps:$4 sm:$0xff]  }
 0x369   : > { %v6609_v31 = vpop.f32.mrf.mxu1  ;;  %6873 = vmatpush1.bf16.msra.mxu0 %v13488_v11  ;;  %v13535_v11 = vld [vmem:[%s18363_s1 + $0x1968] ss:$16 sps:$4 sm:$0xff]   ;;  %v13546_v54 = vld [vmem:[%s18363_s1 + $0x1e74] ss:$16 sps:$4 sm:$0xff]  }
 0x36a   : > { %6902 = vmatpush1.bf16.msra.mxu1 %v13491_v21  ;;  %v6569_v33 = vpop.f32.mrf.mxu0  ;;  %6874 = vmatprep.subr.bf16.mxu0 %v13496_v27  ;;  %v13538_v21 = vld [vmem:[%s18363_s1 + $0x1b68] ss:$16 sps:$4 sm:$0xff]   ;;  %v13541_v27 = vld [vmem:[%s18363_s1 + $0x1c70] ss:$16 sps:$4 sm:$0xff]   ;;  %v13549_v30 = vld [vmem:[%s18363_s1 + $0x1c54] ss:$16 sps:$4 sm:$0xff]  }
 0x36b   : > { %v6610_v34 = vpop.f32.mrf.mxu1  ;;  %6903 = vmatprep.subr.bf16.mxu1 %v13499_v28  ;;  %v13544_v28 = vld [vmem:[%s18363_s1 + $0x1e70] ss:$16 sps:$4 sm:$0xff]   ;;  %v13552_v31 = vld [vmem:[%s18363_s1 + $0x1e54] ss:$16 sps:$4 sm:$0xff]  }
 0x36c   : > { %v13555_v33 = vld [vmem:[%s18363_s1 + $0x1c34] ss:$16 sps:$4 sm:$0xff]  }
 0x36d   : > { %6875 = vmatpush2.bf16.msra.mxu0 %v13494_v32  ;;  %v13547_v32 = vld [vmem:[%s18363_s1 + $0x1c50] ss:$16 sps:$4 sm:$0xff]   ;;  %v13558_v34 = vld [vmem:[%s18363_s1 + $0x1e34] ss:$16 sps:$4 sm:$0xff]  }
 0x36e   : > { %6904 = vmatpush1.bf16.msra.mxu1 %v13497_v59  ;;  %6876 = vmatprep.subr.bf16.mxu0 %v13502_v38  ;;  %v13550_v59 = vld [vmem:[%s18363_s1 + $0x1e50] ss:$16 sps:$4 sm:$0xff]  }
 0x36f   : > { %6905 = vmatprep.subr.bf16.mxu1 %v13505_v39  ;;  %v13553_v38 = vld [vmem:[%s18363_s1 + $0x1c30] ss:$16 sps:$4 sm:$0xff]  }
 0x370   : > { %v13556_v39 = vld [vmem:[%s18363_s1 + $0x1e30] ss:$16 sps:$4 sm:$0xff]  }
 0x371   : > { %6877 = vmatpush2.bf16.msra.mxu0 %v13500_v44  ;;  %v13561_v44 = vld [vmem:[%s18363_s1 + $0x1c14] ss:$16 sps:$4 sm:$0xff]  }
 0x372   : > { %6906 = vmatpush1.bf16.msra.mxu1 %v13503_v42  ;;  %6878 = vmatprep.subr.bf16.mxu0 %v13508_v43  ;;  %v13564_v42 = vld [vmem:[%s18363_s1 + $0x1e14] ss:$16 sps:$4 sm:$0xff]   ;;  %v13559_v43 = vld [vmem:[%s18363_s1 + $0x1c10] ss:$16 sps:$4 sm:$0xff]  }
 0x373   : > { %6907 = vmatprep.subr.bf16.mxu1 %v13511_v45  ;;  %v13562_v45 = vld [vmem:[%s18363_s1 + $0x1e10] ss:$16 sps:$4 sm:$0xff]  }
 0x375   : > { %6879 = vmatpush2.bf16.msra.mxu0 %v13506_v50  ;;  %v13567_v50 = vld [vmem:[%s18363_s1 + $0x1bf4] ss:$16 sps:$4 sm:$0xff]  }
 0x376   : > { %6908 = vmatpush1.bf16.msra.mxu1 %v13509_v52  ;;  %6880 = vmatprep.subr.bf16.mxu0 %v13514_v35  ;;  %v13570_v52 = vld [vmem:[%s18363_s1 + $0x1df4] ss:$16 sps:$4 sm:$0xff]   ;;  %v13565_v35 = vld [vmem:[%s18363_s1 + $0x1bf0] ss:$16 sps:$4 sm:$0xff]  }
 0x377   : > { %6909 = vmatprep.subr.bf16.mxu1 %v13517_v55  ;;  %v13568_v55 = vld [vmem:[%s18363_s1 + $0x1df0] ss:$16 sps:$4 sm:$0xff]  }
 0x379   : > { %6881 = vmatpush2.bf16.msra.mxu0 %v13512_v56  ;;  %v13573_v56 = vld [vmem:[%s18363_s1 + $0x1bd4] ss:$16 sps:$4 sm:$0xff]  }
 0x37a   : > { %6910 = vmatpush1.bf16.msra.mxu1 %v13515_v48  ;;  %6882 = vmatprep.subr.bf16.mxu0 %v13520_v58  ;;  %v13576_v48 = vld [vmem:[%s18363_s1 + $0x1dd4] ss:$16 sps:$4 sm:$0xff]   ;;  %v13571_v58 = vld [vmem:[%s18363_s1 + $0x1bd0] ss:$16 sps:$4 sm:$0xff]  }
 0x37b   : > { %6911 = vmatprep.subr.bf16.mxu1 %v13523_v60  ;;  %v13574_v60 = vld [vmem:[%s18363_s1 + $0x1dd0] ss:$16 sps:$4 sm:$0xff]  }
 0x37d   : > { %6883 = vmatpush2.bf16.msra.mxu0 %v13518_v61  ;;  %v13579_v61 = vld [vmem:[%s18363_s1 + $0x1bb4] ss:$16 sps:$4 sm:$0xff]  }
 0x37e   : > { %6912 = vmatpush1.bf16.msra.mxu1 %v13521_v62  ;;  %6884 = vmatprep.subr.bf16.mxu0 %v13526_v53  ;;  %v13582_v62 = vld [vmem:[%s18363_s1 + $0x1db4] ss:$16 sps:$4 sm:$0xff]   ;;  %v13577_v53 = vld [vmem:[%s18363_s1 + $0x1bb0] ss:$16 sps:$4 sm:$0xff]  }
 0x37f   : > { %6913 = vmatprep.subr.bf16.mxu1 %v13529_v63  ;;  %v13580_v63 = vld [vmem:[%s18363_s1 + $0x1db0] ss:$16 sps:$4 sm:$0xff]  }
 0x381   : > { %6885 = vmatpush2.bf16.msra.mxu0 %v13524_v1  ;;  %v13588_v1 = vld [vmem:[%s18363_s1 + $0x1d94] ss:$16 sps:$4 sm:$0xff]  }
 0x382   : > { %6914 = vmatpush1.bf16.msra.mxu1 %v13527_v3  ;;  %6886 = vmatprep.subr.bf16.mxu0 %v13532_v4 }
 0x383   : > { %11435 = vmatprep.subr.msk.bf16.mxu1 %vm2139_vm1, %v11432_v5 }
 0x385   : > { %6887 = vmatpush2.bf16.msra.mxu0 %v13530_v9  ;;  %v13586_v9 = vld [vmem:[%s18363_s1 + $0x1d90] ss:$16 sps:$4 sm:$0xff]  }
 0x386   : > { %6928 = vmatpush2.bf16.msra.mxu1 %v6525_v10  ;;  %6888 = vmatprep.subr.bf16.mxu0 %v13537_v12 }
 0x387   : > { %6929 = vmatprep.subr.bf16.mxu1 %v13540_v15  ;;  %v13591_v15 = vld [vmem:[%s18363_s1 + $0x1d74] ss:$16 sps:$4 sm:$0xff]  }
 0x389   : > { %6889 = vmatpush2.bf16.msra.mxu0 %v13535_v11 }
 0x38a   : > { %6930 = vmatpush2.bf16.msra.mxu1 %v13538_v21  ;;  %8721 = vmatprep.subr.bf16.mxu0 %v13543_v25 }
 0x38b   : > { %8762 = vmatprep.subr.bf16.mxu1 %v13546_v54 }
 0x38c   : > { %6891 = vmatmul.mubr.bf16.vlgmr.msra.gmra.mxu0 %v14678_v17 }
 0x38d   : > { %6932 = vmatmul.mubr.bf16.vlgmr.msra.gmra.mxu1 %v14813_v2  ;;  %8722 = vmatpush1.bf16.msra.mxu0 %v13541_v27 }
 0x38e   : > { %8763 = vmatpush1.bf16.msra.mxu1 %v13544_v28  ;;  %8723 = vmatprep.subr.bf16.mxu0 %v13549_v30  ;;  %v13589_v28 = vld [vmem:[%s18363_s1 + $0x1d70] ss:$16 sps:$4 sm:$0xff]  }
 0x38f   : > { %8764 = vmatprep.subr.bf16.mxu1 %v13552_v31  ;;  %8753 = vmatprep.mubr.bf16.mxu0 %v14391_v47  ;;  %v13592_v30 = vld [vmem:[%s18363_s1 + $0x1f70] ss:$16 sps:$4 sm:$0xff]  }
 0x390   : > { %8794 = vmatprep.mubr.bf16.mxu1 %v14400_v51 }
 0x391   : > { %8724 = vmatpush1.bf16.msra.mxu0 %v13547_v32 }
 0x392   : > { %8765 = vmatpush1.bf16.msra.mxu1 %v13550_v59  ;;  %8725 = vmatprep.subr.bf16.mxu0 %v13555_v33  ;;  %v13600_v59 = vld [vmem:[%s18363_s1 + $0x1f54] ss:$16 sps:$4 sm:$0xff]   ;;  %v13595_v33 = vld [vmem:[%s18363_s1 + $0x1d50] ss:$16 sps:$4 sm:$0xff]  }
 0x393   : > { %8766 = vmatprep.subr.bf16.mxu1 %v13558_v34  ;;  %v13598_v34 = vld [vmem:[%s18363_s1 + $0x1f50] ss:$16 sps:$4 sm:$0xff]  }
 0x395   : > { %8726 = vmatpush1.bf16.msra.mxu0 %v13553_v38  ;;  %v13603_v38 = vld [vmem:[%s18363_s1 + $0x1d34] ss:$16 sps:$4 sm:$0xff]  }
 0x396   : > { %8767 = vmatpush1.bf16.msra.mxu1 %v13556_v39  ;;  %8727 = vmatprep.subr.bf16.mxu0 %v13561_v44  ;;  %v13606_v39 = vld [vmem:[%s18363_s1 + $0x1f34] ss:$16 sps:$4 sm:$0xff]   ;;  %v13601_v44 = vld [vmem:[%s18363_s1 + $0x1d30] ss:$16 sps:$4 sm:$0xff]  }
 0x397   : > { %8768 = vmatprep.subr.bf16.mxu1 %v13564_v42  ;;  %v13604_v42 = vld [vmem:[%s18363_s1 + $0x1f30] ss:$16 sps:$4 sm:$0xff]  }
 0x399   : > { %8728 = vmatpush1.bf16.msra.mxu0 %v13559_v43  ;;  %v13609_v43 = vld [vmem:[%s18363_s1 + $0x1d14] ss:$16 sps:$4 sm:$0xff]  }
 0x39a   : > { %8769 = vmatpush1.bf16.msra.mxu1 %v13562_v45  ;;  %8729 = vmatprep.subr.bf16.mxu0 %v13567_v50  ;;  %v13612_v45 = vld [vmem:[%s18363_s1 + $0x1f14] ss:$16 sps:$4 sm:$0xff]   ;;  %v13607_v50 = vld [vmem:[%s18363_s1 + $0x1d10] ss:$16 sps:$4 sm:$0xff]  }
 0x39b   : > { %8770 = vmatprep.subr.bf16.mxu1 %v13570_v52  ;;  %v13610_v52 = vld [vmem:[%s18363_s1 + $0x1f10] ss:$16 sps:$4 sm:$0xff]  }
 0x39d   : > { %8730 = vmatpush1.bf16.msra.mxu0 %v13565_v35  ;;  %v13615_v35 = vld [vmem:[%s18363_s1 + $0x1cf4] ss:$16 sps:$4 sm:$0xff]  }
 0x39e   : > { %8771 = vmatpush1.bf16.msra.mxu1 %v13568_v55  ;;  %8731 = vmatprep.subr.bf16.mxu0 %v13573_v56  ;;  %v13618_v55 = vld [vmem:[%s18363_s1 + $0x1ef4] ss:$16 sps:$4 sm:$0xff]   ;;  %v13613_v56 = vld [vmem:[%s18363_s1 + $0x1cf0] ss:$16 sps:$4 sm:$0xff]  }
 0x39f   : > { %8772 = vmatprep.subr.bf16.mxu1 %v13576_v48  ;;  %v13616_v48 = vld [vmem:[%s18363_s1 + $0x1ef0] ss:$16 sps:$4 sm:$0xff]  }
 0x3a1   : > { %8732 = vmatpush1.bf16.msra.mxu0 %v13571_v58  ;;  %v13621_v58 = vld [vmem:[%s18363_s1 + $0x1cd4] ss:$16 sps:$4 sm:$0xff]  }
 0x3a2   : > { %8773 = vmatpush1.bf16.msra.mxu1 %v13574_v60  ;;  %8733 = vmatprep.subr.bf16.mxu0 %v13579_v61  ;;  %v13624_v60 = vld [vmem:[%s18363_s1 + $0x1ed4] ss:$16 sps:$4 sm:$0xff]   ;;  %v13619_v61 = vld [vmem:[%s18363_s1 + $0x1cd0] ss:$16 sps:$4 sm:$0xff]  }
 0x3a3   : > { %8774 = vmatprep.subr.bf16.mxu1 %v13582_v62  ;;  %v13622_v62 = vld [vmem:[%s18363_s1 + $0x1ed0] ss:$16 sps:$4 sm:$0xff]  }
 0x3a4   : > { %v6646_v3 = vpop.f32.mrf.mxu0 }
 0x3a5   : > { %v6687_v4 = vpop.f32.mrf.mxu1  ;;  %v6647_v5 = vadd.f32 %v6646_v3, %v16986_v19  ;;  %8734 = vmatpush1.bf16.msra.mxu0 %v13577_v53  ;;  %v13594_v19 = vld [vmem:[%s18363_s1 + $0x1f74] ss:$16 sps:$4 sm:$0xff]  }
 0x3a6   : > { %8775 = vmatpush1.bf16.msra.mxu1 %v13580_v63  ;;  %v6648_v10 = vpop.f32.mrf.mxu0  ;;  %8735 = vmatprep.subr.bf16.mxu0 %v13585_v0  ;;  %v13627_v53 = vld [vmem:[%s18363_s1 + $0x1cb4] ss:$16 sps:$4 sm:$0xff]   ;;  %v13625_v0 = vld [vmem:[%s18363_s1 + $0x1cb0] ss:$16 sps:$4 sm:$0xff]  }
 0x3a7   : > { %v6689_v12 = vpop.f32.mrf.mxu1  ;;  %8776 = vmatprep.subr.bf16.mxu1 %v13588_v1  ;;  %v17200_v11 = vadd.f32 %v6687_v4, %v6647_v5  ;;  %v6649_v21 = vadd.f32 %v6648_v10, %v17000_v29  ;;  %v13597_v29 = vld [vmem:[%s18363_s1 + $0x1d54] ss:$16 sps:$4 sm:$0xff]   ;;  %v13628_v1 = vld [vmem:[%s18363_s1 + $0x1eb0] ss:$16 sps:$4 sm:$0xff]  }
 0x3a8   : > { %v6650_v25 = vpop.f32.mrf.mxu0  ;;  %v13630_v63 = vld [vmem:[%s18363_s1 + $0x1eb4] ss:$16 sps:$4 sm:$0xff]   ;;  %v13631_v5 = vld [vmem:[%s18363_s1 + $0x1c90] ss:$16 sps:$4 sm:$0xff]  }
 0x3a9   : > { %v6691_v54 = vpop.f32.mrf.mxu1  ;;  %v17203_v27 = vadd.f32 %v6689_v12, %v6649_v21  ;;  %8736 = vmatpush1.bf16.msra.mxu0 %v13583_v8  ;;  %v13633_v3 = vld [vmem:[%s18363_s1 + $0x1c94] ss:$16 sps:$4 sm:$0xff]   ;;  %v13634_v8 = vld [vmem:[%s18363_s1 + $0x1e90] ss:$16 sps:$4 sm:$0xff]  }
 0x3aa   : > { %8777 = vmatpush1.bf16.msra.mxu1 %v13586_v9  ;;  %v6651_v31 = vpop.f32.mrf.mxu0  ;;  %8737 = vmatprep.subr.bf16.mxu0 %v13591_v15  ;;  %v13636_v4 = vld [vmem:[%s18363_s1 + $0x1e94] ss:$16 sps:$4 sm:$0xff]   ;;  %v13637_v12 = vld [vmem:[%s18363_s1 + $0x2070] ss:$16 sps:$4 sm:$0xff]  }
 0x3ab   : > { %v6692_v32 = vpop.f32.mrf.mxu1  ;;  %8778 = vmatprep.subr.bf16.mxu1 %v13594_v19  ;;  %v13639_v9 = vld [vmem:[%s18363_s1 + $0x2074] ss:$16 sps:$4 sm:$0xff]   ;;  %v13640_v15 = vld [vmem:[%s18363_s1 + $0x2270] ss:$16 sps:$4 sm:$0xff]  }
 0x3ac   : > { %v13642_v10 = vld [vmem:[%s18363_s1 + $0x2274] ss:$16 sps:$4 sm:$0xff]  }
 0x3ad   : > { %8738 = vmatpush2.bf16.msra.mxu0 %v13589_v28  ;;  %v13645_v19 = vld [vmem:[%s18363_s1 + $0x2054] ss:$16 sps:$4 sm:$0xff]   ;;  %v13643_v28 = vld [vmem:[%s18363_s1 + $0x2050] ss:$16 sps:$4 sm:$0xff]  }
 0x3ae   : > { %8779 = vmatpush2.bf16.msra.mxu1 %v13592_v30  ;;  %8739 = vmatprep.subr.bf16.mxu0 %v13597_v29  ;;  %v13648_v21 = vld [vmem:[%s18363_s1 + $0x2254] ss:$16 sps:$4 sm:$0xff]   ;;  %v13646_v30 = vld [vmem:[%s18363_s1 + $0x2250] ss:$16 sps:$4 sm:$0xff]  }
 0x3af   : > { %8780 = vmatprep.subr.bf16.mxu1 %v13600_v59  ;;  %v13651_v32 = vld [vmem:[%s18363_s1 + $0x2034] ss:$16 sps:$4 sm:$0xff]  }
 0x3b1   : > { %8740 = vmatpush2.bf16.msra.mxu0 %v13595_v33 }
 0x3b2   : > { %8781 = vmatpush2.bf16.msra.mxu1 %v13598_v34  ;;  %8741 = vmatprep.subr.bf16.mxu0 %v13603_v38  ;;  %v13663_v38 = vld [vmem:[%s18363_s1 + $0x1ff4] ss:$16 sps:$4 sm:$0xff]  }
 0x3b3   : > { %8782 = vmatprep.subr.bf16.mxu1 %v13606_v39  ;;  %v13666_v39 = vld [vmem:[%s18363_s1 + $0x21f4] ss:$16 sps:$4 sm:$0xff]  }
 0x3b5   : > { %8742 = vmatpush2.bf16.msra.mxu0 %v13601_v44  ;;  %v13661_v44 = vld [vmem:[%s18363_s1 + $0x1ff0] ss:$16 sps:$4 sm:$0xff]  }
 0x3b6   : > { %8783 = vmatpush2.bf16.msra.mxu1 %v13604_v42  ;;  %8743 = vmatprep.subr.bf16.mxu0 %v13609_v43  ;;  %v13664_v42 = vld [vmem:[%s18363_s1 + $0x21f0] ss:$16 sps:$4 sm:$0xff]   ;;  %v13669_v43 = vld [vmem:[%s18363_s1 + $0x1fd4] ss:$16 sps:$4 sm:$0xff]  }
 0x3b7   : > { %8784 = vmatprep.subr.bf16.mxu1 %v13612_v45  ;;  %v13672_v45 = vld [vmem:[%s18363_s1 + $0x21d4] ss:$16 sps:$4 sm:$0xff]  }
 0x3b9   : > { %8744 = vmatpush2.bf16.msra.mxu0 %v13607_v50  ;;  %v13667_v50 = vld [vmem:[%s18363_s1 + $0x1fd0] ss:$16 sps:$4 sm:$0xff]  }
 0x3ba   : > { %8785 = vmatpush2.bf16.msra.mxu1 %v13610_v52  ;;  %8745 = vmatprep.subr.bf16.mxu0 %v13615_v35  ;;  %v13670_v52 = vld [vmem:[%s18363_s1 + $0x21d0] ss:$16 sps:$4 sm:$0xff]   ;;  %v13675_v35 = vld [vmem:[%s18363_s1 + $0x1fb4] ss:$16 sps:$4 sm:$0xff]  }
 0x3bb   : > { %8786 = vmatprep.subr.bf16.mxu1 %v13618_v55  ;;  %v13678_v55 = vld [vmem:[%s18363_s1 + $0x21b4] ss:$16 sps:$4 sm:$0xff]  }
 0x3bd   : > { %8746 = vmatpush2.bf16.msra.mxu0 %v13613_v56  ;;  %v13673_v56 = vld [vmem:[%s18363_s1 + $0x1fb0] ss:$16 sps:$4 sm:$0xff]  }
 0x3be   : > { %8787 = vmatpush2.bf16.msra.mxu1 %v13616_v48  ;;  %8747 = vmatprep.subr.bf16.mxu0 %v13621_v58  ;;  %v13676_v48 = vld [vmem:[%s18363_s1 + $0x21b0] ss:$16 sps:$4 sm:$0xff]   ;;  %v13681_v58 = vld [vmem:[%s18363_s1 + $0x1f94] ss:$16 sps:$4 sm:$0xff]  }
 0x3bf   : > { %8788 = vmatprep.subr.bf16.mxu1 %v13624_v60  ;;  %v13684_v60 = vld [vmem:[%s18363_s1 + $0x2194] ss:$16 sps:$4 sm:$0xff]  }
 0x3c1   : > { %8748 = vmatpush2.bf16.msra.mxu0 %v13619_v61 }
 0x3c2   : > { %8789 = vmatpush2.bf16.msra.mxu1 %v13622_v62  ;;  %8749 = vmatprep.subr.bf16.mxu0 %v13627_v53  ;;  %v13679_v62 = vld [vmem:[%s18363_s1 + $0x1f90] ss:$16 sps:$4 sm:$0xff]  }
 0x3c3   : > { %8790 = vmatprep.subr.bf16.mxu1 %v13630_v63  ;;  %v13682_v53 = vld [vmem:[%s18363_s1 + $0x2190] ss:$16 sps:$4 sm:$0xff]  }
 0x3c5   : > { %8750 = vmatpush2.bf16.msra.mxu0 %v13625_v0  ;;  %v13687_v0 = vld [vmem:[%s18363_s1 + $0x2174] ss:$16 sps:$4 sm:$0xff]  }
 0x3c6   : > { %8791 = vmatpush2.bf16.msra.mxu1 %v13628_v1  ;;  %8751 = vmatprep.subr.bf16.mxu0 %v13633_v3  ;;  %v13690_v1 = vld [vmem:[%s18363_s1 + $0x2374] ss:$16 sps:$4 sm:$0xff]  }
 0x3c7   : > { %8792 = vmatprep.subr.bf16.mxu1 %v13636_v4  ;;  %v13685_v4 = vld [vmem:[%s18363_s1 + $0x2170] ss:$16 sps:$4 sm:$0xff]  }
 0x3c9   : > { %8752 = vmatpush2.bf16.msra.mxu0 %v13631_v5  ;;  %v13688_v5 = vld [vmem:[%s18363_s1 + $0x2370] ss:$16 sps:$4 sm:$0xff]  }
 0x3ca   : > { %8793 = vmatpush2.bf16.msra.mxu1 %v13634_v8  ;;  %8803 = vmatprep.subr.bf16.mxu0 %v13639_v9  ;;  %v13693_v9 = vld [vmem:[%s18363_s1 + $0x2154] ss:$16 sps:$4 sm:$0xff]  }
 0x3cb   : > { %8844 = vmatprep.subr.bf16.mxu1 %v13642_v10  ;;  %v13696_v10 = vld [vmem:[%s18363_s1 + $0x2354] ss:$16 sps:$4 sm:$0xff]  }
 0x3cc   : > { %v6728_v25 = vpop.f32.mrf.mxu0  ;;  %8754 = vmatmul.mubr.bf16.vlgmr.msra.gmra.mxu0 %v14458_v6 }
 0x3cd   : > { %8795 = vmatmul.mubr.bf16.vlgmr.msra.gmra.mxu1 %v14460_v7  ;;  %v6729_v54 = vadd.f32 %v6728_v25, %v17200_v11  ;;  %8804 = vmatpush1.bf16.msra.mxu0 %v13637_v12  ;;  %v13654_v11 = vld [vmem:[%s18363_s1 + $0x2234] ss:$16 sps:$4 sm:$0xff]   ;;  %v13691_v12 = vld [vmem:[%s18363_s1 + $0x2150] ss:$16 sps:$4 sm:$0xff]  }
 0x3ce   : > { %8845 = vmatpush1.bf16.msra.mxu1 %v13640_v15  ;;  %v6730_v31 = vpop.f32.mrf.mxu0  ;;  %8805 = vmatprep.subr.bf16.mxu0 %v13645_v19  ;;  %v13694_v15 = vld [vmem:[%s18363_s1 + $0x2350] ss:$16 sps:$4 sm:$0xff]   ;;  %v13699_v19 = vld [vmem:[%s18363_s1 + $0x2134] ss:$16 sps:$4 sm:$0xff]  }
 0x3cf   : > { %8846 = vmatprep.subr.bf16.mxu1 %v13648_v21  ;;  %v17331_v29 = vmax.f32 %v4749_v24, %v6729_v54  ;;  %v6731_v59 = vadd.f32 %v6730_v31, %v17203_v27  ;;  %8835 = vmatprep.mubr.bf16.mxu0 %v14550_v36  ;;  %v13657_v27 = vld [vmem:[%s18363_s1 + $0x2014] ss:$16 sps:$4 sm:$0xff]   ;;  %v13697_v25 = vld [vmem:[%s18363_s1 + $0x2130] ss:$16 sps:$4 sm:$0xff]  }
 0x3d0   : > { %8876 = vmatprep.mubr.bf16.mxu1 %v14554_v37  ;;  %v6732_v33 = vpop.f32.mrf.mxu0  ;;  %v13702_v21 = vld [vmem:[%s18363_s1 + $0x2334] ss:$16 sps:$4 sm:$0xff]   ;;  %v13700_v54 = vld [vmem:[%s18363_s1 + $0x2330] ss:$16 sps:$4 sm:$0xff]  }
 0x3d1   : > { %v17339_v34 = vmax.f32 %v4750_v22, %v6731_v59  ;;  %8806 = vmatpush1.bf16.msra.mxu0 %v13643_v28  ;;  %v13658_v22 = vld [vmem:[%s18363_s1 + $0x2210] ss:$16 sps:$4 sm:$0xff]   ;;  %v13705_v28 = vld [vmem:[%s18363_s1 + $0x2114] ss:$16 sps:$4 sm:$0xff]  }
 0x3d2   : > { %8847 = vmatpush1.bf16.msra.mxu1 %v13646_v30  ;;  %v6733_v24 = vpop.f32.mrf.mxu0  ;;  %8807 = vmatprep.subr.bf16.mxu0 %v13651_v32  ;;  %v13708_v30 = vld [vmem:[%s18363_s1 + $0x2314] ss:$16 sps:$4 sm:$0xff]   ;;  %v13703_v31 = vld [vmem:[%s18363_s1 + $0x2110] ss:$16 sps:$4 sm:$0xff]  }
 0x3d3   : > { %8848 = vmatprep.subr.bf16.mxu1 %v13654_v11  ;;  %v13706_v32 = vld [vmem:[%s18363_s1 + $0x2310] ss:$16 sps:$4 sm:$0xff]   ;;  %v13711_v11 = vld [vmem:[%s18363_s1 + $0x20f4] ss:$16 sps:$4 sm:$0xff]  }
 0x3d4   : > { %v13714_v59 = vld [vmem:[%s18363_s1 + $0x22f4] ss:$16 sps:$4 sm:$0xff]   ;;  %v13709_v33 = vld [vmem:[%s18363_s1 + $0x20f0] ss:$16 sps:$4 sm:$0xff]  }
 0x3d5   : > { %8808 = vmatpush1.bf16.msra.mxu0 %v13649_v14  ;;  %v13712_v14 = vld [vmem:[%s18363_s1 + $0x22f0] ss:$16 sps:$4 sm:$0xff]   ;;  %v13720_v24 = vld [vmem:[%s18363_s1 + $0x22d4] ss:$16 sps:$4 sm:$0xff]  }
 0x3d6   : > { %8849 = vmatpush1.bf16.msra.mxu1 %v13652_v13  ;;  %8809 = vmatprep.subr.bf16.mxu0 %v13657_v27  ;;  %v13717_v13 = vld [vmem:[%s18363_s1 + $0x20d4] ss:$16 sps:$4 sm:$0xff]   ;;  %v13715_v27 = vld [vmem:[%s18363_s1 + $0x20d0] ss:$16 sps:$4 sm:$0xff]  }
 0x3d7   : > { %8850 = vmatprep.subr.bf16.mxu1 %v13660_v20  ;;  %v13718_v20 = vld [vmem:[%s18363_s1 + $0x22d0] ss:$16 sps:$4 sm:$0xff]  }
 0x3d9   : > { %8810 = vmatpush1.bf16.msra.mxu0 %v13655_v40  ;;  %v13723_v40 = vld [vmem:[%s18363_s1 + $0x20b4] ss:$16 sps:$4 sm:$0xff]  }
 0x3da   : > { %8851 = vmatpush1.bf16.msra.mxu1 %v13658_v22  ;;  %8811 = vmatprep.subr.bf16.mxu0 %v13663_v38  ;;  %v13726_v22 = vld [vmem:[%s18363_s1 + $0x22b4] ss:$16 sps:$4 sm:$0xff]   ;;  %v13721_v38 = vld [vmem:[%s18363_s1 + $0x20b0] ss:$16 sps:$4 sm:$0xff]  }
 0x3db   : > { %8852 = vmatprep.subr.bf16.mxu1 %v13666_v39  ;;  %v13724_v39 = vld [vmem:[%s18363_s1 + $0x22b0] ss:$16 sps:$4 sm:$0xff]  }
 0x3dd   : > { %8812 = vmatpush1.bf16.msra.mxu0 %v13661_v44  ;;  %v13729_v44 = vld [vmem:[%s18363_s1 + $0x2094] ss:$16 sps:$4 sm:$0xff]  }
 0x3de   : > { %8853 = vmatpush1.bf16.msra.mxu1 %v13664_v42  ;;  %8813 = vmatprep.subr.bf16.mxu0 %v13669_v43  ;;  %v13732_v42 = vld [vmem:[%s18363_s1 + $0x2294] ss:$16 sps:$4 sm:$0xff]   ;;  %v13727_v43 = vld [vmem:[%s18363_s1 + $0x2090] ss:$16 sps:$4 sm:$0xff]  }
 0x3df   : > { %8854 = vmatprep.subr.bf16.mxu1 %v13672_v45  ;;  %v13730_v45 = vld [vmem:[%s18363_s1 + $0x2290] ss:$16 sps:$4 sm:$0xff]  }
 0x3e1   : > { %8814 = vmatpush1.bf16.msra.mxu0 %v13667_v50  ;;  %v13735_v50 = vld [vmem:[%s18363_s1 + $0x2474] ss:$16 sps:$4 sm:$0xff]  }
 0x3e2   : > { %8855 = vmatpush1.bf16.msra.mxu1 %v13670_v52  ;;  %8815 = vmatprep.subr.bf16.mxu0 %v13675_v35  ;;  %v13738_v52 = vld [vmem:[%s18363_s1 + $0x1c7c] ss:$16 sps:$4 sm:$0xff]   ;;  %v13733_v35 = vld [vmem:[%s18363_s1 + $0x2470] ss:$16 sps:$4 sm:$0xff]  }
 0x3e3   : > { %8856 = vmatprep.subr.bf16.mxu1 %v13678_v55  ;;  %v13736_v55 = vld [vmem:[%s18363_s1 + $0x1c78] ss:$16 sps:$4 sm:$0xff]  }
 0x3e5   : > { %v17401_v61 = vpop.f32.mrf.mxu1  ;;  %8816 = vmatpush1.bf16.msra.mxu0 %v13673_v56  ;;  %v13741_v56 = vld [vmem:[%s18363_s1 + $0x2454] ss:$16 sps:$4 sm:$0xff]  }
 0x3e6   : > { %8857 = vmatpush1.bf16.msra.mxu1 %v13676_v48  ;;  %8817 = vmatprep.subr.bf16.mxu0 %v13681_v58  ;;  %v13744_v48 = vld [vmem:[%s18363_s1 + $0x1c5c] ss:$16 sps:$4 sm:$0xff]  }
 0x3e7   : > { %v17409_v63 = vpop.f32.mrf.mxu1  ;;  %8858 = vmatprep.subr.bf16.mxu1 %v13684_v60 }
 0x3e9   : > { %v6773_v3 = vpop.f32.mrf.mxu1  ;;  %8818 = vmatpush1.bf16.msra.mxu0 %v13679_v62  ;;  %v13739_v62 = vld [vmem:[%s18363_s1 + $0x2450] ss:$16 sps:$4 sm:$0xff]  }
 0x3ea   : > { %8859 = vmatpush1.bf16.msra.mxu1 %v13682_v53  ;;  %8819 = vmatprep.subr.bf16.mxu0 %v13687_v0  ;;  %v13742_v53 = vld [vmem:[%s18363_s1 + $0x1c58] ss:$16 sps:$4 sm:$0xff]  }
 0x3eb   : > { %v6774_v8 = vpop.f32.mrf.mxu1  ;;  %8860 = vmatprep.subr.bf16.mxu1 %v13690_v1  ;;  %v13747_v1 = vld [vmem:[%s18363_s1 + $0x2434] ss:$16 sps:$4 sm:$0xff]  }
 0x3ec   : > { %v13748_v8 = vld [vmem:[%s18363_s1 + $0x1c38] ss:$16 sps:$4 sm:$0xff]  }
 0x3ed   : > { %8820 = vmatpush2.bf16.msra.mxu0 %v13685_v4 }
 0x3ee   : > { %8861 = vmatpush2.bf16.msra.mxu1 %v13688_v5  ;;  %8821 = vmatprep.subr.bf16.mxu0 %v13693_v9  ;;  %v13745_v5 = vld [vmem:[%s18363_s1 + $0x2430] ss:$16 sps:$4 sm:$0xff]  }
 0x3ef   : > { %8862 = vmatprep.subr.bf16.mxu1 %v13696_v10  ;;  %v13751_v10 = vld [vmem:[%s18363_s1 + $0x2410] ss:$16 sps:$4 sm:$0xff]  }
 0x3f1   : > { %8822 = vmatpush2.bf16.msra.mxu0 %v13691_v12  ;;  %v13754_v12 = vld [vmem:[%s18363_s1 + $0x1c18] ss:$16 sps:$4 sm:$0xff]  }
 0x3f2   : > { %8863 = vmatpush2.bf16.msra.mxu1 %v13694_v15  ;;  %8823 = vmatprep.subr.bf16.mxu0 %v13699_v19  ;;  %v13759_v15 = vld [vmem:[%s18363_s1 + $0x23f4] ss:$16 sps:$4 sm:$0xff]   ;;  %v13762_v19 = vld [vmem:[%s18363_s1 + $0x1bfc] ss:$16 sps:$4 sm:$0xff]  }
 0x3f3   : > { %8864 = vmatprep.subr.bf16.mxu1 %v13702_v21  ;;  %v13757_v21 = vld [vmem:[%s18363_s1 + $0x23f0] ss:$16 sps:$4 sm:$0xff]  }
 0x3f5   : > { %8824 = vmatpush2.bf16.msra.mxu0 %v13697_v25  ;;  %v13760_v25 = vld [vmem:[%s18363_s1 + $0x1bf8] ss:$16 sps:$4 sm:$0xff]  }
 0x3f6   : > { %8865 = vmatpush2.bf16.msra.mxu1 %v13700_v54  ;;  %8825 = vmatprep.subr.bf16.mxu0 %v13705_v28  ;;  %v13765_v54 = vld [vmem:[%s18363_s1 + $0x23d4] ss:$16 sps:$4 sm:$0xff]   ;;  %v13768_v28 = vld [vmem:[%s18363_s1 + $0x1bdc] ss:$16 sps:$4 sm:$0xff]  }
 0x3f7   : > { %8866 = vmatprep.subr.bf16.mxu1 %v13708_v30  ;;  %v13763_v30 = vld [vmem:[%s18363_s1 + $0x23d0] ss:$16 sps:$4 sm:$0xff]  }
 0x3f9   : > { %8826 = vmatpush2.bf16.msra.mxu0 %v13703_v31  ;;  %v13766_v31 = vld [vmem:[%s18363_s1 + $0x1bd8] ss:$16 sps:$4 sm:$0xff]  }
 0x3fa   : > { %8867 = vmatpush2.bf16.msra.mxu1 %v13706_v32  ;;  %8827 = vmatprep.subr.bf16.mxu0 %v13711_v11  ;;  %v13771_v32 = vld [vmem:[%s18363_s1 + $0x23b4] ss:$16 sps:$4 sm:$0xff]   ;;  %v13774_v11 = vld [vmem:[%s18363_s1 + $0x1bbc] ss:$16 sps:$4 sm:$0xff]  }
 0x3fb   : > { %8868 = vmatprep.subr.bf16.mxu1 %v13714_v59  ;;  %v13769_v59 = vld [vmem:[%s18363_s1 + $0x23b0] ss:$16 sps:$4 sm:$0xff]  }
 0x3fd   : > { %8828 = vmatpush2.bf16.msra.mxu0 %v13709_v33  ;;  %v13772_v33 = vld [vmem:[%s18363_s1 + $0x1bb8] ss:$16 sps:$4 sm:$0xff]  }
 0x3fe   : > { %8869 = vmatpush2.bf16.msra.mxu1 %v13712_v14  ;;  %8829 = vmatprep.subr.bf16.mxu0 %v13717_v13  ;;  %v13777_v14 = vld [vmem:[%s18363_s1 + $0x2394] ss:$16 sps:$4 sm:$0xff]   ;;  %v13780_v13 = vld [vmem:[%s18363_s1 + $0x1b9c] ss:$16 sps:$4 sm:$0xff]  }
 0x3ff   : > { %8870 = vmatprep.subr.bf16.mxu1 %v13720_v24  ;;  %v11729_v24 = vld [vmem:[%s18363_s1 + $0x24b0] sm:$0xff] }
 0x401   : > { %8830 = vmatpush2.bf16.msra.mxu0 %v13715_v27 }
 0x402   : > { %8871 = vmatpush2.bf16.msra.mxu1 %v13718_v20  ;;  %8831 = vmatprep.subr.bf16.mxu0 %v13723_v40  ;;  %v13775_v40 = vld [vmem:[%s18363_s1 + $0x2390] ss:$16 sps:$4 sm:$0xff]  }
 0x403   : > { %8872 = vmatprep.subr.bf16.mxu1 %v13726_v22  ;;  %v13778_v22 = vld [vmem:[%s18363_s1 + $0x1b98] ss:$16 sps:$4 sm:$0xff]  }
 0x405   : > { %8832 = vmatpush2.bf16.msra.mxu0 %v13721_v38 }
 0x406   : > { %8873 = vmatpush2.bf16.msra.mxu1 %v13724_v39  ;;  %8833 = vmatprep.subr.bf16.mxu0 %v13729_v44  ;;  %v12024_v39 = vcombine.high %v11729_v24, %v11729_v24  ;;  %v13784_v44 = vld [vmem:[%s18363_s1 + $0x1d7c] ss:$16 sps:$4 sm:$0xff]  }
 0x407   : > { %8874 = vmatprep.subr.bf16.mxu1 %v13732_v42  ;;  %v12023_v42 = vcombine.low %v11729_v24, %v11729_v24 }
 0x409   : > { %8834 = vmatpush2.bf16.msra.mxu0 %v13727_v43 }
 0x40a   : > { %8875 = vmatpush2.bf16.msra.mxu1 %v13730_v45  ;;  %8885 = vmatprep.subr.bf16.mxu0 %v13735_v50  ;;  %v13782_v50 = vld [vmem:[%s18363_s1 + $0x1d78] ss:$16 sps:$4 sm:$0xff]  }
 0x40b   : > { %8926 = vmatprep.subr.bf16.mxu1 %v13738_v52 }
 0x40c   : > { %v6810_v58 = vpop.f32.mrf.mxu0  ;;  %8836 = vmatmul.mubr.bf16.vlgmr.msra.gmra.mxu0 %v14674_v16 }
 0x40d   : > { %8877 = vmatmul.mubr.bf16.vlgmr.msra.gmra.mxu1 %v14678_v17  ;;  %v6811_v60 = vadd.f32 %v6810_v58, %v17401_v61  ;;  %8886 = vmatpush1.bf16.msra.mxu0 %v13733_v35  ;;  %v13750_v61 = vld [vmem:[%s18363_s1 + $0x1c3c] ss:$16 sps:$4 sm:$0xff]   ;;  %v8710_v35 = vsel %vm2139_vm1, %v12023_v42, 0  ;;  %v13789_v58 = vld [vmem:[%s18363_s1 + $0x1d58] ss:$16 sps:$4 sm:$0xff]  }
 0x40e   : > { %8927 = vmatpush1.bf16.msra.mxu1 %v13736_v55  ;;  %v6812_v0 = vpop.f32.mrf.mxu0  ;;  %8887 = vmatprep.subr.bf16.mxu0 %v13741_v56  ;;  %v13788_v55 = vld [vmem:[%s18363_s1 + $0x2494] ss:$16 sps:$4 sm:$0xff]   ;;  %v13791_v56 = vld [vmem:[%s18363_s1 + $0x1d5c] ss:$16 sps:$4 sm:$0xff]  }
 0x40f   : > { %8928 = vmatprep.subr.bf16.mxu1 %v13744_v48  ;;  %v6813_v3 = vadd.f32 %v6812_v0, %v17409_v63  ;;  %12028 = vmatprep.mubr.msk.bf16.mxu0 %vm2135_vm0, %v14697_v23  ;;  %v13753_v63 = vld [vmem:[%s18363_s1 + $0x2414] ss:$16 sps:$4 sm:$0xff]   ;;  %v13786_v48 = vld [vmem:[%s18363_s1 + $0x2490] ss:$16 sps:$4 sm:$0xff]   ;;  %v13795_v0 = vld [vmem:[%s18363_s1 + $0x1e78] ss:$16 sps:$4 sm:$0xff]  }
 0x410   : > { %8958 = vmatprep.mubr.bf16.mxu1 %v14391_v47  ;;  %v6814_v4 = vpop.f32.mrf.mxu0  ;;  %v13756_v47 = vld [vmem:[%s18363_s1 + $0x1c1c] ss:$16 sps:$4 sm:$0xff]  }
 0x411   : > { %8888 = vmatpush1.bf16.msra.mxu0 %v13739_v62  ;;  %v13797_v62 = vld [vmem:[%s18363_s1 + $0x1e7c] ss:$16 sps:$4 sm:$0xff]   ;;  %v13801_v4 = vld [vmem:[%s18363_s1 + $0x1e58] ss:$16 sps:$4 sm:$0xff]  }
 0x412   : > { %8929 = vmatpush1.bf16.msra.mxu1 %v13742_v53  ;;  %v6815_v9 = vpop.f32.mrf.mxu0  ;;  %8889 = vmatprep.subr.bf16.mxu0 %v13747_v1  ;;  %v13792_v53 = vld [vmem:[%s18363_s1 + $0x1d38] ss:$16 sps:$4 sm:$0xff]   ;;  %v13800_v1 = vld [vmem:[%s18363_s1 + $0x1d1c] ss:$16 sps:$4 sm:$0xff]  }
 0x413   : > { %8930 = vmatprep.subr.bf16.mxu1 %v13750_v61  ;;  %v13803_v61 = vld [vmem:[%s18363_s1 + $0x1e5c] ss:$16 sps:$4 sm:$0xff]   ;;  %v13804_v9 = vld [vmem:[%s18363_s1 + $0x1cf8] ss:$16 sps:$4 sm:$0xff]  }
 0x415   : > { %8890 = vmatpush1.bf16.msra.mxu0 %v13745_v5  ;;  %v13806_v5 = vld [vmem:[%s18363_s1 + $0x1cfc] ss:$16 sps:$4 sm:$0xff]  }
 0x416   : > { %8931 = vmatpush1.bf16.msra.mxu1 %v13748_v8  ;;  %8891 = vmatprep.subr.bf16.mxu0 %v13753_v63  ;;  %v13809_v8 = vld [vmem:[%s18363_s1 + $0x1e3c] ss:$16 sps:$4 sm:$0xff]   ;;  %v13807_v63 = vld [vmem:[%s18363_s1 + $0x1e38] ss:$16 sps:$4 sm:$0xff]  }
 0x417   : > { %8932 = vmatprep.subr.bf16.mxu1 %v13756_v47  ;;  %v13812_v47 = vld [vmem:[%s18363_s1 + $0x1cdc] ss:$16 sps:$4 sm:$0xff]  }
 0x419   : > { %8892 = vmatpush1.bf16.msra.mxu0 %v13751_v10  ;;  %v13810_v10 = vld [vmem:[%s18363_s1 + $0x1cd8] ss:$16 sps:$4 sm:$0xff]  }
 0x41a   : > { %8933 = vmatpush1.bf16.msra.mxu1 %v13754_v12  ;;  %8893 = vmatprep.subr.bf16.mxu0 %v13759_v15  ;;  %v13813_v12 = vld [vmem:[%s18363_s1 + $0x1e18] ss:$16 sps:$4 sm:$0xff]   ;;  %v13818_v15 = vld [vmem:[%s18363_s1 + $0x1cbc] ss:$16 sps:$4 sm:$0xff]  }
 0x41b   : > { %8934 = vmatprep.subr.bf16.mxu1 %v13762_v19  ;;  %v13821_v19 = vld [vmem:[%s18363_s1 + $0x1dfc] ss:$16 sps:$4 sm:$0xff]  }
 0x41d   : > { %8894 = vmatpush1.bf16.msra.mxu0 %v13757_v21  ;;  %v13816_v21 = vld [vmem:[%s18363_s1 + $0x1cb8] ss:$16 sps:$4 sm:$0xff]  }
 0x41e   : > { %8935 = vmatpush1.bf16.msra.mxu1 %v13760_v25  ;;  %8895 = vmatprep.subr.bf16.mxu0 %v13765_v54  ;;  %v13819_v25 = vld [vmem:[%s18363_s1 + $0x1df8] ss:$16 sps:$4 sm:$0xff]   ;;  %v13824_v54 = vld [vmem:[%s18363_s1 + $0x1c9c] ss:$16 sps:$4 sm:$0xff]  }
 0x41f   : > { %8936 = vmatprep.subr.bf16.mxu1 %v13768_v28  ;;  %v13827_v28 = vld [vmem:[%s18363_s1 + $0x1ddc] ss:$16 sps:$4 sm:$0xff]  }
 0x421   : > { %8896 = vmatpush1.bf16.msra.mxu0 %v13763_v30  ;;  %v13822_v30 = vld [vmem:[%s18363_s1 + $0x1c98] ss:$16 sps:$4 sm:$0xff]  }
 0x422   : > { %8937 = vmatpush1.bf16.msra.mxu1 %v13766_v31  ;;  %8897 = vmatprep.subr.bf16.mxu0 %v13771_v32  ;;  %v13825_v31 = vld [vmem:[%s18363_s1 + $0x1dd8] ss:$16 sps:$4 sm:$0xff]   ;;  %v13830_v32 = vld [vmem:[%s18363_s1 + $0x1dbc] ss:$16 sps:$4 sm:$0xff]  }
 0x423   : > { %8938 = vmatprep.subr.bf16.mxu1 %v13774_v11  ;;  %v13833_v11 = vld [vmem:[%s18363_s1 + $0x207c] ss:$16 sps:$4 sm:$0xff]  }
 0x425   : > { %v6851_v27 = vpop.f32.mrf.mxu1  ;;  %8898 = vmatpush1.bf16.msra.mxu0 %v13769_v59  ;;  %v13828_v59 = vld [vmem:[%s18363_s1 + $0x1db8] ss:$16 sps:$4 sm:$0xff]  }
 0x426   : > { %v17607_v20 = vadd.f32 %v6851_v27, %v6811_v60  ;;  %8939 = vmatpush1.bf16.msra.mxu1 %v13772_v33  ;;  %8899 = vmatprep.subr.bf16.mxu0 %v13777_v14  ;;  %v13794_v60 = vld [vmem:[%s18363_s1 + $0x1d3c] ss:$16 sps:$4 sm:$0xff]   ;;  %v13831_v33 = vld [vmem:[%s18363_s1 + $0x2078] ss:$16 sps:$4 sm:$0xff]  }
 0x427   : > { %v6853_v38 = vpop.f32.mrf.mxu1  ;;  %8940 = vmatprep.subr.bf16.mxu1 %v13780_v13  ;;  %v13836_v14 = vld [vmem:[%s18363_s1 + $0x1d9c] ss:$16 sps:$4 sm:$0xff]  }
 0x428   : > { %v17618_v43 = vadd.f32 %v6853_v38, %v6813_v3  ;;  %v13798_v3 = vld [vmem:[%s18363_s1 + $0x1d18] ss:$16 sps:$4 sm:$0xff]   ;;  %v13839_v13 = vld [vmem:[%s18363_s1 + $0x205c] ss:$16 sps:$4 sm:$0xff]  }
 0x429   : > { %v6855_v45 = vpop.f32.mrf.mxu1  ;;  %8900 = vmatpush1.bf16.msra.mxu0 %v13775_v40  ;;  %v13837_v38 = vld [vmem:[%s18363_s1 + $0x2058] ss:$16 sps:$4 sm:$0xff]  }
 0x42a   : > { %8941 = vmatpush1.bf16.msra.mxu1 %v13778_v22  ;;  %12027 = vmatprep.subr.msk.bf16.mxu0 %vm2139_vm1, %v12024_v39  ;;  %v13834_v22 = vld [vmem:[%s18363_s1 + $0x1d98] ss:$16 sps:$4 sm:$0xff]  }
 0x42b   : > { %v6856_v52 = vpop.f32.mrf.mxu1  ;;  %8942 = vmatprep.subr.bf16.mxu1 %v13784_v44 }
 0x42d   : > { %8914 = vmatpush2.bf16.msra.mxu0 %v8710_v35 }
 0x42e   : > { %8943 = vmatpush2.bf16.msra.mxu1 %v13782_v50  ;;  %8915 = vmatprep.subr.bf16.mxu0 %v13788_v55 }
 0x42f   : > { %8944 = vmatprep.subr.bf16.mxu1 %v13791_v56  ;;  %v13840_v56 = vld [vmem:[%s18363_s1 + $0x1f78] ss:$16 sps:$4 sm:$0xff]  }
 0x431   : > { %8916 = vmatpush2.bf16.msra.mxu0 %v13786_v48 }
 0x432   : > { %8945 = vmatpush2.bf16.msra.mxu1 %v13789_v58  ;;  %8967 = vmatprep.subr.bf16.mxu0 %v13797_v62  ;;  %v13846_v58 = vld [vmem:[%s18363_s1 + $0x1f58] ss:$16 sps:$4 sm:$0xff]   ;;  %v13854_v62 = vld [vmem:[%s18363_s1 + $0x1f3c] ss:$16 sps:$4 sm:$0xff]  }
 0x433   : > { %8946 = vmatprep.subr.bf16.mxu1 %v13794_v60  ;;  %v13849_v60 = vld [vmem:[%s18363_s1 + $0x2018] ss:$16 sps:$4 sm:$0xff]  }
 0x434   : > { %8918 = vmatmul.mubr.bf16.vlgmr.msra.gmra.mxu0 %v14813_v2 }
 0x435   : > { %8968 = vmatpush1.bf16.msra.mxu0 %v13795_v0  ;;  %8999 = vmatprep.mubr.bf16.mxu0 %v14400_v51  ;;  %v13815_v51 = vld [vmem:[%s18363_s1 + $0x1e1c] ss:$16 sps:$4 sm:$0xff]  }
 0x436   : > { %8947 = vmatpush2.bf16.msra.mxu1 %v13792_v53  ;;  %8969 = vmatprep.subr.bf16.mxu0 %v13803_v61  ;;  %v13860_v53 = vld [vmem:[%s18363_s1 + $0x1f1c] ss:$16 sps:$4 sm:$0xff]   ;;  %v13861_v61 = vld [vmem:[%s18363_s1 + $0x1fd8] ss:$16 sps:$4 sm:$0xff]  }
 0x437   : > { %8948 = vmatprep.subr.bf16.mxu1 %v13800_v1  ;;  %v13863_v0 = vld [vmem:[%s18363_s1 + $0x1fdc] ss:$16 sps:$4 sm:$0xff]   ;;  %v13858_v1 = vld [vmem:[%s18363_s1 + $0x1f18] ss:$16 sps:$4 sm:$0xff]  }
 0x439   : > { %8970 = vmatpush1.bf16.msra.mxu0 %v13801_v4  ;;  %v13869_v4 = vld [vmem:[%s18363_s1 + $0x1fbc] ss:$16 sps:$4 sm:$0xff]  }
 0x43a   : > { %8949 = vmatpush2.bf16.msra.mxu1 %v13798_v3  ;;  %8971 = vmatprep.subr.bf16.mxu0 %v13809_v8  ;;  %v13866_v3 = vld [vmem:[%s18363_s1 + $0x1efc] ss:$16 sps:$4 sm:$0xff]   ;;  %v13867_v8 = vld [vmem:[%s18363_s1 + $0x1fb8] ss:$16 sps:$4 sm:$0xff]  }
 0x43b   : > { %8950 = vmatprep.subr.bf16.mxu1 %v13806_v5  ;;  %v13864_v5 = vld [vmem:[%s18363_s1 + $0x1ef8] ss:$16 sps:$4 sm:$0xff]  }
 0x43d   : > { %8972 = vmatpush1.bf16.msra.mxu0 %v13807_v63  ;;  %v13875_v63 = vld [vmem:[%s18363_s1 + $0x1f9c] ss:$16 sps:$4 sm:$0xff]  }
 0x43e   : > { %8951 = vmatpush2.bf16.msra.mxu1 %v13804_v9  ;;  %8973 = vmatprep.subr.bf16.mxu0 %v13815_v51  ;;  %v13872_v9 = vld [vmem:[%s18363_s1 + $0x1edc] ss:$16 sps:$4 sm:$0xff]   ;;  %v13873_v51 = vld [vmem:[%s18363_s1 + $0x1f98] ss:$16 sps:$4 sm:$0xff]  }
 0x43f   : > { %8952 = vmatprep.subr.bf16.mxu1 %v13812_v47  ;;  %v13870_v47 = vld [vmem:[%s18363_s1 + $0x1ed8] ss:$16 sps:$4 sm:$0xff]  }
 0x441   : > { %8974 = vmatpush1.bf16.msra.mxu0 %v13813_v12  ;;  %v13881_v12 = vld [vmem:[%s18363_s1 + $0x217c] ss:$16 sps:$4 sm:$0xff]  }
 0x442   : > { %8953 = vmatpush2.bf16.msra.mxu1 %v13810_v10  ;;  %8975 = vmatprep.subr.bf16.mxu0 %v13821_v19  ;;  %v13878_v10 = vld [vmem:[%s18363_s1 + $0x1ebc] ss:$16 sps:$4 sm:$0xff]   ;;  %v13879_v19 = vld [vmem:[%s18363_s1 + $0x2178] ss:$16 sps:$4 sm:$0xff]  }
 0x443   : > { %8954 = vmatprep.subr.bf16.mxu1 %v13818_v15  ;;  %v13876_v15 = vld [vmem:[%s18363_s1 + $0x1eb8] ss:$16 sps:$4 sm:$0xff]  }
 0x445   : > { %8976 = vmatpush1.bf16.msra.mxu0 %v13819_v25  ;;  %v13887_v25 = vld [vmem:[%s18363_s1 + $0x215c] ss:$16 sps:$4 sm:$0xff]  }
 0x446   : > { %8955 = vmatpush2.bf16.msra.mxu1 %v13816_v21  ;;  %8977 = vmatprep.subr.bf16.mxu0 %v13827_v28  ;;  %v13884_v21 = vld [vmem:[%s18363_s1 + $0x1e9c] ss:$16 sps:$4 sm:$0xff]   ;;  %v13885_v28 = vld [vmem:[%s18363_s1 + $0x2158] ss:$16 sps:$4 sm:$0xff]  }
 0x447   : > { %8956 = vmatprep.subr.bf16.mxu1 %v13824_v54  ;;  %v13882_v54 = vld [vmem:[%s18363_s1 + $0x1e98] ss:$16 sps:$4 sm:$0xff]  }
 0x449   : > { %8978 = vmatpush1.bf16.msra.mxu0 %v13825_v31  ;;  %v13893_v31 = vld [vmem:[%s18363_s1 + $0x227c] ss:$16 sps:$4 sm:$0xff]  }
 0x44a   : > { %8957 = vmatpush2.bf16.msra.mxu1 %v13822_v30  ;;  %8979 = vmatprep.subr.bf16.mxu0 %v13830_v32  ;;  %v13890_v30 = vld [vmem:[%s18363_s1 + $0x213c] ss:$16 sps:$4 sm:$0xff]   ;;  %v13888_v32 = vld [vmem:[%s18363_s1 + $0x2138] ss:$16 sps:$4 sm:$0xff]  }
 0x44b   : > { %9008 = vmatprep.subr.bf16.mxu1 %v13833_v11  ;;  %v13891_v11 = vld [vmem:[%s18363_s1 + $0x2278] ss:$16 sps:$4 sm:$0xff]  }
 0x44c   : > { %v6892_v24 = vpop.f32.mrf.mxu0 }
 0x44d   : > { %v6933_v27 = vpop.f32.mrf.mxu1  ;;  %8959 = vmatmul.mubr.bf16.vlgmr.msra.gmra.mxu1 %v14458_v6  ;;  %v6893_v40 = vadd.f32 %v6892_v24, %v17607_v20  ;;  %8980 = vmatpush1.bf16.msra.mxu0 %v13828_v59  ;;  %v13842_v6 = vld [vmem:[%s18363_s1 + $0x1f7c] ss:$16 sps:$4 sm:$0xff]  }
 0x44e   : > { %9009 = vmatpush1.bf16.msra.mxu1 %v13831_v33  ;;  %v6894_v39 = vpop.f32.mrf.mxu0  ;;  %8981 = vmatprep.subr.bf16.mxu0 %v13836_v14  ;;  %v13845_v20 = vld [vmem:[%s18363_s1 + $0x203c] ss:$16 sps:$4 sm:$0xff]   ;;  %v13894_v14 = vld [vmem:[%s18363_s1 + $0x2118] ss:$16 sps:$4 sm:$0xff]  }
 0x44f   : > { %v6935_v44 = vpop.f32.mrf.mxu1  ;;  %9010 = vmatprep.subr.bf16.mxu1 %v13839_v13  ;;  %v6934_v42 = vadd.f32 %v6933_v27, %v6893_v40  ;;  %v6895_v45 = vadd.f32 %v6894_v39, %v17618_v43  ;;  %9040 = vmatprep.mubr.bf16.mxu1 %v14550_v36  ;;  %v13843_v43 = vld [vmem:[%s18363_s1 + $0x2038] ss:$16 sps:$4 sm:$0xff]   ;;  %v13896_v59 = vld [vmem:[%s18363_s1 + $0x211c] ss:$16 sps:$4 sm:$0xff]  }
 0x450   : > { %v6896_v50 = vpop.f32.mrf.mxu0  ;;  %v13899_v33 = vld [vmem:[%s18363_s1 + $0x225c] ss:$16 sps:$4 sm:$0xff]   ;;  %v13897_v13 = vld [vmem:[%s18363_s1 + $0x2258] ss:$16 sps:$4 sm:$0xff]  }
 0x451   : > { %v6937_v52 = vpop.f32.mrf.mxu1  ;;  %v17748_v35 = vmax.f32 %v4751_v46, %v6934_v42  ;;  %v6936_v55 = vadd.f32 %v6935_v44, %v6895_v45  ;;  %8982 = vmatpush1.bf16.msra.mxu0 %v13834_v22  ;;  %v13902_v24 = vld [vmem:[%s18363_s1 + $0x20fc] ss:$16 sps:$4 sm:$0xff]   ;;  %v13900_v27 = vld [vmem:[%s18363_s1 + $0x20f8] ss:$16 sps:$4 sm:$0xff]  }
 0x452   : > { %9011 = vmatpush1.bf16.msra.mxu1 %v13837_v38  ;;  %v6897_v48 = vpop.f32.mrf.mxu0  ;;  %8983 = vmatprep.subr.bf16.mxu0 %v13842_v6  ;;  %v13903_v40 = vld [vmem:[%s18363_s1 + $0x2238] ss:$16 sps:$4 sm:$0xff]   ;;  %v13908_v22 = vld [vmem:[%s18363_s1 + $0x20dc] ss:$16 sps:$4 sm:$0xff]  }
 0x453   : > { %v6938_v36 = vpop.f32.mrf.mxu1  ;;  %9012 = vmatprep.subr.bf16.mxu1 %v13845_v20  ;;  %v17765_v46 = vmax.f32 %v4752_v57, %v6936_v55  ;;  %v13855_v57 = vld [vmem:[%s18363_s1 + $0x1ff8] ss:$16 sps:$4 sm:$0xff]   ;;  %v13914_v44 = vld [vmem:[%s18363_s1 + $0x20bc] ss:$16 sps:$4 sm:$0xff]  }
 0x454   : > { %v13906_v38 = vld [vmem:[%s18363_s1 + $0x20d8] ss:$16 sps:$4 sm:$0xff]   ;;  %v13917_v6 = vld [vmem:[%s18363_s1 + $0x21fc] ss:$16 sps:$4 sm:$0xff]  }
 0x455   : > { %8984 = vmatpush2.bf16.msra.mxu0 %v13840_v56  ;;  %v13909_v39 = vld [vmem:[%s18363_s1 + $0x2218] ss:$16 sps:$4 sm:$0xff]   ;;  %v13920_v45 = vld [vmem:[%s18363_s1 + $0x209c] ss:$16 sps:$4 sm:$0xff]  }
 0x456   : > { %9013 = vmatpush1.bf16.msra.mxu1 %v13843_v43  ;;  %8985 = vmatprep.subr.bf16.mxu0 %v13848_v18  ;;  %v13912_v20 = vld [vmem:[%s18363_s1 + $0x20b8] ss:$16 sps:$4 sm:$0xff]   ;;  %v13923_v50 = vld [vmem:[%s18363_s1 + $0x21dc] ss:$16 sps:$4 sm:$0xff]  }
 0x457   : > { %9014 = vmatprep.subr.bf16.mxu1 %v13851_v41  ;;  %v13915_v42 = vld [vmem:[%s18363_s1 + $0x21f8] ss:$16 sps:$4 sm:$0xff]   ;;  %v13926_v56 = vld [vmem:[%s18363_s1 + $0x21bc] ss:$16 sps:$4 sm:$0xff]  }
 0x458   : > { %v13918_v52 = vld [vmem:[%s18363_s1 + $0x2098] ss:$16 sps:$4 sm:$0xff]   ;;  %v13929_v43 = vld [vmem:[%s18363_s1 + $0x247c] ss:$16 sps:$4 sm:$0xff]  }
 0x459   : > { %8986 = vmatpush2.bf16.msra.mxu0 %v13846_v58  ;;  %v13921_v55 = vld [vmem:[%s18363_s1 + $0x21d8] ss:$16 sps:$4 sm:$0xff]   ;;  %v13932_v18 = vld [vmem:[%s18363_s1 + $0x219c] ss:$16 sps:$4 sm:$0xff]  }
 0x45a   : > { %9015 = vmatpush1.bf16.msra.mxu1 %v13849_v60  ;;  %8987 = vmatprep.subr.bf16.mxu0 %v13854_v62  ;;  %v13924_v48 = vld [vmem:[%s18363_s1 + $0x21b8] ss:$16 sps:$4 sm:$0xff]   ;;  %v13935_v41 = vld [vmem:[%s18363_s1 + $0x245c] ss:$16 sps:$4 sm:$0xff]  }
 0x45b   : > { %9016 = vmatprep.subr.bf16.mxu1 %v13857_v26  ;;  %v13927_v36 = vld [vmem:[%s18363_s1 + $0x2478] ss:$16 sps:$4 sm:$0xff]  }
 0x45c   : > { %v13930_v26 = vld [vmem:[%s18363_s1 + $0x2198] ss:$16 sps:$4 sm:$0xff]  }
 0x45d   : > { %8988 = vmatpush2.bf16.msra.mxu0 %v13852_v49  ;;  %v13933_v49 = vld [vmem:[%s18363_s1 + $0x2458] ss:$16 sps:$4 sm:$0xff]  }
 0x45e   : > { %9017 = vmatpush1.bf16.msra.mxu1 %v13855_v57  ;;  %8989 = vmatprep.subr.bf16.mxu0 %v13860_v53 }
 0x45f   : > { %9018 = vmatprep.subr.bf16.mxu1 %v13863_v0  ;;  %v13941_v0 = vld [vmem:[%s18363_s1 + $0x243c] ss:$16 sps:$4 sm:$0xff]  }
 0x461   : > { %8990 = vmatpush2.bf16.msra.mxu0 %v13858_v1 }
 0x462   : > { %9019 = vmatpush1.bf16.msra.mxu1 %v13861_v61  ;;  %8991 = vmatprep.subr.bf16.mxu0 %v13866_v3 }
 0x463   : > { %9020 = vmatprep.subr.bf16.mxu1 %v13869_v4  ;;  %v13936_v4 = vld [vmem:[%s18363_s1 + $0x2378] ss:$16 sps:$4 sm:$0xff]  }
 0x465   : > { %8992 = vmatpush2.bf16.msra.mxu0 %v13864_v5  ;;  %v13939_v5 = vld [vmem:[%s18363_s1 + $0x2438] ss:$16 sps:$4 sm:$0xff]  }
 0x466   : > { %9021 = vmatpush1.bf16.msra.mxu1 %v13867_v8  ;;  %8993 = vmatprep.subr.bf16.mxu0 %v13872_v9 }
 0x467   : > { %9022 = vmatprep.subr.bf16.mxu1 %v13875_v63  ;;  %v13947_v63 = vld [vmem:[%s18363_s1 + $0x241c] ss:$16 sps:$4 sm:$0xff]  }
 0x469   : > { %8994 = vmatpush2.bf16.msra.mxu0 %v13870_v47  ;;  %v13942_v47 = vld [vmem:[%s18363_s1 + $0x2358] ss:$16 sps:$4 sm:$0xff]  }
 0x46a   : > { %9023 = vmatpush1.bf16.msra.mxu1 %v13873_v51  ;;  %8995 = vmatprep.subr.bf16.mxu0 %v13878_v10  ;;  %v13945_v51 = vld [vmem:[%s18363_s1 + $0x2418] ss:$16 sps:$4 sm:$0xff]   ;;  %v13950_v10 = vld [vmem:[%s18363_s1 + $0x233c] ss:$16 sps:$4 sm:$0xff]  }
 0x46b   : > { %9024 = vmatprep.subr.bf16.mxu1 %v13881_v12  ;;  %v13953_v12 = vld [vmem:[%s18363_s1 + $0x23fc] ss:$16 sps:$4 sm:$0xff]  }
 0x46d   : > { %8996 = vmatpush2.bf16.msra.mxu0 %v13876_v15  ;;  %v13948_v15 = vld [vmem:[%s18363_s1 + $0x2338] ss:$16 sps:$4 sm:$0xff]  }
 0x46e   : > { %9025 = vmatpush2.bf16.msra.mxu1 %v13879_v19  ;;  %8997 = vmatprep.subr.bf16.mxu0 %v13884_v21  ;;  %v13951_v19 = vld [vmem:[%s18363_s1 + $0x23f8] ss:$16 sps:$4 sm:$0xff]   ;;  %v13956_v21 = vld [vmem:[%s18363_s1 + $0x231c] ss:$16 sps:$4 sm:$0xff]  }
 0x46f   : > { %9026 = vmatprep.subr.bf16.mxu1 %v13887_v25  ;;  %v13959_v25 = vld [vmem:[%s18363_s1 + $0x23dc] ss:$16 sps:$4 sm:$0xff]  }
 0x471   : > { %8998 = vmatpush2.bf16.msra.mxu0 %v13882_v54  ;;  %v13954_v54 = vld [vmem:[%s18363_s1 + $0x2318] ss:$16 sps:$4 sm:$0xff]  }
 0x472   : > { %9027 = vmatpush2.bf16.msra.mxu1 %v13885_v28  ;;  %9049 = vmatprep.subr.bf16.mxu0 %v13893_v31  ;;  %v13957_v28 = vld [vmem:[%s18363_s1 + $0x23d8] ss:$16 sps:$4 sm:$0xff]   ;;  %v13965_v31 = vld [vmem:[%s18363_s1 + $0x23bc] ss:$16 sps:$4 sm:$0xff]  }
 0x473   : > { %9028 = vmatprep.subr.bf16.mxu1 %v13890_v30  ;;  %v13962_v30 = vld [vmem:[%s18363_s1 + $0x22fc] ss:$16 sps:$4 sm:$0xff]  }
 0x474   : > { %9000 = vmatmul.mubr.bf16.vlgmr.msra.gmra.mxu0 %v14460_v7  ;;  %v13905_v7 = vld [vmem:[%s18363_s1 + $0x223c] ss:$16 sps:$4 sm:$0xff]  }
 0x475   : > { %9050 = vmatpush1.bf16.msra.mxu0 %v13891_v11  ;;  %9081 = vmatprep.mubr.bf16.mxu0 %v14554_v37  ;;  %v13911_v37 = vld [vmem:[%s18363_s1 + $0x221c] ss:$16 sps:$4 sm:$0xff]   ;;  %v13963_v11 = vld [vmem:[%s18363_s1 + $0x23b8] ss:$16 sps:$4 sm:$0xff]  }
 0x476   : > { %9029 = vmatpush2.bf16.msra.mxu1 %v13888_v32  ;;  %9051 = vmatprep.subr.bf16.mxu0 %v13899_v33  ;;  %v13960_v32 = vld [vmem:[%s18363_s1 + $0x22f8] ss:$16 sps:$4 sm:$0xff]   ;;  %v13971_v33 = vld [vmem:[%s18363_s1 + $0x239c] ss:$16 sps:$4 sm:$0xff]  }
 0x477   : > { %9030 = vmatprep.subr.bf16.mxu1 %v13896_v59  ;;  %v13968_v59 = vld [vmem:[%s18363_s1 + $0x22dc] ss:$16 sps:$4 sm:$0xff]  }
 0x479   : > { %9052 = vmatpush1.bf16.msra.mxu0 %v13897_v13  ;;  %v13966_v13 = vld [vmem:[%s18363_s1 + $0x22d8] ss:$16 sps:$4 sm:$0xff]  }
 0x47a   : > { %9031 = vmatpush2.bf16.msra.mxu1 %v13894_v14  ;;  %9053 = vmatprep.subr.bf16.mxu0 %v13905_v7  ;;  %v11730_v14 = vld [vmem:[%s18363_s1 + $0x24b8] sm:$0xff] }
 0x47b   : > { %9032 = vmatprep.subr.bf16.mxu1 %v13902_v24  ;;  %v13969_v24 = vld [vmem:[%s18363_s1 + $0x2398] ss:$16 sps:$4 sm:$0xff]   ;;  %v13974_v7 = vld [vmem:[%s18363_s1 + $0x22bc] ss:$16 sps:$4 sm:$0xff]  }
 0x47d   : > { %9054 = vmatpush1.bf16.msra.mxu0 %v13903_v40  ;;  %v12025_v40 = vcombine.low %v11730_v14, %v11730_v14 }
 0x47e   : > { %9033 = vmatpush2.bf16.msra.mxu1 %v13900_v27  ;;  %9055 = vmatprep.subr.bf16.mxu0 %v13911_v37  ;;  %v12026_v27 = vcombine.high %v11730_v14, %v11730_v14  ;;  %v14027_v14 = vld [vmem:[%s18365_s3 + $0x94] ss:$8 sps:$4 sm:$0xff]  }
 0x47f   : > { %9034 = vmatprep.subr.bf16.mxu1 %v13908_v22  ;;  %v13972_v22 = vld [vmem:[%s18363_s1 + $0x22b8] ss:$16 sps:$4 sm:$0xff]   ;;  %v8716_v37 = vsel %vm2139_vm1, %v12025_v40, 0 }
 0x480   : > { %v14028_v40 = vld [vmem:[%s18365_s3 + $0x80] ss:$8 sps:$4 sm:$0xff]  }
 0x481   : > { %9056 = vmatpush1.bf16.msra.mxu0 %v13909_v39  ;;  %v13982_v39 = vld [vmem:[%s18363_s1 + $0x249c] ss:$16 sps:$4 sm:$0xff]  }
 0x482   : > { %9035 = vmatpush2.bf16.msra.mxu1 %v13906_v38  ;;  %9057 = vmatprep.subr.bf16.mxu0 %v13917_v6  ;;  %v13979_v38 = vld [vmem:[%s18363_s1 + $0x229c] ss:$16 sps:$4 sm:$0xff]   ;;  %v13980_v6 = vld [vmem:[%s18363_s1 + $0x2498] ss:$16 sps:$4 sm:$0xff]  }
 0x483   : > { %9036 = vmatprep.subr.bf16.mxu1 %v13914_v44  ;;  %v13977_v44 = vld [vmem:[%s18363_s1 + $0x2298] ss:$16 sps:$4 sm:$0xff]  }
 0x485   : > { %9058 = vmatpush1.bf16.msra.mxu0 %v13915_v42  ;;  %v13983_v42 = vld [vmem:[%s18365_s3 + $0x70] ss:$8 sps:$4 sm:$0xff]  }
 0x486   : > { %9037 = vmatpush2.bf16.msra.mxu1 %v13912_v20  ;;  %9059 = vmatprep.subr.bf16.mxu0 %v13923_v50  ;;  %v13985_v20 = vld [vmem:[%s18365_s3 + $0x74] ss:$8 sps:$4 sm:$0xff]   ;;  %v13986_v50 = vld [vmem:[%s18365_s3 + $0x60] ss:$8 sps:$4 sm:$0xff]  }
 0x487   : > { %9038 = vmatprep.subr.bf16.mxu1 %v13920_v45  ;;  %v13988_v45 = vld [vmem:[%s18365_s3 + $0x64] ss:$8 sps:$4 sm:$0xff]  }
 0x489   : > { %9060 = vmatpush1.bf16.msra.mxu0 %v13921_v55  ;;  %v13989_v55 = vld [vmem:[%s18365_s3 + $0x50] ss:$8 sps:$4 sm:$0xff]  }
 0x48a   : > { %9039 = vmatpush2.bf16.msra.mxu1 %v13918_v52  ;;  %9061 = vmatprep.subr.bf16.mxu0 %v13926_v56  ;;  %v13991_v52 = vld [vmem:[%s18365_s3 + $0x54] ss:$8 sps:$4 sm:$0xff]  }
 0x48b   : > { %9090 = vmatprep.subr.bf16.mxu1 %v13929_v43  ;;  %v13997_v56 = vld [vmem:[%s18365_s3 + $0x34] ss:$8 sps:$4 sm:$0xff]   ;;  %v13995_v43 = vld [vmem:[%s18365_s3 + $0x30] ss:$8 sps:$4 sm:$0xff]  }
 0x48c   : > { %v8755_v58 = vpop.f32.mrf.mxu0 }
 0x48d   : > { %v8796_v60 = vpop.f32.mrf.mxu1  ;;  %9041 = vmatmul.mubr.bf16.vlgmr.msra.gmra.mxu1 %v14674_v16  ;;  %9062 = vmatpush1.bf16.msra.mxu0 %v13924_v48  ;;  %v13938_v16 = vld [vmem:[%s18363_s1 + $0x237c] ss:$16 sps:$4 sm:$0xff]  }
 0x48e   : > { %v17938_v62 = vadd.f32 %v8796_v60, %v8755_v58  ;;  %9091 = vmatpush1.bf16.msra.mxu1 %v13927_v36  ;;  %v8757_v57 = vpop.f32.mrf.mxu0  ;;  %9063 = vmatprep.subr.bf16.mxu0 %v13932_v18  ;;  %v14000_v48 = vld [vmem:[%s18365_s3 + $0x24] ss:$8 sps:$4 sm:$0xff]   ;;  %v13998_v36 = vld [vmem:[%s18365_s3 + $0x20] ss:$8 sps:$4 sm:$0xff]   ;;  %v14003_v18 = vld [vmem:[%s18365_s3 + $0x14] ss:$8 sps:$4 sm:$0xff]  }
 0x48f   : > { %v8798_v53 = vpop.f32.mrf.mxu1  ;;  %9092 = vmatprep.subr.bf16.mxu1 %v13935_v41  ;;  %12030 = vmatprep.mubr.msk.bf16.mxu1 %vm2135_vm0, %v14697_v23  ;;  %v13944_v23 = vld [vmem:[%s18363_s1 + $0x235c] ss:$16 sps:$4 sm:$0xff]   ;;  %v14001_v41 = vld [vmem:[%s18365_s3 + $0x10] ss:$8 sps:$4 sm:$0xff]  }
 0x490   : > { %v17952_v1 = vadd.f32 %v8798_v53, %v8757_v57  ;;  %v8759_v61 = vpop.f32.mrf.mxu0  ;;  %v14006_v58 = vld [vmem:[%s18365_s3 + $0x4] ss:$8 sps:$4 sm:$0xff]  }
 0x491   : > { %v8800_v3 = vpop.f32.mrf.mxu1  ;;  %9064 = vmatpush1.bf16.msra.mxu0 %v13930_v26 }
 0x492   : > { %9093 = vmatpush1.bf16.msra.mxu1 %v13933_v49  ;;  %v8760_v8 = vpop.f32.mrf.mxu0  ;;  %9065 = vmatprep.subr.bf16.mxu0 %v13938_v16  ;;  %v14004_v49 = vld [vmem:[%s18365_s3] ss:$8 sps:$4 sm:$0xff]   ;;  %v14009_v16 = vld [vmem:[%s18365_s3 + $0xf4] ss:$8 sps:$4 sm:$0xff]   ;;  %v14007_v3 = vld [vmem:[%s18365_s3 + $0xf0] ss:$8 sps:$4 sm:$0xff]  }
 0x493   : > { %v8801_v9 = vpop.f32.mrf.mxu1  ;;  %9094 = vmatprep.subr.bf16.mxu1 %v13941_v0  ;;  %v14012_v8 = vld [vmem:[%s18365_s3 + $0xe4] ss:$8 sps:$4 sm:$0xff]  }
 0x494   : > { %v14031_v9 = vld [vmem:[%s18365_s3 + $0x170] ss:$8 sps:$4 sm:$0xff]  }
 0x495   : > { %9066 = vmatpush2.bf16.msra.mxu0 %v13936_v4 }
 0x496   : > { %9095 = vmatpush1.bf16.msra.mxu1 %v13939_v5  ;;  %9067 = vmatprep.subr.bf16.mxu0 %v13944_v23  ;;  %v14033_v23 = vld [vmem:[%s18365_s3 + $0x174] ss:$8 sps:$4 sm:$0xff]  }
 0x497   : > { %9096 = vmatprep.subr.bf16.mxu1 %v13947_v63  ;;  %v14036_v63 = vld [vmem:[%s18365_s3 + $0x164] ss:$8 sps:$4 sm:$0xff]  }
 0x499   : > { %9068 = vmatpush2.bf16.msra.mxu0 %v13942_v47  ;;  %v14010_v47 = vld [vmem:[%s18365_s3 + $0xe0] ss:$8 sps:$4 sm:$0xff]  }
 0x49a   : > { %9097 = vmatpush1.bf16.msra.mxu1 %v13945_v51  ;;  %9069 = vmatprep.subr.bf16.mxu0 %v13950_v10  ;;  %v14034_v51 = vld [vmem:[%s18365_s3 + $0x160] ss:$8 sps:$4 sm:$0xff]   ;;  %v14015_v10 = vld [vmem:[%s18365_s3 + $0xd4] ss:$8 sps:$4 sm:$0xff]  }
 0x49b   : > { %9098 = vmatprep.subr.bf16.mxu1 %v13953_v12  ;;  %v14039_v12 = vld [vmem:[%s18365_s3 + $0x154] ss:$8 sps:$4 sm:$0xff]  }
 0x49d   : > { %9070 = vmatpush2.bf16.msra.mxu0 %v13948_v15  ;;  %v14013_v15 = vld [vmem:[%s18365_s3 + $0xd0] ss:$8 sps:$4 sm:$0xff]  }
 0x49e   : > { %9099 = vmatpush1.bf16.msra.mxu1 %v13951_v19  ;;  %9071 = vmatprep.subr.bf16.mxu0 %v13956_v21  ;;  %v14037_v19 = vld [vmem:[%s18365_s3 + $0x150] ss:$8 sps:$4 sm:$0xff]   ;;  %v14018_v21 = vld [vmem:[%s18365_s3 + $0xc4] ss:$8 sps:$4 sm:$0xff]  }
 0x49f   : > { %9100 = vmatprep.subr.bf16.mxu1 %v13959_v25  ;;  %v14042_v25 = vld [vmem:[%s18365_s3 + $0x144] ss:$8 sps:$4 sm:$0xff]  }
 0x4a1   : > { %9072 = vmatpush2.bf16.msra.mxu0 %v13954_v54  ;;  %v14016_v54 = vld [vmem:[%s18365_s3 + $0xc0] ss:$8 sps:$4 sm:$0xff]  }
 0x4a2   : > { %9101 = vmatpush1.bf16.msra.mxu1 %v13957_v28  ;;  %9073 = vmatprep.subr.bf16.mxu0 %v13962_v30  ;;  %v14040_v28 = vld [vmem:[%s18365_s3 + $0x140] ss:$8 sps:$4 sm:$0xff]   ;;  %v14021_v30 = vld [vmem:[%s18365_s3 + $0xb4] ss:$8 sps:$4 sm:$0xff]  }
 0x4a3   : > { %9102 = vmatprep.subr.bf16.mxu1 %v13965_v31  ;;  %v14045_v31 = vld [vmem:[%s18365_s3 + $0x134] ss:$8 sps:$4 sm:$0xff]  }
 0x4a5   : > { %9074 = vmatpush2.bf16.msra.mxu0 %v13960_v32  ;;  %v14019_v32 = vld [vmem:[%s18365_s3 + $0xb0] ss:$8 sps:$4 sm:$0xff]  }
 0x4a6   : > { %9103 = vmatpush1.bf16.msra.mxu1 %v13963_v11  ;;  %9075 = vmatprep.subr.bf16.mxu0 %v13968_v59  ;;  %v14043_v11 = vld [vmem:[%s18365_s3 + $0x130] ss:$8 sps:$4 sm:$0xff]   ;;  %v14024_v59 = vld [vmem:[%s18365_s3 + $0xa4] ss:$8 sps:$4 sm:$0xff]  }
 0x4a7   : > { %9104 = vmatprep.subr.bf16.mxu1 %v13971_v33  ;;  %v14022_v33 = vld [vmem:[%s18365_s3 + $0xa0] ss:$8 sps:$4 sm:$0xff]  }
 0x4a9   : > { %9076 = vmatpush2.bf16.msra.mxu0 %v13966_v13  ;;  %v9137_v13 = vlaneseq }
 0x4aa   : > { %9105 = vmatpush1.bf16.msra.mxu1 %v13969_v24  ;;  %9077 = vmatprep.subr.bf16.mxu0 %v13974_v7  ;;  %v14025_v24 = vld [vmem:[%s18365_s3 + $0x90] ss:$8 sps:$4 sm:$0xff]   ;;  %v14030_v7 = vld [vmem:[%s18365_s3 + $0x84] ss:$8 sps:$4 sm:$0xff]  }
 0x4ab   : > { %12029 = vmatprep.subr.msk.bf16.mxu1 %vm2139_vm1, %v12026_v27  ;;  %v18176_v27 = vshrl.u32 %v9137_v13, 7 }
 0x4ad   : > { %9078 = vmatpush2.bf16.msra.mxu0 %v13972_v22 }
 0x4ae   : > { %9119 = vmatpush2.bf16.msra.mxu1 %v8716_v37  ;;  %9079 = vmatprep.subr.bf16.mxu0 %v13979_v38  ;;  %v9139_v38 = vsub.s32 0, %v18176_v27 }
 0x4af   : > { %9120 = vmatprep.subr.bf16.mxu1 %v13982_v39  ;;  %v18188_v39 = vld [vmem:[%s18364_s2] sm:$0xf] }
 0x4b1   : > { %9080 = vmatpush2.bf16.msra.mxu0 %v13977_v44  ;;  %v14048_v44 = vld [vmem:[%s18365_s3 + $0x124] ss:$8 sps:$4 sm:$0xff]  }
 0x4b2   : > { %9121 = vmatpush2.bf16.msra.mxu1 %v13980_v6  ;;  %9485 = vmatprep.subr.bf16.mxu0 %v13985_v20  ;;  %v9143_v20 = vsub.s32 1, %v18176_v27 }
 0x4b3   : > { %9526 = vmatprep.subr.bf16.mxu1 %v14033_v23 }
 0x4b4   : > { %9082 = vmatmul.mubr.bf16.vlgmr.msra.gmra.mxu0 %v14678_v17  ;;  %v13994_v17 = vld [vmem:[%s18365_s3 + $0x44] ss:$8 sps:$4 sm:$0xff]  }
 0x4b5   : > { %9123 = vmatmul.mubr.bf16.vlgmr.msra.gmra.mxu1 %v14813_v2  ;;  %9486 = vmatpush1.bf16.msra.mxu0 %v13983_v42  ;;  %v13992_v2 = vld [vmem:[%s18365_s3 + $0x40] ss:$8 sps:$4 sm:$0xff]  }
 0x4b6   : > { %9487 = vmatprep.subr.bf16.mxu0 %v13988_v45  ;;  %9527 = vmatpush1.bf16.msra.mxu1 %v14031_v9 }
 0x4b7   : > { %9528 = vmatprep.subr.bf16.mxu1 %v14036_v63  ;;  %v14058_v63 = vld [vmem:[%s18367_s5 + $0x78] sm:$0xff]  }
 0x4b9   : > { %9488 = vmatpush1.bf16.msra.mxu0 %v13986_v50  ;;  %v9140_v50 = vrot.slane %v18188_v39, %v9139_v38 }
 0x4ba   : > { %9489 = vmatprep.subr.bf16.mxu0 %v13991_v52  ;;  %9529 = vmatpush1.bf16.msra.mxu1 %v14034_v51 }
 0x4bb   : > { %9530 = vmatprep.subr.bf16.mxu1 %v14039_v12 }
 0x4bd   : > { %9490 = vmatpush1.bf16.msra.mxu0 %v13989_v55  ;;  %v14051_v55 = vld [vmem:[%s18365_s3 + $0x114] ss:$8 sps:$4 sm:$0xff]  }
 0x4be   : > { %9491 = vmatprep.subr.bf16.mxu0 %v13994_v17  ;;  %9531 = vmatpush1.bf16.msra.mxu1 %v14037_v19 }
 0x4bf   : > { %9532 = vmatprep.subr.bf16.mxu1 %v14042_v25  ;;  %v9147_v25 = vsub.s32 2, %v18176_v27 }
 0x4c1   : > { %9492 = vmatpush1.bf16.msra.mxu0 %v13992_v2 }
 0x4c2   : > { %9493 = vmatprep.subr.bf16.mxu0 %v13997_v56  ;;  %9533 = vmatpush1.bf16.msra.mxu1 %v14040_v28  ;;  %v9144_v56 = vrot.slane %v18188_v39, %v9143_v20 }
 0x4c3   : > { %9534 = vmatprep.subr.bf16.mxu1 %v14045_v31 }
 0x4c5   : > { %9494 = vmatpush1.bf16.msra.mxu0 %v13995_v43  ;;  %v14049_v43 = vld [vmem:[%s18365_s3 + $0x110] ss:$8 sps:$4 sm:$0xff]  }
 0x4c6   : > { %9495 = vmatprep.subr.bf16.mxu0 %v14000_v48  ;;  %9535 = vmatpush1.bf16.msra.mxu1 %v14043_v11 }
 0x4c7   : > { %9536 = vmatprep.subr.bf16.mxu1 %v14048_v44 }
 0x4c9   : > { %9496 = vmatpush1.bf16.msra.mxu0 %v13998_v36 }
 0x4ca   : > { %9497 = vmatprep.subr.bf16.mxu0 %v14003_v18 }
 0x4cc   : > { %v18092_v60 = vpop.f32.mrf.mxu0 }
 0x4cd   : > { %v18094_v26 = vpop.f32.mrf.mxu1  ;;  %9498 = vmatpush1.bf16.msra.mxu0 %v14001_v41  ;;  %v8838_v22 = vadd.f32 %v18092_v60, %v17938_v62  ;;  %v14046_v62 = vld [vmem:[%s18365_s3 + $0x120] ss:$8 sps:$4 sm:$0xff]  }
 0x4ce   : > { %v8839_v57 = vpop.f32.mrf.mxu0  ;;  %9499 = vmatprep.subr.bf16.mxu0 %v14006_v58  ;;  %9537 = vmatpush1.bf16.msra.mxu1 %v14046_v62  ;;  %v14052_v60 = vld [vmem:[%s18365_s3 + $0x100] ss:$8 sps:$4 sm:$0xff]  }
 0x4cf   : > { %v18099_v53 = vpop.f32.mrf.mxu1  ;;  %v8840_v37 = vadd.f32 %v8839_v57, %v17952_v1  ;;  %v8879_v6 = vadd.f32 %v18094_v26, %v8838_v22  ;;  %9538 = vmatprep.subr.bf16.mxu1 %v14051_v55  ;;  %v14057_v57 = vld [vmem:[%s18365_s3 + $0x184] ss:$8 sps:$4 sm:$0xff]   ;;  %v14059_v55 = vld [vmem:[%s18367_s5 + $0x38] sm:$0xff]  }
 0x4d0   : > { %v8841_v0 = vpop.f32.mrf.mxu0 }
 0x4d1   : > { %v8882_v61 = vpop.f32.mrf.mxu1  ;;  %9500 = vmatpush1.bf16.msra.mxu0 %v14004_v49  ;;  %v8881_v42 = vadd.f32 %v18099_v53, %v8840_v37  ;;  %v14055_v53 = vld [vmem:[%s18365_s3 + $0x180] ss:$8 sps:$4 sm:$0xff]  }
 0x4d2   : > { %v8842_v4 = vpop.f32.mrf.mxu0  ;;  %9501 = vmatprep.subr.bf16.mxu0 %v14009_v16  ;;  %9539 = vmatpush1.bf16.msra.mxu1 %v14049_v43  ;;  %v14065_v43 = vld [vmem:[%s18367_s5 + $0x20] sm:$0xff]  }
 0x4d3   : > { %v8883_v5 = vpop.f32.mrf.mxu1 }
 0x4d5   : > { %9502 = vmatpush2.bf16.msra.mxu0 %v14007_v3 }
 0x4d6   : > { %9503 = vmatprep.subr.bf16.mxu0 %v14012_v8 }
 0x4d9   : > { %9504 = vmatpush2.bf16.msra.mxu0 %v14010_v47 }
 0x4da   : > { %9505 = vmatprep.subr.bf16.mxu0 %v14015_v10 }
 0x4dd   : > { %9506 = vmatpush2.bf16.msra.mxu0 %v14013_v15 }
 0x4de   : > { %9507 = vmatprep.subr.bf16.mxu0 %v14018_v21 }
 0x4e1   : > { %9508 = vmatpush2.bf16.msra.mxu0 %v14016_v54 }
 0x4e2   : > { %9509 = vmatprep.subr.bf16.mxu0 %v14021_v30 }
 0x4e5   : > { %9510 = vmatpush2.bf16.msra.mxu0 %v14019_v32  ;;  %v9151_v32 = vsub.s32 3, %v18176_v27  ;;  %v14080_v27 = vld [vmem:[%s18369_s7 + $0x8] sm:$0xff]  }
 0x4e6   : > { %9511 = vmatprep.subr.bf16.mxu0 %v14024_v59 }
 0x4e7   : > { %v9152_v37 = vrot.slane %v18188_v39, %v9151_v32  ;;  %v12082_v32 = vld [vmem:[%s18368_s6] ss:$0 sm:$0xff] }
 0x4e9   : > { %9512 = vmatpush2.bf16.msra.mxu0 %v14022_v33 }
 0x4ea   : > { %9513 = vmatprep.subr.bf16.mxu0 %v14027_v14  ;;  %v9148_v14 = vrot.slane %v18188_v39, %v9147_v25  ;;  %v14062_v39 = vld [vmem:[%s18367_s5 + $0x68] sm:$0xff]  }
 0x4ed   : > { %9514 = vmatpush2.bf16.msra.mxu0 %v14025_v24 }
 0x4ee   : > { %9515 = vmatprep.subr.bf16.mxu0 %v14030_v7 }
 0x4f1   : > { %9516 = vmatpush2.bf16.msra.mxu0 %v14028_v40 }
 0x4f4   : > { %v8919_v1 = vpop.f32.mrf.mxu0 }
 0x4f5   : > { %v8920_v45 = vadd.f32 %v8919_v1, %v8879_v6 }
 0x4f6   : > { %v8921_v52 = vpop.f32.mrf.mxu0 }
 0x4f7   : > { %v9131_v17 = vmax.f32 %v17331_v29, %v8920_v45  ;;  %v8922_v2 = vadd.f32 %v8921_v52, %v8881_v42  ;;  %v14054_v29 = vld [vmem:[%s18365_s3 + $0x104] ss:$8 sps:$4 sm:$0xff]  }
 0x4f8   : > { %v8923_v48 = vpop.f32.mrf.mxu0  ;;  %9540 = vmatprep.subr.bf16.mxu1 %v14054_v29 }
 0x4f9   : > { %v9157_v36 = vadd.f32 %v9140_v50, %v9131_v17  ;;  %v9132_v18 = vmax.f32 %v17339_v34, %v8922_v2  ;;  %9541 = vmatpush1.bf16.msra.mxu1 %v14052_v60  ;;  %v14063_v2 = vld [vmem:[%s18367_s5 + $0x28] sm:$0xff]   ;;  %v14066_v48 = vld [vmem:[%s18367_s5 + $0x58] sm:$0xff]  }
 0x4fa   : > { %v8924_v41 = vpop.f32.mrf.mxu0  ;;  %9556 = vmatprep.subr.bf16.mxu1 %v14057_v57  ;;  %v14070_v60 = vld [vmem:[%s18367_s5 + $0x48] sm:$0xff]  }
 0x4fb   : > { %v9158_v58 = vadd.f32 %v9144_v56, %v9132_v18  ;;  %v9161_v26 = vmax.f32 %v9157_v36, 0.0  ;;  %v14064_v56 = vld [vmem:[%s18367_s5 + $0x60] sm:$0xff]   ;;  %v14067_v36 = vld [vmem:[%s18367_s5 + $0x18] sm:$0xff]   ;;  %v14068_v18 = vld [vmem:[%s18367_s5 + $0x50] sm:$0xff]  }
 0x4fc   : > { %v14069_v41 = vld [vmem:[%s18367_s5 + $0x10] sm:$0xff]  }
 0x4fd   : > { %v9162_v49 = vmax.f32 %v9158_v58, 0.0  ;;  %v9165_v16 = vpack.c.bf16 %v9161_v26, %v9161_v26  ;;  %9557 = vmatpush2.bf16.msra.mxu1 %v14055_v53  ;;  %v14071_v26 = vld [vmem:[%s18367_s5 + $0x8] sm:$0xff]   ;;  %v14073_v53 = vld [vmem:[%s18367_s5] sm:$0xff]  }
 0x4fe   : > { %12112 = vmatprep.subr.bf16.mxu1 %v14058_v63 }
 0x4ff   : > { %v9166_v34 = vpack.c.bf16 %v9162_v49, %v9162_v49 }
 0x501   : > { %9517 = vmatprep.mubr.bf16.mxu0 %v9166_v34  ;;  %v14072_v34 = vld [vmem:[%s18367_s5 + $0x40] sm:$0xff]  }
 0x502   : > { %9518 = vmatmul.mubr.bf16.vlgmr.msra.gmra.mxu0 %v9165_v16  ;;  %v14074_v16 = vld [vmem:[%s18369_s7 + $0x38] sm:$0xff]  }
 0x50d   : > { %v8960_v0 = vpop.f32.mrf.mxu1 }
 0x50f   : > { %v8962_v61 = vpop.f32.mrf.mxu1 }
 0x511   : > { %v8964_v3 = vpop.f32.mrf.mxu1 }
 0x512   : > { %v14076_v3 = vld [vmem:[%s18369_s7 + $0x28] sm:$0xff]  }
 0x513   : > { %v8965_v4 = vpop.f32.mrf.mxu1 }
 0x514   : > { %v14077_v4 = vld [vmem:[%s18369_s7 + $0x20] sm:$0xff]  }
 0x534   : > { %v9001_v5 = vpop.f32.mrf.mxu0 }
 0x535   : > { %v9002_v15 = vadd.f32 %v9001_v5, %v8960_v0  ;;  %v14144_v0 = vmov 0.0   ;;  %v14078_v5 = vld [vmem:[%s18369_s7 + $0x18] sm:$0xff]  }
 0x536   : > { %v9003_v8 = vpop.f32.mrf.mxu0  ;;  %12143 = vmatprep.subr.bf16.mxu0 %v14144_v0  ;;  %12159 = vmatprep.mubr.msk.bf16.mxu0 %vm14145_vm3, %v14144_v0 }
 0x537   : > { %v9004_v19 = vadd.f32 %v9003_v8, %v8962_v61  ;;  %12144 = vmatpush3.bf16.msra.mxu0 %v14074_v16  ;;  %v14075_v61 = vld [vmem:[%s18369_s7 + $0x30] sm:$0xff]   ;;  %v9219_v8 = vld [vmem:[%s18366_s4] sm:$0x3] }
 0x538   : > { %v9005_v9 = vpop.f32.mrf.mxu0  ;;  %12145 = vmatprep.subr.bf16.mxu0 %v14144_v0 }
 0x539   : > { %v9224_v9 = vrot.slane %v9219_v8, %v9139_v38  ;;  %v14079_v38 = vld [vmem:[%s18369_s7 + $0x10] sm:$0xff]  }
 0x53a   : > { %v9006_v23 = vpop.f32.mrf.mxu0 }
 0x53b   : > { %12146 = vmatpush3.bf16.msra.mxu0 %v14075_v61  ;;  %v9228_v23 = vrot.slane %v9219_v8, %v9143_v20  ;;  %v14081_v20 = vld [vmem:[%s18369_s7] sm:$0xff]  }
 0x53c   : > { %12147 = vmatprep.subr.bf16.mxu0 %v14144_v0 }
 0x53f   : > { %12148 = vmatpush3.bf16.msra.mxu0 %v14076_v3 }
 0x540   : > { %12149 = vmatprep.subr.bf16.mxu0 %v14144_v0 }
 0x543   : > { %12150 = vmatpush3.bf16.msra.mxu0 %v14077_v4 }
 0x544   : > { %12151 = vmatprep.subr.bf16.mxu0 %v14144_v0 }
 0x547   : > { %12152 = vmatpush3.bf16.msra.mxu0 %v14078_v5 }
 0x548   : > { %12153 = vmatprep.subr.bf16.mxu0 %v14144_v0 }
 0x54b   : > { %12154 = vmatpush3.bf16.msra.mxu0 %v14079_v38 }
 0x54c   : > { %12155 = vmatprep.subr.bf16.mxu0 %v14144_v0 }
 0x54d   : > { %v9042_v47 = vpop.f32.mrf.mxu1 }
 0x54e   : > { %v9043_v21 = vadd.f32 %v9042_v47, %v9002_v15 }
 0x54f   : > { %v9044_v51 = vpop.f32.mrf.mxu1  ;;  %12156 = vmatpush3.bf16.msra.mxu0 %v14080_v27 }
 0x550   : > { %v9045_v30 = vadd.f32 %v9044_v51, %v9004_v19  ;;  %12157 = vmatprep.subr.bf16.mxu0 %v14144_v0 }
 0x551   : > { %v9046_v10 = vpop.f32.mrf.mxu1 }
 0x553   : > { %v9047_v12 = vpop.f32.mrf.mxu1  ;;  %12158 = vmatpush3.bf16.msra.mxu0 %v14081_v20 }
 0x574   : > { %v9083_v54 = vpop.f32.mrf.mxu0 }
 0x575   : > { %v9124_v28 = vpop.f32.mrf.mxu1  ;;  %v9084_v31 = vadd.f32 %v9083_v54, %v9043_v21 }
 0x576   : > { %v9085_v11 = vpop.f32.mrf.mxu0 }
 0x577   : > { %v9126_v59 = vpop.f32.mrf.mxu1  ;;  %v9125_v33 = vadd.f32 %v9124_v28, %v9084_v31  ;;  %v9086_v13 = vadd.f32 %v9085_v11, %v9045_v30 }
 0x578   : > { %v9087_v24 = vpop.f32.mrf.mxu0 }
 0x579   : > { %v9128_v7 = vpop.f32.mrf.mxu1  ;;  %v9133_v40 = vmax.f32 %v17748_v35, %v9125_v33  ;;  %v9127_v22 = vadd.f32 %v9126_v59, %v9086_v13  ;;  %v14060_v35 = vld [vmem:[%s18367_s5 + $0x70] sm:$0xff]  }
 0x57a   : > { %v9088_v44 = vpop.f32.mrf.mxu0 }
 0x57b   : > { %v9129_v6 = vpop.f32.mrf.mxu1  ;;  %v9159_v62 = vadd.f32 %v9148_v14, %v9133_v40  ;;  %v9134_v1 = vmax.f32 %v17765_v46, %v9127_v22  ;;  %v14061_v46 = vld [vmem:[%s18367_s5 + $0x30] sm:$0xff]   ;;  %v12099_v40 = vld [vmem:[%s18370_s8] ss:$0 sm:$0xff] }
 0x57d   : > { %v9160_v42 = vadd.f32 %v9152_v37, %v9134_v1  ;;  %v9163_v45 = vmax.f32 %v9159_v62, 0.0 }
 0x57f   : > { %v9164_v50 = vmax.f32 %v9160_v42, 0.0  ;;  %v9167_v17 = vpack.c.bf16 %v9163_v45, %v9163_v45 }
 0x581   : > { %v9168_v52 = vpack.c.bf16 %v9164_v50, %v9164_v50 }
 0x583   : > { %12081 = vmatprep.mubr.msk.bf16.mxu1 %vm9481_vm2, %v9168_v52 }
 0x584   : > { %9559 = vmatmul.mubr.bf16.vlgmr.msra.gmra.mxu1 %v9167_v17 }
 0x585   : > { %12113 = vmatpush3.bf16.msra.mxu1 %v14059_v55 }
 0x586   : > { %12114 = vmatprep.subr.bf16.mxu1 %v14060_v35 }
 0x589   : > { %12115 = vmatpush3.bf16.msra.mxu1 %v14061_v46 }
 0x58a   : > { %12116 = vmatprep.subr.bf16.mxu1 %v14062_v39 }
 0x58d   : > { %12117 = vmatpush3.bf16.msra.mxu1 %v14063_v2 }
 0x58e   : > { %12118 = vmatprep.subr.bf16.mxu1 %v14064_v56 }
 0x591   : > { %12119 = vmatpush3.bf16.msra.mxu1 %v14065_v43 }
 0x592   : > { %12120 = vmatprep.subr.bf16.mxu1 %v14066_v48 }
 0x595   : > { %12121 = vmatpush3.bf16.msra.mxu1 %v14067_v36 }
 0x596   : > { %12122 = vmatprep.subr.bf16.mxu1 %v14068_v18 }
 0x599   : > { %12123 = vmatpush3.bf16.msra.mxu1 %v14069_v41 }
 0x59a   : > { %12124 = vmatprep.subr.bf16.mxu1 %v14070_v60 }
 0x59d   : > { %12125 = vmatpush3.bf16.msra.mxu1 %v14071_v26 }
 0x59e   : > { %12126 = vmatprep.subr.bf16.mxu1 %v14072_v34 }
 0x5a1   : > { %12127 = vmatpush3.bf16.msra.mxu1 %v14073_v53 }
 0x5c2   : > { %v9519_v29 = vpop.f32.mrf.mxu0 }
 0x5c3   : > { %v9520_v63 = vadd.f32 %v9519_v29, %v9224_v9 }
 0x5c4   : > { %v9521_v58 = vpop.f32.mrf.mxu0 }
 0x5c5   : > { %v9522_v51 = vadd.f32 %v9521_v58, %v9228_v23 }
 0x5c6   : > { %v9523_v49 = vpop.f32.mrf.mxu0 }
 0x5c8   : > { %v9524_v57 = vpop.f32.mrf.mxu0 }
 0x644   : > { %v9560_v47 = vpop.f32.mrf.mxu1 }
 0x645   : > { %v9561_v10 = vadd.f32 %v9560_v47, %v9520_v63 }
 0x646   : > { %v9562_v12 = vpop.f32.mrf.mxu1 }
 0x647   : > { %v9563_v15 = vadd.f32 %v9562_v12, %v9522_v51  ;;  %v9567_v19 = vmax.f32 %v9561_v10, 0.0 }
 0x648   : > { %v9564_v21 = vpop.f32.mrf.mxu1 }
 0x649   : > { %v9568_v25 = vmax.f32 %v9563_v15, 0.0  ;;  %v9569_v30 = vpack.c.bf16 %v9567_v19, %v9567_v19 }
 0x64a   : > { %v9565_v54 = vpop.f32.mrf.mxu1 }
 0x64b   : > { %v9570_v28 = vpack.c.bf16 %v9568_v25, %v9568_v25 }
 0x64d   : > { %9738 = vmatprep.mubr.bf16.mxu1 %v9570_v28 }
 0x64e   : > { %9739 = vmatmul.mubr.bf16.vlgmr.msra.gmra.mxu1 %v9569_v30 }
 0x70e   : > { %v12128_v31 = vpop.f32.mrf.mxu1 }
 0x710   : > { %v12129_v11 = vpop.f32.mrf.mxu1 }
 0x711   : > { %v12130_v59 = vadd.f32 %v12129_v11, %v12128_v31 }
 0x712   : > { %v12131_v33 = vpop.f32.mrf.mxu1 }
 0x713   : > { %v9741_v14 = vadd.f32 %v12130_v59, %v12082_v32 }
 0x714   : > { %v12132_v13 = vpop.f32.mrf.mxu1 }
 0x715   : > { %v9746_v24 = vmax.f32 %v9741_v14, 0.0 }
 0x717   : > { %v9747_v7 = vpack.c.bf16 %v9746_v24, %v9746_v24 }
 0x719   : > { %12160 = vmatmul.mubr.bf16.vlgmr.msra.gmra.mxu0 %v9747_v7 }
 0x7d9   : > { %v9853_v22 = vpop.f32.mrf.mxu0 }
 0x7da   : > { %v9854_v37 = vadd.f32 %v12099_v40, %v9853_v22 }
 0x7db   : > { %v12161_v44 = vpop.f32.mrf.mxu0 }
 0x7dc   : > { %9859 = vst [vmem:[%s325_s23] sm:$0xff] %v9854_v37 }
 0x7dd   : > { %v9856_v6 = vpop.f32.mrf.mxu0 }
 0x7de   : > { %14095 = shalt.err (!%p14092_p3)
}
 0x7df   : > { %s14096_s17 = scalar_lea.hbm %s18321_s25, 128  ;;  %s14100_s23 = scalar_lea.hbm %s18371_s9, 256 }
 0x7e0   : > { %p14097_p4 = scmp.ne.s32.totalorder %s18321_s25, %s14096_s17  ;;  %p14101_p9 = scmp.lt.s32.totalorder %s18321_s25, %s18371_s9 }
 0x7e1   : > { %p14102_p10 = scmp.lt.s32.totalorder %s14100_s23, %s14096_s17 }
 0x7e2   : > { %p14098_p7 = pnand %p14097_p4, %p14235_p5 }
 0x7e3   : > { %p14103_p11 = por %p14102_p10, %p14101_p9 }
 0x7e4   : > { %p14099_p8 = pneg %p14098_p7 }
 0x7e6   : > { %p14104_p12 = pnand %p14103_p11, %p14099_p8 }
 0x7e8   : > { %14107 = shalt.err (!%p14104_p12)
}
 0x7e9   : > { %12164 = dma.vmem_to_hbm [thread:$0]  (%p14235_p5), %s18323_s14, 128, %s18321_s25, %s9861_s21   ;;  %v12162_v62 = vpop.f32.mrf.mxu0 }
 0x7ea PF: > { %p12170_p13 = scmp.ge.s32.totalorder %s14142_s12, 2  ;;  %s9886_s26 = sand.u32 1, %s14130_s30  }
 0x7eb   : > { %s9887_s13 = scalar_lea.sflag [#allocation3], %s9886_s26 }
 0x7ec   : > { %p12167_p0 = pnand %p12170_p13, %p14239_p6 }
 0x7ee   : > { %p12168_p1 = pneg %p12167_p0 }
 0x7f0   : > { %14125 = dma.done.wait (%p12168_p1), %s9887_s13, 128  }
 0x7f1   : > { %14127 = vsyncadd (%p12168_p1), %s9887_s13, 4294967168  ;;  %p19_p2 = scmp.ge.s32.totalorder %s14222_s15, 4   ;;  %s18374_s30 = smov %s14134_s10 }
 0x7f2   : > { %s18375_s10 = smov %s14138_s11  ;;  %s18376_s11 = smov %s14233_s18 }
 0x7f3   : > { %s18377_s12 = smov %s14222_s15  ;;  %21 = sbr.rel (!%p19_p2) target bundleno = 3 (0x3), region = 94 }
 0x7f8   :  { %9892 = vsyncpa [#allocation3], 1 }
 0x7f9   :  { %9894 = vsyncpa [#allocation3 + $0x1], 1 }

</bundles_post_ra>
